<compile_context>
chip_gen: v7x
topology: tpu7x:2x2x1
jax: 0.10.0
libtpu: 0.0.40
codegen_flags: <defaults>
</compile_context>

<pallas_src>
import jax
import jax.numpy as jnp
from jax import lax
from jax.experimental import pallas as pl
from jax.experimental.pallas import tpu as pltpu

EPS = 1e-5          # PyTorch InstanceNorm default eps
SLOPE = 0.2         # LeakyReLU negative_slope
NUM_CLASSES = 33
EMB_DIMS = 1024     # forced by conv7 in_channels = 1216 = 1024 + 3*64


def _dot(a, b):
    return jnp.dot(a, b, preferred_element_type=jnp.float32)


def _leaky_relu(y):
    # max(y, 0.2*y) == LeakyReLU(0.2) for slope in [0, 1]
    return jnp.maximum(y, SLOPE * y)


def _stats(v):
    """Single-pass per-channel mean / biased variance over rows (axis 0)."""
    m = jnp.mean(v, axis=0, keepdims=True)
    m2 = jnp.mean(v * v, axis=0, keepdims=True)
    return m, jnp.maximum(m2 - m * m, 0.0)


def _inorm(y):
    m, var = _stats(y)
    return (y - m) * lax.rsqrt(var + EPS)


def _edge_block2(x, wa, wd, w2, a_scr):
    """graph-feature -> conv+IN+LReLU -> conv+IN+LReLU -> max over neighbors.

    First conv decomposed as A[j] + D[i]; exact product-grid IN stats.  Second
    conv processed in neighbor-major chunks with running sum/sumsq (IN stats)
    and a running max over neighbors (leading-axis VPU max); max_j commutes
    with IN + LReLU, so the N^2 map is never materialized or revisited.
    """
    n = x.shape[0]
    num_chunks, cj, co1 = a_scr.shape          # chunked-A staging buffer
    co2 = w2.shape[1]

    xb = x.astype(jnp.bfloat16)
    a = _dot(xb, wa)                           # (N, 64)  A = x @ W_diff
    d = _dot(xb, wd)                           # (N, 64)  D = x @ (W_center - W_diff)
    mu_a, var_a = _stats(a)
    mu_d, var_d = _stats(d)
    rstd = lax.rsqrt(var_a + var_d + EPS)
    an = (a - mu_a) * rstd                     # normalized first-conv pieces
    dn = (d - mu_d) * rstd
    a_scr[...] = an.reshape(num_chunks, cj, co1)

    def body(c, carry):
        s, ss, zmax = carry
        ablk = a_scr[c]                                            # (cj, 64)
        # neighbor index j is the OUTER axis of the chunk
        y = _leaky_relu(ablk[:, None, :] + dn[None, :, :])         # (cj, N, 64)
        z = _dot(y.reshape(cj * n, co1).astype(jnp.bfloat16), w2)  # (cj*N, 64) f32
        s = s + jnp.sum(z, axis=0, keepdims=True)
        ss = ss + jnp.sum(z * z, axis=0, keepdims=True)
        zc = jnp.max(z.reshape(cj, n, co2), axis=0)                # leading-axis max (VPU)
        return s, ss, jnp.maximum(zmax, zc)

    init = (jnp.zeros((1, co2), jnp.float32),
            jnp.zeros((1, co2), jnp.float32),
            jnp.full((n, co2), -jnp.inf, jnp.float32))
    s, ss, zmax = lax.fori_loop(0, num_chunks, body, init)

    inv = 1.0 / float(n * n)
    mu = s * inv
    var = jnp.maximum(ss * inv - mu * mu, 0.0)
    # max_j commutes with IN (+rstd>0) and LeakyReLU -> apply them to the max.
    return _leaky_relu((zmax - mu) * lax.rsqrt(var + EPS))


def _edge_block1(x, wa, wd):
    """graph-feature -> conv+IN+LReLU -> max over neighbors (block 3).
    max_j commutes with IN + LReLU, so no N^2 tensor and no second pass."""
    xb = x.astype(jnp.bfloat16)
    a = _dot(xb, wa)
    d = _dot(xb, wd)
    mu_a, var_a = _stats(a)
    mu_d, var_d = _stats(d)
    rstd = lax.rsqrt(var_a + var_d + EPS)
    a_max = jnp.max(a, axis=0, keepdims=True)          # max over neighbors j
    return _leaky_relu((a_max - mu_a + (d - mu_d)) * rstd)   # (N, 64)


def _dgcnn_kernel(x_ref,
                  w1a_ref, w1d_ref, w2_ref,
                  w3a_ref, w3d_ref, w4_ref,
                  w5a_ref, w5d_ref, w9_ref,
                  w6_hbm, w7g_hbm, w7l_hbm, w8_hbm,
                  o_ref,
                  w6_v, w7g_v, w7l_v, w8_v, dma_sem, a_scr):
    # ---- start head-weight DMAs immediately: they overlap the edge blocks ----
    cp6 = pltpu.make_async_copy(w6_hbm, w6_v, dma_sem.at[0])
    cp7g = pltpu.make_async_copy(w7g_hbm, w7g_v, dma_sem.at[1])
    cp7l = pltpu.make_async_copy(w7l_hbm, w7l_v, dma_sem.at[2])
    cp8 = pltpu.make_async_copy(w8_hbm, w8_v, dma_sem.at[3])
    cp6.start(); cp7g.start(); cp7l.start(); cp8.start()

    xb = x_ref[0]                                             # (N, C) f32

    # ---- edge-conv blocks (all intermediates stay on-chip) ----
    x1 = _edge_block2(xb, w1a_ref[...], w1d_ref[...], w2_ref[...], a_scr)   # (N, 64)
    x2 = _edge_block2(x1, w3a_ref[...], w3d_ref[...], w4_ref[...], a_scr)   # (N, 64)
    x3 = _edge_block1(x2, w5a_ref[...], w5d_ref[...])                       # (N, 64)

    # ---- head ----
    # single K=192 operand reused by conv6 and conv7's local branch
    xcat = jnp.concatenate([x1, x2, x3], axis=-1).astype(jnp.bfloat16)      # (N, 192)

    cp6.wait()
    y6 = _leaky_relu(_inorm(_dot(xcat, w6_v[...])))           # (N, 1024)
    g = jnp.max(y6, axis=0, keepdims=True).astype(jnp.bfloat16)   # (1, 1024) global feat

    cp7g.wait(); cp7l.wait()
    # conv7: global branch is a single-row matmul broadcast AFTER the dot
    y7 = _dot(g, w7g_v[...]) + _dot(xcat, w7l_v[...])         # (N, 512)
    y7 = _leaky_relu(_inorm(y7))

    cp8.wait()
    y8 = _leaky_relu(_inorm(_dot(y7.astype(jnp.bfloat16), w8_v[...])))      # (N, 256)

    # TODO(synk): nn.Dropout(p) is treated as eval-mode identity.
    y9 = _dot(y8.astype(jnp.bfloat16), w9_ref[...])           # (N, 33)

    # softmax over the class (lane) axis, f32
    y9 = y9 - jnp.max(y9, axis=-1, keepdims=True)
    e = jnp.exp(y9)
    o_ref[0] = e / jnp.sum(e, axis=-1, keepdims=True)


def _pick_chunk(n):
    """Neighbor-axis chunk size so each second-conv slab has ~128 rows."""
    target = max(1, 128 // n)
    cj = 1
    for c in range(1, min(n, target) + 1):
        if n % c == 0:
            cj = c
    return cj


@jax.jit
def dgcnn_cls_forward(x, params):
    """x: (B, N, 20) float32 -> (N, 33) softmax probs (batch element 0)."""
    x = x[:1]                        # reference returns `...[0]`; b>0 is dead work
    B, N, C = x.shape
    cj = _pick_chunk(N)
    num_chunks = N // cj
    bf16 = jnp.bfloat16

    # Split the (diff, center) concat structure; fold center into D = Wb - Wa
    # in f32, then cast everything the MXU touches to bf16.
    w1, w3, w5, w7 = params["w1t"], params["w3t"], params["w5t"], params["w7t"]
    small = [w1[:C], w1[C:] - w1[:C], params["w2t"],
             w3[:64], w3[64:] - w3[:64], params["w4t"],
             w5[:64], w5[64:] - w5[:64],
             params["w9t"]]
    big = [params["w6t"], w7[:EMB_DIMS], w7[EMB_DIMS:], params["w8t"]]
    small = [w.astype(bf16) for w in small]
    big = [w.astype(bf16) for w in big]          # manually DMA'd inside the kernel

    in_specs = [pl.BlockSpec((1, N, C), lambda b: (b, 0, 0))]
    in_specs += [pl.BlockSpec(w.shape, lambda b: (0, 0)) for w in small]
    in_specs += [pl.BlockSpec(memory_space=pl.ANY) for _ in big]   # stay in HBM

    scratch_shapes = [pltpu.VMEM(w.shape, bf16) for w in big]
    scratch_shapes += [pltpu.SemaphoreType.DMA((len(big),)),
                       pltpu.VMEM((num_chunks, cj, 64), jnp.float32)]

    out = pl.pallas_call(
        _dgcnn_kernel,
        grid=(B,),
        in_specs=in_specs,
        out_specs=pl.BlockSpec((1, N, NUM_CLASSES), lambda b: (b, 0, 0)),
        out_shape=jax.ShapeDtypeStruct((B, N, NUM_CLASSES), jnp.float32),
        scratch_shapes=scratch_shapes,
        compiler_params=pltpu.CompilerParams(
            dimension_semantics=("arbitrary",),     # grid size 1: semantics moot
            vmem_limit_bytes=32 * 1024 * 1024,
        ),
    )(x, *small, *big)
    return out[0]


def init_params(key):
    # Conv weights (bias=False), stored pre-transposed as (Cin, Cout), f32.
    shapes = {
        "w1t": (40, 64),
        "w2t": (64, 64),
        "w3t": (128, 64),
        "w4t": (64, 64),
        "w5t": (128, 64),
        "w6t": (192, EMB_DIMS),
        "w7t": (EMB_DIMS + 192, 512),
        "w8t": (512, 256),
        "w9t": (256, NUM_CLASSES),
    }
    params = {}
    for name in sorted(shapes):
        key, sub = jax.random.split(key)
        fan_in = shapes[name][0]
        bound = (1.0 / fan_in) ** 0.5
        params[name] = jax.random.uniform(sub, shapes[name], jnp.float32, -bound, bound)
    return params


if __name__ == "__main__":
    key = jax.random.PRNGKey(0)
    pkey, xkey = jax.random.split(key)
    params = init_params(pkey)

    B, N, C = 2, 16, 20   # conv1 in_channels=40 forces C=20; k == N in the reference
    x = jax.random.normal(xkey, (B, N, C), dtype=jnp.float32)

    out = dgcnn_cls_forward(x, params)
    out = jax.block_until_ready(out)

    assert out.shape == (N, NUM_CLASSES), out.shape
    assert bool(jnp.all(jnp.isfinite(out)))
    # rows are softmax distributions
    assert bool(jnp.allclose(jnp.sum(out, axis=-1), 1.0, atol=1e-3))
    print("KERNEL_OK")
</pallas_src>

<mosaic_0001>
module attributes {stable_mosaic.version = 11 : i64} {
  func.func @_dgcnn_kernel(%arg0: i32, %arg1: memref<1x16x20xf32, #tpu.memory_space<vmem>>, %arg2: memref<20x64xbf16, #tpu.memory_space<vmem>>, %arg3: memref<20x64xbf16, #tpu.memory_space<vmem>>, %arg4: memref<64x64xbf16, #tpu.memory_space<vmem>>, %arg5: memref<64x64xbf16, #tpu.memory_space<vmem>>, %arg6: memref<64x64xbf16, #tpu.memory_space<vmem>>, %arg7: memref<64x64xbf16, #tpu.memory_space<vmem>>, %arg8: memref<64x64xbf16, #tpu.memory_space<vmem>>, %arg9: memref<64x64xbf16, #tpu.memory_space<vmem>>, %arg10: memref<256x33xbf16, #tpu.memory_space<vmem>>, %arg11: memref<192x1024xbf16, #tpu.memory_space<any>>, %arg12: memref<1024x512xbf16, #tpu.memory_space<any>>, %arg13: memref<192x512xbf16, #tpu.memory_space<any>>, %arg14: memref<512x256xbf16, #tpu.memory_space<any>>, %arg15: memref<1x16x33xf32, #tpu.memory_space<vmem>>, %arg16: memref<192x1024xbf16, #tpu.memory_space<vmem>>, %arg17: memref<1024x512xbf16, #tpu.memory_space<vmem>>, %arg18: memref<192x512xbf16, #tpu.memory_space<vmem>>, %arg19: memref<512x256xbf16, #tpu.memory_space<vmem>>, %arg20: memref<4x!tpu.dma_semaphore, #tpu.memory_space<semaphore_mem>>, %arg21: memref<2x8x64xf32, #tpu.memory_space<vmem>>) attributes {dimension_semantics = [#tpu.dimension_semantics<arbitrary>], iteration_bounds = array<i64: 1>, scalar_prefetch = 0 : i64, scratch_operands = 6 : i64, tpu.core_type = #tpu.core_type<tc>, window_params = [{transform_indices = @transform_0, window_bounds = array<i64: 1, 16, 20>}, {pipeline_mode = #tpu.pipeline_mode<synchronous>, transform_indices = @transform_1, window_bounds = array<i64: 20, 64>}, {pipeline_mode = #tpu.pipeline_mode<synchronous>, transform_indices = @transform_2, window_bounds = array<i64: 20, 64>}, {pipeline_mode = #tpu.pipeline_mode<synchronous>, transform_indices = @transform_3, window_bounds = array<i64: 64, 64>}, {pipeline_mode = #tpu.pipeline_mode<synchronous>, transform_indices = @transform_4, window_bounds = array<i64: 64, 64>}, {pipeline_mode = #tpu.pipeline_mode<synchronous>, transform_indices = @transform_5, window_bounds = array<i64: 64, 64>}, {pipeline_mode = #tpu.pipeline_mode<synchronous>, transform_indices = @transform_6, window_bounds = array<i64: 64, 64>}, {pipeline_mode = #tpu.pipeline_mode<synchronous>, transform_indices = @transform_7, window_bounds = array<i64: 64, 64>}, {pipeline_mode = #tpu.pipeline_mode<synchronous>, transform_indices = @transform_8, window_bounds = array<i64: 64, 64>}, {pipeline_mode = #tpu.pipeline_mode<synchronous>, transform_indices = @transform_9, window_bounds = array<i64: 256, 33>}, {}, {}, {}, {}, {transform_indices = @transform_14, window_bounds = array<i64: 1, 16, 33>}]} {
    %c0_i32 = arith.constant 0 : i32
    %0 = tpu.memref_slice %arg20[%c0_i32] : memref<4x!tpu.dma_semaphore, #tpu.memory_space<semaphore_mem>> -> memref<1x!tpu.dma_semaphore, #tpu.memory_space<semaphore_mem>>
    %1 = tpu.memref_squeeze %0 : memref<1x!tpu.dma_semaphore, #tpu.memory_space<semaphore_mem>> -> memref<!tpu.dma_semaphore, #tpu.memory_space<semaphore_mem>>
    tpu.enqueue_dma source(%arg11 : memref<192x1024xbf16, #tpu.memory_space<any>>) target(%arg16 : memref<192x1024xbf16, #tpu.memory_space<vmem>>) target_semaphore(%1 : memref<!tpu.dma_semaphore, #tpu.memory_space<semaphore_mem>>)
    %c1_i32 = arith.constant 1 : i32
    %2 = tpu.memref_slice %arg20[%c1_i32] : memref<4x!tpu.dma_semaphore, #tpu.memory_space<semaphore_mem>> -> memref<1x!tpu.dma_semaphore, #tpu.memory_space<semaphore_mem>>
    %3 = tpu.memref_squeeze %2 : memref<1x!tpu.dma_semaphore, #tpu.memory_space<semaphore_mem>> -> memref<!tpu.dma_semaphore, #tpu.memory_space<semaphore_mem>>
    tpu.enqueue_dma source(%arg12 : memref<1024x512xbf16, #tpu.memory_space<any>>) target(%arg17 : memref<1024x512xbf16, #tpu.memory_space<vmem>>) target_semaphore(%3 : memref<!tpu.dma_semaphore, #tpu.memory_space<semaphore_mem>>)
    %c2_i32 = arith.constant 2 : i32
    %4 = tpu.memref_slice %arg20[%c2_i32] : memref<4x!tpu.dma_semaphore, #tpu.memory_space<semaphore_mem>> -> memref<1x!tpu.dma_semaphore, #tpu.memory_space<semaphore_mem>>
    %5 = tpu.memref_squeeze %4 : memref<1x!tpu.dma_semaphore, #tpu.memory_space<semaphore_mem>> -> memref<!tpu.dma_semaphore, #tpu.memory_space<semaphore_mem>>
    tpu.enqueue_dma source(%arg13 : memref<192x512xbf16, #tpu.memory_space<any>>) target(%arg18 : memref<192x512xbf16, #tpu.memory_space<vmem>>) target_semaphore(%5 : memref<!tpu.dma_semaphore, #tpu.memory_space<semaphore_mem>>)
    %c3_i32 = arith.constant 3 : i32
    %6 = tpu.memref_slice %arg20[%c3_i32] : memref<4x!tpu.dma_semaphore, #tpu.memory_space<semaphore_mem>> -> memref<1x!tpu.dma_semaphore, #tpu.memory_space<semaphore_mem>>
    %7 = tpu.memref_squeeze %6 : memref<1x!tpu.dma_semaphore, #tpu.memory_space<semaphore_mem>> -> memref<!tpu.dma_semaphore, #tpu.memory_space<semaphore_mem>>
    tpu.enqueue_dma source(%arg14 : memref<512x256xbf16, #tpu.memory_space<any>>) target(%arg19 : memref<512x256xbf16, #tpu.memory_space<vmem>>) target_semaphore(%7 : memref<!tpu.dma_semaphore, #tpu.memory_space<semaphore_mem>>)
    %c0 = arith.constant 0 : index
    %c0_0 = arith.constant 0 : index
    %c0_1 = arith.constant 0 : index
    %8 = vector.load %arg1[%c0, %c0_0, %c0_1] : memref<1x16x20xf32, #tpu.memory_space<vmem>>, vector<1x16x20xf32>
    %9 = vector.shape_cast %8 : vector<1x16x20xf32> to vector<16x20xf32>
    %c0_2 = arith.constant 0 : index
    %c0_3 = arith.constant 0 : index
    %10 = vector.load %arg2[%c0_2, %c0_3] : memref<20x64xbf16, #tpu.memory_space<vmem>>, vector<20x64xbf16>
    %c0_4 = arith.constant 0 : index
    %c0_5 = arith.constant 0 : index
    %11 = vector.load %arg3[%c0_4, %c0_5] : memref<20x64xbf16, #tpu.memory_space<vmem>>, vector<20x64xbf16>
    %c0_6 = arith.constant 0 : index
    %c0_7 = arith.constant 0 : index
    %12 = vector.load %arg4[%c0_6, %c0_7] : memref<64x64xbf16, #tpu.memory_space<vmem>>, vector<64x64xbf16>
    %13 = arith.truncf %9 : vector<16x20xf32> to vector<16x20xbf16>
    %cst = arith.constant dense<0.000000e+00> : vector<16x64xf32>
    %14 = tpu.matmul %13, %10, %cst {dimension_numbers = #tpu.dot_dimension_numbers<[1], [0], [0], [1], [0, 0, 1, 1], [], []>} : vector<16x20xbf16>, vector<20x64xbf16>, vector<16x64xf32> -> vector<16x64xf32>
    %cst_8 = arith.constant dense<0.000000e+00> : vector<16x64xf32>
    %15 = tpu.matmul %13, %11, %cst_8 {dimension_numbers = #tpu.dot_dimension_numbers<[1], [0], [0], [1], [0, 0, 1, 1], [], []>} : vector<16x20xbf16>, vector<20x64xbf16>, vector<16x64xf32> -> vector<16x64xf32>
    %cst_9 = arith.constant dense<0.000000e+00> : vector<64xf32>
    %16 = vector.multi_reduction <add>, %14, %cst_9 [0] : vector<16x64xf32> to vector<64xf32>
    %17 = vector.shape_cast %16 : vector<64xf32> to vector<1x64xf32>
    %cst_10 = arith.constant 1.600000e+01 : f32
    %18 = vector.broadcast %cst_10 : f32 to vector<1x64xf32>
    %19 = arith.divf %17, %18 : vector<1x64xf32>
    %20 = arith.mulf %14, %14 : vector<16x64xf32>
    %cst_11 = arith.constant dense<0.000000e+00> : vector<64xf32>
    %21 = vector.multi_reduction <add>, %20, %cst_11 [0] : vector<16x64xf32> to vector<64xf32>
    %22 = vector.shape_cast %21 : vector<64xf32> to vector<1x64xf32>
    %cst_12 = arith.constant 1.600000e+01 : f32
    %23 = vector.broadcast %cst_12 : f32 to vector<1x64xf32>
    %24 = arith.divf %22, %23 : vector<1x64xf32>
    %25 = arith.mulf %19, %19 : vector<1x64xf32>
    %26 = arith.subf %24, %25 : vector<1x64xf32>
    %cst_13 = arith.constant 0.000000e+00 : f32
    %27 = vector.broadcast %cst_13 : f32 to vector<1x64xf32>
    %28 = arith.maximumf %26, %27 : vector<1x64xf32>
    %cst_14 = arith.constant dense<0.000000e+00> : vector<64xf32>
    %29 = vector.multi_reduction <add>, %15, %cst_14 [0] : vector<16x64xf32> to vector<64xf32>
    %30 = vector.shape_cast %29 : vector<64xf32> to vector<1x64xf32>
    %cst_15 = arith.constant 1.600000e+01 : f32
    %31 = vector.broadcast %cst_15 : f32 to vector<1x64xf32>
    %32 = arith.divf %30, %31 : vector<1x64xf32>
    %33 = arith.mulf %15, %15 : vector<16x64xf32>
    %cst_16 = arith.constant dense<0.000000e+00> : vector<64xf32>
    %34 = vector.multi_reduction <add>, %33, %cst_16 [0] : vector<16x64xf32> to vector<64xf32>
    %35 = vector.shape_cast %34 : vector<64xf32> to vector<1x64xf32>
    %cst_17 = arith.constant 1.600000e+01 : f32
    %36 = vector.broadcast %cst_17 : f32 to vector<1x64xf32>
    %37 = arith.divf %35, %36 : vector<1x64xf32>
    %38 = arith.mulf %32, %32 : vector<1x64xf32>
    %39 = arith.subf %37, %38 : vector<1x64xf32>
    %cst_18 = arith.constant 0.000000e+00 : f32
    %40 = vector.broadcast %cst_18 : f32 to vector<1x64xf32>
    %41 = arith.maximumf %39, %40 : vector<1x64xf32>
    %42 = arith.addf %28, %41 : vector<1x64xf32>
    %cst_19 = arith.constant 9.99999974E-6 : f32
    %43 = vector.broadcast %cst_19 : f32 to vector<1x64xf32>
    %44 = arith.addf %42, %43 : vector<1x64xf32>
    %45 = math.rsqrt %44 : vector<1x64xf32>
    %46 = vector.broadcast %19 : vector<1x64xf32> to vector<16x64xf32>
    %47 = arith.subf %14, %46 : vector<16x64xf32>
    %48 = vector.broadcast %45 : vector<1x64xf32> to vector<16x64xf32>
    %49 = arith.mulf %47, %48 : vector<16x64xf32>
    %50 = vector.broadcast %32 : vector<1x64xf32> to vector<16x64xf32>
    %51 = arith.subf %15, %50 : vector<16x64xf32>
    %52 = vector.broadcast %45 : vector<1x64xf32> to vector<16x64xf32>
    %53 = arith.mulf %51, %52 : vector<16x64xf32>
    %54 = vector.shape_cast %49 : vector<16x64xf32> to vector<2x8x64xf32>
    %c0_20 = arith.constant 0 : index
    %c0_21 = arith.constant 0 : index
    %c0_22 = arith.constant 0 : index
    %55 = vector.load %arg21[%c0_20, %c0_21, %c0_22] : memref<2x8x64xf32, #tpu.memory_space<vmem>>, vector<2x8x64xf32>
    tpu.vector_store %arg21[%c0_20, %c0_21, %c0_22], %54 {strides = array<i32>} : memref<2x8x64xf32, #tpu.memory_space<vmem>>, vector<2x8x64xf32>,
    %cst_23 = arith.constant 0.000000e+00 : f32
    %56 = vector.broadcast %cst_23 : f32 to vector<1x64xf32>
    %cst_24 = arith.constant 0.000000e+00 : f32
    %57 = vector.broadcast %cst_24 : f32 to vector<1x64xf32>
    %cst_25 = arith.constant 0xFF800000 : f32
    %58 = vector.broadcast %cst_25 : f32 to vector<16x64xf32>
    %c0_i32_26 = arith.constant 0 : i32
    %c2_i32_27 = arith.constant 2 : i32
    %59 = arith.addi %c0_i32_26, %c2_i32_27 : i32
    %c1_i32_28 = arith.constant 1 : i32
    %60:3 = scf.for %arg22 = %c0_i32_26 to %59 step %c1_i32_28 iter_args(%arg23 = %56, %arg24 = %57, %arg25 = %58) -> (vector<1x64xf32>, vector<1x64xf32>, vector<16x64xf32>)  : i32 {
      %303 = arith.index_cast %arg22 : i32 to index
      %c0_134 = arith.constant 0 : index
      %c0_135 = arith.constant 0 : index
      %304 = vector.load %arg21[%303, %c0_134, %c0_135] : memref<2x8x64xf32, #tpu.memory_space<vmem>>, vector<1x8x64xf32>
      %305 = vector.shape_cast %304 : vector<1x8x64xf32> to vector<8x64xf32>
      %306 = vector.shape_cast %305 : vector<8x64xf32> to vector<8x1x64xf32>
      %307 = vector.shape_cast %53 : vector<16x64xf32> to vector<1x16x64xf32>
      %308 = vector.broadcast %306 : vector<8x1x64xf32> to vector<8x16x64xf32>
      %309 = vector.broadcast %307 : vector<1x16x64xf32> to vector<8x16x64xf32>
      %310 = arith.addf %308, %309 : vector<8x16x64xf32>
      %cst_136 = arith.constant 2.000000e-01 : f32
      %311 = vector.broadcast %cst_136 : f32 to vector<8x16x64xf32>
      %312 = arith.mulf %311, %310 : vector<8x16x64xf32>
      %313 = arith.maximumf %310, %312 : vector<8x16x64xf32>
      %314 = vector.shape_cast %313 : vector<8x16x64xf32> to vector<128x64xf32>
      %315 = arith.truncf %314 : vector<128x64xf32> to vector<128x64xbf16>
      %cst_137 = arith.constant dense<0.000000e+00> : vector<128x64xf32>
      %316 = tpu.matmul %315, %12, %cst_137 {dimension_numbers = #tpu.dot_dimension_numbers<[1], [0], [0], [1], [0, 0, 1, 1], [], []>} : vector<128x64xbf16>, vector<64x64xbf16>, vector<128x64xf32> -> vector<128x64xf32>
      %cst_138 = arith.constant dense<0.000000e+00> : vector<64xf32>
      %317 = vector.multi_reduction <add>, %316, %cst_138 [0] : vector<128x64xf32> to vector<64xf32>
      %318 = vector.shape_cast %317 : vector<64xf32> to vector<1x64xf32>
      %319 = arith.addf %arg23, %318 : vector<1x64xf32>
      %320 = arith.mulf %316, %316 : vector<128x64xf32>
      %cst_139 = arith.constant dense<0.000000e+00> : vector<64xf32>
      %321 = vector.multi_reduction <add>, %320, %cst_139 [0] : vector<128x64xf32> to vector<64xf32>
      %322 = vector.shape_cast %321 : vector<64xf32> to vector<1x64xf32>
      %323 = arith.addf %arg24, %322 : vector<1x64xf32>
      %324 = vector.shape_cast %316 : vector<128x64xf32> to vector<8x16x64xf32>
      %cst_140 = arith.constant dense<0xFF800000> : vector<16x64xf32>
      %325 = vector.multi_reduction <maximumf>, %324, %cst_140 [0] : vector<8x16x64xf32> to vector<16x64xf32>
      %326 = arith.maximumf %arg25, %325 : vector<16x64xf32>
      scf.yield %319, %323, %326 : vector<1x64xf32>, vector<1x64xf32>, vector<16x64xf32>
    }
    %c2_i32_29 = arith.constant 2 : i32
    %cst_30 = arith.constant 3.906250e-03 : f32
    %61 = vector.broadcast %cst_30 : f32 to vector<1x64xf32>
    %62 = arith.mulf %60#0, %61 : vector<1x64xf32>
    %cst_31 = arith.constant 3.906250e-03 : f32
    %63 = vector.broadcast %cst_31 : f32 to vector<1x64xf32>
    %64 = arith.mulf %60#1, %63 : vector<1x64xf32>
    %65 = arith.mulf %62, %62 : vector<1x64xf32>
    %66 = arith.subf %64, %65 : vector<1x64xf32>
    %cst_32 = arith.constant 0.000000e+00 : f32
    %67 = vector.broadcast %cst_32 : f32 to vector<1x64xf32>
    %68 = arith.maximumf %66, %67 : vector<1x64xf32>
    %69 = vector.broadcast %62 : vector<1x64xf32> to vector<16x64xf32>
    %70 = arith.subf %60#2, %69 : vector<16x64xf32>
    %cst_33 = arith.constant 9.99999974E-6 : f32
    %71 = vector.broadcast %cst_33 : f32 to vector<1x64xf32>
    %72 = arith.addf %68, %71 : vector<1x64xf32>
    %73 = math.rsqrt %72 : vector<1x64xf32>
    %74 = vector.broadcast %73 : vector<1x64xf32> to vector<16x64xf32>
    %75 = arith.mulf %70, %74 : vector<16x64xf32>
    %cst_34 = arith.constant 2.000000e-01 : f32
    %76 = vector.broadcast %cst_34 : f32 to vector<16x64xf32>
    %77 = arith.mulf %76, %75 : vector<16x64xf32>
    %78 = arith.maximumf %75, %77 : vector<16x64xf32>
    %c0_35 = arith.constant 0 : index
    %c0_36 = arith.constant 0 : index
    %79 = vector.load %arg5[%c0_35, %c0_36] : memref<64x64xbf16, #tpu.memory_space<vmem>>, vector<64x64xbf16>
    %c0_37 = arith.constant 0 : index
    %c0_38 = arith.constant 0 : index
    %80 = vector.load %arg6[%c0_37, %c0_38] : memref<64x64xbf16, #tpu.memory_space<vmem>>, vector<64x64xbf16>
    %c0_39 = arith.constant 0 : index
    %c0_40 = arith.constant 0 : index
    %81 = vector.load %arg7[%c0_39, %c0_40] : memref<64x64xbf16, #tpu.memory_space<vmem>>, vector<64x64xbf16>
    %82 = arith.truncf %78 : vector<16x64xf32> to vector<16x64xbf16>
    %cst_41 = arith.constant dense<0.000000e+00> : vector<16x64xf32>
    %83 = tpu.matmul %82, %79, %cst_41 {dimension_numbers = #tpu.dot_dimension_numbers<[1], [0], [0], [1], [0, 0, 1, 1], [], []>} : vector<16x64xbf16>, vector<64x64xbf16>, vector<16x64xf32> -> vector<16x64xf32>
    %cst_42 = arith.constant dense<0.000000e+00> : vector<16x64xf32>
    %84 = tpu.matmul %82, %80, %cst_42 {dimension_numbers = #tpu.dot_dimension_numbers<[1], [0], [0], [1], [0, 0, 1, 1], [], []>} : vector<16x64xbf16>, vector<64x64xbf16>, vector<16x64xf32> -> vector<16x64xf32>
    %cst_43 = arith.constant dense<0.000000e+00> : vector<64xf32>
    %85 = vector.multi_reduction <add>, %83, %cst_43 [0] : vector<16x64xf32> to vector<64xf32>
    %86 = vector.shape_cast %85 : vector<64xf32> to vector<1x64xf32>
    %cst_44 = arith.constant 1.600000e+01 : f32
    %87 = vector.broadcast %cst_44 : f32 to vector<1x64xf32>
    %88 = arith.divf %86, %87 : vector<1x64xf32>
    %89 = arith.mulf %83, %83 : vector<16x64xf32>
    %cst_45 = arith.constant dense<0.000000e+00> : vector<64xf32>
    %90 = vector.multi_reduction <add>, %89, %cst_45 [0] : vector<16x64xf32> to vector<64xf32>
    %91 = vector.shape_cast %90 : vector<64xf32> to vector<1x64xf32>
    %cst_46 = arith.constant 1.600000e+01 : f32
    %92 = vector.broadcast %cst_46 : f32 to vector<1x64xf32>
    %93 = arith.divf %91, %92 : vector<1x64xf32>
    %94 = arith.mulf %88, %88 : vector<1x64xf32>
    %95 = arith.subf %93, %94 : vector<1x64xf32>
    %cst_47 = arith.constant 0.000000e+00 : f32
    %96 = vector.broadcast %cst_47 : f32 to vector<1x64xf32>
    %97 = arith.maximumf %95, %96 : vector<1x64xf32>
    %cst_48 = arith.constant dense<0.000000e+00> : vector<64xf32>
    %98 = vector.multi_reduction <add>, %84, %cst_48 [0] : vector<16x64xf32> to vector<64xf32>
    %99 = vector.shape_cast %98 : vector<64xf32> to vector<1x64xf32>
    %cst_49 = arith.constant 1.600000e+01 : f32
    %100 = vector.broadcast %cst_49 : f32 to vector<1x64xf32>
    %101 = arith.divf %99, %100 : vector<1x64xf32>
    %102 = arith.mulf %84, %84 : vector<16x64xf32>
    %cst_50 = arith.constant dense<0.000000e+00> : vector<64xf32>
    %103 = vector.multi_reduction <add>, %102, %cst_50 [0] : vector<16x64xf32> to vector<64xf32>
    %104 = vector.shape_cast %103 : vector<64xf32> to vector<1x64xf32>
    %cst_51 = arith.constant 1.600000e+01 : f32
    %105 = vector.broadcast %cst_51 : f32 to vector<1x64xf32>
    %106 = arith.divf %104, %105 : vector<1x64xf32>
    %107 = arith.mulf %101, %101 : vector<1x64xf32>
    %108 = arith.subf %106, %107 : vector<1x64xf32>
    %cst_52 = arith.constant 0.000000e+00 : f32
    %109 = vector.broadcast %cst_52 : f32 to vector<1x64xf32>
    %110 = arith.maximumf %108, %109 : vector<1x64xf32>
    %111 = arith.addf %97, %110 : vector<1x64xf32>
    %cst_53 = arith.constant 9.99999974E-6 : f32
    %112 = vector.broadcast %cst_53 : f32 to vector<1x64xf32>
    %113 = arith.addf %111, %112 : vector<1x64xf32>
    %114 = math.rsqrt %113 : vector<1x64xf32>
    %115 = vector.broadcast %88 : vector<1x64xf32> to vector<16x64xf32>
    %116 = arith.subf %83, %115 : vector<16x64xf32>
    %117 = vector.broadcast %114 : vector<1x64xf32> to vector<16x64xf32>
    %118 = arith.mulf %116, %117 : vector<16x64xf32>
    %119 = vector.broadcast %101 : vector<1x64xf32> to vector<16x64xf32>
    %120 = arith.subf %84, %119 : vector<16x64xf32>
    %121 = vector.broadcast %114 : vector<1x64xf32> to vector<16x64xf32>
    %122 = arith.mulf %120, %121 : vector<16x64xf32>
    %123 = vector.shape_cast %118 : vector<16x64xf32> to vector<2x8x64xf32>
    %c0_54 = arith.constant 0 : index
    %c0_55 = arith.constant 0 : index
    %c0_56 = arith.constant 0 : index
    %124 = vector.load %arg21[%c0_54, %c0_55, %c0_56] : memref<2x8x64xf32, #tpu.memory_space<vmem>>, vector<2x8x64xf32>
    tpu.vector_store %arg21[%c0_54, %c0_55, %c0_56], %123 {strides = array<i32>} : memref<2x8x64xf32, #tpu.memory_space<vmem>>, vector<2x8x64xf32>,
    %cst_57 = arith.constant 0.000000e+00 : f32
    %125 = vector.broadcast %cst_57 : f32 to vector<1x64xf32>
    %cst_58 = arith.constant 0.000000e+00 : f32
    %126 = vector.broadcast %cst_58 : f32 to vector<1x64xf32>
    %cst_59 = arith.constant 0xFF800000 : f32
    %127 = vector.broadcast %cst_59 : f32 to vector<16x64xf32>
    %c0_i32_60 = arith.constant 0 : i32
    %c2_i32_61 = arith.constant 2 : i32
    %128 = arith.addi %c0_i32_60, %c2_i32_61 : i32
    %c1_i32_62 = arith.constant 1 : i32
    %129:3 = scf.for %arg22 = %c0_i32_60 to %128 step %c1_i32_62 iter_args(%arg23 = %125, %arg24 = %126, %arg25 = %127) -> (vector<1x64xf32>, vector<1x64xf32>, vector<16x64xf32>)  : i32 {
      %303 = arith.index_cast %arg22 : i32 to index
      %c0_134 = arith.constant 0 : index
      %c0_135 = arith.constant 0 : index
      %304 = vector.load %arg21[%303, %c0_134, %c0_135] : memref<2x8x64xf32, #tpu.memory_space<vmem>>, vector<1x8x64xf32>
      %305 = vector.shape_cast %304 : vector<1x8x64xf32> to vector<8x64xf32>
      %306 = vector.shape_cast %305 : vector<8x64xf32> to vector<8x1x64xf32>
      %307 = vector.shape_cast %122 : vector<16x64xf32> to vector<1x16x64xf32>
      %308 = vector.broadcast %306 : vector<8x1x64xf32> to vector<8x16x64xf32>
      %309 = vector.broadcast %307 : vector<1x16x64xf32> to vector<8x16x64xf32>
      %310 = arith.addf %308, %309 : vector<8x16x64xf32>
      %cst_136 = arith.constant 2.000000e-01 : f32
      %311 = vector.broadcast %cst_136 : f32 to vector<8x16x64xf32>
      %312 = arith.mulf %311, %310 : vector<8x16x64xf32>
      %313 = arith.maximumf %310, %312 : vector<8x16x64xf32>
      %314 = vector.shape_cast %313 : vector<8x16x64xf32> to vector<128x64xf32>
      %315 = arith.truncf %314 : vector<128x64xf32> to vector<128x64xbf16>
      %cst_137 = arith.constant dense<0.000000e+00> : vector<128x64xf32>
      %316 = tpu.matmul %315, %81, %cst_137 {dimension_numbers = #tpu.dot_dimension_numbers<[1], [0], [0], [1], [0, 0, 1, 1], [], []>} : vector<128x64xbf16>, vector<64x64xbf16>, vector<128x64xf32> -> vector<128x64xf32>
      %cst_138 = arith.constant dense<0.000000e+00> : vector<64xf32>
      %317 = vector.multi_reduction <add>, %316, %cst_138 [0] : vector<128x64xf32> to vector<64xf32>
      %318 = vector.shape_cast %317 : vector<64xf32> to vector<1x64xf32>
      %319 = arith.addf %arg23, %318 : vector<1x64xf32>
      %320 = arith.mulf %316, %316 : vector<128x64xf32>
      %cst_139 = arith.constant dense<0.000000e+00> : vector<64xf32>
      %321 = vector.multi_reduction <add>, %320, %cst_139 [0] : vector<128x64xf32> to vector<64xf32>
      %322 = vector.shape_cast %321 : vector<64xf32> to vector<1x64xf32>
      %323 = arith.addf %arg24, %322 : vector<1x64xf32>
      %324 = vector.shape_cast %316 : vector<128x64xf32> to vector<8x16x64xf32>
      %cst_140 = arith.constant dense<0xFF800000> : vector<16x64xf32>
      %325 = vector.multi_reduction <maximumf>, %324, %cst_140 [0] : vector<8x16x64xf32> to vector<16x64xf32>
      %326 = arith.maximumf %arg25, %325 : vector<16x64xf32>
      scf.yield %319, %323, %326 : vector<1x64xf32>, vector<1x64xf32>, vector<16x64xf32>
    }
    %c2_i32_63 = arith.constant 2 : i32
    %cst_64 = arith.constant 3.906250e-03 : f32
    %130 = vector.broadcast %cst_64 : f32 to vector<1x64xf32>
    %131 = arith.mulf %129#0, %130 : vector<1x64xf32>
    %cst_65 = arith.constant 3.906250e-03 : f32
    %132 = vector.broadcast %cst_65 : f32 to vector<1x64xf32>
    %133 = arith.mulf %129#1, %132 : vector<1x64xf32>
    %134 = arith.mulf %131, %131 : vector<1x64xf32>
    %135 = arith.subf %133, %134 : vector<1x64xf32>
    %cst_66 = arith.constant 0.000000e+00 : f32
    %136 = vector.broadcast %cst_66 : f32 to vector<1x64xf32>
    %137 = arith.maximumf %135, %136 : vector<1x64xf32>
    %138 = vector.broadcast %131 : vector<1x64xf32> to vector<16x64xf32>
    %139 = arith.subf %129#2, %138 : vector<16x64xf32>
    %cst_67 = arith.constant 9.99999974E-6 : f32
    %140 = vector.broadcast %cst_67 : f32 to vector<1x64xf32>
    %141 = arith.addf %137, %140 : vector<1x64xf32>
    %142 = math.rsqrt %141 : vector<1x64xf32>
    %143 = vector.broadcast %142 : vector<1x64xf32> to vector<16x64xf32>
    %144 = arith.mulf %139, %143 : vector<16x64xf32>
    %cst_68 = arith.constant 2.000000e-01 : f32
    %145 = vector.broadcast %cst_68 : f32 to vector<16x64xf32>
    %146 = arith.mulf %145, %144 : vector<16x64xf32>
    %147 = arith.maximumf %144, %146 : vector<16x64xf32>
    %c0_69 = arith.constant 0 : index
    %c0_70 = arith.constant 0 : index
    %148 = vector.load %arg8[%c0_69, %c0_70] : memref<64x64xbf16, #tpu.memory_space<vmem>>, vector<64x64xbf16>
    %c0_71 = arith.constant 0 : index
    %c0_72 = arith.constant 0 : index
    %149 = vector.load %arg9[%c0_71, %c0_72] : memref<64x64xbf16, #tpu.memory_space<vmem>>, vector<64x64xbf16>
    %150 = arith.truncf %147 : vector<16x64xf32> to vector<16x64xbf16>
    %cst_73 = arith.constant dense<0.000000e+00> : vector<16x64xf32>
    %151 = tpu.matmul %150, %148, %cst_73 {dimension_numbers = #tpu.dot_dimension_numbers<[1], [0], [0], [1], [0, 0, 1, 1], [], []>} : vector<16x64xbf16>, vector<64x64xbf16>, vector<16x64xf32> -> vector<16x64xf32>
    %cst_74 = arith.constant dense<0.000000e+00> : vector<16x64xf32>
    %152 = tpu.matmul %150, %149, %cst_74 {dimension_numbers = #tpu.dot_dimension_numbers<[1], [0], [0], [1], [0, 0, 1, 1], [], []>} : vector<16x64xbf16>, vector<64x64xbf16>, vector<16x64xf32> -> vector<16x64xf32>
    %cst_75 = arith.constant dense<0.000000e+00> : vector<64xf32>
    %153 = vector.multi_reduction <add>, %151, %cst_75 [0] : vector<16x64xf32> to vector<64xf32>
    %154 = vector.shape_cast %153 : vector<64xf32> to vector<1x64xf32>
    %cst_76 = arith.constant 1.600000e+01 : f32
    %155 = vector.broadcast %cst_76 : f32 to vector<1x64xf32>
    %156 = arith.divf %154, %155 : vector<1x64xf32>
    %157 = arith.mulf %151, %151 : vector<16x64xf32>
    %cst_77 = arith.constant dense<0.000000e+00> : vector<64xf32>
    %158 = vector.multi_reduction <add>, %157, %cst_77 [0] : vector<16x64xf32> to vector<64xf32>
    %159 = vector.shape_cast %158 : vector<64xf32> to vector<1x64xf32>
    %cst_78 = arith.constant 1.600000e+01 : f32
    %160 = vector.broadcast %cst_78 : f32 to vector<1x64xf32>
    %161 = arith.divf %159, %160 : vector<1x64xf32>
    %162 = arith.mulf %156, %156 : vector<1x64xf32>
    %163 = arith.subf %161, %162 : vector<1x64xf32>
    %cst_79 = arith.constant 0.000000e+00 : f32
    %164 = vector.broadcast %cst_79 : f32 to vector<1x64xf32>
    %165 = arith.maximumf %163, %164 : vector<1x64xf32>
    %cst_80 = arith.constant dense<0.000000e+00> : vector<64xf32>
    %166 = vector.multi_reduction <add>, %152, %cst_80 [0] : vector<16x64xf32> to vector<64xf32>
    %167 = vector.shape_cast %166 : vector<64xf32> to vector<1x64xf32>
    %cst_81 = arith.constant 1.600000e+01 : f32
    %168 = vector.broadcast %cst_81 : f32 to vector<1x64xf32>
    %169 = arith.divf %167, %168 : vector<1x64xf32>
    %170 = arith.mulf %152, %152 : vector<16x64xf32>
    %cst_82 = arith.constant dense<0.000000e+00> : vector<64xf32>
    %171 = vector.multi_reduction <add>, %170, %cst_82 [0] : vector<16x64xf32> to vector<64xf32>
    %172 = vector.shape_cast %171 : vector<64xf32> to vector<1x64xf32>
    %cst_83 = arith.constant 1.600000e+01 : f32
    %173 = vector.broadcast %cst_83 : f32 to vector<1x64xf32>
    %174 = arith.divf %172, %173 : vector<1x64xf32>
    %175 = arith.mulf %169, %169 : vector<1x64xf32>
    %176 = arith.subf %174, %175 : vector<1x64xf32>
    %cst_84 = arith.constant 0.000000e+00 : f32
    %177 = vector.broadcast %cst_84 : f32 to vector<1x64xf32>
    %178 = arith.maximumf %176, %177 : vector<1x64xf32>
    %179 = arith.addf %165, %178 : vector<1x64xf32>
    %cst_85 = arith.constant 9.99999974E-6 : f32
    %180 = vector.broadcast %cst_85 : f32 to vector<1x64xf32>
    %181 = arith.addf %179, %180 : vector<1x64xf32>
    %182 = math.rsqrt %181 : vector<1x64xf32>
    %cst_86 = arith.constant dense<0xFF800000> : vector<64xf32>
    %183 = vector.multi_reduction <maximumf>, %151, %cst_86 [0] : vector<16x64xf32> to vector<64xf32>
    %184 = vector.shape_cast %183 : vector<64xf32> to vector<1x64xf32>
    %185 = arith.subf %184, %156 : vector<1x64xf32>
    %186 = vector.broadcast %169 : vector<1x64xf32> to vector<16x64xf32>
    %187 = arith.subf %152, %186 : vector<16x64xf32>
    %188 = vector.broadcast %185 : vector<1x64xf32> to vector<16x64xf32>
    %189 = arith.addf %188, %187 : vector<16x64xf32>
    %190 = vector.broadcast %182 : vector<1x64xf32> to vector<16x64xf32>
    %191 = arith.mulf %189, %190 : vector<16x64xf32>
    %cst_87 = arith.constant 2.000000e-01 : f32
    %192 = vector.broadcast %cst_87 : f32 to vector<16x64xf32>
    %193 = arith.mulf %192, %191 : vector<16x64xf32>
    %194 = arith.maximumf %191, %193 : vector<16x64xf32>
    %195 = tpu.concatenate %78, %147, %194 in 1 : vector<16x64xf32>, vector<16x64xf32>, vector<16x64xf32> -> vector<16x192xf32>
    %196 = arith.truncf %195 : vector<16x192xf32> to vector<16x192xbf16>
    %c0_i32_88 = arith.constant 0 : i32
    %197 = tpu.memref_slice %arg20[%c0_i32_88] : memref<4x!tpu.dma_semaphore, #tpu.memory_space<semaphore_mem>> -> memref<1x!tpu.dma_semaphore, #tpu.memory_space<semaphore_mem>>
    %198 = tpu.memref_squeeze %197 : memref<1x!tpu.dma_semaphore, #tpu.memory_space<semaphore_mem>> -> memref<!tpu.dma_semaphore, #tpu.memory_space<semaphore_mem>>
    tpu.wait_dma2 semaphore(%198 : memref<!tpu.dma_semaphore, #tpu.memory_space<semaphore_mem>>) src(%arg11 : memref<192x1024xbf16, #tpu.memory_space<any>>) dst(%arg16 : memref<192x1024xbf16, #tpu.memory_space<vmem>>)
    %c0_89 = arith.constant 0 : index
    %c0_90 = arith.constant 0 : index
    %199 = vector.load %arg16[%c0_89, %c0_90] : memref<192x1024xbf16, #tpu.memory_space<vmem>>, vector<192x1024xbf16>
    %cst_91 = arith.constant dense<0.000000e+00> : vector<16x1024xf32>
    %200 = tpu.matmul %196, %199, %cst_91 {dimension_numbers = #tpu.dot_dimension_numbers<[1], [0], [0], [1], [0, 0, 1, 1], [], []>} : vector<16x192xbf16>, vector<192x1024xbf16>, vector<16x1024xf32> -> vector<16x1024xf32>
    %cst_92 = arith.constant dense<0.000000e+00> : vector<1024xf32>
    %201 = vector.multi_reduction <add>, %200, %cst_92 [0] : vector<16x1024xf32> to vector<1024xf32>
    %202 = vector.shape_cast %201 : vector<1024xf32> to vector<1x1024xf32>
    %cst_93 = arith.constant 1.600000e+01 : f32
    %203 = vector.broadcast %cst_93 : f32 to vector<1x1024xf32>
    %204 = arith.divf %202, %203 : vector<1x1024xf32>
    %205 = arith.mulf %200, %200 : vector<16x1024xf32>
    %cst_94 = arith.constant dense<0.000000e+00> : vector<1024xf32>
    %206 = vector.multi_reduction <add>, %205, %cst_94 [0] : vector<16x1024xf32> to vector<1024xf32>
    %207 = vector.shape_cast %206 : vector<1024xf32> to vector<1x1024xf32>
    %cst_95 = arith.constant 1.600000e+01 : f32
    %208 = vector.broadcast %cst_95 : f32 to vector<1x1024xf32>
    %209 = arith.divf %207, %208 : vector<1x1024xf32>
    %210 = arith.mulf %204, %204 : vector<1x1024xf32>
    %211 = arith.subf %209, %210 : vector<1x1024xf32>
    %cst_96 = arith.constant 0.000000e+00 : f32
    %212 = vector.broadcast %cst_96 : f32 to vector<1x1024xf32>
    %213 = arith.maximumf %211, %212 : vector<1x1024xf32>
    %214 = vector.broadcast %204 : vector<1x1024xf32> to vector<16x1024xf32>
    %215 = arith.subf %200, %214 : vector<16x1024xf32>
    %cst_97 = arith.constant 9.99999974E-6 : f32
    %216 = vector.broadcast %cst_97 : f32 to vector<1x1024xf32>
    %217 = arith.addf %213, %216 : vector<1x1024xf32>
    %218 = math.rsqrt %217 : vector<1x1024xf32>
    %219 = vector.broadcast %218 : vector<1x1024xf32> to vector<16x1024xf32>
    %220 = arith.mulf %215, %219 : vector<16x1024xf32>
    %cst_98 = arith.constant 2.000000e-01 : f32
    %221 = vector.broadcast %cst_98 : f32 to vector<16x1024xf32>
    %222 = arith.mulf %221, %220 : vector<16x1024xf32>
    %223 = arith.maximumf %220, %222 : vector<16x1024xf32>
    %cst_99 = arith.constant dense<0xFF800000> : vector<1024xf32>
    %224 = vector.multi_reduction <maximumf>, %223, %cst_99 [0] : vector<16x1024xf32> to vector<1024xf32>
    %225 = vector.shape_cast %224 : vector<1024xf32> to vector<1x1024xf32>
    %226 = arith.truncf %225 : vector<1x1024xf32> to vector<1x1024xbf16>
    %c1_i32_100 = arith.constant 1 : i32
    %227 = tpu.memref_slice %arg20[%c1_i32_100] : memref<4x!tpu.dma_semaphore, #tpu.memory_space<semaphore_mem>> -> memref<1x!tpu.dma_semaphore, #tpu.memory_space<semaphore_mem>>
    %228 = tpu.memref_squeeze %227 : memref<1x!tpu.dma_semaphore, #tpu.memory_space<semaphore_mem>> -> memref<!tpu.dma_semaphore, #tpu.memory_space<semaphore_mem>>
    tpu.wait_dma2 semaphore(%228 : memref<!tpu.dma_semaphore, #tpu.memory_space<semaphore_mem>>) src(%arg12 : memref<1024x512xbf16, #tpu.memory_space<any>>) dst(%arg17 : memref<1024x512xbf16, #tpu.memory_space<vmem>>)
    %c2_i32_101 = arith.constant 2 : i32
    %229 = tpu.memref_slice %arg20[%c2_i32_101] : memref<4x!tpu.dma_semaphore, #tpu.memory_space<semaphore_mem>> -> memref<1x!tpu.dma_semaphore, #tpu.memory_space<semaphore_mem>>
    %230 = tpu.memref_squeeze %229 : memref<1x!tpu.dma_semaphore, #tpu.memory_space<semaphore_mem>> -> memref<!tpu.dma_semaphore, #tpu.memory_space<semaphore_mem>>
    tpu.wait_dma2 semaphore(%230 : memref<!tpu.dma_semaphore, #tpu.memory_space<semaphore_mem>>) src(%arg13 : memref<192x512xbf16, #tpu.memory_space<any>>) dst(%arg18 : memref<192x512xbf16, #tpu.memory_space<vmem>>)
    %c0_102 = arith.constant 0 : index
    %c0_103 = arith.constant 0 : index
    %231 = vector.load %arg17[%c0_102, %c0_103] : memref<1024x512xbf16, #tpu.memory_space<vmem>>, vector<1024x512xbf16>
    %cst_104 = arith.constant dense<0.000000e+00> : vector<1x512xf32>
    %232 = tpu.matmul %226, %231, %cst_104 {dimension_numbers = #tpu.dot_dimension_numbers<[1], [0], [0], [1], [0, 0, 1, 1], [], []>} : vector<1x1024xbf16>, vector<1024x512xbf16>, vector<1x512xf32> -> vector<1x512xf32>
    %c0_105 = arith.constant 0 : index
    %c0_106 = arith.constant 0 : index
    %233 = vector.load %arg18[%c0_105, %c0_106] : memref<192x512xbf16, #tpu.memory_space<vmem>>, vector<192x512xbf16>
    %cst_107 = arith.constant dense<0.000000e+00> : vector<16x512xf32>
    %234 = tpu.matmul %196, %233, %cst_107 {dimension_numbers = #tpu.dot_dimension_numbers<[1], [0], [0], [1], [0, 0, 1, 1], [], []>} : vector<16x192xbf16>, vector<192x512xbf16>, vector<16x512xf32> -> vector<16x512xf32>
    %235 = vector.broadcast %232 : vector<1x512xf32> to vector<16x512xf32>
    %236 = arith.addf %235, %234 : vector<16x512xf32>
    %cst_108 = arith.constant dense<0.000000e+00> : vector<512xf32>
    %237 = vector.multi_reduction <add>, %236, %cst_108 [0] : vector<16x512xf32> to vector<512xf32>
    %238 = vector.shape_cast %237 : vector<512xf32> to vector<1x512xf32>
    %cst_109 = arith.constant 1.600000e+01 : f32
    %239 = vector.broadcast %cst_109 : f32 to vector<1x512xf32>
    %240 = arith.divf %238, %239 : vector<1x512xf32>
    %241 = arith.mulf %236, %236 : vector<16x512xf32>
    %cst_110 = arith.constant dense<0.000000e+00> : vector<512xf32>
    %242 = vector.multi_reduction <add>, %241, %cst_110 [0] : vector<16x512xf32> to vector<512xf32>
    %243 = vector.shape_cast %242 : vector<512xf32> to vector<1x512xf32>
    %cst_111 = arith.constant 1.600000e+01 : f32
    %244 = vector.broadcast %cst_111 : f32 to vector<1x512xf32>
    %245 = arith.divf %243, %244 : vector<1x512xf32>
    %246 = arith.mulf %240, %240 : vector<1x512xf32>
    %247 = arith.subf %245, %246 : vector<1x512xf32>
    %cst_112 = arith.constant 0.000000e+00 : f32
    %248 = vector.broadcast %cst_112 : f32 to vector<1x512xf32>
    %249 = arith.maximumf %247, %248 : vector<1x512xf32>
    %250 = vector.broadcast %240 : vector<1x512xf32> to vector<16x512xf32>
    %251 = arith.subf %236, %250 : vector<16x512xf32>
    %cst_113 = arith.constant 9.99999974E-6 : f32
    %252 = vector.broadcast %cst_113 : f32 to vector<1x512xf32>
    %253 = arith.addf %249, %252 : vector<1x512xf32>
    %254 = math.rsqrt %253 : vector<1x512xf32>
    %255 = vector.broadcast %254 : vector<1x512xf32> to vector<16x512xf32>
    %256 = arith.mulf %251, %255 : vector<16x512xf32>
    %cst_114 = arith.constant 2.000000e-01 : f32
    %257 = vector.broadcast %cst_114 : f32 to vector<16x512xf32>
    %258 = arith.mulf %257, %256 : vector<16x512xf32>
    %259 = arith.maximumf %256, %258 : vector<16x512xf32>
    %c3_i32_115 = arith.constant 3 : i32
    %260 = tpu.memref_slice %arg20[%c3_i32_115] : memref<4x!tpu.dma_semaphore, #tpu.memory_space<semaphore_mem>> -> memref<1x!tpu.dma_semaphore, #tpu.memory_space<semaphore_mem>>
    %261 = tpu.memref_squeeze %260 : memref<1x!tpu.dma_semaphore, #tpu.memory_space<semaphore_mem>> -> memref<!tpu.dma_semaphore, #tpu.memory_space<semaphore_mem>>
    tpu.wait_dma2 semaphore(%261 : memref<!tpu.dma_semaphore, #tpu.memory_space<semaphore_mem>>) src(%arg14 : memref<512x256xbf16, #tpu.memory_space<any>>) dst(%arg19 : memref<512x256xbf16, #tpu.memory_space<vmem>>)
    %262 = arith.truncf %259 : vector<16x512xf32> to vector<16x512xbf16>
    %c0_116 = arith.constant 0 : index
    %c0_117 = arith.constant 0 : index
    %263 = vector.load %arg19[%c0_116, %c0_117] : memref<512x256xbf16, #tpu.memory_space<vmem>>, vector<512x256xbf16>
    %cst_118 = arith.constant dense<0.000000e+00> : vector<16x256xf32>
    %264 = tpu.matmul %262, %263, %cst_118 {dimension_numbers = #tpu.dot_dimension_numbers<[1], [0], [0], [1], [0, 0, 1, 1], [], []>} : vector<16x512xbf16>, vector<512x256xbf16>, vector<16x256xf32> -> vector<16x256xf32>
    %cst_119 = arith.constant dense<0.000000e+00> : vector<256xf32>
    %265 = vector.multi_reduction <add>, %264, %cst_119 [0] : vector<16x256xf32> to vector<256xf32>
    %266 = vector.shape_cast %265 : vector<256xf32> to vector<1x256xf32>
    %cst_120 = arith.constant 1.600000e+01 : f32
    %267 = vector.broadcast %cst_120 : f32 to vector<1x256xf32>
    %268 = arith.divf %266, %267 : vector<1x256xf32>
    %269 = arith.mulf %264, %264 : vector<16x256xf32>
    %cst_121 = arith.constant dense<0.000000e+00> : vector<256xf32>
    %270 = vector.multi_reduction <add>, %269, %cst_121 [0] : vector<16x256xf32> to vector<256xf32>
    %271 = vector.shape_cast %270 : vector<256xf32> to vector<1x256xf32>
    %cst_122 = arith.constant 1.600000e+01 : f32
    %272 = vector.broadcast %cst_122 : f32 to vector<1x256xf32>
    %273 = arith.divf %271, %272 : vector<1x256xf32>
    %274 = arith.mulf %268, %268 : vector<1x256xf32>
    %275 = arith.subf %273, %274 : vector<1x256xf32>
    %cst_123 = arith.constant 0.000000e+00 : f32
    %276 = vector.broadcast %cst_123 : f32 to vector<1x256xf32>
    %277 = arith.maximumf %275, %276 : vector<1x256xf32>
    %278 = vector.broadcast %268 : vector<1x256xf32> to vector<16x256xf32>
    %279 = arith.subf %264, %278 : vector<16x256xf32>
    %cst_124 = arith.constant 9.99999974E-6 : f32
    %280 = vector.broadcast %cst_124 : f32 to vector<1x256xf32>
    %281 = arith.addf %277, %280 : vector<1x256xf32>
    %282 = math.rsqrt %281 : vector<1x256xf32>
    %283 = vector.broadcast %282 : vector<1x256xf32> to vector<16x256xf32>
    %284 = arith.mulf %279, %283 : vector<16x256xf32>
    %cst_125 = arith.constant 2.000000e-01 : f32
    %285 = vector.broadcast %cst_125 : f32 to vector<16x256xf32>
    %286 = arith.mulf %285, %284 : vector<16x256xf32>
    %287 = arith.maximumf %284, %286 : vector<16x256xf32>
    %288 = arith.truncf %287 : vector<16x256xf32> to vector<16x256xbf16>
    %c0_126 = arith.constant 0 : index
    %c0_127 = arith.constant 0 : index
    %289 = vector.load %arg10[%c0_126, %c0_127] : memref<256x33xbf16, #tpu.memory_space<vmem>>, vector<256x33xbf16>
    %cst_128 = arith.constant dense<0.000000e+00> : vector<16x33xf32>
    %290 = tpu.matmul %288, %289, %cst_128 {dimension_numbers = #tpu.dot_dimension_numbers<[1], [0], [0], [1], [0, 0, 1, 1], [], []>} : vector<16x256xbf16>, vector<256x33xbf16>, vector<16x33xf32> -> vector<16x33xf32>
    %cst_129 = arith.constant dense<0xFF800000> : vector<16xf32>
    %291 = vector.multi_reduction <maximumf>, %290, %cst_129 [1] : vector<16x33xf32> to vector<16xf32>
    %292 = vector.shape_cast %291 : vector<16xf32> to vector<16x1xf32>
    %293 = vector.broadcast %292 : vector<16x1xf32> to vector<16x33xf32>
    %294 = arith.subf %290, %293 : vector<16x33xf32>
    %295 = math.exp %294 : vector<16x33xf32>
    %cst_130 = arith.constant dense<0.000000e+00> : vector<16xf32>
    %296 = vector.multi_reduction <add>, %295, %cst_130 [1] : vector<16x33xf32> to vector<16xf32>
    %297 = vector.shape_cast %296 : vector<16xf32> to vector<16x1xf32>
    %298 = vector.broadcast %297 : vector<16x1xf32> to vector<16x33xf32>
    %299 = arith.divf %295, %298 : vector<16x33xf32>
    %c0_131 = arith.constant 0 : index
    %c0_132 = arith.constant 0 : index
    %c0_133 = arith.constant 0 : index
    %300 = vector.load %arg15[%c0_131, %c0_132, %c0_133] : memref<1x16x33xf32, #tpu.memory_space<vmem>>, vector<1x16x33xf32>
    %301 = vector.shape_cast %300 : vector<1x16x33xf32> to vector<16x33xf32>
    %302 = vector.shape_cast %299 : vector<16x33xf32> to vector<1x16x33xf32>
    tpu.vector_store %arg15[%c0_131, %c0_132, %c0_133], %302 {strides = array<i32>} : memref<1x16x33xf32, #tpu.memory_space<vmem>>, vector<1x16x33xf32>,
    return
  }
  func.func @transform_0(%arg0: i32) -> (i32, i32, i32) {
    %c0_i32 = arith.constant 0 : i32
    %c0_i32_0 = arith.constant 0 : i32
    %c0_i32_1 = arith.constant 0 : i32
    return %arg0, %c0_i32, %c0_i32_0 : i32, i32, i32
  }
  func.func @transform_1(%arg0: i32) -> (i32, i32) {
    %c0_i32 = arith.constant 0 : i32
    %c0_i32_0 = arith.constant 0 : i32
    %c0_i32_1 = arith.constant 0 : i32
    return %c0_i32, %c0_i32_0 : i32, i32
  }
  func.func @transform_2(%arg0: i32) -> (i32, i32) {
    %c0_i32 = arith.constant 0 : i32
    %c0_i32_0 = arith.constant 0 : i32
    %c0_i32_1 = arith.constant 0 : i32
    return %c0_i32, %c0_i32_0 : i32, i32
  }
  func.func @transform_3(%arg0: i32) -> (i32, i32) {
    %c0_i32 = arith.constant 0 : i32
    %c0_i32_0 = arith.constant 0 : i32
    %c0_i32_1 = arith.constant 0 : i32
    return %c0_i32, %c0_i32_0 : i32, i32
  }
  func.func @transform_4(%arg0: i32) -> (i32, i32) {
    %c0_i32 = arith.constant 0 : i32
    %c0_i32_0 = arith.constant 0 : i32
    %c0_i32_1 = arith.constant 0 : i32
    return %c0_i32, %c0_i32_0 : i32, i32
  }
  func.func @transform_5(%arg0: i32) -> (i32, i32) {
    %c0_i32 = arith.constant 0 : i32
    %c0_i32_0 = arith.constant 0 : i32
    %c0_i32_1 = arith.constant 0 : i32
    return %c0_i32, %c0_i32_0 : i32, i32
  }
  func.func @transform_6(%arg0: i32) -> (i32, i32) {
    %c0_i32 = arith.constant 0 : i32
    %c0_i32_0 = arith.constant 0 : i32
    %c0_i32_1 = arith.constant 0 : i32
    return %c0_i32, %c0_i32_0 : i32, i32
  }
  func.func @transform_7(%arg0: i32) -> (i32, i32) {
    %c0_i32 = arith.constant 0 : i32
    %c0_i32_0 = arith.constant 0 : i32
    %c0_i32_1 = arith.constant 0 : i32
    return %c0_i32, %c0_i32_0 : i32, i32
  }
  func.func @transform_8(%arg0: i32) -> (i32, i32) {
    %c0_i32 = arith.constant 0 : i32
    %c0_i32_0 = arith.constant 0 : i32
    %c0_i32_1 = arith.constant 0 : i32
    return %c0_i32, %c0_i32_0 : i32, i32
  }
  func.func @transform_9(%arg0: i32) -> (i32, i32) {
    %c0_i32 = arith.constant 0 : i32
    %c0_i32_0 = arith.constant 0 : i32
    %c0_i32_1 = arith.constant 0 : i32
    return %c0_i32, %c0_i32_0 : i32, i32
  }
  func.func @transform_14(%arg0: i32) -> (i32, i32, i32) {
    %c0_i32 = arith.constant 0 : i32
    %c0_i32_0 = arith.constant 0 : i32
    %c0_i32_1 = arith.constant 0 : i32
    return %arg0, %c0_i32, %c0_i32_0 : i32, i32, i32
  }
}

</mosaic_0001>

<bundles_post_ra>
// kernel: dgcnn_cls_forward.1
= control target key start
LH: loop header
LB: loop body
LE: loop exit
PB: predicated region body
PF: predicated region fallthrough
CT: control target
= control target key end

     0   :  { %19 = vsyncpa [#allocation9], 0  ;;  %s13669_s0 = inlined_call_operand.vmem [shape: f32[1,16,20], index: 0, kind: input, shape index: {}]   ;;  %s13670_s1 = inlined_call_operand.vmem [shape: bf16[20,64], index: 1, kind: input, shape index: {}]   ;;  %s13671_s2 = inlined_call_operand.vmem [shape: bf16[20,64], index: 2, kind: input, shape index: {}]   ;;  %s13672_s3 = inlined_call_operand.vmem [shape: bf16[64,64], index: 3, kind: input, shape index: {}]   ;;  %s13673_s4 = inlined_call_operand.vmem [shape: bf16[64,64], index: 4, kind: input, shape index: {}]   ;;  %s13674_s5 = inlined_call_operand.vmem [shape: bf16[64,64], index: 5, kind: input, shape index: {}]   ;;  %s13675_s6 = inlined_call_operand.vmem [shape: bf16[64,64], index: 6, kind: input, shape index: {}]   ;;  %s13676_s7 = inlined_call_operand.vmem [shape: bf16[64,64], index: 7, kind: input, shape index: {}]   ;;  %s13677_s8 = inlined_call_operand.vmem [shape: bf16[64,64], index: 8, kind: input, shape index: {}]   ;;  %s13678_s9 = inlined_call_operand.vmem [shape: bf16[256,33], index: 9, kind: input, shape index: {}]   ;;  %s13679_s10 = inlined_call_operand.vmem [shape: bf16[192,1024], index: 10, kind: input, shape index: {}]   ;;  %s13680_s11 = inlined_call_operand.vmem [shape: bf16[1024,512], index: 11, kind: input, shape index: {}]   ;;  %s13681_s12 = inlined_call_operand.vmem [shape: bf16[192,512], index: 12, kind: input, shape index: {}]   ;;  %s13682_s13 = inlined_call_operand.vmem [shape: bf16[512,256], index: 13, kind: input, shape index: {}]   ;;  %s13683_s14 = inlined_call_operand.hbm [shape: f32[1,16,33], index: 14, kind: output, shape index: {}]  }
   0x1   :  { %v58_v0 = vld [vmem:[%s13679_s10] sm:$0xf]  ;;  %v62_v2 = vld [vmem:[%s13679_s10 + $0x4] sm:$0xf]  ;;  %v66_v4 = vld [vmem:[%s13679_s10 + $0x8] sm:$0xf] }
   0x2   :  { %v60_v1 = vld [vmem:[%s13679_s10 + $0x20] sm:$0xf]  ;;  %59 = vst [vmem:[#allocation2] sm:$0xf] %v58_v0  ;;  %v64_v3 = vld [vmem:[%s13679_s10 + $0x24] sm:$0xf] }
   0x3   :  { %61 = vst [vmem:[#allocation2 + $0x4] sm:$0xf] %v60_v1  ;;  %63 = vst [vmem:[#allocation2 + $0x8] sm:$0xf] %v62_v2  ;;  %v68_v5 = vld [vmem:[%s13679_s10 + $0x28] sm:$0xf] }
   0x4   :  { %65 = vst [vmem:[#allocation2 + $0xc] sm:$0xf] %v64_v3  ;;  %67 = vst [vmem:[#allocation2 + $0x10] sm:$0xf] %v66_v4  ;;  %v70_v6 = vld [vmem:[%s13679_s10 + $0xc] sm:$0xf] }
   0x5   :  { %v72_v7 = vld [vmem:[%s13679_s10 + $0x2c] sm:$0xf]  ;;  %69 = vst [vmem:[#allocation2 + $0x14] sm:$0xf] %v68_v5  ;;  %71 = vst [vmem:[#allocation2 + $0x18] sm:$0xf] %v70_v6 }
   0x6   :  { %73 = vst [vmem:[#allocation2 + $0x1c] sm:$0xf] %v72_v7  ;;  %v74_v8 = vld [vmem:[%s13679_s10 + $0x10] sm:$0xf]  ;;  %v78_v10 = vld [vmem:[%s13679_s10 + $0x14] sm:$0xf] }
   0x7   :  { %v76_v9 = vld [vmem:[%s13679_s10 + $0x30] sm:$0xf]  ;;  %75 = vst [vmem:[#allocation2 + $0x20] sm:$0xf] %v74_v8  ;;  %79 = vst [vmem:[#allocation2 + $0x28] sm:$0xf] %v78_v10 }
   0x8   :  { %77 = vst [vmem:[#allocation2 + $0x24] sm:$0xf] %v76_v9  ;;  %v80_v11 = vld [vmem:[%s13679_s10 + $0x34] sm:$0xf]  ;;  %v82_v12 = vld [vmem:[%s13679_s10 + $0x18] sm:$0xf] }
   0x9   :  { %v84_v13 = vld [vmem:[%s13679_s10 + $0x38] sm:$0xf]  ;;  %81 = vst [vmem:[#allocation2 + $0x2c] sm:$0xf] %v80_v11  ;;  %83 = vst [vmem:[#allocation2 + $0x30] sm:$0xf] %v82_v12 }
   0xa   :  { %85 = vst [vmem:[#allocation2 + $0x34] sm:$0xf] %v84_v13  ;;  %v86_v14 = vld [vmem:[%s13679_s10 + $0x1c] sm:$0xf]  ;;  %v92_v16 = vld [vmem:[%s13679_s10 + $0x60] sm:$0xf] }
   0xb   :  { %v88_v15 = vld [vmem:[%s13679_s10 + $0x3c] sm:$0xff]   ;;  %87 = vst [vmem:[#allocation2 + $0x38] sm:$0xf] %v86_v14  ;;  %93 = vst [vmem:[#allocation2 + $0x44] sm:$0xf] %v92_v16 }
   0xc   :  { %89 = vst [vmem:[#allocation2 + $0x3c] sm:$0xff] %v88_v15   ;;  %v94_v17 = vld [vmem:[%s13679_s10 + $0x44] sm:$0xf]  ;;  %v98_v19 = vld [vmem:[%s13679_s10 + $0x48] sm:$0xf]  ;;  %v120_v30 = vld [vmem:[%s13679_s10 + $0x7c] sm:$0xff]  }
   0xd   :  { %v96_v18 = vld [vmem:[%s13679_s10 + $0x64] sm:$0xf]  ;;  %95 = vst [vmem:[#allocation2 + $0x48] sm:$0xf] %v94_v17  ;;  %99 = vst [vmem:[#allocation2 + $0x50] sm:$0xf] %v98_v19 }
   0xe   :  { %97 = vst [vmem:[#allocation2 + $0x4c] sm:$0xf] %v96_v18  ;;  %v100_v20 = vld [vmem:[%s13679_s10 + $0x68] sm:$0xf]  ;;  %v102_v21 = vld [vmem:[%s13679_s10 + $0x4c] sm:$0xf] }
   0xf   :  { %v104_v22 = vld [vmem:[%s13679_s10 + $0x6c] sm:$0xf]  ;;  %101 = vst [vmem:[#allocation2 + $0x54] sm:$0xf] %v100_v20  ;;  %103 = vst [vmem:[#allocation2 + $0x58] sm:$0xf] %v102_v21 }
  0x10   :  { %105 = vst [vmem:[#allocation2 + $0x5c] sm:$0xf] %v104_v22  ;;  %v106_v23 = vld [vmem:[%s13679_s10 + $0x50] sm:$0xf]  ;;  %v110_v25 = vld [vmem:[%s13679_s10 + $0x54] sm:$0xf] }
  0x11   :  { %v108_v24 = vld [vmem:[%s13679_s10 + $0x70] sm:$0xf]  ;;  %107 = vst [vmem:[#allocation2 + $0x60] sm:$0xf] %v106_v23  ;;  %111 = vst [vmem:[#allocation2 + $0x68] sm:$0xf] %v110_v25 }
  0x12   :  { %109 = vst [vmem:[#allocation2 + $0x64] sm:$0xf] %v108_v24  ;;  %v112_v26 = vld [vmem:[%s13679_s10 + $0x74] sm:$0xf]  ;;  %v114_v27 = vld [vmem:[%s13679_s10 + $0x58] sm:$0xf] }
  0x13   :  { %v116_v28 = vld [vmem:[%s13679_s10 + $0x78] sm:$0xf]  ;;  %113 = vst [vmem:[#allocation2 + $0x6c] sm:$0xf] %v112_v26  ;;  %115 = vst [vmem:[#allocation2 + $0x70] sm:$0xf] %v114_v27 }
  0x14   :  { %117 = vst [vmem:[#allocation2 + $0x74] sm:$0xf] %v116_v28  ;;  %v118_v29 = vld [vmem:[%s13679_s10 + $0x5c] sm:$0xf]  ;;  %v124_v31 = vld [vmem:[%s13679_s10 + $0xa0] sm:$0xf] }
  0x15   :  { %119 = vst [vmem:[#allocation2 + $0x78] sm:$0xf] %v118_v29  ;;  %121 = vst [vmem:[#allocation2 + $0x7c] sm:$0xff] %v120_v30   ;;  %v126_v32 = vld [vmem:[%s13679_s10 + $0x84] sm:$0xf]  ;;  %v152_v45 = vld [vmem:[%s13679_s10 + $0xbc] sm:$0xff]  }
  0x16   :  { %125 = vst [vmem:[#allocation2 + $0x84] sm:$0xf] %v124_v31  ;;  %v128_v33 = vld [vmem:[%s13679_s10 + $0xa4] sm:$0xf]  ;;  %v130_v34 = vld [vmem:[%s13679_s10 + $0x88] sm:$0xf] }
  0x17   :  { %127 = vst [vmem:[#allocation2 + $0x88] sm:$0xf] %v126_v32  ;;  %129 = vst [vmem:[#allocation2 + $0x8c] sm:$0xf] %v128_v33  ;;  %v132_v35 = vld [vmem:[%s13679_s10 + $0xa8] sm:$0xf] }
  0x18   :  { %131 = vst [vmem:[#allocation2 + $0x90] sm:$0xf] %v130_v34  ;;  %v134_v36 = vld [vmem:[%s13679_s10 + $0x8c] sm:$0xf]  ;;  %133 = vst [vmem:[#allocation2 + $0x94] sm:$0xf] %v132_v35 }
  0x19   :  { %v136_v37 = vld [vmem:[%s13679_s10 + $0xac] sm:$0xf]  ;;  %135 = vst [vmem:[#allocation2 + $0x98] sm:$0xf] %v134_v36  ;;  %v138_v38 = vld [vmem:[%s13679_s10 + $0x90] sm:$0xf] }
  0x1a   :  { %137 = vst [vmem:[#allocation2 + $0x9c] sm:$0xf] %v136_v37  ;;  %v140_v39 = vld [vmem:[%s13679_s10 + $0xb0] sm:$0xf]  ;;  %v142_v40 = vld [vmem:[%s13679_s10 + $0x94] sm:$0xf] }
  0x1b   :  { %139 = vst [vmem:[#allocation2 + $0xa0] sm:$0xf] %v138_v38  ;;  %141 = vst [vmem:[#allocation2 + $0xa4] sm:$0xf] %v140_v39  ;;  %v144_v41 = vld [vmem:[%s13679_s10 + $0xb4] sm:$0xf] }
  0x1c   :  { %143 = vst [vmem:[#allocation2 + $0xa8] sm:$0xf] %v142_v40  ;;  %v146_v42 = vld [vmem:[%s13679_s10 + $0x98] sm:$0xf]  ;;  %145 = vst [vmem:[#allocation2 + $0xac] sm:$0xf] %v144_v41 }
  0x1d   :  { %v148_v43 = vld [vmem:[%s13679_s10 + $0xb8] sm:$0xf]  ;;  %147 = vst [vmem:[#allocation2 + $0xb0] sm:$0xf] %v146_v42  ;;  %v150_v44 = vld [vmem:[%s13679_s10 + $0x9c] sm:$0xf] }
  0x1e   :  { %149 = vst [vmem:[#allocation2 + $0xb4] sm:$0xf] %v148_v43  ;;  %v156_v46 = vld [vmem:[%s13679_s10 + $0xe0] sm:$0xf]  ;;  %151 = vst [vmem:[#allocation2 + $0xb8] sm:$0xf] %v150_v44 }
  0x1f   :  { %153 = vst [vmem:[#allocation2 + $0xbc] sm:$0xff] %v152_v45   ;;  %157 = vst [vmem:[#allocation2 + $0xc4] sm:$0xf] %v156_v46  ;;  %v158_v47 = vld [vmem:[%s13679_s10 + $0xc4] sm:$0xf]  ;;  %v184_v60 = vld [vmem:[%s13679_s10 + $0xfc] sm:$0xff]  }
  0x20   :  { %v160_v48 = vld [vmem:[%s13679_s10 + $0xe4] sm:$0xf]  ;;  %v162_v49 = vld [vmem:[%s13679_s10 + $0xc8] sm:$0xf]  ;;  %159 = vst [vmem:[#allocation2 + $0xc8] sm:$0xf] %v158_v47 }
  0x21   :  { %161 = vst [vmem:[#allocation2 + $0xcc] sm:$0xf] %v160_v48  ;;  %163 = vst [vmem:[#allocation2 + $0xd0] sm:$0xf] %v162_v49  ;;  %v164_v50 = vld [vmem:[%s13679_s10 + $0xe8] sm:$0xf] }
  0x22   :  { %v166_v51 = vld [vmem:[%s13679_s10 + $0xcc] sm:$0xf]  ;;  %165 = vst [vmem:[#allocation2 + $0xd4] sm:$0xf] %v164_v50  ;;  %v170_v53 = vld [vmem:[%s13679_s10 + $0xd0] sm:$0xf] }
  0x23   :  { %v168_v52 = vld [vmem:[%s13679_s10 + $0xec] sm:$0xf]  ;;  %167 = vst [vmem:[#allocation2 + $0xd8] sm:$0xf] %v166_v51  ;;  %v172_v54 = vld [vmem:[%s13679_s10 + $0xf0] sm:$0xf] }
  0x24   :  { %169 = vst [vmem:[#allocation2 + $0xdc] sm:$0xf] %v168_v52  ;;  %v174_v55 = vld [vmem:[%s13679_s10 + $0xd4] sm:$0xf]  ;;  %171 = vst [vmem:[#allocation2 + $0xe0] sm:$0xf] %v170_v53 }
  0x25   :  { %173 = vst [vmem:[#allocation2 + $0xe4] sm:$0xf] %v172_v54  ;;  %175 = vst [vmem:[#allocation2 + $0xe8] sm:$0xf] %v174_v55  ;;  %v176_v56 = vld [vmem:[%s13679_s10 + $0xf4] sm:$0xf] }
  0x26   :  { %v178_v57 = vld [vmem:[%s13679_s10 + $0xd8] sm:$0xf]  ;;  %177 = vst [vmem:[#allocation2 + $0xec] sm:$0xf] %v176_v56  ;;  %v182_v59 = vld [vmem:[%s13679_s10 + $0xdc] sm:$0xf] }
  0x27   :  { %v180_v58 = vld [vmem:[%s13679_s10 + $0xf8] sm:$0xf]  ;;  %179 = vst [vmem:[#allocation2 + $0xf0] sm:$0xf] %v178_v57  ;;  %v188_v61 = vld [vmem:[%s13679_s10 + $0x120] sm:$0xf] }
  0x28   :  { %181 = vst [vmem:[#allocation2 + $0xf4] sm:$0xf] %v180_v58  ;;  %183 = vst [vmem:[#allocation2 + $0xf8] sm:$0xf] %v182_v59  ;;  %v190_v62 = vld [vmem:[%s13679_s10 + $0x104] sm:$0xf] }
  0x29   :  { %185 = vst [vmem:[#allocation2 + $0xfc] sm:$0xff] %v184_v60   ;;  %189 = vst [vmem:[#allocation2 + $0x104] sm:$0xf] %v188_v61  ;;  %v192_v63 = vld [vmem:[%s13679_s10 + $0x124] sm:$0xf]  ;;  %v216_v11 = vld [vmem:[%s13679_s10 + $0x13c] sm:$0xff]  }
  0x2a   :  { %v194_v0 = vld [vmem:[%s13679_s10 + $0x108] sm:$0xf]  ;;  %191 = vst [vmem:[#allocation2 + $0x108] sm:$0xf] %v190_v62  ;;  %193 = vst [vmem:[#allocation2 + $0x10c] sm:$0xf] %v192_v63 }
  0x2b   :  { %195 = vst [vmem:[#allocation2 + $0x110] sm:$0xf] %v194_v0  ;;  %v196_v1 = vld [vmem:[%s13679_s10 + $0x128] sm:$0xf]  ;;  %v198_v2 = vld [vmem:[%s13679_s10 + $0x10c] sm:$0xf] }
  0x2c   :  { %v200_v3 = vld [vmem:[%s13679_s10 + $0x12c] sm:$0xf]  ;;  %197 = vst [vmem:[#allocation2 + $0x114] sm:$0xf] %v196_v1  ;;  %199 = vst [vmem:[#allocation2 + $0x118] sm:$0xf] %v198_v2 }
  0x2d   :  { %201 = vst [vmem:[#allocation2 + $0x11c] sm:$0xf] %v200_v3  ;;  %v202_v4 = vld [vmem:[%s13679_s10 + $0x110] sm:$0xf]  ;;  %v206_v6 = vld [vmem:[%s13679_s10 + $0x114] sm:$0xf] }
  0x2e   :  { %v204_v5 = vld [vmem:[%s13679_s10 + $0x130] sm:$0xf]  ;;  %203 = vst [vmem:[#allocation2 + $0x120] sm:$0xf] %v202_v4  ;;  %207 = vst [vmem:[#allocation2 + $0x128] sm:$0xf] %v206_v6 }
  0x2f   :  { %205 = vst [vmem:[#allocation2 + $0x124] sm:$0xf] %v204_v5  ;;  %v208_v7 = vld [vmem:[%s13679_s10 + $0x134] sm:$0xf]  ;;  %v210_v8 = vld [vmem:[%s13679_s10 + $0x118] sm:$0xf] }
  0x30   :  { %v212_v9 = vld [vmem:[%s13679_s10 + $0x138] sm:$0xf]  ;;  %209 = vst [vmem:[#allocation2 + $0x12c] sm:$0xf] %v208_v7  ;;  %211 = vst [vmem:[#allocation2 + $0x130] sm:$0xf] %v210_v8 }
  0x31   :  { %213 = vst [vmem:[#allocation2 + $0x134] sm:$0xf] %v212_v9  ;;  %v214_v10 = vld [vmem:[%s13679_s10 + $0x11c] sm:$0xf]  ;;  %v220_v12 = vld [vmem:[%s13679_s10 + $0x160] sm:$0xf] }
  0x32   :  { %215 = vst [vmem:[#allocation2 + $0x138] sm:$0xf] %v214_v10  ;;  %217 = vst [vmem:[#allocation2 + $0x13c] sm:$0xff] %v216_v11   ;;  %v222_v13 = vld [vmem:[%s13679_s10 + $0x144] sm:$0xf]  ;;  %v248_v26 = vld [vmem:[%s13679_s10 + $0x17c] sm:$0xff]  }
  0x33   :  { %221 = vst [vmem:[#allocation2 + $0x144] sm:$0xf] %v220_v12  ;;  %v224_v14 = vld [vmem:[%s13679_s10 + $0x164] sm:$0xf]  ;;  %v226_v15 = vld [vmem:[%s13679_s10 + $0x148] sm:$0xf] }
  0x34   :  { %223 = vst [vmem:[#allocation2 + $0x148] sm:$0xf] %v222_v13  ;;  %225 = vst [vmem:[#allocation2 + $0x14c] sm:$0xf] %v224_v14  ;;  %v228_v16 = vld [vmem:[%s13679_s10 + $0x168] sm:$0xf] }
  0x35   :  { %227 = vst [vmem:[#allocation2 + $0x150] sm:$0xf] %v226_v15  ;;  %v230_v17 = vld [vmem:[%s13679_s10 + $0x14c] sm:$0xf]  ;;  %229 = vst [vmem:[#allocation2 + $0x154] sm:$0xf] %v228_v16 }
  0x36   :  { %v232_v18 = vld [vmem:[%s13679_s10 + $0x16c] sm:$0xf]  ;;  %231 = vst [vmem:[#allocation2 + $0x158] sm:$0xf] %v230_v17  ;;  %v234_v19 = vld [vmem:[%s13679_s10 + $0x150] sm:$0xf] }
  0x37   :  { %233 = vst [vmem:[#allocation2 + $0x15c] sm:$0xf] %v232_v18  ;;  %v236_v20 = vld [vmem:[%s13679_s10 + $0x170] sm:$0xf]  ;;  %v238_v21 = vld [vmem:[%s13679_s10 + $0x154] sm:$0xf] }
  0x38   :  { %235 = vst [vmem:[#allocation2 + $0x160] sm:$0xf] %v234_v19  ;;  %237 = vst [vmem:[#allocation2 + $0x164] sm:$0xf] %v236_v20  ;;  %v240_v22 = vld [vmem:[%s13679_s10 + $0x174] sm:$0xf] }
  0x39   :  { %239 = vst [vmem:[#allocation2 + $0x168] sm:$0xf] %v238_v21  ;;  %v242_v23 = vld [vmem:[%s13679_s10 + $0x158] sm:$0xf]  ;;  %241 = vst [vmem:[#allocation2 + $0x16c] sm:$0xf] %v240_v22 }
  0x3a   :  { %v244_v24 = vld [vmem:[%s13679_s10 + $0x178] sm:$0xf]  ;;  %243 = vst [vmem:[#allocation2 + $0x170] sm:$0xf] %v242_v23  ;;  %v246_v25 = vld [vmem:[%s13679_s10 + $0x15c] sm:$0xf] }
  0x3b   :  { %245 = vst [vmem:[#allocation2 + $0x174] sm:$0xf] %v244_v24  ;;  %v252_v27 = vld [vmem:[%s13679_s10 + $0x1a0] sm:$0xf]  ;;  %247 = vst [vmem:[#allocation2 + $0x178] sm:$0xf] %v246_v25 }
  0x3c   :  { %249 = vst [vmem:[#allocation2 + $0x17c] sm:$0xff] %v248_v26   ;;  %253 = vst [vmem:[#allocation2 + $0x184] sm:$0xf] %v252_v27  ;;  %v254_v28 = vld [vmem:[%s13679_s10 + $0x184] sm:$0xf]  ;;  %v280_v41 = vld [vmem:[%s13679_s10 + $0x1bc] sm:$0xff]  }
  0x3d   :  { %v256_v29 = vld [vmem:[%s13679_s10 + $0x1a4] sm:$0xf]  ;;  %v258_v30 = vld [vmem:[%s13679_s10 + $0x188] sm:$0xf]  ;;  %255 = vst [vmem:[#allocation2 + $0x188] sm:$0xf] %v254_v28 }
  0x3e   :  { %257 = vst [vmem:[#allocation2 + $0x18c] sm:$0xf] %v256_v29  ;;  %259 = vst [vmem:[#allocation2 + $0x190] sm:$0xf] %v258_v30  ;;  %v260_v31 = vld [vmem:[%s13679_s10 + $0x1a8] sm:$0xf] }
  0x3f   :  { %v262_v32 = vld [vmem:[%s13679_s10 + $0x18c] sm:$0xf]  ;;  %261 = vst [vmem:[#allocation2 + $0x194] sm:$0xf] %v260_v31  ;;  %v266_v34 = vld [vmem:[%s13679_s10 + $0x190] sm:$0xf] }
  0x40   :  { %v264_v33 = vld [vmem:[%s13679_s10 + $0x1ac] sm:$0xf]  ;;  %263 = vst [vmem:[#allocation2 + $0x198] sm:$0xf] %v262_v32  ;;  %v268_v35 = vld [vmem:[%s13679_s10 + $0x1b0] sm:$0xf] }
  0x41   :  { %265 = vst [vmem:[#allocation2 + $0x19c] sm:$0xf] %v264_v33  ;;  %v270_v36 = vld [vmem:[%s13679_s10 + $0x194] sm:$0xf]  ;;  %267 = vst [vmem:[#allocation2 + $0x1a0] sm:$0xf] %v266_v34 }
  0x42   :  { %269 = vst [vmem:[#allocation2 + $0x1a4] sm:$0xf] %v268_v35  ;;  %271 = vst [vmem:[#allocation2 + $0x1a8] sm:$0xf] %v270_v36  ;;  %v272_v37 = vld [vmem:[%s13679_s10 + $0x1b4] sm:$0xf] }
  0x43   :  { %v274_v38 = vld [vmem:[%s13679_s10 + $0x198] sm:$0xf]  ;;  %273 = vst [vmem:[#allocation2 + $0x1ac] sm:$0xf] %v272_v37  ;;  %v278_v40 = vld [vmem:[%s13679_s10 + $0x19c] sm:$0xf] }
  0x44   :  { %v276_v39 = vld [vmem:[%s13679_s10 + $0x1b8] sm:$0xf]  ;;  %275 = vst [vmem:[#allocation2 + $0x1b0] sm:$0xf] %v274_v38  ;;  %v284_v42 = vld [vmem:[%s13679_s10 + $0x1e0] sm:$0xf] }
  0x45   :  { %277 = vst [vmem:[#allocation2 + $0x1b4] sm:$0xf] %v276_v39  ;;  %279 = vst [vmem:[#allocation2 + $0x1b8] sm:$0xf] %v278_v40  ;;  %v286_v43 = vld [vmem:[%s13679_s10 + $0x1c4] sm:$0xf] }
  0x46   :  { %281 = vst [vmem:[#allocation2 + $0x1bc] sm:$0xff] %v280_v41   ;;  %285 = vst [vmem:[#allocation2 + $0x1c4] sm:$0xf] %v284_v42  ;;  %v288_v44 = vld [vmem:[%s13679_s10 + $0x1e4] sm:$0xf]  ;;  %v312_v56 = vld [vmem:[%s13679_s10 + $0x1fc] sm:$0xff]  }
  0x47   :  { %v290_v45 = vld [vmem:[%s13679_s10 + $0x1c8] sm:$0xf]  ;;  %287 = vst [vmem:[#allocation2 + $0x1c8] sm:$0xf] %v286_v43  ;;  %289 = vst [vmem:[#allocation2 + $0x1cc] sm:$0xf] %v288_v44 }
  0x48   :  { %291 = vst [vmem:[#allocation2 + $0x1d0] sm:$0xf] %v290_v45  ;;  %v292_v46 = vld [vmem:[%s13679_s10 + $0x1e8] sm:$0xf]  ;;  %v294_v47 = vld [vmem:[%s13679_s10 + $0x1cc] sm:$0xf] }
  0x49   :  { %v296_v48 = vld [vmem:[%s13679_s10 + $0x1ec] sm:$0xf]  ;;  %293 = vst [vmem:[#allocation2 + $0x1d4] sm:$0xf] %v292_v46  ;;  %295 = vst [vmem:[#allocation2 + $0x1d8] sm:$0xf] %v294_v47 }
  0x4a   :  { %297 = vst [vmem:[#allocation2 + $0x1dc] sm:$0xf] %v296_v48  ;;  %v298_v49 = vld [vmem:[%s13679_s10 + $0x1d0] sm:$0xf]  ;;  %v302_v51 = vld [vmem:[%s13679_s10 + $0x1d4] sm:$0xf] }
  0x4b   :  { %v300_v50 = vld [vmem:[%s13679_s10 + $0x1f0] sm:$0xf]  ;;  %299 = vst [vmem:[#allocation2 + $0x1e0] sm:$0xf] %v298_v49  ;;  %303 = vst [vmem:[#allocation2 + $0x1e8] sm:$0xf] %v302_v51 }
  0x4c   :  { %301 = vst [vmem:[#allocation2 + $0x1e4] sm:$0xf] %v300_v50  ;;  %v304_v52 = vld [vmem:[%s13679_s10 + $0x1f4] sm:$0xf]  ;;  %v306_v53 = vld [vmem:[%s13679_s10 + $0x1d8] sm:$0xf] }
  0x4d   :  { %v308_v54 = vld [vmem:[%s13679_s10 + $0x1f8] sm:$0xf]  ;;  %305 = vst [vmem:[#allocation2 + $0x1ec] sm:$0xf] %v304_v52  ;;  %307 = vst [vmem:[#allocation2 + $0x1f0] sm:$0xf] %v306_v53 }
  0x4e   :  { %309 = vst [vmem:[#allocation2 + $0x1f4] sm:$0xf] %v308_v54  ;;  %v310_v55 = vld [vmem:[%s13679_s10 + $0x1dc] sm:$0xf]  ;;  %v316_v57 = vld [vmem:[%s13679_s10 + $0x220] sm:$0xf] }
  0x4f   :  { %311 = vst [vmem:[#allocation2 + $0x1f8] sm:$0xf] %v310_v55  ;;  %313 = vst [vmem:[#allocation2 + $0x1fc] sm:$0xff] %v312_v56   ;;  %v318_v58 = vld [vmem:[%s13679_s10 + $0x204] sm:$0xf]  ;;  %v344_v7 = vld [vmem:[%s13679_s10 + $0x23c] sm:$0xff]  }
  0x50   :  { %317 = vst [vmem:[#allocation2 + $0x204] sm:$0xf] %v316_v57  ;;  %v320_v59 = vld [vmem:[%s13679_s10 + $0x224] sm:$0xf]  ;;  %v322_v60 = vld [vmem:[%s13679_s10 + $0x208] sm:$0xf] }
  0x51   :  { %319 = vst [vmem:[#allocation2 + $0x208] sm:$0xf] %v318_v58  ;;  %321 = vst [vmem:[#allocation2 + $0x20c] sm:$0xf] %v320_v59  ;;  %v324_v61 = vld [vmem:[%s13679_s10 + $0x228] sm:$0xf] }
  0x52   :  { %323 = vst [vmem:[#allocation2 + $0x210] sm:$0xf] %v322_v60  ;;  %v326_v62 = vld [vmem:[%s13679_s10 + $0x20c] sm:$0xf]  ;;  %325 = vst [vmem:[#allocation2 + $0x214] sm:$0xf] %v324_v61 }
  0x53   :  { %v328_v63 = vld [vmem:[%s13679_s10 + $0x22c] sm:$0xf]  ;;  %327 = vst [vmem:[#allocation2 + $0x218] sm:$0xf] %v326_v62  ;;  %v330_v0 = vld [vmem:[%s13679_s10 + $0x210] sm:$0xf] }
  0x54   :  { %329 = vst [vmem:[#allocation2 + $0x21c] sm:$0xf] %v328_v63  ;;  %v332_v1 = vld [vmem:[%s13679_s10 + $0x230] sm:$0xf]  ;;  %v334_v2 = vld [vmem:[%s13679_s10 + $0x214] sm:$0xf] }
  0x55   :  { %331 = vst [vmem:[#allocation2 + $0x220] sm:$0xf] %v330_v0  ;;  %333 = vst [vmem:[#allocation2 + $0x224] sm:$0xf] %v332_v1  ;;  %v336_v3 = vld [vmem:[%s13679_s10 + $0x234] sm:$0xf] }
  0x56   :  { %335 = vst [vmem:[#allocation2 + $0x228] sm:$0xf] %v334_v2  ;;  %v338_v4 = vld [vmem:[%s13679_s10 + $0x218] sm:$0xf]  ;;  %337 = vst [vmem:[#allocation2 + $0x22c] sm:$0xf] %v336_v3 }
  0x57   :  { %v340_v5 = vld [vmem:[%s13679_s10 + $0x238] sm:$0xf]  ;;  %339 = vst [vmem:[#allocation2 + $0x230] sm:$0xf] %v338_v4  ;;  %v342_v6 = vld [vmem:[%s13679_s10 + $0x21c] sm:$0xf] }
  0x58   :  { %341 = vst [vmem:[#allocation2 + $0x234] sm:$0xf] %v340_v5  ;;  %v348_v8 = vld [vmem:[%s13679_s10 + $0x260] sm:$0xf]  ;;  %343 = vst [vmem:[#allocation2 + $0x238] sm:$0xf] %v342_v6 }
  0x59   :  { %345 = vst [vmem:[#allocation2 + $0x23c] sm:$0xff] %v344_v7   ;;  %349 = vst [vmem:[#allocation2 + $0x244] sm:$0xf] %v348_v8  ;;  %v350_v9 = vld [vmem:[%s13679_s10 + $0x244] sm:$0xf]  ;;  %v376_v22 = vld [vmem:[%s13679_s10 + $0x27c] sm:$0xff]  }
  0x5a   :  { %v352_v10 = vld [vmem:[%s13679_s10 + $0x264] sm:$0xf]  ;;  %v354_v11 = vld [vmem:[%s13679_s10 + $0x248] sm:$0xf]  ;;  %351 = vst [vmem:[#allocation2 + $0x248] sm:$0xf] %v350_v9 }
  0x5b   :  { %353 = vst [vmem:[#allocation2 + $0x24c] sm:$0xf] %v352_v10  ;;  %355 = vst [vmem:[#allocation2 + $0x250] sm:$0xf] %v354_v11  ;;  %v356_v12 = vld [vmem:[%s13679_s10 + $0x268] sm:$0xf] }
  0x5c   :  { %v358_v13 = vld [vmem:[%s13679_s10 + $0x24c] sm:$0xf]  ;;  %357 = vst [vmem:[#allocation2 + $0x254] sm:$0xf] %v356_v12  ;;  %v362_v15 = vld [vmem:[%s13679_s10 + $0x250] sm:$0xf] }
  0x5d   :  { %v360_v14 = vld [vmem:[%s13679_s10 + $0x26c] sm:$0xf]  ;;  %359 = vst [vmem:[#allocation2 + $0x258] sm:$0xf] %v358_v13  ;;  %v364_v16 = vld [vmem:[%s13679_s10 + $0x270] sm:$0xf] }
  0x5e   :  { %361 = vst [vmem:[#allocation2 + $0x25c] sm:$0xf] %v360_v14  ;;  %v366_v17 = vld [vmem:[%s13679_s10 + $0x254] sm:$0xf]  ;;  %363 = vst [vmem:[#allocation2 + $0x260] sm:$0xf] %v362_v15 }
  0x5f   :  { %365 = vst [vmem:[#allocation2 + $0x264] sm:$0xf] %v364_v16  ;;  %367 = vst [vmem:[#allocation2 + $0x268] sm:$0xf] %v366_v17  ;;  %v368_v18 = vld [vmem:[%s13679_s10 + $0x274] sm:$0xf] }
  0x60   :  { %v370_v19 = vld [vmem:[%s13679_s10 + $0x258] sm:$0xf]  ;;  %369 = vst [vmem:[#allocation2 + $0x26c] sm:$0xf] %v368_v18  ;;  %v374_v21 = vld [vmem:[%s13679_s10 + $0x25c] sm:$0xf] }
  0x61   :  { %v372_v20 = vld [vmem:[%s13679_s10 + $0x278] sm:$0xf]  ;;  %371 = vst [vmem:[#allocation2 + $0x270] sm:$0xf] %v370_v19  ;;  %v380_v23 = vld [vmem:[%s13679_s10 + $0x2a0] sm:$0xf] }
  0x62   :  { %373 = vst [vmem:[#allocation2 + $0x274] sm:$0xf] %v372_v20  ;;  %375 = vst [vmem:[#allocation2 + $0x278] sm:$0xf] %v374_v21  ;;  %v382_v24 = vld [vmem:[%s13679_s10 + $0x284] sm:$0xf] }
  0x63   :  { %377 = vst [vmem:[#allocation2 + $0x27c] sm:$0xff] %v376_v22   ;;  %381 = vst [vmem:[#allocation2 + $0x284] sm:$0xf] %v380_v23  ;;  %v384_v25 = vld [vmem:[%s13679_s10 + $0x2a4] sm:$0xf]  ;;  %v408_v37 = vld [vmem:[%s13679_s10 + $0x2bc] sm:$0xff]  }
  0x64   :  { %v386_v26 = vld [vmem:[%s13679_s10 + $0x288] sm:$0xf]  ;;  %383 = vst [vmem:[#allocation2 + $0x288] sm:$0xf] %v382_v24  ;;  %385 = vst [vmem:[#allocation2 + $0x28c] sm:$0xf] %v384_v25 }
  0x65   :  { %387 = vst [vmem:[#allocation2 + $0x290] sm:$0xf] %v386_v26  ;;  %v388_v27 = vld [vmem:[%s13679_s10 + $0x2a8] sm:$0xf]  ;;  %v390_v28 = vld [vmem:[%s13679_s10 + $0x28c] sm:$0xf] }
  0x66   :  { %v392_v29 = vld [vmem:[%s13679_s10 + $0x2ac] sm:$0xf]  ;;  %389 = vst [vmem:[#allocation2 + $0x294] sm:$0xf] %v388_v27  ;;  %391 = vst [vmem:[#allocation2 + $0x298] sm:$0xf] %v390_v28 }
  0x67   :  { %393 = vst [vmem:[#allocation2 + $0x29c] sm:$0xf] %v392_v29  ;;  %v394_v30 = vld [vmem:[%s13679_s10 + $0x290] sm:$0xf]  ;;  %v398_v32 = vld [vmem:[%s13679_s10 + $0x294] sm:$0xf] }
  0x68   :  { %v396_v31 = vld [vmem:[%s13679_s10 + $0x2b0] sm:$0xf]  ;;  %395 = vst [vmem:[#allocation2 + $0x2a0] sm:$0xf] %v394_v30  ;;  %399 = vst [vmem:[#allocation2 + $0x2a8] sm:$0xf] %v398_v32 }
  0x69   :  { %397 = vst [vmem:[#allocation2 + $0x2a4] sm:$0xf] %v396_v31  ;;  %v400_v33 = vld [vmem:[%s13679_s10 + $0x2b4] sm:$0xf]  ;;  %v402_v34 = vld [vmem:[%s13679_s10 + $0x298] sm:$0xf] }
  0x6a   :  { %v404_v35 = vld [vmem:[%s13679_s10 + $0x2b8] sm:$0xf]  ;;  %401 = vst [vmem:[#allocation2 + $0x2ac] sm:$0xf] %v400_v33  ;;  %403 = vst [vmem:[#allocation2 + $0x2b0] sm:$0xf] %v402_v34 }
  0x6b   :  { %405 = vst [vmem:[#allocation2 + $0x2b4] sm:$0xf] %v404_v35  ;;  %v406_v36 = vld [vmem:[%s13679_s10 + $0x29c] sm:$0xf]  ;;  %v412_v38 = vld [vmem:[%s13679_s10 + $0x2e0] sm:$0xf] }
  0x6c   :  { %407 = vst [vmem:[#allocation2 + $0x2b8] sm:$0xf] %v406_v36  ;;  %409 = vst [vmem:[#allocation2 + $0x2bc] sm:$0xff] %v408_v37   ;;  %v414_v39 = vld [vmem:[%s13679_s10 + $0x2c4] sm:$0xf] }
  0x6d   :  { %413 = vst [vmem:[#allocation2 + $0x2c4] sm:$0xf] %v412_v38  ;;  %v416_v40 = vld [vmem:[%s13679_s10 + $0x2e4] sm:$0xf]  ;;  %v418_v41 = vld [vmem:[%s13679_s10 + $0x2c8] sm:$0xf] }
  0x6e   :  { %415 = vst [vmem:[#allocation2 + $0x2c8] sm:$0xf] %v414_v39  ;;  %417 = vst [vmem:[#allocation2 + $0x2cc] sm:$0xf] %v416_v40  ;;  %v420_v42 = vld [vmem:[%s13679_s10 + $0x2e8] sm:$0xf] }
  0x6f   :  { %419 = vst [vmem:[#allocation2 + $0x2d0] sm:$0xf] %v418_v41  ;;  %v422_v43 = vld [vmem:[%s13679_s10 + $0x2cc] sm:$0xf]  ;;  %421 = vst [vmem:[#allocation2 + $0x2d4] sm:$0xf] %v420_v42 }
  0x70   :  { %v424_v44 = vld [vmem:[%s13679_s10 + $0x2ec] sm:$0xf]  ;;  %423 = vst [vmem:[#allocation2 + $0x2d8] sm:$0xf] %v422_v43  ;;  %v426_v45 = vld [vmem:[%s13679_s10 + $0x2d0] sm:$0xf] }
  0x71   :  { %425 = vst [vmem:[#allocation2 + $0x2dc] sm:$0xf] %v424_v44  ;;  %v428_v46 = vld [vmem:[%s13679_s10 + $0x2f0] sm:$0xf]  ;;  %v430_v47 = vld [vmem:[%s13679_s10 + $0x2d4] sm:$0xf] }
  0x72   :  { %427 = vst [vmem:[#allocation2 + $0x2e0] sm:$0xf] %v426_v45  ;;  %429 = vst [vmem:[#allocation2 + $0x2e4] sm:$0xf] %v428_v46  ;;  %v432_v48 = vld [vmem:[%s13679_s10 + $0x2f4] sm:$0xf] }
  0x73   :  { %431 = vst [vmem:[#allocation2 + $0x2e8] sm:$0xf] %v430_v47  ;;  %v434_v49 = vld [vmem:[%s13679_s10 + $0x2d8] sm:$0xf]  ;;  %433 = vst [vmem:[#allocation2 + $0x2ec] sm:$0xf] %v432_v48 }
  0x74   :  { %v436_v50 = vld [vmem:[%s13679_s10 + $0x2f8] sm:$0xf]  ;;  %435 = vst [vmem:[#allocation2 + $0x2f0] sm:$0xf] %v434_v49  ;;  %v438_v51 = vld [vmem:[%s13679_s10 + $0x2dc] sm:$0xf] }
  0x75   :  { %437 = vst [vmem:[#allocation2 + $0x2f4] sm:$0xf] %v436_v50  ;;  %v440_v52 = vld [vmem:[%s13679_s10 + $0x2fc] sm:$0xf]  ;;  %439 = vst [vmem:[#allocation2 + $0x2f8] sm:$0xf] %v438_v51 }
  0x76   :  { %441 = vst [vmem:[#allocation2 + $0x2fc] sm:$0xf] %v440_v52 }
  0x77   :  { %856 = vsyncadd [#allocation6], 12288  ;;  %v875_v53 = vld [vmem:[%s13680_s11] sm:$0xf]  ;;  %v877_v54 = vld [vmem:[%s13680_s11 + $0x10] sm:$0xf] }
  0x78   :  { %876 = vst [vmem:[#allocation3] sm:$0xf] %v875_v53  ;;  %878 = vst [vmem:[#allocation3 + $0x4] sm:$0xf] %v877_v54  ;;  %v879_v55 = vld [vmem:[%s13680_s11 + $0x4] sm:$0xf] }
  0x79   :  { %v881_v56 = vld [vmem:[%s13680_s11 + $0x14] sm:$0xf]  ;;  %v883_v57 = vld [vmem:[%s13680_s11 + $0x8] sm:$0xf]  ;;  %880 = vst [vmem:[#allocation3 + $0x8] sm:$0xf] %v879_v55 }
  0x7a   :  { %882 = vst [vmem:[#allocation3 + $0xc] sm:$0xf] %v881_v56  ;;  %884 = vst [vmem:[#allocation3 + $0x10] sm:$0xf] %v883_v57  ;;  %v885_v58 = vld [vmem:[%s13680_s11 + $0x18] sm:$0xf] }
  0x7b   :  { %v887_v59 = vld [vmem:[%s13680_s11 + $0xc] sm:$0xf]  ;;  %v889_v60 = vld [vmem:[%s13680_s11 + $0x1c] sm:$0xff]   ;;  %886 = vst [vmem:[#allocation3 + $0x14] sm:$0xf] %v885_v58 }
  0x7c   :  { %888 = vst [vmem:[#allocation3 + $0x18] sm:$0xf] %v887_v59  ;;  %890 = vst [vmem:[#allocation3 + $0x1c] sm:$0xff] %v889_v60   ;;  %v893_v61 = vld [vmem:[%s13680_s11 + $0x30] sm:$0xf]  ;;  %v905_v3 = vld [vmem:[%s13680_s11 + $0x3c] sm:$0xff]  }
  0x7d   :  { %v895_v62 = vld [vmem:[%s13680_s11 + $0x24] sm:$0xf]  ;;  %v897_v63 = vld [vmem:[%s13680_s11 + $0x34] sm:$0xf]  ;;  %894 = vst [vmem:[#allocation3 + $0x24] sm:$0xf] %v893_v61 }
  0x7e   :  { %896 = vst [vmem:[#allocation3 + $0x28] sm:$0xf] %v895_v62  ;;  %898 = vst [vmem:[#allocation3 + $0x2c] sm:$0xf] %v897_v63  ;;  %v899_v0 = vld [vmem:[%s13680_s11 + $0x28] sm:$0xf] }
  0x7f   :  { %v901_v1 = vld [vmem:[%s13680_s11 + $0x38] sm:$0xf]  ;;  %v903_v2 = vld [vmem:[%s13680_s11 + $0x2c] sm:$0xf]  ;;  %900 = vst [vmem:[#allocation3 + $0x30] sm:$0xf] %v899_v0 }
  0x80   :  { %902 = vst [vmem:[#allocation3 + $0x34] sm:$0xf] %v901_v1  ;;  %904 = vst [vmem:[#allocation3 + $0x38] sm:$0xf] %v903_v2  ;;  %v909_v4 = vld [vmem:[%s13680_s11 + $0x50] sm:$0xf] }
  0x81   :  { %v911_v5 = vld [vmem:[%s13680_s11 + $0x44] sm:$0xf]  ;;  %906 = vst [vmem:[#allocation3 + $0x3c] sm:$0xff] %v905_v3   ;;  %910 = vst [vmem:[#allocation3 + $0x44] sm:$0xf] %v909_v4  ;;  %v921_v10 = vld [vmem:[%s13680_s11 + $0x5c] sm:$0xff]  }
  0x82   :  { %912 = vst [vmem:[#allocation3 + $0x48] sm:$0xf] %v911_v5  ;;  %v913_v6 = vld [vmem:[%s13680_s11 + $0x54] sm:$0xf]  ;;  %v915_v7 = vld [vmem:[%s13680_s11 + $0x48] sm:$0xf] }
  0x83   :  { %v917_v8 = vld [vmem:[%s13680_s11 + $0x58] sm:$0xf]  ;;  %914 = vst [vmem:[#allocation3 + $0x4c] sm:$0xf] %v913_v6  ;;  %916 = vst [vmem:[#allocation3 + $0x50] sm:$0xf] %v915_v7 }
  0x84   :  { %918 = vst [vmem:[#allocation3 + $0x54] sm:$0xf] %v917_v8  ;;  %v919_v9 = vld [vmem:[%s13680_s11 + $0x4c] sm:$0xf]  ;;  %v925_v11 = vld [vmem:[%s13680_s11 + $0x70] sm:$0xf] }
  0x85   :  { %920 = vst [vmem:[#allocation3 + $0x58] sm:$0xf] %v919_v9  ;;  %922 = vst [vmem:[#allocation3 + $0x5c] sm:$0xff] %v921_v10   ;;  %v927_v12 = vld [vmem:[%s13680_s11 + $0x64] sm:$0xf]  ;;  %v937_v17 = vld [vmem:[%s13680_s11 + $0x7c] sm:$0xff]  }
  0x86   :  { %926 = vst [vmem:[#allocation3 + $0x64] sm:$0xf] %v925_v11  ;;  %v929_v13 = vld [vmem:[%s13680_s11 + $0x74] sm:$0xf]  ;;  %v931_v14 = vld [vmem:[%s13680_s11 + $0x68] sm:$0xf] }
  0x87   :  { %928 = vst [vmem:[#allocation3 + $0x68] sm:$0xf] %v927_v12  ;;  %930 = vst [vmem:[#allocation3 + $0x6c] sm:$0xf] %v929_v13  ;;  %v933_v15 = vld [vmem:[%s13680_s11 + $0x78] sm:$0xf] }
  0x88   :  { %932 = vst [vmem:[#allocation3 + $0x70] sm:$0xf] %v931_v14  ;;  %v935_v16 = vld [vmem:[%s13680_s11 + $0x6c] sm:$0xf]  ;;  %934 = vst [vmem:[#allocation3 + $0x74] sm:$0xf] %v933_v15 }
  0x89   :  { %936 = vst [vmem:[#allocation3 + $0x78] sm:$0xf] %v935_v16  ;;  %938 = vst [vmem:[#allocation3 + $0x7c] sm:$0xff] %v937_v17   ;;  %v941_v18 = vld [vmem:[%s13680_s11 + $0x90] sm:$0xf]  ;;  %v953_v24 = vld [vmem:[%s13680_s11 + $0x9c] sm:$0xff]  }
  0x8a   :  { %v943_v19 = vld [vmem:[%s13680_s11 + $0x84] sm:$0xf]  ;;  %v945_v20 = vld [vmem:[%s13680_s11 + $0x94] sm:$0xf]  ;;  %942 = vst [vmem:[#allocation3 + $0x84] sm:$0xf] %v941_v18 }
  0x8b   :  { %944 = vst [vmem:[#allocation3 + $0x88] sm:$0xf] %v943_v19  ;;  %946 = vst [vmem:[#allocation3 + $0x8c] sm:$0xf] %v945_v20  ;;  %v947_v21 = vld [vmem:[%s13680_s11 + $0x88] sm:$0xf] }
  0x8c   :  { %v949_v22 = vld [vmem:[%s13680_s11 + $0x98] sm:$0xf]  ;;  %v951_v23 = vld [vmem:[%s13680_s11 + $0x8c] sm:$0xf]  ;;  %948 = vst [vmem:[#allocation3 + $0x90] sm:$0xf] %v947_v21 }
  0x8d   :  { %950 = vst [vmem:[#allocation3 + $0x94] sm:$0xf] %v949_v22  ;;  %952 = vst [vmem:[#allocation3 + $0x98] sm:$0xf] %v951_v23  ;;  %v957_v25 = vld [vmem:[%s13680_s11 + $0xb0] sm:$0xf] }
  0x8e   :  { %v959_v26 = vld [vmem:[%s13680_s11 + $0xa4] sm:$0xf]  ;;  %954 = vst [vmem:[#allocation3 + $0x9c] sm:$0xff] %v953_v24   ;;  %958 = vst [vmem:[#allocation3 + $0xa4] sm:$0xf] %v957_v25  ;;  %v969_v31 = vld [vmem:[%s13680_s11 + $0xbc] sm:$0xff]  }
  0x8f   :  { %960 = vst [vmem:[#allocation3 + $0xa8] sm:$0xf] %v959_v26  ;;  %v961_v27 = vld [vmem:[%s13680_s11 + $0xb4] sm:$0xf]  ;;  %v963_v28 = vld [vmem:[%s13680_s11 + $0xa8] sm:$0xf] }
  0x90   :  { %v965_v29 = vld [vmem:[%s13680_s11 + $0xb8] sm:$0xf]  ;;  %962 = vst [vmem:[#allocation3 + $0xac] sm:$0xf] %v961_v27  ;;  %964 = vst [vmem:[#allocation3 + $0xb0] sm:$0xf] %v963_v28 }
  0x91   :  { %966 = vst [vmem:[#allocation3 + $0xb4] sm:$0xf] %v965_v29  ;;  %v967_v30 = vld [vmem:[%s13680_s11 + $0xac] sm:$0xf]  ;;  %v973_v32 = vld [vmem:[%s13680_s11 + $0xd0] sm:$0xf] }
  0x92   :  { %968 = vst [vmem:[#allocation3 + $0xb8] sm:$0xf] %v967_v30  ;;  %970 = vst [vmem:[#allocation3 + $0xbc] sm:$0xff] %v969_v31   ;;  %v975_v33 = vld [vmem:[%s13680_s11 + $0xc4] sm:$0xf]  ;;  %v985_v38 = vld [vmem:[%s13680_s11 + $0xdc] sm:$0xff]  }
  0x93   :  { %974 = vst [vmem:[#allocation3 + $0xc4] sm:$0xf] %v973_v32  ;;  %v977_v34 = vld [vmem:[%s13680_s11 + $0xd4] sm:$0xf]  ;;  %v979_v35 = vld [vmem:[%s13680_s11 + $0xc8] sm:$0xf] }
  0x94   :  { %976 = vst [vmem:[#allocation3 + $0xc8] sm:$0xf] %v975_v33  ;;  %978 = vst [vmem:[#allocation3 + $0xcc] sm:$0xf] %v977_v34  ;;  %v981_v36 = vld [vmem:[%s13680_s11 + $0xd8] sm:$0xf] }
  0x95   :  { %980 = vst [vmem:[#allocation3 + $0xd0] sm:$0xf] %v979_v35  ;;  %v983_v37 = vld [vmem:[%s13680_s11 + $0xcc] sm:$0xf]  ;;  %982 = vst [vmem:[#allocation3 + $0xd4] sm:$0xf] %v981_v36 }
  0x96   :  { %984 = vst [vmem:[#allocation3 + $0xd8] sm:$0xf] %v983_v37  ;;  %986 = vst [vmem:[#allocation3 + $0xdc] sm:$0xff] %v985_v38   ;;  %v989_v39 = vld [vmem:[%s13680_s11 + $0xf0] sm:$0xf]  ;;  %v1001_v45 = vld [vmem:[%s13680_s11 + $0xfc] sm:$0xff]  }
  0x97   :  { %v991_v40 = vld [vmem:[%s13680_s11 + $0xe4] sm:$0xf]  ;;  %v993_v41 = vld [vmem:[%s13680_s11 + $0xf4] sm:$0xf]  ;;  %990 = vst [vmem:[#allocation3 + $0xe4] sm:$0xf] %v989_v39 }
  0x98   :  { %992 = vst [vmem:[#allocation3 + $0xe8] sm:$0xf] %v991_v40  ;;  %994 = vst [vmem:[#allocation3 + $0xec] sm:$0xf] %v993_v41  ;;  %v995_v42 = vld [vmem:[%s13680_s11 + $0xe8] sm:$0xf] }
  0x99   :  { %v997_v43 = vld [vmem:[%s13680_s11 + $0xf8] sm:$0xf]  ;;  %v999_v44 = vld [vmem:[%s13680_s11 + $0xec] sm:$0xf]  ;;  %996 = vst [vmem:[#allocation3 + $0xf0] sm:$0xf] %v995_v42 }
  0x9a   :  { %998 = vst [vmem:[#allocation3 + $0xf4] sm:$0xf] %v997_v43  ;;  %1000 = vst [vmem:[#allocation3 + $0xf8] sm:$0xf] %v999_v44  ;;  %v1005_v46 = vld [vmem:[%s13680_s11 + $0x110] sm:$0xf] }
  0x9b   :  { %v1007_v47 = vld [vmem:[%s13680_s11 + $0x104] sm:$0xf]  ;;  %1002 = vst [vmem:[#allocation3 + $0xfc] sm:$0xff] %v1001_v45   ;;  %1006 = vst [vmem:[#allocation3 + $0x104] sm:$0xf] %v1005_v46  ;;  %v1017_v52 = vld [vmem:[%s13680_s11 + $0x11c] sm:$0xff]  }
  0x9c   :  { %1008 = vst [vmem:[#allocation3 + $0x108] sm:$0xf] %v1007_v47  ;;  %v1009_v48 = vld [vmem:[%s13680_s11 + $0x114] sm:$0xf]  ;;  %v1011_v49 = vld [vmem:[%s13680_s11 + $0x108] sm:$0xf] }
  0x9d   :  { %v1013_v50 = vld [vmem:[%s13680_s11 + $0x118] sm:$0xf]  ;;  %1010 = vst [vmem:[#allocation3 + $0x10c] sm:$0xf] %v1009_v48  ;;  %1012 = vst [vmem:[#allocation3 + $0x110] sm:$0xf] %v1011_v49 }
  0x9e   :  { %1014 = vst [vmem:[#allocation3 + $0x114] sm:$0xf] %v1013_v50  ;;  %v1015_v51 = vld [vmem:[%s13680_s11 + $0x10c] sm:$0xf]  ;;  %v1021_v53 = vld [vmem:[%s13680_s11 + $0x130] sm:$0xf] }
  0x9f   :  { %1016 = vst [vmem:[#allocation3 + $0x118] sm:$0xf] %v1015_v51  ;;  %1018 = vst [vmem:[#allocation3 + $0x11c] sm:$0xff] %v1017_v52   ;;  %v1023_v54 = vld [vmem:[%s13680_s11 + $0x124] sm:$0xf]  ;;  %v1033_v59 = vld [vmem:[%s13680_s11 + $0x13c] sm:$0xff]  }
  0xa0   :  { %1022 = vst [vmem:[#allocation3 + $0x124] sm:$0xf] %v1021_v53  ;;  %v1025_v55 = vld [vmem:[%s13680_s11 + $0x134] sm:$0xf]  ;;  %v1027_v56 = vld [vmem:[%s13680_s11 + $0x128] sm:$0xf] }
  0xa1   :  { %1024 = vst [vmem:[#allocation3 + $0x128] sm:$0xf] %v1023_v54  ;;  %1026 = vst [vmem:[#allocation3 + $0x12c] sm:$0xf] %v1025_v55  ;;  %v1029_v57 = vld [vmem:[%s13680_s11 + $0x138] sm:$0xf] }
  0xa2   :  { %1028 = vst [vmem:[#allocation3 + $0x130] sm:$0xf] %v1027_v56  ;;  %v1031_v58 = vld [vmem:[%s13680_s11 + $0x12c] sm:$0xf]  ;;  %1030 = vst [vmem:[#allocation3 + $0x134] sm:$0xf] %v1029_v57 }
  0xa3   :  { %1032 = vst [vmem:[#allocation3 + $0x138] sm:$0xf] %v1031_v58  ;;  %1034 = vst [vmem:[#allocation3 + $0x13c] sm:$0xff] %v1033_v59   ;;  %v1037_v60 = vld [vmem:[%s13680_s11 + $0x150] sm:$0xf]  ;;  %v1049_v2 = vld [vmem:[%s13680_s11 + $0x15c] sm:$0xff]  }
  0xa4   :  { %v1039_v61 = vld [vmem:[%s13680_s11 + $0x144] sm:$0xf]  ;;  %v1041_v62 = vld [vmem:[%s13680_s11 + $0x154] sm:$0xf]  ;;  %1038 = vst [vmem:[#allocation3 + $0x144] sm:$0xf] %v1037_v60 }
  0xa5   :  { %1040 = vst [vmem:[#allocation3 + $0x148] sm:$0xf] %v1039_v61  ;;  %1042 = vst [vmem:[#allocation3 + $0x14c] sm:$0xf] %v1041_v62  ;;  %v1043_v63 = vld [vmem:[%s13680_s11 + $0x148] sm:$0xf] }
  0xa6   :  { %v1045_v0 = vld [vmem:[%s13680_s11 + $0x158] sm:$0xf]  ;;  %v1047_v1 = vld [vmem:[%s13680_s11 + $0x14c] sm:$0xf]  ;;  %1044 = vst [vmem:[#allocation3 + $0x150] sm:$0xf] %v1043_v63 }
  0xa7   :  { %1046 = vst [vmem:[#allocation3 + $0x154] sm:$0xf] %v1045_v0  ;;  %1048 = vst [vmem:[#allocation3 + $0x158] sm:$0xf] %v1047_v1  ;;  %v1053_v3 = vld [vmem:[%s13680_s11 + $0x170] sm:$0xf] }
  0xa8   :  { %v1055_v4 = vld [vmem:[%s13680_s11 + $0x164] sm:$0xf]  ;;  %1050 = vst [vmem:[#allocation3 + $0x15c] sm:$0xff] %v1049_v2   ;;  %1054 = vst [vmem:[#allocation3 + $0x164] sm:$0xf] %v1053_v3  ;;  %v1065_v9 = vld [vmem:[%s13680_s11 + $0x17c] sm:$0xff]  }
  0xa9   :  { %1056 = vst [vmem:[#allocation3 + $0x168] sm:$0xf] %v1055_v4  ;;  %v1057_v5 = vld [vmem:[%s13680_s11 + $0x174] sm:$0xf]  ;;  %v1059_v6 = vld [vmem:[%s13680_s11 + $0x168] sm:$0xf] }
  0xaa   :  { %v1061_v7 = vld [vmem:[%s13680_s11 + $0x178] sm:$0xf]  ;;  %1058 = vst [vmem:[#allocation3 + $0x16c] sm:$0xf] %v1057_v5  ;;  %1060 = vst [vmem:[#allocation3 + $0x170] sm:$0xf] %v1059_v6 }
  0xab   :  { %1062 = vst [vmem:[#allocation3 + $0x174] sm:$0xf] %v1061_v7  ;;  %v1063_v8 = vld [vmem:[%s13680_s11 + $0x16c] sm:$0xf]  ;;  %v1069_v10 = vld [vmem:[%s13680_s11 + $0x190] sm:$0xf] }
  0xac   :  { %1064 = vst [vmem:[#allocation3 + $0x178] sm:$0xf] %v1063_v8  ;;  %1066 = vst [vmem:[#allocation3 + $0x17c] sm:$0xff] %v1065_v9   ;;  %v1071_v11 = vld [vmem:[%s13680_s11 + $0x184] sm:$0xf]  ;;  %v1081_v16 = vld [vmem:[%s13680_s11 + $0x19c] sm:$0xff]  }
  0xad   :  { %1070 = vst [vmem:[#allocation3 + $0x184] sm:$0xf] %v1069_v10  ;;  %v1073_v12 = vld [vmem:[%s13680_s11 + $0x194] sm:$0xf]  ;;  %v1075_v13 = vld [vmem:[%s13680_s11 + $0x188] sm:$0xf] }
  0xae   :  { %1072 = vst [vmem:[#allocation3 + $0x188] sm:$0xf] %v1071_v11  ;;  %1074 = vst [vmem:[#allocation3 + $0x18c] sm:$0xf] %v1073_v12  ;;  %v1077_v14 = vld [vmem:[%s13680_s11 + $0x198] sm:$0xf] }
  0xaf   :  { %1076 = vst [vmem:[#allocation3 + $0x190] sm:$0xf] %v1075_v13  ;;  %v1079_v15 = vld [vmem:[%s13680_s11 + $0x18c] sm:$0xf]  ;;  %1078 = vst [vmem:[#allocation3 + $0x194] sm:$0xf] %v1077_v14 }
  0xb0   :  { %1080 = vst [vmem:[#allocation3 + $0x198] sm:$0xf] %v1079_v15  ;;  %1082 = vst [vmem:[#allocation3 + $0x19c] sm:$0xff] %v1081_v16   ;;  %v1085_v17 = vld [vmem:[%s13680_s11 + $0x1b0] sm:$0xf]  ;;  %v1097_v23 = vld [vmem:[%s13680_s11 + $0x1bc] sm:$0xff]  }
  0xb1   :  { %v1087_v18 = vld [vmem:[%s13680_s11 + $0x1a4] sm:$0xf]  ;;  %v1089_v19 = vld [vmem:[%s13680_s11 + $0x1b4] sm:$0xf]  ;;  %1086 = vst [vmem:[#allocation3 + $0x1a4] sm:$0xf] %v1085_v17 }
  0xb2   :  { %1088 = vst [vmem:[#allocation3 + $0x1a8] sm:$0xf] %v1087_v18  ;;  %1090 = vst [vmem:[#allocation3 + $0x1ac] sm:$0xf] %v1089_v19  ;;  %v1091_v20 = vld [vmem:[%s13680_s11 + $0x1a8] sm:$0xf] }
  0xb3   :  { %v1093_v21 = vld [vmem:[%s13680_s11 + $0x1b8] sm:$0xf]  ;;  %v1095_v22 = vld [vmem:[%s13680_s11 + $0x1ac] sm:$0xf]  ;;  %1092 = vst [vmem:[#allocation3 + $0x1b0] sm:$0xf] %v1091_v20 }
  0xb4   :  { %1094 = vst [vmem:[#allocation3 + $0x1b4] sm:$0xf] %v1093_v21  ;;  %1096 = vst [vmem:[#allocation3 + $0x1b8] sm:$0xf] %v1095_v22  ;;  %v1101_v24 = vld [vmem:[%s13680_s11 + $0x1d0] sm:$0xf] }
  0xb5   :  { %v1103_v25 = vld [vmem:[%s13680_s11 + $0x1c4] sm:$0xf]  ;;  %1098 = vst [vmem:[#allocation3 + $0x1bc] sm:$0xff] %v1097_v23   ;;  %1102 = vst [vmem:[#allocation3 + $0x1c4] sm:$0xf] %v1101_v24  ;;  %v1113_v30 = vld [vmem:[%s13680_s11 + $0x1dc] sm:$0xff]  }
  0xb6   :  { %1104 = vst [vmem:[#allocation3 + $0x1c8] sm:$0xf] %v1103_v25  ;;  %v1105_v26 = vld [vmem:[%s13680_s11 + $0x1d4] sm:$0xf]  ;;  %v1107_v27 = vld [vmem:[%s13680_s11 + $0x1c8] sm:$0xf] }
  0xb7   :  { %v1109_v28 = vld [vmem:[%s13680_s11 + $0x1d8] sm:$0xf]  ;;  %1106 = vst [vmem:[#allocation3 + $0x1cc] sm:$0xf] %v1105_v26  ;;  %1108 = vst [vmem:[#allocation3 + $0x1d0] sm:$0xf] %v1107_v27 }
  0xb8   :  { %1110 = vst [vmem:[#allocation3 + $0x1d4] sm:$0xf] %v1109_v28  ;;  %v1111_v29 = vld [vmem:[%s13680_s11 + $0x1cc] sm:$0xf]  ;;  %v1117_v31 = vld [vmem:[%s13680_s11 + $0x1f0] sm:$0xf] }
  0xb9   :  { %1112 = vst [vmem:[#allocation3 + $0x1d8] sm:$0xf] %v1111_v29  ;;  %1114 = vst [vmem:[#allocation3 + $0x1dc] sm:$0xff] %v1113_v30   ;;  %v1119_v32 = vld [vmem:[%s13680_s11 + $0x1e4] sm:$0xf]  ;;  %v1129_v37 = vld [vmem:[%s13680_s11 + $0x1fc] sm:$0xff]  }
  0xba   :  { %1118 = vst [vmem:[#allocation3 + $0x1e4] sm:$0xf] %v1117_v31  ;;  %v1121_v33 = vld [vmem:[%s13680_s11 + $0x1f4] sm:$0xf]  ;;  %v1123_v34 = vld [vmem:[%s13680_s11 + $0x1e8] sm:$0xf] }
  0xbb   :  { %1120 = vst [vmem:[#allocation3 + $0x1e8] sm:$0xf] %v1119_v32  ;;  %1122 = vst [vmem:[#allocation3 + $0x1ec] sm:$0xf] %v1121_v33  ;;  %v1125_v35 = vld [vmem:[%s13680_s11 + $0x1f8] sm:$0xf] }
  0xbc   :  { %1124 = vst [vmem:[#allocation3 + $0x1f0] sm:$0xf] %v1123_v34  ;;  %v1127_v36 = vld [vmem:[%s13680_s11 + $0x1ec] sm:$0xf]  ;;  %1126 = vst [vmem:[#allocation3 + $0x1f4] sm:$0xf] %v1125_v35 }
  0xbd   :  { %1128 = vst [vmem:[#allocation3 + $0x1f8] sm:$0xf] %v1127_v36  ;;  %1130 = vst [vmem:[#allocation3 + $0x1fc] sm:$0xff] %v1129_v37   ;;  %v1133_v38 = vld [vmem:[%s13680_s11 + $0x210] sm:$0xf]  ;;  %v1145_v44 = vld [vmem:[%s13680_s11 + $0x21c] sm:$0xff]  }
  0xbe   :  { %v1135_v39 = vld [vmem:[%s13680_s11 + $0x204] sm:$0xf]  ;;  %v1137_v40 = vld [vmem:[%s13680_s11 + $0x214] sm:$0xf]  ;;  %1134 = vst [vmem:[#allocation3 + $0x204] sm:$0xf] %v1133_v38 }
  0xbf   :  { %1136 = vst [vmem:[#allocation3 + $0x208] sm:$0xf] %v1135_v39  ;;  %1138 = vst [vmem:[#allocation3 + $0x20c] sm:$0xf] %v1137_v40  ;;  %v1139_v41 = vld [vmem:[%s13680_s11 + $0x208] sm:$0xf] }
  0xc0   :  { %v1141_v42 = vld [vmem:[%s13680_s11 + $0x218] sm:$0xf]  ;;  %v1143_v43 = vld [vmem:[%s13680_s11 + $0x20c] sm:$0xf]  ;;  %1140 = vst [vmem:[#allocation3 + $0x210] sm:$0xf] %v1139_v41 }
  0xc1   :  { %1142 = vst [vmem:[#allocation3 + $0x214] sm:$0xf] %v1141_v42  ;;  %1144 = vst [vmem:[#allocation3 + $0x218] sm:$0xf] %v1143_v43  ;;  %v1149_v45 = vld [vmem:[%s13680_s11 + $0x230] sm:$0xf] }
  0xc2   :  { %v1151_v46 = vld [vmem:[%s13680_s11 + $0x224] sm:$0xf]  ;;  %1146 = vst [vmem:[#allocation3 + $0x21c] sm:$0xff] %v1145_v44   ;;  %1150 = vst [vmem:[#allocation3 + $0x224] sm:$0xf] %v1149_v45  ;;  %v1161_v51 = vld [vmem:[%s13680_s11 + $0x23c] sm:$0xff]  }
  0xc3   :  { %1152 = vst [vmem:[#allocation3 + $0x228] sm:$0xf] %v1151_v46  ;;  %v1153_v47 = vld [vmem:[%s13680_s11 + $0x234] sm:$0xf]  ;;  %v1155_v48 = vld [vmem:[%s13680_s11 + $0x228] sm:$0xf] }
  0xc4   :  { %v1157_v49 = vld [vmem:[%s13680_s11 + $0x238] sm:$0xf]  ;;  %1154 = vst [vmem:[#allocation3 + $0x22c] sm:$0xf] %v1153_v47  ;;  %1156 = vst [vmem:[#allocation3 + $0x230] sm:$0xf] %v1155_v48 }
  0xc5   :  { %1158 = vst [vmem:[#allocation3 + $0x234] sm:$0xf] %v1157_v49  ;;  %v1159_v50 = vld [vmem:[%s13680_s11 + $0x22c] sm:$0xf]  ;;  %v1165_v52 = vld [vmem:[%s13680_s11 + $0x250] sm:$0xf] }
  0xc6   :  { %1160 = vst [vmem:[#allocation3 + $0x238] sm:$0xf] %v1159_v50  ;;  %1162 = vst [vmem:[#allocation3 + $0x23c] sm:$0xff] %v1161_v51   ;;  %v1167_v53 = vld [vmem:[%s13680_s11 + $0x244] sm:$0xf]  ;;  %v1177_v58 = vld [vmem:[%s13680_s11 + $0x25c] sm:$0xff]  }
  0xc7   :  { %1166 = vst [vmem:[#allocation3 + $0x244] sm:$0xf] %v1165_v52  ;;  %v1169_v54 = vld [vmem:[%s13680_s11 + $0x254] sm:$0xf]  ;;  %v1171_v55 = vld [vmem:[%s13680_s11 + $0x248] sm:$0xf] }
  0xc8   :  { %1168 = vst [vmem:[#allocation3 + $0x248] sm:$0xf] %v1167_v53  ;;  %1170 = vst [vmem:[#allocation3 + $0x24c] sm:$0xf] %v1169_v54  ;;  %v1173_v56 = vld [vmem:[%s13680_s11 + $0x258] sm:$0xf] }
  0xc9   :  { %1172 = vst [vmem:[#allocation3 + $0x250] sm:$0xf] %v1171_v55  ;;  %v1175_v57 = vld [vmem:[%s13680_s11 + $0x24c] sm:$0xf]  ;;  %1174 = vst [vmem:[#allocation3 + $0x254] sm:$0xf] %v1173_v56 }
  0xca   :  { %1176 = vst [vmem:[#allocation3 + $0x258] sm:$0xf] %v1175_v57  ;;  %1178 = vst [vmem:[#allocation3 + $0x25c] sm:$0xff] %v1177_v58   ;;  %v1181_v59 = vld [vmem:[%s13680_s11 + $0x270] sm:$0xf]  ;;  %v1193_v1 = vld [vmem:[%s13680_s11 + $0x27c] sm:$0xff]  }
  0xcb   :  { %v1183_v60 = vld [vmem:[%s13680_s11 + $0x264] sm:$0xf]  ;;  %v1185_v61 = vld [vmem:[%s13680_s11 + $0x274] sm:$0xf]  ;;  %1182 = vst [vmem:[#allocation3 + $0x264] sm:$0xf] %v1181_v59 }
  0xcc   :  { %1184 = vst [vmem:[#allocation3 + $0x268] sm:$0xf] %v1183_v60  ;;  %1186 = vst [vmem:[#allocation3 + $0x26c] sm:$0xf] %v1185_v61  ;;  %v1187_v62 = vld [vmem:[%s13680_s11 + $0x268] sm:$0xf] }
  0xcd   :  { %v1189_v63 = vld [vmem:[%s13680_s11 + $0x278] sm:$0xf]  ;;  %v1191_v0 = vld [vmem:[%s13680_s11 + $0x26c] sm:$0xf]  ;;  %1188 = vst [vmem:[#allocation3 + $0x270] sm:$0xf] %v1187_v62 }
  0xce   :  { %1190 = vst [vmem:[#allocation3 + $0x274] sm:$0xf] %v1189_v63  ;;  %1192 = vst [vmem:[#allocation3 + $0x278] sm:$0xf] %v1191_v0  ;;  %v1197_v2 = vld [vmem:[%s13680_s11 + $0x290] sm:$0xf] }
  0xcf   :  { %v1199_v3 = vld [vmem:[%s13680_s11 + $0x284] sm:$0xf]  ;;  %1194 = vst [vmem:[#allocation3 + $0x27c] sm:$0xff] %v1193_v1   ;;  %1198 = vst [vmem:[#allocation3 + $0x284] sm:$0xf] %v1197_v2  ;;  %v1209_v8 = vld [vmem:[%s13680_s11 + $0x29c] sm:$0xff]  }
  0xd0   :  { %1200 = vst [vmem:[#allocation3 + $0x288] sm:$0xf] %v1199_v3  ;;  %v1201_v4 = vld [vmem:[%s13680_s11 + $0x294] sm:$0xf]  ;;  %v1203_v5 = vld [vmem:[%s13680_s11 + $0x288] sm:$0xf] }
  0xd1   :  { %v1205_v6 = vld [vmem:[%s13680_s11 + $0x298] sm:$0xf]  ;;  %1202 = vst [vmem:[#allocation3 + $0x28c] sm:$0xf] %v1201_v4  ;;  %1204 = vst [vmem:[#allocation3 + $0x290] sm:$0xf] %v1203_v5 }
  0xd2   :  { %1206 = vst [vmem:[#allocation3 + $0x294] sm:$0xf] %v1205_v6  ;;  %v1207_v7 = vld [vmem:[%s13680_s11 + $0x28c] sm:$0xf]  ;;  %v1213_v9 = vld [vmem:[%s13680_s11 + $0x2b0] sm:$0xf] }
  0xd3   :  { %1208 = vst [vmem:[#allocation3 + $0x298] sm:$0xf] %v1207_v7  ;;  %1210 = vst [vmem:[#allocation3 + $0x29c] sm:$0xff] %v1209_v8   ;;  %v1215_v10 = vld [vmem:[%s13680_s11 + $0x2a4] sm:$0xf]  ;;  %v1225_v15 = vld [vmem:[%s13680_s11 + $0x2bc] sm:$0xff]  }
  0xd4   :  { %1214 = vst [vmem:[#allocation3 + $0x2a4] sm:$0xf] %v1213_v9  ;;  %v1217_v11 = vld [vmem:[%s13680_s11 + $0x2b4] sm:$0xf]  ;;  %v1219_v12 = vld [vmem:[%s13680_s11 + $0x2a8] sm:$0xf] }
  0xd5   :  { %1216 = vst [vmem:[#allocation3 + $0x2a8] sm:$0xf] %v1215_v10  ;;  %1218 = vst [vmem:[#allocation3 + $0x2ac] sm:$0xf] %v1217_v11  ;;  %v1221_v13 = vld [vmem:[%s13680_s11 + $0x2b8] sm:$0xf] }
  0xd6   :  { %1220 = vst [vmem:[#allocation3 + $0x2b0] sm:$0xf] %v1219_v12  ;;  %v1223_v14 = vld [vmem:[%s13680_s11 + $0x2ac] sm:$0xf]  ;;  %1222 = vst [vmem:[#allocation3 + $0x2b4] sm:$0xf] %v1221_v13 }
  0xd7   :  { %1224 = vst [vmem:[#allocation3 + $0x2b8] sm:$0xf] %v1223_v14  ;;  %1226 = vst [vmem:[#allocation3 + $0x2bc] sm:$0xff] %v1225_v15   ;;  %v1229_v16 = vld [vmem:[%s13680_s11 + $0x2d0] sm:$0xf]  ;;  %v1241_v22 = vld [vmem:[%s13680_s11 + $0x2dc] sm:$0xff]  }
  0xd8   :  { %v1231_v17 = vld [vmem:[%s13680_s11 + $0x2c4] sm:$0xf]  ;;  %v1233_v18 = vld [vmem:[%s13680_s11 + $0x2d4] sm:$0xf]  ;;  %1230 = vst [vmem:[#allocation3 + $0x2c4] sm:$0xf] %v1229_v16 }
  0xd9   :  { %1232 = vst [vmem:[#allocation3 + $0x2c8] sm:$0xf] %v1231_v17  ;;  %1234 = vst [vmem:[#allocation3 + $0x2cc] sm:$0xf] %v1233_v18  ;;  %v1235_v19 = vld [vmem:[%s13680_s11 + $0x2c8] sm:$0xf] }
  0xda   :  { %v1237_v20 = vld [vmem:[%s13680_s11 + $0x2d8] sm:$0xf]  ;;  %v1239_v21 = vld [vmem:[%s13680_s11 + $0x2cc] sm:$0xf]  ;;  %1236 = vst [vmem:[#allocation3 + $0x2d0] sm:$0xf] %v1235_v19 }
  0xdb   :  { %1238 = vst [vmem:[#allocation3 + $0x2d4] sm:$0xf] %v1237_v20  ;;  %1240 = vst [vmem:[#allocation3 + $0x2d8] sm:$0xf] %v1239_v21  ;;  %v1245_v23 = vld [vmem:[%s13680_s11 + $0x2f0] sm:$0xf] }
  0xdc   :  { %v1247_v24 = vld [vmem:[%s13680_s11 + $0x2e4] sm:$0xf]  ;;  %1242 = vst [vmem:[#allocation3 + $0x2dc] sm:$0xff] %v1241_v22   ;;  %1246 = vst [vmem:[#allocation3 + $0x2e4] sm:$0xf] %v1245_v23  ;;  %v1257_v29 = vld [vmem:[%s13680_s11 + $0x2fc] sm:$0xff]  }
  0xdd   :  { %1248 = vst [vmem:[#allocation3 + $0x2e8] sm:$0xf] %v1247_v24  ;;  %v1249_v25 = vld [vmem:[%s13680_s11 + $0x2f4] sm:$0xf]  ;;  %v1251_v26 = vld [vmem:[%s13680_s11 + $0x2e8] sm:$0xf] }
  0xde   :  { %v1253_v27 = vld [vmem:[%s13680_s11 + $0x2f8] sm:$0xf]  ;;  %1250 = vst [vmem:[#allocation3 + $0x2ec] sm:$0xf] %v1249_v25  ;;  %1252 = vst [vmem:[#allocation3 + $0x2f0] sm:$0xf] %v1251_v26 }
  0xdf   :  { %1254 = vst [vmem:[#allocation3 + $0x2f4] sm:$0xf] %v1253_v27  ;;  %v1255_v28 = vld [vmem:[%s13680_s11 + $0x2ec] sm:$0xf]  ;;  %v1261_v30 = vld [vmem:[%s13680_s11 + $0x310] sm:$0xf] }
  0xe0   :  { %1256 = vst [vmem:[#allocation3 + $0x2f8] sm:$0xf] %v1255_v28  ;;  %1258 = vst [vmem:[#allocation3 + $0x2fc] sm:$0xff] %v1257_v29   ;;  %v1263_v31 = vld [vmem:[%s13680_s11 + $0x304] sm:$0xf]  ;;  %v1273_v36 = vld [vmem:[%s13680_s11 + $0x31c] sm:$0xff]  }
  0xe1   :  { %1262 = vst [vmem:[#allocation3 + $0x304] sm:$0xf] %v1261_v30  ;;  %v1265_v32 = vld [vmem:[%s13680_s11 + $0x314] sm:$0xf]  ;;  %v1267_v33 = vld [vmem:[%s13680_s11 + $0x308] sm:$0xf] }
  0xe2   :  { %1264 = vst [vmem:[#allocation3 + $0x308] sm:$0xf] %v1263_v31  ;;  %1266 = vst [vmem:[#allocation3 + $0x30c] sm:$0xf] %v1265_v32  ;;  %v1269_v34 = vld [vmem:[%s13680_s11 + $0x318] sm:$0xf] }
  0xe3   :  { %1268 = vst [vmem:[#allocation3 + $0x310] sm:$0xf] %v1267_v33  ;;  %v1271_v35 = vld [vmem:[%s13680_s11 + $0x30c] sm:$0xf]  ;;  %1270 = vst [vmem:[#allocation3 + $0x314] sm:$0xf] %v1269_v34 }
  0xe4   :  { %1272 = vst [vmem:[#allocation3 + $0x318] sm:$0xf] %v1271_v35  ;;  %1274 = vst [vmem:[#allocation3 + $0x31c] sm:$0xff] %v1273_v36   ;;  %v1277_v37 = vld [vmem:[%s13680_s11 + $0x330] sm:$0xf]  ;;  %v1289_v43 = vld [vmem:[%s13680_s11 + $0x33c] sm:$0xff]  }
  0xe5   :  { %v1279_v38 = vld [vmem:[%s13680_s11 + $0x324] sm:$0xf]  ;;  %v1281_v39 = vld [vmem:[%s13680_s11 + $0x334] sm:$0xf]  ;;  %1278 = vst [vmem:[#allocation3 + $0x324] sm:$0xf] %v1277_v37 }
  0xe6   :  { %1280 = vst [vmem:[#allocation3 + $0x328] sm:$0xf] %v1279_v38  ;;  %1282 = vst [vmem:[#allocation3 + $0x32c] sm:$0xf] %v1281_v39  ;;  %v1283_v40 = vld [vmem:[%s13680_s11 + $0x328] sm:$0xf] }
  0xe7   :  { %v1285_v41 = vld [vmem:[%s13680_s11 + $0x338] sm:$0xf]  ;;  %v1287_v42 = vld [vmem:[%s13680_s11 + $0x32c] sm:$0xf]  ;;  %1284 = vst [vmem:[#allocation3 + $0x330] sm:$0xf] %v1283_v40 }
  0xe8   :  { %1286 = vst [vmem:[#allocation3 + $0x334] sm:$0xf] %v1285_v41  ;;  %1288 = vst [vmem:[#allocation3 + $0x338] sm:$0xf] %v1287_v42  ;;  %v1293_v44 = vld [vmem:[%s13680_s11 + $0x350] sm:$0xf] }
  0xe9   :  { %v1295_v45 = vld [vmem:[%s13680_s11 + $0x344] sm:$0xf]  ;;  %1290 = vst [vmem:[#allocation3 + $0x33c] sm:$0xff] %v1289_v43   ;;  %1294 = vst [vmem:[#allocation3 + $0x344] sm:$0xf] %v1293_v44  ;;  %v1305_v50 = vld [vmem:[%s13680_s11 + $0x35c] sm:$0xff]  }
  0xea   :  { %1296 = vst [vmem:[#allocation3 + $0x348] sm:$0xf] %v1295_v45  ;;  %v1297_v46 = vld [vmem:[%s13680_s11 + $0x354] sm:$0xf]  ;;  %v1299_v47 = vld [vmem:[%s13680_s11 + $0x348] sm:$0xf] }
  0xeb   :  { %v1301_v48 = vld [vmem:[%s13680_s11 + $0x358] sm:$0xf]  ;;  %1298 = vst [vmem:[#allocation3 + $0x34c] sm:$0xf] %v1297_v46  ;;  %1300 = vst [vmem:[#allocation3 + $0x350] sm:$0xf] %v1299_v47 }
  0xec   :  { %1302 = vst [vmem:[#allocation3 + $0x354] sm:$0xf] %v1301_v48  ;;  %v1303_v49 = vld [vmem:[%s13680_s11 + $0x34c] sm:$0xf]  ;;  %v1309_v51 = vld [vmem:[%s13680_s11 + $0x370] sm:$0xf] }
  0xed   :  { %1304 = vst [vmem:[#allocation3 + $0x358] sm:$0xf] %v1303_v49  ;;  %1306 = vst [vmem:[#allocation3 + $0x35c] sm:$0xff] %v1305_v50   ;;  %v1311_v52 = vld [vmem:[%s13680_s11 + $0x364] sm:$0xf]  ;;  %v1321_v57 = vld [vmem:[%s13680_s11 + $0x37c] sm:$0xff]  }
  0xee   :  { %1310 = vst [vmem:[#allocation3 + $0x364] sm:$0xf] %v1309_v51  ;;  %v1313_v53 = vld [vmem:[%s13680_s11 + $0x374] sm:$0xf]  ;;  %v1315_v54 = vld [vmem:[%s13680_s11 + $0x368] sm:$0xf] }
  0xef   :  { %1312 = vst [vmem:[#allocation3 + $0x368] sm:$0xf] %v1311_v52  ;;  %1314 = vst [vmem:[#allocation3 + $0x36c] sm:$0xf] %v1313_v53  ;;  %v1317_v55 = vld [vmem:[%s13680_s11 + $0x378] sm:$0xf] }
  0xf0   :  { %1316 = vst [vmem:[#allocation3 + $0x370] sm:$0xf] %v1315_v54  ;;  %v1319_v56 = vld [vmem:[%s13680_s11 + $0x36c] sm:$0xf]  ;;  %1318 = vst [vmem:[#allocation3 + $0x374] sm:$0xf] %v1317_v55 }
  0xf1   :  { %1320 = vst [vmem:[#allocation3 + $0x378] sm:$0xf] %v1319_v56  ;;  %1322 = vst [vmem:[#allocation3 + $0x37c] sm:$0xff] %v1321_v57   ;;  %v1325_v58 = vld [vmem:[%s13680_s11 + $0x390] sm:$0xf]  ;;  %v1337_v0 = vld [vmem:[%s13680_s11 + $0x39c] sm:$0xff]  }
  0xf2   :  { %v1327_v59 = vld [vmem:[%s13680_s11 + $0x384] sm:$0xf]  ;;  %v1329_v60 = vld [vmem:[%s13680_s11 + $0x394] sm:$0xf]  ;;  %1326 = vst [vmem:[#allocation3 + $0x384] sm:$0xf] %v1325_v58 }
  0xf3   :  { %1328 = vst [vmem:[#allocation3 + $0x388] sm:$0xf] %v1327_v59  ;;  %1330 = vst [vmem:[#allocation3 + $0x38c] sm:$0xf] %v1329_v60  ;;  %v1331_v61 = vld [vmem:[%s13680_s11 + $0x388] sm:$0xf] }
  0xf4   :  { %v1333_v62 = vld [vmem:[%s13680_s11 + $0x398] sm:$0xf]  ;;  %v1335_v63 = vld [vmem:[%s13680_s11 + $0x38c] sm:$0xf]  ;;  %1332 = vst [vmem:[#allocation3 + $0x390] sm:$0xf] %v1331_v61 }
  0xf5   :  { %1334 = vst [vmem:[#allocation3 + $0x394] sm:$0xf] %v1333_v62  ;;  %1336 = vst [vmem:[#allocation3 + $0x398] sm:$0xf] %v1335_v63  ;;  %v1341_v1 = vld [vmem:[%s13680_s11 + $0x3b0] sm:$0xf] }
  0xf6   :  { %v1343_v2 = vld [vmem:[%s13680_s11 + $0x3a4] sm:$0xf]  ;;  %1338 = vst [vmem:[#allocation3 + $0x39c] sm:$0xff] %v1337_v0   ;;  %1342 = vst [vmem:[#allocation3 + $0x3a4] sm:$0xf] %v1341_v1  ;;  %v1353_v7 = vld [vmem:[%s13680_s11 + $0x3bc] sm:$0xff]  }
  0xf7   :  { %1344 = vst [vmem:[#allocation3 + $0x3a8] sm:$0xf] %v1343_v2  ;;  %v1345_v3 = vld [vmem:[%s13680_s11 + $0x3b4] sm:$0xf]  ;;  %v1347_v4 = vld [vmem:[%s13680_s11 + $0x3a8] sm:$0xf] }
  0xf8   :  { %v1349_v5 = vld [vmem:[%s13680_s11 + $0x3b8] sm:$0xf]  ;;  %1346 = vst [vmem:[#allocation3 + $0x3ac] sm:$0xf] %v1345_v3  ;;  %1348 = vst [vmem:[#allocation3 + $0x3b0] sm:$0xf] %v1347_v4 }
  0xf9   :  { %1350 = vst [vmem:[#allocation3 + $0x3b4] sm:$0xf] %v1349_v5  ;;  %v1351_v6 = vld [vmem:[%s13680_s11 + $0x3ac] sm:$0xf]  ;;  %v1357_v8 = vld [vmem:[%s13680_s11 + $0x3d0] sm:$0xf] }
  0xfa   :  { %1352 = vst [vmem:[#allocation3 + $0x3b8] sm:$0xf] %v1351_v6  ;;  %1354 = vst [vmem:[#allocation3 + $0x3bc] sm:$0xff] %v1353_v7   ;;  %v1359_v9 = vld [vmem:[%s13680_s11 + $0x3c4] sm:$0xf]  ;;  %v1369_v14 = vld [vmem:[%s13680_s11 + $0x3dc] sm:$0xff]  }
  0xfb   :  { %1358 = vst [vmem:[#allocation3 + $0x3c4] sm:$0xf] %v1357_v8  ;;  %v1361_v10 = vld [vmem:[%s13680_s11 + $0x3d4] sm:$0xf]  ;;  %v1363_v11 = vld [vmem:[%s13680_s11 + $0x3c8] sm:$0xf] }
  0xfc   :  { %1360 = vst [vmem:[#allocation3 + $0x3c8] sm:$0xf] %v1359_v9  ;;  %1362 = vst [vmem:[#allocation3 + $0x3cc] sm:$0xf] %v1361_v10  ;;  %v1365_v12 = vld [vmem:[%s13680_s11 + $0x3d8] sm:$0xf] }
  0xfd   :  { %1364 = vst [vmem:[#allocation3 + $0x3d0] sm:$0xf] %v1363_v11  ;;  %v1367_v13 = vld [vmem:[%s13680_s11 + $0x3cc] sm:$0xf]  ;;  %1366 = vst [vmem:[#allocation3 + $0x3d4] sm:$0xf] %v1365_v12 }
  0xfe   :  { %1368 = vst [vmem:[#allocation3 + $0x3d8] sm:$0xf] %v1367_v13  ;;  %1370 = vst [vmem:[#allocation3 + $0x3dc] sm:$0xff] %v1369_v14   ;;  %v1373_v15 = vld [vmem:[%s13680_s11 + $0x3f0] sm:$0xf]  ;;  %v1385_v21 = vld [vmem:[%s13680_s11 + $0x3fc] sm:$0xff]  }
  0xff   :  { %v1375_v16 = vld [vmem:[%s13680_s11 + $0x3e4] sm:$0xf]  ;;  %v1377_v17 = vld [vmem:[%s13680_s11 + $0x3f4] sm:$0xf]  ;;  %1374 = vst [vmem:[#allocation3 + $0x3e4] sm:$0xf] %v1373_v15 }
 0x100   :  { %1376 = vst [vmem:[#allocation3 + $0x3e8] sm:$0xf] %v1375_v16  ;;  %1378 = vst [vmem:[#allocation3 + $0x3ec] sm:$0xf] %v1377_v17  ;;  %v1379_v18 = vld [vmem:[%s13680_s11 + $0x3e8] sm:$0xf] }
 0x101   :  { %v1381_v19 = vld [vmem:[%s13680_s11 + $0x3f8] sm:$0xf]  ;;  %v1383_v20 = vld [vmem:[%s13680_s11 + $0x3ec] sm:$0xf]  ;;  %1380 = vst [vmem:[#allocation3 + $0x3f0] sm:$0xf] %v1379_v18 }
 0x102   :  { %1382 = vst [vmem:[#allocation3 + $0x3f4] sm:$0xf] %v1381_v19  ;;  %1384 = vst [vmem:[#allocation3 + $0x3f8] sm:$0xf] %v1383_v20  ;;  %v1389_v22 = vld [vmem:[%s13680_s11 + $0x410] sm:$0xf] }
 0x103   :  { %v1391_v23 = vld [vmem:[%s13680_s11 + $0x404] sm:$0xf]  ;;  %1386 = vst [vmem:[#allocation3 + $0x3fc] sm:$0xff] %v1385_v21   ;;  %1390 = vst [vmem:[#allocation3 + $0x404] sm:$0xf] %v1389_v22  ;;  %v1401_v28 = vld [vmem:[%s13680_s11 + $0x41c] sm:$0xff]  }
 0x104   :  { %1392 = vst [vmem:[#allocation3 + $0x408] sm:$0xf] %v1391_v23  ;;  %v1393_v24 = vld [vmem:[%s13680_s11 + $0x414] sm:$0xf]  ;;  %v1395_v25 = vld [vmem:[%s13680_s11 + $0x408] sm:$0xf] }
 0x105   :  { %v1397_v26 = vld [vmem:[%s13680_s11 + $0x418] sm:$0xf]  ;;  %1394 = vst [vmem:[#allocation3 + $0x40c] sm:$0xf] %v1393_v24  ;;  %1396 = vst [vmem:[#allocation3 + $0x410] sm:$0xf] %v1395_v25 }
 0x106   :  { %1398 = vst [vmem:[#allocation3 + $0x414] sm:$0xf] %v1397_v26  ;;  %v1399_v27 = vld [vmem:[%s13680_s11 + $0x40c] sm:$0xf]  ;;  %v1405_v29 = vld [vmem:[%s13680_s11 + $0x430] sm:$0xf] }
 0x107   :  { %1400 = vst [vmem:[#allocation3 + $0x418] sm:$0xf] %v1399_v27  ;;  %1402 = vst [vmem:[#allocation3 + $0x41c] sm:$0xff] %v1401_v28   ;;  %v1407_v30 = vld [vmem:[%s13680_s11 + $0x424] sm:$0xf]  ;;  %v1417_v35 = vld [vmem:[%s13680_s11 + $0x43c] sm:$0xff]  }
 0x108   :  { %1406 = vst [vmem:[#allocation3 + $0x424] sm:$0xf] %v1405_v29  ;;  %v1409_v31 = vld [vmem:[%s13680_s11 + $0x434] sm:$0xf]  ;;  %v1411_v32 = vld [vmem:[%s13680_s11 + $0x428] sm:$0xf] }
 0x109   :  { %1408 = vst [vmem:[#allocation3 + $0x428] sm:$0xf] %v1407_v30  ;;  %1410 = vst [vmem:[#allocation3 + $0x42c] sm:$0xf] %v1409_v31  ;;  %v1413_v33 = vld [vmem:[%s13680_s11 + $0x438] sm:$0xf] }
 0x10a   :  { %1412 = vst [vmem:[#allocation3 + $0x430] sm:$0xf] %v1411_v32  ;;  %v1415_v34 = vld [vmem:[%s13680_s11 + $0x42c] sm:$0xf]  ;;  %1414 = vst [vmem:[#allocation3 + $0x434] sm:$0xf] %v1413_v33 }
 0x10b   :  { %1416 = vst [vmem:[#allocation3 + $0x438] sm:$0xf] %v1415_v34  ;;  %1418 = vst [vmem:[#allocation3 + $0x43c] sm:$0xff] %v1417_v35   ;;  %v1421_v36 = vld [vmem:[%s13680_s11 + $0x450] sm:$0xf]  ;;  %v1433_v42 = vld [vmem:[%s13680_s11 + $0x45c] sm:$0xff]  }
 0x10c   :  { %v1423_v37 = vld [vmem:[%s13680_s11 + $0x444] sm:$0xf]  ;;  %v1425_v38 = vld [vmem:[%s13680_s11 + $0x454] sm:$0xf]  ;;  %1422 = vst [vmem:[#allocation3 + $0x444] sm:$0xf] %v1421_v36 }
 0x10d   :  { %1424 = vst [vmem:[#allocation3 + $0x448] sm:$0xf] %v1423_v37  ;;  %1426 = vst [vmem:[#allocation3 + $0x44c] sm:$0xf] %v1425_v38  ;;  %v1427_v39 = vld [vmem:[%s13680_s11 + $0x448] sm:$0xf] }
 0x10e   :  { %v1429_v40 = vld [vmem:[%s13680_s11 + $0x458] sm:$0xf]  ;;  %v1431_v41 = vld [vmem:[%s13680_s11 + $0x44c] sm:$0xf]  ;;  %1428 = vst [vmem:[#allocation3 + $0x450] sm:$0xf] %v1427_v39 }
 0x10f   :  { %1430 = vst [vmem:[#allocation3 + $0x454] sm:$0xf] %v1429_v40  ;;  %1432 = vst [vmem:[#allocation3 + $0x458] sm:$0xf] %v1431_v41  ;;  %v1437_v43 = vld [vmem:[%s13680_s11 + $0x470] sm:$0xf] }
 0x110   :  { %v1439_v44 = vld [vmem:[%s13680_s11 + $0x464] sm:$0xf]  ;;  %1434 = vst [vmem:[#allocation3 + $0x45c] sm:$0xff] %v1433_v42   ;;  %1438 = vst [vmem:[#allocation3 + $0x464] sm:$0xf] %v1437_v43  ;;  %v1449_v49 = vld [vmem:[%s13680_s11 + $0x47c] sm:$0xff]  }
 0x111   :  { %1440 = vst [vmem:[#allocation3 + $0x468] sm:$0xf] %v1439_v44  ;;  %v1441_v45 = vld [vmem:[%s13680_s11 + $0x474] sm:$0xf]  ;;  %v1443_v46 = vld [vmem:[%s13680_s11 + $0x468] sm:$0xf] }
 0x112   :  { %v1445_v47 = vld [vmem:[%s13680_s11 + $0x478] sm:$0xf]  ;;  %1442 = vst [vmem:[#allocation3 + $0x46c] sm:$0xf] %v1441_v45  ;;  %1444 = vst [vmem:[#allocation3 + $0x470] sm:$0xf] %v1443_v46 }
 0x113   :  { %1446 = vst [vmem:[#allocation3 + $0x474] sm:$0xf] %v1445_v47  ;;  %v1447_v48 = vld [vmem:[%s13680_s11 + $0x46c] sm:$0xf]  ;;  %v1453_v50 = vld [vmem:[%s13680_s11 + $0x490] sm:$0xf] }
 0x114   :  { %1448 = vst [vmem:[#allocation3 + $0x478] sm:$0xf] %v1447_v48  ;;  %1450 = vst [vmem:[#allocation3 + $0x47c] sm:$0xff] %v1449_v49   ;;  %v1455_v51 = vld [vmem:[%s13680_s11 + $0x484] sm:$0xf]  ;;  %v1465_v56 = vld [vmem:[%s13680_s11 + $0x49c] sm:$0xff]  }
 0x115   :  { %1454 = vst [vmem:[#allocation3 + $0x484] sm:$0xf] %v1453_v50  ;;  %v1457_v52 = vld [vmem:[%s13680_s11 + $0x494] sm:$0xf]  ;;  %v1459_v53 = vld [vmem:[%s13680_s11 + $0x488] sm:$0xf] }
 0x116   :  { %1456 = vst [vmem:[#allocation3 + $0x488] sm:$0xf] %v1455_v51  ;;  %1458 = vst [vmem:[#allocation3 + $0x48c] sm:$0xf] %v1457_v52  ;;  %v1461_v54 = vld [vmem:[%s13680_s11 + $0x498] sm:$0xf] }
 0x117   :  { %1460 = vst [vmem:[#allocation3 + $0x490] sm:$0xf] %v1459_v53  ;;  %v1463_v55 = vld [vmem:[%s13680_s11 + $0x48c] sm:$0xf]  ;;  %1462 = vst [vmem:[#allocation3 + $0x494] sm:$0xf] %v1461_v54 }
 0x118   :  { %1464 = vst [vmem:[#allocation3 + $0x498] sm:$0xf] %v1463_v55  ;;  %1466 = vst [vmem:[#allocation3 + $0x49c] sm:$0xff] %v1465_v56   ;;  %v1469_v57 = vld [vmem:[%s13680_s11 + $0x4b0] sm:$0xf]  ;;  %v1481_v63 = vld [vmem:[%s13680_s11 + $0x4bc] sm:$0xff]  }
 0x119   :  { %v1471_v58 = vld [vmem:[%s13680_s11 + $0x4a4] sm:$0xf]  ;;  %v1473_v59 = vld [vmem:[%s13680_s11 + $0x4b4] sm:$0xf]  ;;  %1470 = vst [vmem:[#allocation3 + $0x4a4] sm:$0xf] %v1469_v57 }
 0x11a   :  { %1472 = vst [vmem:[#allocation3 + $0x4a8] sm:$0xf] %v1471_v58  ;;  %1474 = vst [vmem:[#allocation3 + $0x4ac] sm:$0xf] %v1473_v59  ;;  %v1475_v60 = vld [vmem:[%s13680_s11 + $0x4a8] sm:$0xf] }
 0x11b   :  { %v1477_v61 = vld [vmem:[%s13680_s11 + $0x4b8] sm:$0xf]  ;;  %v1479_v62 = vld [vmem:[%s13680_s11 + $0x4ac] sm:$0xf]  ;;  %1476 = vst [vmem:[#allocation3 + $0x4b0] sm:$0xf] %v1475_v60 }
 0x11c   :  { %1478 = vst [vmem:[#allocation3 + $0x4b4] sm:$0xf] %v1477_v61  ;;  %1480 = vst [vmem:[#allocation3 + $0x4b8] sm:$0xf] %v1479_v62  ;;  %v1485_v0 = vld [vmem:[%s13680_s11 + $0x4d0] sm:$0xf] }
 0x11d   :  { %v1487_v1 = vld [vmem:[%s13680_s11 + $0x4c4] sm:$0xf]  ;;  %1482 = vst [vmem:[#allocation3 + $0x4bc] sm:$0xff] %v1481_v63   ;;  %1486 = vst [vmem:[#allocation3 + $0x4c4] sm:$0xf] %v1485_v0  ;;  %v1497_v6 = vld [vmem:[%s13680_s11 + $0x4dc] sm:$0xff]  }
 0x11e   :  { %1488 = vst [vmem:[#allocation3 + $0x4c8] sm:$0xf] %v1487_v1  ;;  %v1489_v2 = vld [vmem:[%s13680_s11 + $0x4d4] sm:$0xf]  ;;  %v1491_v3 = vld [vmem:[%s13680_s11 + $0x4c8] sm:$0xf] }
 0x11f   :  { %v1493_v4 = vld [vmem:[%s13680_s11 + $0x4d8] sm:$0xf]  ;;  %1490 = vst [vmem:[#allocation3 + $0x4cc] sm:$0xf] %v1489_v2  ;;  %1492 = vst [vmem:[#allocation3 + $0x4d0] sm:$0xf] %v1491_v3 }
 0x120   :  { %1494 = vst [vmem:[#allocation3 + $0x4d4] sm:$0xf] %v1493_v4  ;;  %v1495_v5 = vld [vmem:[%s13680_s11 + $0x4cc] sm:$0xf]  ;;  %v1501_v7 = vld [vmem:[%s13680_s11 + $0x4f0] sm:$0xf] }
 0x121   :  { %1496 = vst [vmem:[#allocation3 + $0x4d8] sm:$0xf] %v1495_v5  ;;  %1498 = vst [vmem:[#allocation3 + $0x4dc] sm:$0xff] %v1497_v6   ;;  %v1503_v8 = vld [vmem:[%s13680_s11 + $0x4e4] sm:$0xf]  ;;  %v1513_v13 = vld [vmem:[%s13680_s11 + $0x4fc] sm:$0xff]  }
 0x122   :  { %1502 = vst [vmem:[#allocation3 + $0x4e4] sm:$0xf] %v1501_v7  ;;  %v1505_v9 = vld [vmem:[%s13680_s11 + $0x4f4] sm:$0xf]  ;;  %v1507_v10 = vld [vmem:[%s13680_s11 + $0x4e8] sm:$0xf] }
 0x123   :  { %1504 = vst [vmem:[#allocation3 + $0x4e8] sm:$0xf] %v1503_v8  ;;  %1506 = vst [vmem:[#allocation3 + $0x4ec] sm:$0xf] %v1505_v9  ;;  %v1509_v11 = vld [vmem:[%s13680_s11 + $0x4f8] sm:$0xf] }
 0x124   :  { %1508 = vst [vmem:[#allocation3 + $0x4f0] sm:$0xf] %v1507_v10  ;;  %v1511_v12 = vld [vmem:[%s13680_s11 + $0x4ec] sm:$0xf]  ;;  %1510 = vst [vmem:[#allocation3 + $0x4f4] sm:$0xf] %v1509_v11 }
 0x125   :  { %1512 = vst [vmem:[#allocation3 + $0x4f8] sm:$0xf] %v1511_v12  ;;  %1514 = vst [vmem:[#allocation3 + $0x4fc] sm:$0xff] %v1513_v13   ;;  %v1517_v14 = vld [vmem:[%s13680_s11 + $0x510] sm:$0xf]  ;;  %v1529_v20 = vld [vmem:[%s13680_s11 + $0x51c] sm:$0xff]  }
 0x126   :  { %v1519_v15 = vld [vmem:[%s13680_s11 + $0x504] sm:$0xf]  ;;  %v1521_v16 = vld [vmem:[%s13680_s11 + $0x514] sm:$0xf]  ;;  %1518 = vst [vmem:[#allocation3 + $0x504] sm:$0xf] %v1517_v14 }
 0x127   :  { %1520 = vst [vmem:[#allocation3 + $0x508] sm:$0xf] %v1519_v15  ;;  %1522 = vst [vmem:[#allocation3 + $0x50c] sm:$0xf] %v1521_v16  ;;  %v1523_v17 = vld [vmem:[%s13680_s11 + $0x508] sm:$0xf] }
 0x128   :  { %v1525_v18 = vld [vmem:[%s13680_s11 + $0x518] sm:$0xf]  ;;  %v1527_v19 = vld [vmem:[%s13680_s11 + $0x50c] sm:$0xf]  ;;  %1524 = vst [vmem:[#allocation3 + $0x510] sm:$0xf] %v1523_v17 }
 0x129   :  { %1526 = vst [vmem:[#allocation3 + $0x514] sm:$0xf] %v1525_v18  ;;  %1528 = vst [vmem:[#allocation3 + $0x518] sm:$0xf] %v1527_v19  ;;  %v1533_v21 = vld [vmem:[%s13680_s11 + $0x530] sm:$0xf] }
 0x12a   :  { %v1535_v22 = vld [vmem:[%s13680_s11 + $0x524] sm:$0xf]  ;;  %1530 = vst [vmem:[#allocation3 + $0x51c] sm:$0xff] %v1529_v20   ;;  %1534 = vst [vmem:[#allocation3 + $0x524] sm:$0xf] %v1533_v21  ;;  %v1545_v27 = vld [vmem:[%s13680_s11 + $0x53c] sm:$0xff]  }
 0x12b   :  { %1536 = vst [vmem:[#allocation3 + $0x528] sm:$0xf] %v1535_v22  ;;  %v1537_v23 = vld [vmem:[%s13680_s11 + $0x534] sm:$0xf]  ;;  %v1539_v24 = vld [vmem:[%s13680_s11 + $0x528] sm:$0xf] }
 0x12c   :  { %v1541_v25 = vld [vmem:[%s13680_s11 + $0x538] sm:$0xf]  ;;  %1538 = vst [vmem:[#allocation3 + $0x52c] sm:$0xf] %v1537_v23  ;;  %1540 = vst [vmem:[#allocation3 + $0x530] sm:$0xf] %v1539_v24 }
 0x12d   :  { %1542 = vst [vmem:[#allocation3 + $0x534] sm:$0xf] %v1541_v25  ;;  %v1543_v26 = vld [vmem:[%s13680_s11 + $0x52c] sm:$0xf]  ;;  %v1549_v28 = vld [vmem:[%s13680_s11 + $0x550] sm:$0xf] }
 0x12e   :  { %1544 = vst [vmem:[#allocation3 + $0x538] sm:$0xf] %v1543_v26  ;;  %1546 = vst [vmem:[#allocation3 + $0x53c] sm:$0xff] %v1545_v27   ;;  %v1551_v29 = vld [vmem:[%s13680_s11 + $0x544] sm:$0xf]  ;;  %v1561_v34 = vld [vmem:[%s13680_s11 + $0x55c] sm:$0xff]  }
 0x12f   :  { %1550 = vst [vmem:[#allocation3 + $0x544] sm:$0xf] %v1549_v28  ;;  %v1553_v30 = vld [vmem:[%s13680_s11 + $0x554] sm:$0xf]  ;;  %v1555_v31 = vld [vmem:[%s13680_s11 + $0x548] sm:$0xf] }
 0x130   :  { %1552 = vst [vmem:[#allocation3 + $0x548] sm:$0xf] %v1551_v29  ;;  %1554 = vst [vmem:[#allocation3 + $0x54c] sm:$0xf] %v1553_v30  ;;  %v1557_v32 = vld [vmem:[%s13680_s11 + $0x558] sm:$0xf] }
 0x131   :  { %1556 = vst [vmem:[#allocation3 + $0x550] sm:$0xf] %v1555_v31  ;;  %v1559_v33 = vld [vmem:[%s13680_s11 + $0x54c] sm:$0xf]  ;;  %1558 = vst [vmem:[#allocation3 + $0x554] sm:$0xf] %v1557_v32 }
 0x132   :  { %1560 = vst [vmem:[#allocation3 + $0x558] sm:$0xf] %v1559_v33  ;;  %1562 = vst [vmem:[#allocation3 + $0x55c] sm:$0xff] %v1561_v34   ;;  %v1565_v35 = vld [vmem:[%s13680_s11 + $0x570] sm:$0xf]  ;;  %v1577_v41 = vld [vmem:[%s13680_s11 + $0x57c] sm:$0xff]  }
 0x133   :  { %v1567_v36 = vld [vmem:[%s13680_s11 + $0x564] sm:$0xf]  ;;  %v1569_v37 = vld [vmem:[%s13680_s11 + $0x574] sm:$0xf]  ;;  %1566 = vst [vmem:[#allocation3 + $0x564] sm:$0xf] %v1565_v35 }
 0x134   :  { %1568 = vst [vmem:[#allocation3 + $0x568] sm:$0xf] %v1567_v36  ;;  %1570 = vst [vmem:[#allocation3 + $0x56c] sm:$0xf] %v1569_v37  ;;  %v1571_v38 = vld [vmem:[%s13680_s11 + $0x568] sm:$0xf] }
 0x135   :  { %v1573_v39 = vld [vmem:[%s13680_s11 + $0x578] sm:$0xf]  ;;  %v1575_v40 = vld [vmem:[%s13680_s11 + $0x56c] sm:$0xf]  ;;  %1572 = vst [vmem:[#allocation3 + $0x570] sm:$0xf] %v1571_v38 }
 0x136   :  { %1574 = vst [vmem:[#allocation3 + $0x574] sm:$0xf] %v1573_v39  ;;  %1576 = vst [vmem:[#allocation3 + $0x578] sm:$0xf] %v1575_v40  ;;  %v1581_v42 = vld [vmem:[%s13680_s11 + $0x590] sm:$0xf] }
 0x137   :  { %v1583_v43 = vld [vmem:[%s13680_s11 + $0x584] sm:$0xf]  ;;  %1578 = vst [vmem:[#allocation3 + $0x57c] sm:$0xff] %v1577_v41   ;;  %1582 = vst [vmem:[#allocation3 + $0x584] sm:$0xf] %v1581_v42  ;;  %v1593_v48 = vld [vmem:[%s13680_s11 + $0x59c] sm:$0xff]  }
 0x138   :  { %1584 = vst [vmem:[#allocation3 + $0x588] sm:$0xf] %v1583_v43  ;;  %v1585_v44 = vld [vmem:[%s13680_s11 + $0x594] sm:$0xf]  ;;  %v1587_v45 = vld [vmem:[%s13680_s11 + $0x588] sm:$0xf] }
 0x139   :  { %v1589_v46 = vld [vmem:[%s13680_s11 + $0x598] sm:$0xf]  ;;  %1586 = vst [vmem:[#allocation3 + $0x58c] sm:$0xf] %v1585_v44  ;;  %1588 = vst [vmem:[#allocation3 + $0x590] sm:$0xf] %v1587_v45 }
 0x13a   :  { %1590 = vst [vmem:[#allocation3 + $0x594] sm:$0xf] %v1589_v46  ;;  %v1591_v47 = vld [vmem:[%s13680_s11 + $0x58c] sm:$0xf]  ;;  %v1597_v49 = vld [vmem:[%s13680_s11 + $0x5b0] sm:$0xf] }
 0x13b   :  { %1592 = vst [vmem:[#allocation3 + $0x598] sm:$0xf] %v1591_v47  ;;  %1594 = vst [vmem:[#allocation3 + $0x59c] sm:$0xff] %v1593_v48   ;;  %v1599_v50 = vld [vmem:[%s13680_s11 + $0x5a4] sm:$0xf]  ;;  %v1609_v55 = vld [vmem:[%s13680_s11 + $0x5bc] sm:$0xff]  }
 0x13c   :  { %1598 = vst [vmem:[#allocation3 + $0x5a4] sm:$0xf] %v1597_v49  ;;  %v1601_v51 = vld [vmem:[%s13680_s11 + $0x5b4] sm:$0xf]  ;;  %v1603_v52 = vld [vmem:[%s13680_s11 + $0x5a8] sm:$0xf] }
 0x13d   :  { %1600 = vst [vmem:[#allocation3 + $0x5a8] sm:$0xf] %v1599_v50  ;;  %1602 = vst [vmem:[#allocation3 + $0x5ac] sm:$0xf] %v1601_v51  ;;  %v1605_v53 = vld [vmem:[%s13680_s11 + $0x5b8] sm:$0xf] }
 0x13e   :  { %1604 = vst [vmem:[#allocation3 + $0x5b0] sm:$0xf] %v1603_v52  ;;  %v1607_v54 = vld [vmem:[%s13680_s11 + $0x5ac] sm:$0xf]  ;;  %1606 = vst [vmem:[#allocation3 + $0x5b4] sm:$0xf] %v1605_v53 }
 0x13f   :  { %1608 = vst [vmem:[#allocation3 + $0x5b8] sm:$0xf] %v1607_v54  ;;  %1610 = vst [vmem:[#allocation3 + $0x5bc] sm:$0xff] %v1609_v55   ;;  %v1613_v56 = vld [vmem:[%s13680_s11 + $0x5d0] sm:$0xf]  ;;  %v1625_v62 = vld [vmem:[%s13680_s11 + $0x5dc] sm:$0xff]  }
 0x140   :  { %v1615_v57 = vld [vmem:[%s13680_s11 + $0x5c4] sm:$0xf]  ;;  %v1617_v58 = vld [vmem:[%s13680_s11 + $0x5d4] sm:$0xf]  ;;  %1614 = vst [vmem:[#allocation3 + $0x5c4] sm:$0xf] %v1613_v56 }
 0x141   :  { %1616 = vst [vmem:[#allocation3 + $0x5c8] sm:$0xf] %v1615_v57  ;;  %1618 = vst [vmem:[#allocation3 + $0x5cc] sm:$0xf] %v1617_v58  ;;  %v1619_v59 = vld [vmem:[%s13680_s11 + $0x5c8] sm:$0xf] }
 0x142   :  { %v1621_v60 = vld [vmem:[%s13680_s11 + $0x5d8] sm:$0xf]  ;;  %v1623_v61 = vld [vmem:[%s13680_s11 + $0x5cc] sm:$0xf]  ;;  %1620 = vst [vmem:[#allocation3 + $0x5d0] sm:$0xf] %v1619_v59 }
 0x143   :  { %1622 = vst [vmem:[#allocation3 + $0x5d4] sm:$0xf] %v1621_v60  ;;  %1624 = vst [vmem:[#allocation3 + $0x5d8] sm:$0xf] %v1623_v61  ;;  %v1629_v63 = vld [vmem:[%s13680_s11 + $0x5f0] sm:$0xf] }
 0x144   :  { %v1631_v0 = vld [vmem:[%s13680_s11 + $0x5e4] sm:$0xf]  ;;  %1626 = vst [vmem:[#allocation3 + $0x5dc] sm:$0xff] %v1625_v62   ;;  %1630 = vst [vmem:[#allocation3 + $0x5e4] sm:$0xf] %v1629_v63  ;;  %v1641_v5 = vld [vmem:[%s13680_s11 + $0x5fc] sm:$0xff]  }
 0x145   :  { %1632 = vst [vmem:[#allocation3 + $0x5e8] sm:$0xf] %v1631_v0  ;;  %v1633_v1 = vld [vmem:[%s13680_s11 + $0x5f4] sm:$0xf]  ;;  %v1635_v2 = vld [vmem:[%s13680_s11 + $0x5e8] sm:$0xf] }
 0x146   :  { %v1637_v3 = vld [vmem:[%s13680_s11 + $0x5f8] sm:$0xf]  ;;  %1634 = vst [vmem:[#allocation3 + $0x5ec] sm:$0xf] %v1633_v1  ;;  %1636 = vst [vmem:[#allocation3 + $0x5f0] sm:$0xf] %v1635_v2 }
 0x147   :  { %1638 = vst [vmem:[#allocation3 + $0x5f4] sm:$0xf] %v1637_v3  ;;  %v1639_v4 = vld [vmem:[%s13680_s11 + $0x5ec] sm:$0xf]  ;;  %v1645_v6 = vld [vmem:[%s13680_s11 + $0x610] sm:$0xf] }
 0x148   :  { %1640 = vst [vmem:[#allocation3 + $0x5f8] sm:$0xf] %v1639_v4  ;;  %1642 = vst [vmem:[#allocation3 + $0x5fc] sm:$0xff] %v1641_v5   ;;  %v1647_v7 = vld [vmem:[%s13680_s11 + $0x604] sm:$0xf]  ;;  %v1657_v12 = vld [vmem:[%s13680_s11 + $0x61c] sm:$0xff]  }
 0x149   :  { %1646 = vst [vmem:[#allocation3 + $0x604] sm:$0xf] %v1645_v6  ;;  %v1649_v8 = vld [vmem:[%s13680_s11 + $0x614] sm:$0xf]  ;;  %v1651_v9 = vld [vmem:[%s13680_s11 + $0x608] sm:$0xf] }
 0x14a   :  { %1648 = vst [vmem:[#allocation3 + $0x608] sm:$0xf] %v1647_v7  ;;  %1650 = vst [vmem:[#allocation3 + $0x60c] sm:$0xf] %v1649_v8  ;;  %v1653_v10 = vld [vmem:[%s13680_s11 + $0x618] sm:$0xf] }
 0x14b   :  { %1652 = vst [vmem:[#allocation3 + $0x610] sm:$0xf] %v1651_v9  ;;  %v1655_v11 = vld [vmem:[%s13680_s11 + $0x60c] sm:$0xf]  ;;  %1654 = vst [vmem:[#allocation3 + $0x614] sm:$0xf] %v1653_v10 }
 0x14c   :  { %1656 = vst [vmem:[#allocation3 + $0x618] sm:$0xf] %v1655_v11  ;;  %1658 = vst [vmem:[#allocation3 + $0x61c] sm:$0xff] %v1657_v12   ;;  %v1661_v13 = vld [vmem:[%s13680_s11 + $0x630] sm:$0xf]  ;;  %v1673_v19 = vld [vmem:[%s13680_s11 + $0x63c] sm:$0xff]  }
 0x14d   :  { %v1663_v14 = vld [vmem:[%s13680_s11 + $0x624] sm:$0xf]  ;;  %v1665_v15 = vld [vmem:[%s13680_s11 + $0x634] sm:$0xf]  ;;  %1662 = vst [vmem:[#allocation3 + $0x624] sm:$0xf] %v1661_v13 }
 0x14e   :  { %1664 = vst [vmem:[#allocation3 + $0x628] sm:$0xf] %v1663_v14  ;;  %1666 = vst [vmem:[#allocation3 + $0x62c] sm:$0xf] %v1665_v15  ;;  %v1667_v16 = vld [vmem:[%s13680_s11 + $0x628] sm:$0xf] }
 0x14f   :  { %v1669_v17 = vld [vmem:[%s13680_s11 + $0x638] sm:$0xf]  ;;  %v1671_v18 = vld [vmem:[%s13680_s11 + $0x62c] sm:$0xf]  ;;  %1668 = vst [vmem:[#allocation3 + $0x630] sm:$0xf] %v1667_v16 }
 0x150   :  { %1670 = vst [vmem:[#allocation3 + $0x634] sm:$0xf] %v1669_v17  ;;  %1672 = vst [vmem:[#allocation3 + $0x638] sm:$0xf] %v1671_v18  ;;  %v1677_v20 = vld [vmem:[%s13680_s11 + $0x650] sm:$0xf] }
 0x151   :  { %v1679_v21 = vld [vmem:[%s13680_s11 + $0x644] sm:$0xf]  ;;  %1674 = vst [vmem:[#allocation3 + $0x63c] sm:$0xff] %v1673_v19   ;;  %1678 = vst [vmem:[#allocation3 + $0x644] sm:$0xf] %v1677_v20  ;;  %v1689_v26 = vld [vmem:[%s13680_s11 + $0x65c] sm:$0xff]  }
 0x152   :  { %1680 = vst [vmem:[#allocation3 + $0x648] sm:$0xf] %v1679_v21  ;;  %v1681_v22 = vld [vmem:[%s13680_s11 + $0x654] sm:$0xf]  ;;  %v1683_v23 = vld [vmem:[%s13680_s11 + $0x648] sm:$0xf] }
 0x153   :  { %v1685_v24 = vld [vmem:[%s13680_s11 + $0x658] sm:$0xf]  ;;  %1682 = vst [vmem:[#allocation3 + $0x64c] sm:$0xf] %v1681_v22  ;;  %1684 = vst [vmem:[#allocation3 + $0x650] sm:$0xf] %v1683_v23 }
 0x154   :  { %1686 = vst [vmem:[#allocation3 + $0x654] sm:$0xf] %v1685_v24  ;;  %v1687_v25 = vld [vmem:[%s13680_s11 + $0x64c] sm:$0xf]  ;;  %v1693_v27 = vld [vmem:[%s13680_s11 + $0x670] sm:$0xf] }
 0x155   :  { %1688 = vst [vmem:[#allocation3 + $0x658] sm:$0xf] %v1687_v25  ;;  %1690 = vst [vmem:[#allocation3 + $0x65c] sm:$0xff] %v1689_v26   ;;  %v1695_v28 = vld [vmem:[%s13680_s11 + $0x664] sm:$0xf]  ;;  %v1705_v33 = vld [vmem:[%s13680_s11 + $0x67c] sm:$0xff]  }
 0x156   :  { %1694 = vst [vmem:[#allocation3 + $0x664] sm:$0xf] %v1693_v27  ;;  %v1697_v29 = vld [vmem:[%s13680_s11 + $0x674] sm:$0xf]  ;;  %v1699_v30 = vld [vmem:[%s13680_s11 + $0x668] sm:$0xf] }
 0x157   :  { %1696 = vst [vmem:[#allocation3 + $0x668] sm:$0xf] %v1695_v28  ;;  %1698 = vst [vmem:[#allocation3 + $0x66c] sm:$0xf] %v1697_v29  ;;  %v1701_v31 = vld [vmem:[%s13680_s11 + $0x678] sm:$0xf] }
 0x158   :  { %1700 = vst [vmem:[#allocation3 + $0x670] sm:$0xf] %v1699_v30  ;;  %v1703_v32 = vld [vmem:[%s13680_s11 + $0x66c] sm:$0xf]  ;;  %1702 = vst [vmem:[#allocation3 + $0x674] sm:$0xf] %v1701_v31 }
 0x159   :  { %1704 = vst [vmem:[#allocation3 + $0x678] sm:$0xf] %v1703_v32  ;;  %1706 = vst [vmem:[#allocation3 + $0x67c] sm:$0xff] %v1705_v33   ;;  %v1709_v34 = vld [vmem:[%s13680_s11 + $0x690] sm:$0xf]  ;;  %v1721_v40 = vld [vmem:[%s13680_s11 + $0x69c] sm:$0xff]  }
 0x15a   :  { %v1711_v35 = vld [vmem:[%s13680_s11 + $0x684] sm:$0xf]  ;;  %v1713_v36 = vld [vmem:[%s13680_s11 + $0x694] sm:$0xf]  ;;  %1710 = vst [vmem:[#allocation3 + $0x684] sm:$0xf] %v1709_v34 }
 0x15b   :  { %1712 = vst [vmem:[#allocation3 + $0x688] sm:$0xf] %v1711_v35  ;;  %1714 = vst [vmem:[#allocation3 + $0x68c] sm:$0xf] %v1713_v36  ;;  %v1715_v37 = vld [vmem:[%s13680_s11 + $0x688] sm:$0xf] }
 0x15c   :  { %v1717_v38 = vld [vmem:[%s13680_s11 + $0x698] sm:$0xf]  ;;  %v1719_v39 = vld [vmem:[%s13680_s11 + $0x68c] sm:$0xf]  ;;  %1716 = vst [vmem:[#allocation3 + $0x690] sm:$0xf] %v1715_v37 }
 0x15d   :  { %1718 = vst [vmem:[#allocation3 + $0x694] sm:$0xf] %v1717_v38  ;;  %1720 = vst [vmem:[#allocation3 + $0x698] sm:$0xf] %v1719_v39  ;;  %v1725_v41 = vld [vmem:[%s13680_s11 + $0x6b0] sm:$0xf] }
 0x15e   :  { %v1727_v42 = vld [vmem:[%s13680_s11 + $0x6a4] sm:$0xf]  ;;  %1722 = vst [vmem:[#allocation3 + $0x69c] sm:$0xff] %v1721_v40   ;;  %1726 = vst [vmem:[#allocation3 + $0x6a4] sm:$0xf] %v1725_v41  ;;  %v1737_v47 = vld [vmem:[%s13680_s11 + $0x6bc] sm:$0xff]  }
 0x15f   :  { %1728 = vst [vmem:[#allocation3 + $0x6a8] sm:$0xf] %v1727_v42  ;;  %v1729_v43 = vld [vmem:[%s13680_s11 + $0x6b4] sm:$0xf]  ;;  %v1731_v44 = vld [vmem:[%s13680_s11 + $0x6a8] sm:$0xf] }
 0x160   :  { %v1733_v45 = vld [vmem:[%s13680_s11 + $0x6b8] sm:$0xf]  ;;  %1730 = vst [vmem:[#allocation3 + $0x6ac] sm:$0xf] %v1729_v43  ;;  %1732 = vst [vmem:[#allocation3 + $0x6b0] sm:$0xf] %v1731_v44 }
 0x161   :  { %1734 = vst [vmem:[#allocation3 + $0x6b4] sm:$0xf] %v1733_v45  ;;  %v1735_v46 = vld [vmem:[%s13680_s11 + $0x6ac] sm:$0xf]  ;;  %v1741_v48 = vld [vmem:[%s13680_s11 + $0x6d0] sm:$0xf] }
 0x162   :  { %1736 = vst [vmem:[#allocation3 + $0x6b8] sm:$0xf] %v1735_v46  ;;  %1738 = vst [vmem:[#allocation3 + $0x6bc] sm:$0xff] %v1737_v47   ;;  %v1743_v49 = vld [vmem:[%s13680_s11 + $0x6c4] sm:$0xf]  ;;  %v1753_v54 = vld [vmem:[%s13680_s11 + $0x6dc] sm:$0xff]  }
 0x163   :  { %1742 = vst [vmem:[#allocation3 + $0x6c4] sm:$0xf] %v1741_v48  ;;  %v1745_v50 = vld [vmem:[%s13680_s11 + $0x6d4] sm:$0xf]  ;;  %v1747_v51 = vld [vmem:[%s13680_s11 + $0x6c8] sm:$0xf] }
 0x164   :  { %1744 = vst [vmem:[#allocation3 + $0x6c8] sm:$0xf] %v1743_v49  ;;  %1746 = vst [vmem:[#allocation3 + $0x6cc] sm:$0xf] %v1745_v50  ;;  %v1749_v52 = vld [vmem:[%s13680_s11 + $0x6d8] sm:$0xf] }
 0x165   :  { %1748 = vst [vmem:[#allocation3 + $0x6d0] sm:$0xf] %v1747_v51  ;;  %v1751_v53 = vld [vmem:[%s13680_s11 + $0x6cc] sm:$0xf]  ;;  %1750 = vst [vmem:[#allocation3 + $0x6d4] sm:$0xf] %v1749_v52 }
 0x166   :  { %1752 = vst [vmem:[#allocation3 + $0x6d8] sm:$0xf] %v1751_v53  ;;  %1754 = vst [vmem:[#allocation3 + $0x6dc] sm:$0xff] %v1753_v54   ;;  %v1757_v55 = vld [vmem:[%s13680_s11 + $0x6f0] sm:$0xf]  ;;  %v1769_v61 = vld [vmem:[%s13680_s11 + $0x6fc] sm:$0xff]  }
 0x167   :  { %v1759_v56 = vld [vmem:[%s13680_s11 + $0x6e4] sm:$0xf]  ;;  %v1761_v57 = vld [vmem:[%s13680_s11 + $0x6f4] sm:$0xf]  ;;  %1758 = vst [vmem:[#allocation3 + $0x6e4] sm:$0xf] %v1757_v55 }
 0x168   :  { %1760 = vst [vmem:[#allocation3 + $0x6e8] sm:$0xf] %v1759_v56  ;;  %1762 = vst [vmem:[#allocation3 + $0x6ec] sm:$0xf] %v1761_v57  ;;  %v1763_v58 = vld [vmem:[%s13680_s11 + $0x6e8] sm:$0xf] }
 0x169   :  { %v1765_v59 = vld [vmem:[%s13680_s11 + $0x6f8] sm:$0xf]  ;;  %v1767_v60 = vld [vmem:[%s13680_s11 + $0x6ec] sm:$0xf]  ;;  %1764 = vst [vmem:[#allocation3 + $0x6f0] sm:$0xf] %v1763_v58 }
 0x16a   :  { %1766 = vst [vmem:[#allocation3 + $0x6f4] sm:$0xf] %v1765_v59  ;;  %1768 = vst [vmem:[#allocation3 + $0x6f8] sm:$0xf] %v1767_v60  ;;  %v1773_v62 = vld [vmem:[%s13680_s11 + $0x710] sm:$0xf] }
 0x16b   :  { %v1775_v63 = vld [vmem:[%s13680_s11 + $0x704] sm:$0xf]  ;;  %1770 = vst [vmem:[#allocation3 + $0x6fc] sm:$0xff] %v1769_v61   ;;  %1774 = vst [vmem:[#allocation3 + $0x704] sm:$0xf] %v1773_v62  ;;  %v1785_v4 = vld [vmem:[%s13680_s11 + $0x71c] sm:$0xff]  }
 0x16c   :  { %1776 = vst [vmem:[#allocation3 + $0x708] sm:$0xf] %v1775_v63  ;;  %v1777_v0 = vld [vmem:[%s13680_s11 + $0x714] sm:$0xf]  ;;  %v1779_v1 = vld [vmem:[%s13680_s11 + $0x708] sm:$0xf] }
 0x16d   :  { %v1781_v2 = vld [vmem:[%s13680_s11 + $0x718] sm:$0xf]  ;;  %1778 = vst [vmem:[#allocation3 + $0x70c] sm:$0xf] %v1777_v0  ;;  %1780 = vst [vmem:[#allocation3 + $0x710] sm:$0xf] %v1779_v1 }
 0x16e   :  { %1782 = vst [vmem:[#allocation3 + $0x714] sm:$0xf] %v1781_v2  ;;  %v1783_v3 = vld [vmem:[%s13680_s11 + $0x70c] sm:$0xf]  ;;  %v1789_v5 = vld [vmem:[%s13680_s11 + $0x730] sm:$0xf] }
 0x16f   :  { %1784 = vst [vmem:[#allocation3 + $0x718] sm:$0xf] %v1783_v3  ;;  %1786 = vst [vmem:[#allocation3 + $0x71c] sm:$0xff] %v1785_v4   ;;  %v1791_v6 = vld [vmem:[%s13680_s11 + $0x724] sm:$0xf]  ;;  %v1801_v11 = vld [vmem:[%s13680_s11 + $0x73c] sm:$0xff]  }
 0x170   :  { %1790 = vst [vmem:[#allocation3 + $0x724] sm:$0xf] %v1789_v5  ;;  %v1793_v7 = vld [vmem:[%s13680_s11 + $0x734] sm:$0xf]  ;;  %v1795_v8 = vld [vmem:[%s13680_s11 + $0x728] sm:$0xf] }
 0x171   :  { %1792 = vst [vmem:[#allocation3 + $0x728] sm:$0xf] %v1791_v6  ;;  %1794 = vst [vmem:[#allocation3 + $0x72c] sm:$0xf] %v1793_v7  ;;  %v1797_v9 = vld [vmem:[%s13680_s11 + $0x738] sm:$0xf] }
 0x172   :  { %1796 = vst [vmem:[#allocation3 + $0x730] sm:$0xf] %v1795_v8  ;;  %v1799_v10 = vld [vmem:[%s13680_s11 + $0x72c] sm:$0xf]  ;;  %1798 = vst [vmem:[#allocation3 + $0x734] sm:$0xf] %v1797_v9 }
 0x173   :  { %1800 = vst [vmem:[#allocation3 + $0x738] sm:$0xf] %v1799_v10  ;;  %1802 = vst [vmem:[#allocation3 + $0x73c] sm:$0xff] %v1801_v11   ;;  %v1805_v12 = vld [vmem:[%s13680_s11 + $0x750] sm:$0xf]  ;;  %v1817_v18 = vld [vmem:[%s13680_s11 + $0x75c] sm:$0xff]  }
 0x174   :  { %v1807_v13 = vld [vmem:[%s13680_s11 + $0x744] sm:$0xf]  ;;  %v1809_v14 = vld [vmem:[%s13680_s11 + $0x754] sm:$0xf]  ;;  %1806 = vst [vmem:[#allocation3 + $0x744] sm:$0xf] %v1805_v12 }
 0x175   :  { %1808 = vst [vmem:[#allocation3 + $0x748] sm:$0xf] %v1807_v13  ;;  %1810 = vst [vmem:[#allocation3 + $0x74c] sm:$0xf] %v1809_v14  ;;  %v1811_v15 = vld [vmem:[%s13680_s11 + $0x748] sm:$0xf] }
 0x176   :  { %v1813_v16 = vld [vmem:[%s13680_s11 + $0x758] sm:$0xf]  ;;  %v1815_v17 = vld [vmem:[%s13680_s11 + $0x74c] sm:$0xf]  ;;  %1812 = vst [vmem:[#allocation3 + $0x750] sm:$0xf] %v1811_v15 }
 0x177   :  { %1814 = vst [vmem:[#allocation3 + $0x754] sm:$0xf] %v1813_v16  ;;  %1816 = vst [vmem:[#allocation3 + $0x758] sm:$0xf] %v1815_v17  ;;  %v1821_v19 = vld [vmem:[%s13680_s11 + $0x770] sm:$0xf] }
 0x178   :  { %v1823_v20 = vld [vmem:[%s13680_s11 + $0x764] sm:$0xf]  ;;  %1818 = vst [vmem:[#allocation3 + $0x75c] sm:$0xff] %v1817_v18   ;;  %1822 = vst [vmem:[#allocation3 + $0x764] sm:$0xf] %v1821_v19  ;;  %v1833_v25 = vld [vmem:[%s13680_s11 + $0x77c] sm:$0xff]  }
 0x179   :  { %1824 = vst [vmem:[#allocation3 + $0x768] sm:$0xf] %v1823_v20  ;;  %v1825_v21 = vld [vmem:[%s13680_s11 + $0x774] sm:$0xf]  ;;  %v1827_v22 = vld [vmem:[%s13680_s11 + $0x768] sm:$0xf] }
 0x17a   :  { %v1829_v23 = vld [vmem:[%s13680_s11 + $0x778] sm:$0xf]  ;;  %1826 = vst [vmem:[#allocation3 + $0x76c] sm:$0xf] %v1825_v21  ;;  %1828 = vst [vmem:[#allocation3 + $0x770] sm:$0xf] %v1827_v22 }
 0x17b   :  { %1830 = vst [vmem:[#allocation3 + $0x774] sm:$0xf] %v1829_v23  ;;  %v1831_v24 = vld [vmem:[%s13680_s11 + $0x76c] sm:$0xf]  ;;  %v1837_v26 = vld [vmem:[%s13680_s11 + $0x790] sm:$0xf] }
 0x17c   :  { %1832 = vst [vmem:[#allocation3 + $0x778] sm:$0xf] %v1831_v24  ;;  %1834 = vst [vmem:[#allocation3 + $0x77c] sm:$0xff] %v1833_v25   ;;  %v1839_v27 = vld [vmem:[%s13680_s11 + $0x784] sm:$0xf]  ;;  %v1849_v32 = vld [vmem:[%s13680_s11 + $0x79c] sm:$0xff]  }
 0x17d   :  { %1838 = vst [vmem:[#allocation3 + $0x784] sm:$0xf] %v1837_v26  ;;  %v1841_v28 = vld [vmem:[%s13680_s11 + $0x794] sm:$0xf]  ;;  %v1843_v29 = vld [vmem:[%s13680_s11 + $0x788] sm:$0xf] }
 0x17e   :  { %1840 = vst [vmem:[#allocation3 + $0x788] sm:$0xf] %v1839_v27  ;;  %1842 = vst [vmem:[#allocation3 + $0x78c] sm:$0xf] %v1841_v28  ;;  %v1845_v30 = vld [vmem:[%s13680_s11 + $0x798] sm:$0xf] }
 0x17f   :  { %1844 = vst [vmem:[#allocation3 + $0x790] sm:$0xf] %v1843_v29  ;;  %v1847_v31 = vld [vmem:[%s13680_s11 + $0x78c] sm:$0xf]  ;;  %1846 = vst [vmem:[#allocation3 + $0x794] sm:$0xf] %v1845_v30 }
 0x180   :  { %1848 = vst [vmem:[#allocation3 + $0x798] sm:$0xf] %v1847_v31  ;;  %1850 = vst [vmem:[#allocation3 + $0x79c] sm:$0xff] %v1849_v32   ;;  %v1853_v33 = vld [vmem:[%s13680_s11 + $0x7b0] sm:$0xf]  ;;  %v1865_v39 = vld [vmem:[%s13680_s11 + $0x7bc] sm:$0xff]  }
 0x181   :  { %v1855_v34 = vld [vmem:[%s13680_s11 + $0x7a4] sm:$0xf]  ;;  %v1857_v35 = vld [vmem:[%s13680_s11 + $0x7b4] sm:$0xf]  ;;  %1854 = vst [vmem:[#allocation3 + $0x7a4] sm:$0xf] %v1853_v33 }
 0x182   :  { %1856 = vst [vmem:[#allocation3 + $0x7a8] sm:$0xf] %v1855_v34  ;;  %1858 = vst [vmem:[#allocation3 + $0x7ac] sm:$0xf] %v1857_v35  ;;  %v1859_v36 = vld [vmem:[%s13680_s11 + $0x7a8] sm:$0xf] }
 0x183   :  { %v1861_v37 = vld [vmem:[%s13680_s11 + $0x7b8] sm:$0xf]  ;;  %v1863_v38 = vld [vmem:[%s13680_s11 + $0x7ac] sm:$0xf]  ;;  %1860 = vst [vmem:[#allocation3 + $0x7b0] sm:$0xf] %v1859_v36 }
 0x184   :  { %1862 = vst [vmem:[#allocation3 + $0x7b4] sm:$0xf] %v1861_v37  ;;  %1864 = vst [vmem:[#allocation3 + $0x7b8] sm:$0xf] %v1863_v38  ;;  %v1869_v40 = vld [vmem:[%s13680_s11 + $0x7d0] sm:$0xf] }
 0x185   :  { %v1871_v41 = vld [vmem:[%s13680_s11 + $0x7c4] sm:$0xf]  ;;  %1866 = vst [vmem:[#allocation3 + $0x7bc] sm:$0xff] %v1865_v39   ;;  %1870 = vst [vmem:[#allocation3 + $0x7c4] sm:$0xf] %v1869_v40  ;;  %v1881_v46 = vld [vmem:[%s13680_s11 + $0x7dc] sm:$0xff]  }
 0x186   :  { %1872 = vst [vmem:[#allocation3 + $0x7c8] sm:$0xf] %v1871_v41  ;;  %v1873_v42 = vld [vmem:[%s13680_s11 + $0x7d4] sm:$0xf]  ;;  %v1875_v43 = vld [vmem:[%s13680_s11 + $0x7c8] sm:$0xf] }
 0x187   :  { %v1877_v44 = vld [vmem:[%s13680_s11 + $0x7d8] sm:$0xf]  ;;  %1874 = vst [vmem:[#allocation3 + $0x7cc] sm:$0xf] %v1873_v42  ;;  %1876 = vst [vmem:[#allocation3 + $0x7d0] sm:$0xf] %v1875_v43 }
 0x188   :  { %1878 = vst [vmem:[#allocation3 + $0x7d4] sm:$0xf] %v1877_v44  ;;  %v1879_v45 = vld [vmem:[%s13680_s11 + $0x7cc] sm:$0xf]  ;;  %v1885_v47 = vld [vmem:[%s13680_s11 + $0x7f0] sm:$0xf] }
 0x189   :  { %1880 = vst [vmem:[#allocation3 + $0x7d8] sm:$0xf] %v1879_v45  ;;  %1882 = vst [vmem:[#allocation3 + $0x7dc] sm:$0xff] %v1881_v46   ;;  %v1887_v48 = vld [vmem:[%s13680_s11 + $0x7e4] sm:$0xf] }
 0x18a   :  { %1886 = vst [vmem:[#allocation3 + $0x7e4] sm:$0xf] %v1885_v47  ;;  %v1889_v49 = vld [vmem:[%s13680_s11 + $0x7f4] sm:$0xf]  ;;  %v1891_v50 = vld [vmem:[%s13680_s11 + $0x7e8] sm:$0xf] }
 0x18b   :  { %1888 = vst [vmem:[#allocation3 + $0x7e8] sm:$0xf] %v1887_v48  ;;  %1890 = vst [vmem:[#allocation3 + $0x7ec] sm:$0xf] %v1889_v49  ;;  %v1893_v51 = vld [vmem:[%s13680_s11 + $0x7f8] sm:$0xf] }
 0x18c   :  { %1892 = vst [vmem:[#allocation3 + $0x7f0] sm:$0xf] %v1891_v50  ;;  %v1895_v52 = vld [vmem:[%s13680_s11 + $0x7ec] sm:$0xf]  ;;  %v1897_v53 = vld [vmem:[%s13680_s11 + $0x7fc] sm:$0xf] }
 0x18d   :  { %1894 = vst [vmem:[#allocation3 + $0x7f4] sm:$0xf] %v1893_v51  ;;  %1896 = vst [vmem:[#allocation3 + $0x7f8] sm:$0xf] %v1895_v52 }
 0x18e   :  { %1898 = vst [vmem:[#allocation3 + $0x7fc] sm:$0xf] %v1897_v53 }
 0x18f   :  { %5034 = vsyncadd [#allocation6 + $0x1], 32768  ;;  %v5053_v54 = vld [vmem:[%s13681_s12] sm:$0xf]  ;;  %v5055_v55 = vld [vmem:[%s13681_s12 + $0x10] sm:$0xf] }
 0x190   :  { %5054 = vst [vmem:[#allocation4] sm:$0xf] %v5053_v54  ;;  %5056 = vst [vmem:[#allocation4 + $0x4] sm:$0xf] %v5055_v55  ;;  %v5057_v56 = vld [vmem:[%s13681_s12 + $0x4] sm:$0xf] }
 0x191   :  { %v5059_v57 = vld [vmem:[%s13681_s12 + $0x14] sm:$0xf]  ;;  %v5061_v58 = vld [vmem:[%s13681_s12 + $0x8] sm:$0xf]  ;;  %5058 = vst [vmem:[#allocation4 + $0x8] sm:$0xf] %v5057_v56 }
 0x192   :  { %5060 = vst [vmem:[#allocation4 + $0xc] sm:$0xf] %v5059_v57  ;;  %5062 = vst [vmem:[#allocation4 + $0x10] sm:$0xf] %v5061_v58  ;;  %v5063_v59 = vld [vmem:[%s13681_s12 + $0x18] sm:$0xf] }
 0x193   :  { %v5065_v60 = vld [vmem:[%s13681_s12 + $0xc] sm:$0xf]  ;;  %v5067_v61 = vld [vmem:[%s13681_s12 + $0x1c] sm:$0xff]   ;;  %5064 = vst [vmem:[#allocation4 + $0x14] sm:$0xf] %v5063_v59 }
 0x194   :  { %5066 = vst [vmem:[#allocation4 + $0x18] sm:$0xf] %v5065_v60  ;;  %5068 = vst [vmem:[#allocation4 + $0x1c] sm:$0xff] %v5067_v61   ;;  %v5071_v62 = vld [vmem:[%s13681_s12 + $0x30] sm:$0xf]  ;;  %v5083_v4 = vld [vmem:[%s13681_s12 + $0x3c] sm:$0xff]  }
 0x195   :  { %v5073_v63 = vld [vmem:[%s13681_s12 + $0x24] sm:$0xf]  ;;  %v5075_v0 = vld [vmem:[%s13681_s12 + $0x34] sm:$0xf]  ;;  %5072 = vst [vmem:[#allocation4 + $0x24] sm:$0xf] %v5071_v62 }
 0x196   :  { %5074 = vst [vmem:[#allocation4 + $0x28] sm:$0xf] %v5073_v63  ;;  %5076 = vst [vmem:[#allocation4 + $0x2c] sm:$0xf] %v5075_v0  ;;  %v5077_v1 = vld [vmem:[%s13681_s12 + $0x28] sm:$0xf] }
 0x197   :  { %v5079_v2 = vld [vmem:[%s13681_s12 + $0x38] sm:$0xf]  ;;  %v5081_v3 = vld [vmem:[%s13681_s12 + $0x2c] sm:$0xf]  ;;  %5078 = vst [vmem:[#allocation4 + $0x30] sm:$0xf] %v5077_v1 }
 0x198   :  { %5080 = vst [vmem:[#allocation4 + $0x34] sm:$0xf] %v5079_v2  ;;  %5082 = vst [vmem:[#allocation4 + $0x38] sm:$0xf] %v5081_v3  ;;  %v5087_v5 = vld [vmem:[%s13681_s12 + $0x50] sm:$0xf] }
 0x199   :  { %v5089_v6 = vld [vmem:[%s13681_s12 + $0x44] sm:$0xf]  ;;  %5084 = vst [vmem:[#allocation4 + $0x3c] sm:$0xff] %v5083_v4   ;;  %5088 = vst [vmem:[#allocation4 + $0x44] sm:$0xf] %v5087_v5  ;;  %v5099_v11 = vld [vmem:[%s13681_s12 + $0x5c] sm:$0xff]  }
 0x19a   :  { %5090 = vst [vmem:[#allocation4 + $0x48] sm:$0xf] %v5089_v6  ;;  %v5091_v7 = vld [vmem:[%s13681_s12 + $0x54] sm:$0xf]  ;;  %v5093_v8 = vld [vmem:[%s13681_s12 + $0x48] sm:$0xf] }
 0x19b   :  { %v5095_v9 = vld [vmem:[%s13681_s12 + $0x58] sm:$0xf]  ;;  %5092 = vst [vmem:[#allocation4 + $0x4c] sm:$0xf] %v5091_v7  ;;  %5094 = vst [vmem:[#allocation4 + $0x50] sm:$0xf] %v5093_v8 }
 0x19c   :  { %5096 = vst [vmem:[#allocation4 + $0x54] sm:$0xf] %v5095_v9  ;;  %v5097_v10 = vld [vmem:[%s13681_s12 + $0x4c] sm:$0xf]  ;;  %v5103_v12 = vld [vmem:[%s13681_s12 + $0x70] sm:$0xf] }
 0x19d   :  { %5098 = vst [vmem:[#allocation4 + $0x58] sm:$0xf] %v5097_v10  ;;  %5100 = vst [vmem:[#allocation4 + $0x5c] sm:$0xff] %v5099_v11   ;;  %v5105_v13 = vld [vmem:[%s13681_s12 + $0x64] sm:$0xf]  ;;  %v5115_v18 = vld [vmem:[%s13681_s12 + $0x7c] sm:$0xff]  }
 0x19e   :  { %5104 = vst [vmem:[#allocation4 + $0x64] sm:$0xf] %v5103_v12  ;;  %v5107_v14 = vld [vmem:[%s13681_s12 + $0x74] sm:$0xf]  ;;  %v5109_v15 = vld [vmem:[%s13681_s12 + $0x68] sm:$0xf] }
 0x19f   :  { %5106 = vst [vmem:[#allocation4 + $0x68] sm:$0xf] %v5105_v13  ;;  %5108 = vst [vmem:[#allocation4 + $0x6c] sm:$0xf] %v5107_v14  ;;  %v5111_v16 = vld [vmem:[%s13681_s12 + $0x78] sm:$0xf] }
 0x1a0   :  { %5110 = vst [vmem:[#allocation4 + $0x70] sm:$0xf] %v5109_v15  ;;  %v5113_v17 = vld [vmem:[%s13681_s12 + $0x6c] sm:$0xf]  ;;  %5112 = vst [vmem:[#allocation4 + $0x74] sm:$0xf] %v5111_v16 }
 0x1a1   :  { %5114 = vst [vmem:[#allocation4 + $0x78] sm:$0xf] %v5113_v17  ;;  %5116 = vst [vmem:[#allocation4 + $0x7c] sm:$0xff] %v5115_v18   ;;  %v5119_v19 = vld [vmem:[%s13681_s12 + $0x90] sm:$0xf]  ;;  %v5131_v25 = vld [vmem:[%s13681_s12 + $0x9c] sm:$0xff]  }
 0x1a2   :  { %v5121_v20 = vld [vmem:[%s13681_s12 + $0x84] sm:$0xf]  ;;  %v5123_v21 = vld [vmem:[%s13681_s12 + $0x94] sm:$0xf]  ;;  %5120 = vst [vmem:[#allocation4 + $0x84] sm:$0xf] %v5119_v19 }
 0x1a3   :  { %5122 = vst [vmem:[#allocation4 + $0x88] sm:$0xf] %v5121_v20  ;;  %5124 = vst [vmem:[#allocation4 + $0x8c] sm:$0xf] %v5123_v21  ;;  %v5125_v22 = vld [vmem:[%s13681_s12 + $0x88] sm:$0xf] }
 0x1a4   :  { %v5127_v23 = vld [vmem:[%s13681_s12 + $0x98] sm:$0xf]  ;;  %v5129_v24 = vld [vmem:[%s13681_s12 + $0x8c] sm:$0xf]  ;;  %5126 = vst [vmem:[#allocation4 + $0x90] sm:$0xf] %v5125_v22 }
 0x1a5   :  { %5128 = vst [vmem:[#allocation4 + $0x94] sm:$0xf] %v5127_v23  ;;  %5130 = vst [vmem:[#allocation4 + $0x98] sm:$0xf] %v5129_v24  ;;  %v5135_v26 = vld [vmem:[%s13681_s12 + $0xb0] sm:$0xf] }
 0x1a6   :  { %v5137_v27 = vld [vmem:[%s13681_s12 + $0xa4] sm:$0xf]  ;;  %5132 = vst [vmem:[#allocation4 + $0x9c] sm:$0xff] %v5131_v25   ;;  %5136 = vst [vmem:[#allocation4 + $0xa4] sm:$0xf] %v5135_v26  ;;  %v5147_v32 = vld [vmem:[%s13681_s12 + $0xbc] sm:$0xff]  }
 0x1a7   :  { %5138 = vst [vmem:[#allocation4 + $0xa8] sm:$0xf] %v5137_v27  ;;  %v5139_v28 = vld [vmem:[%s13681_s12 + $0xb4] sm:$0xf]  ;;  %v5141_v29 = vld [vmem:[%s13681_s12 + $0xa8] sm:$0xf] }
 0x1a8   :  { %v5143_v30 = vld [vmem:[%s13681_s12 + $0xb8] sm:$0xf]  ;;  %5140 = vst [vmem:[#allocation4 + $0xac] sm:$0xf] %v5139_v28  ;;  %5142 = vst [vmem:[#allocation4 + $0xb0] sm:$0xf] %v5141_v29 }
 0x1a9   :  { %5144 = vst [vmem:[#allocation4 + $0xb4] sm:$0xf] %v5143_v30  ;;  %v5145_v31 = vld [vmem:[%s13681_s12 + $0xac] sm:$0xf]  ;;  %v5151_v33 = vld [vmem:[%s13681_s12 + $0xd0] sm:$0xf] }
 0x1aa   :  { %5146 = vst [vmem:[#allocation4 + $0xb8] sm:$0xf] %v5145_v31  ;;  %5148 = vst [vmem:[#allocation4 + $0xbc] sm:$0xff] %v5147_v32   ;;  %v5153_v34 = vld [vmem:[%s13681_s12 + $0xc4] sm:$0xf]  ;;  %v5163_v39 = vld [vmem:[%s13681_s12 + $0xdc] sm:$0xff]  }
 0x1ab   :  { %5152 = vst [vmem:[#allocation4 + $0xc4] sm:$0xf] %v5151_v33  ;;  %v5155_v35 = vld [vmem:[%s13681_s12 + $0xd4] sm:$0xf]  ;;  %v5157_v36 = vld [vmem:[%s13681_s12 + $0xc8] sm:$0xf] }
 0x1ac   :  { %5154 = vst [vmem:[#allocation4 + $0xc8] sm:$0xf] %v5153_v34  ;;  %5156 = vst [vmem:[#allocation4 + $0xcc] sm:$0xf] %v5155_v35  ;;  %v5159_v37 = vld [vmem:[%s13681_s12 + $0xd8] sm:$0xf] }
 0x1ad   :  { %5158 = vst [vmem:[#allocation4 + $0xd0] sm:$0xf] %v5157_v36  ;;  %v5161_v38 = vld [vmem:[%s13681_s12 + $0xcc] sm:$0xf]  ;;  %5160 = vst [vmem:[#allocation4 + $0xd4] sm:$0xf] %v5159_v37 }
 0x1ae   :  { %5162 = vst [vmem:[#allocation4 + $0xd8] sm:$0xf] %v5161_v38  ;;  %5164 = vst [vmem:[#allocation4 + $0xdc] sm:$0xff] %v5163_v39   ;;  %v5167_v40 = vld [vmem:[%s13681_s12 + $0xf0] sm:$0xf]  ;;  %v5179_v46 = vld [vmem:[%s13681_s12 + $0xfc] sm:$0xff]  }
 0x1af   :  { %v5169_v41 = vld [vmem:[%s13681_s12 + $0xe4] sm:$0xf]  ;;  %v5171_v42 = vld [vmem:[%s13681_s12 + $0xf4] sm:$0xf]  ;;  %5168 = vst [vmem:[#allocation4 + $0xe4] sm:$0xf] %v5167_v40 }
 0x1b0   :  { %5170 = vst [vmem:[#allocation4 + $0xe8] sm:$0xf] %v5169_v41  ;;  %5172 = vst [vmem:[#allocation4 + $0xec] sm:$0xf] %v5171_v42  ;;  %v5173_v43 = vld [vmem:[%s13681_s12 + $0xe8] sm:$0xf] }
 0x1b1   :  { %v5175_v44 = vld [vmem:[%s13681_s12 + $0xf8] sm:$0xf]  ;;  %v5177_v45 = vld [vmem:[%s13681_s12 + $0xec] sm:$0xf]  ;;  %5174 = vst [vmem:[#allocation4 + $0xf0] sm:$0xf] %v5173_v43 }
 0x1b2   :  { %5176 = vst [vmem:[#allocation4 + $0xf4] sm:$0xf] %v5175_v44  ;;  %5178 = vst [vmem:[#allocation4 + $0xf8] sm:$0xf] %v5177_v45  ;;  %v5183_v47 = vld [vmem:[%s13681_s12 + $0x110] sm:$0xf] }
 0x1b3   :  { %v5185_v48 = vld [vmem:[%s13681_s12 + $0x104] sm:$0xf]  ;;  %5180 = vst [vmem:[#allocation4 + $0xfc] sm:$0xff] %v5179_v46   ;;  %5184 = vst [vmem:[#allocation4 + $0x104] sm:$0xf] %v5183_v47  ;;  %v5195_v53 = vld [vmem:[%s13681_s12 + $0x11c] sm:$0xff]  }
 0x1b4   :  { %5186 = vst [vmem:[#allocation4 + $0x108] sm:$0xf] %v5185_v48  ;;  %v5187_v49 = vld [vmem:[%s13681_s12 + $0x114] sm:$0xf]  ;;  %v5189_v50 = vld [vmem:[%s13681_s12 + $0x108] sm:$0xf] }
 0x1b5   :  { %v5191_v51 = vld [vmem:[%s13681_s12 + $0x118] sm:$0xf]  ;;  %5188 = vst [vmem:[#allocation4 + $0x10c] sm:$0xf] %v5187_v49  ;;  %5190 = vst [vmem:[#allocation4 + $0x110] sm:$0xf] %v5189_v50 }
 0x1b6   :  { %5192 = vst [vmem:[#allocation4 + $0x114] sm:$0xf] %v5191_v51  ;;  %v5193_v52 = vld [vmem:[%s13681_s12 + $0x10c] sm:$0xf]  ;;  %v5199_v54 = vld [vmem:[%s13681_s12 + $0x130] sm:$0xf] }
 0x1b7   :  { %5194 = vst [vmem:[#allocation4 + $0x118] sm:$0xf] %v5193_v52  ;;  %5196 = vst [vmem:[#allocation4 + $0x11c] sm:$0xff] %v5195_v53   ;;  %v5201_v55 = vld [vmem:[%s13681_s12 + $0x124] sm:$0xf]  ;;  %v5211_v60 = vld [vmem:[%s13681_s12 + $0x13c] sm:$0xff]  }
 0x1b8   :  { %5200 = vst [vmem:[#allocation4 + $0x124] sm:$0xf] %v5199_v54  ;;  %v5203_v56 = vld [vmem:[%s13681_s12 + $0x134] sm:$0xf]  ;;  %v5205_v57 = vld [vmem:[%s13681_s12 + $0x128] sm:$0xf] }
 0x1b9   :  { %5202 = vst [vmem:[#allocation4 + $0x128] sm:$0xf] %v5201_v55  ;;  %5204 = vst [vmem:[#allocation4 + $0x12c] sm:$0xf] %v5203_v56  ;;  %v5207_v58 = vld [vmem:[%s13681_s12 + $0x138] sm:$0xf] }
 0x1ba   :  { %5206 = vst [vmem:[#allocation4 + $0x130] sm:$0xf] %v5205_v57  ;;  %v5209_v59 = vld [vmem:[%s13681_s12 + $0x12c] sm:$0xf]  ;;  %5208 = vst [vmem:[#allocation4 + $0x134] sm:$0xf] %v5207_v58 }
 0x1bb   :  { %5210 = vst [vmem:[#allocation4 + $0x138] sm:$0xf] %v5209_v59  ;;  %5212 = vst [vmem:[#allocation4 + $0x13c] sm:$0xff] %v5211_v60   ;;  %v5215_v61 = vld [vmem:[%s13681_s12 + $0x150] sm:$0xf]  ;;  %v5227_v3 = vld [vmem:[%s13681_s12 + $0x15c] sm:$0xff]  }
 0x1bc   :  { %v5217_v62 = vld [vmem:[%s13681_s12 + $0x144] sm:$0xf]  ;;  %v5219_v63 = vld [vmem:[%s13681_s12 + $0x154] sm:$0xf]  ;;  %5216 = vst [vmem:[#allocation4 + $0x144] sm:$0xf] %v5215_v61 }
 0x1bd   :  { %5218 = vst [vmem:[#allocation4 + $0x148] sm:$0xf] %v5217_v62  ;;  %5220 = vst [vmem:[#allocation4 + $0x14c] sm:$0xf] %v5219_v63  ;;  %v5221_v0 = vld [vmem:[%s13681_s12 + $0x148] sm:$0xf] }
 0x1be   :  { %v5223_v1 = vld [vmem:[%s13681_s12 + $0x158] sm:$0xf]  ;;  %v5225_v2 = vld [vmem:[%s13681_s12 + $0x14c] sm:$0xf]  ;;  %5222 = vst [vmem:[#allocation4 + $0x150] sm:$0xf] %v5221_v0 }
 0x1bf   :  { %5224 = vst [vmem:[#allocation4 + $0x154] sm:$0xf] %v5223_v1  ;;  %5226 = vst [vmem:[#allocation4 + $0x158] sm:$0xf] %v5225_v2  ;;  %v5231_v4 = vld [vmem:[%s13681_s12 + $0x170] sm:$0xf] }
 0x1c0   :  { %v5233_v5 = vld [vmem:[%s13681_s12 + $0x164] sm:$0xf]  ;;  %5228 = vst [vmem:[#allocation4 + $0x15c] sm:$0xff] %v5227_v3   ;;  %5232 = vst [vmem:[#allocation4 + $0x164] sm:$0xf] %v5231_v4 }
 0x1c1   :  { %5234 = vst [vmem:[#allocation4 + $0x168] sm:$0xf] %v5233_v5  ;;  %v5235_v6 = vld [vmem:[%s13681_s12 + $0x174] sm:$0xf]  ;;  %v5237_v7 = vld [vmem:[%s13681_s12 + $0x168] sm:$0xf] }
 0x1c2   :  { %v5239_v8 = vld [vmem:[%s13681_s12 + $0x178] sm:$0xf]  ;;  %5236 = vst [vmem:[#allocation4 + $0x16c] sm:$0xf] %v5235_v6  ;;  %5238 = vst [vmem:[#allocation4 + $0x170] sm:$0xf] %v5237_v7 }
 0x1c3   :  { %5240 = vst [vmem:[#allocation4 + $0x174] sm:$0xf] %v5239_v8  ;;  %v5241_v9 = vld [vmem:[%s13681_s12 + $0x16c] sm:$0xf]  ;;  %v5243_v10 = vld [vmem:[%s13681_s12 + $0x17c] sm:$0xf] }
 0x1c4   :  { %5242 = vst [vmem:[#allocation4 + $0x178] sm:$0xf] %v5241_v9  ;;  %5244 = vst [vmem:[#allocation4 + $0x17c] sm:$0xf] %v5243_v10 }
 0x1c5   :  { %5467 = vsyncadd [#allocation6 + $0x2], 6144  ;;  %v5486_v11 = vld [vmem:[%s13682_s13] sm:$0xf]  ;;  %v5488_v12 = vld [vmem:[%s13682_s13 + $0x8] sm:$0xf] }
 0x1c6   :  { %5487 = vst [vmem:[#allocation5] sm:$0xf] %v5486_v11  ;;  %5489 = vst [vmem:[#allocation5 + $0x4] sm:$0xf] %v5488_v12  ;;  %v5490_v13 = vld [vmem:[%s13682_s13 + $0x4] sm:$0xf] }
 0x1c7   :  { %v5492_v14 = vld [vmem:[%s13682_s13 + $0xc] sm:$0xff]   ;;  %v5496_v15 = vld [vmem:[%s13682_s13 + $0x18] sm:$0xf]  ;;  %5491 = vst [vmem:[#allocation5 + $0x8] sm:$0xf] %v5490_v13  ;;  %v5500_v17 = vld [vmem:[%s13682_s13 + $0x1c] sm:$0xff]  }
 0x1c8   :  { %5493 = vst [vmem:[#allocation5 + $0xc] sm:$0xff] %v5492_v14   ;;  %5497 = vst [vmem:[#allocation5 + $0x14] sm:$0xf] %v5496_v15  ;;  %v5498_v16 = vld [vmem:[%s13682_s13 + $0x14] sm:$0xf]  ;;  %v5508_v20 = vld [vmem:[%s13682_s13 + $0x2c] sm:$0xff]  }
 0x1c9   :  { %v5504_v18 = vld [vmem:[%s13682_s13 + $0x28] sm:$0xf]  ;;  %5499 = vst [vmem:[#allocation5 + $0x18] sm:$0xf] %v5498_v16  ;;  %5501 = vst [vmem:[#allocation5 + $0x1c] sm:$0xff] %v5500_v17   ;;  %v5516_v23 = vld [vmem:[%s13682_s13 + $0x3c] sm:$0xff]  }
 0x1ca   :  { %5505 = vst [vmem:[#allocation5 + $0x24] sm:$0xf] %v5504_v18  ;;  %v5506_v19 = vld [vmem:[%s13682_s13 + $0x24] sm:$0xf]  ;;  %v5512_v21 = vld [vmem:[%s13682_s13 + $0x38] sm:$0xf] }
 0x1cb   :  { %5507 = vst [vmem:[#allocation5 + $0x28] sm:$0xf] %v5506_v19  ;;  %5509 = vst [vmem:[#allocation5 + $0x2c] sm:$0xff] %v5508_v20   ;;  %v5514_v22 = vld [vmem:[%s13682_s13 + $0x34] sm:$0xf]  ;;  %v5524_v26 = vld [vmem:[%s13682_s13 + $0x4c] sm:$0xff]  }
 0x1cc   :  { %5513 = vst [vmem:[#allocation5 + $0x34] sm:$0xf] %v5512_v21  ;;  %v5520_v24 = vld [vmem:[%s13682_s13 + $0x48] sm:$0xf]  ;;  %5515 = vst [vmem:[#allocation5 + $0x38] sm:$0xf] %v5514_v22 }
 0x1cd   :  { %5517 = vst [vmem:[#allocation5 + $0x3c] sm:$0xff] %v5516_v23   ;;  %5521 = vst [vmem:[#allocation5 + $0x44] sm:$0xf] %v5520_v24  ;;  %v5522_v25 = vld [vmem:[%s13682_s13 + $0x44] sm:$0xf]  ;;  %v5532_v29 = vld [vmem:[%s13682_s13 + $0x5c] sm:$0xff]  }
 0x1ce   :  { %v5528_v27 = vld [vmem:[%s13682_s13 + $0x58] sm:$0xf]  ;;  %5523 = vst [vmem:[#allocation5 + $0x48] sm:$0xf] %v5522_v25  ;;  %5525 = vst [vmem:[#allocation5 + $0x4c] sm:$0xff] %v5524_v26   ;;  %v5540_v32 = vld [vmem:[%s13682_s13 + $0x6c] sm:$0xff]  }
 0x1cf   :  { %5529 = vst [vmem:[#allocation5 + $0x54] sm:$0xf] %v5528_v27  ;;  %v5530_v28 = vld [vmem:[%s13682_s13 + $0x54] sm:$0xf]  ;;  %v5536_v30 = vld [vmem:[%s13682_s13 + $0x68] sm:$0xf] }
 0x1d0   :  { %5531 = vst [vmem:[#allocation5 + $0x58] sm:$0xf] %v5530_v28  ;;  %5533 = vst [vmem:[#allocation5 + $0x5c] sm:$0xff] %v5532_v29   ;;  %v5538_v31 = vld [vmem:[%s13682_s13 + $0x64] sm:$0xf]  ;;  %v5548_v35 = vld [vmem:[%s13682_s13 + $0x7c] sm:$0xff]  }
 0x1d1   :  { %5537 = vst [vmem:[#allocation5 + $0x64] sm:$0xf] %v5536_v30  ;;  %v5544_v33 = vld [vmem:[%s13682_s13 + $0x78] sm:$0xf]  ;;  %5539 = vst [vmem:[#allocation5 + $0x68] sm:$0xf] %v5538_v31 }
 0x1d2   :  { %5541 = vst [vmem:[#allocation5 + $0x6c] sm:$0xff] %v5540_v32   ;;  %5545 = vst [vmem:[#allocation5 + $0x74] sm:$0xf] %v5544_v33  ;;  %v5546_v34 = vld [vmem:[%s13682_s13 + $0x74] sm:$0xf]  ;;  %v5556_v38 = vld [vmem:[%s13682_s13 + $0x8c] sm:$0xff]  }
 0x1d3   :  { %v5552_v36 = vld [vmem:[%s13682_s13 + $0x88] sm:$0xf]  ;;  %5547 = vst [vmem:[#allocation5 + $0x78] sm:$0xf] %v5546_v34  ;;  %5549 = vst [vmem:[#allocation5 + $0x7c] sm:$0xff] %v5548_v35   ;;  %v5564_v41 = vld [vmem:[%s13682_s13 + $0x9c] sm:$0xff]  }
 0x1d4   :  { %5553 = vst [vmem:[#allocation5 + $0x84] sm:$0xf] %v5552_v36  ;;  %v5554_v37 = vld [vmem:[%s13682_s13 + $0x84] sm:$0xf]  ;;  %v5560_v39 = vld [vmem:[%s13682_s13 + $0x98] sm:$0xf] }
 0x1d5   :  { %5555 = vst [vmem:[#allocation5 + $0x88] sm:$0xf] %v5554_v37  ;;  %5557 = vst [vmem:[#allocation5 + $0x8c] sm:$0xff] %v5556_v38   ;;  %v5562_v40 = vld [vmem:[%s13682_s13 + $0x94] sm:$0xf]  ;;  %v5572_v44 = vld [vmem:[%s13682_s13 + $0xac] sm:$0xff]  }
 0x1d6   :  { %5561 = vst [vmem:[#allocation5 + $0x94] sm:$0xf] %v5560_v39  ;;  %v5568_v42 = vld [vmem:[%s13682_s13 + $0xa8] sm:$0xf]  ;;  %5563 = vst [vmem:[#allocation5 + $0x98] sm:$0xf] %v5562_v40 }
 0x1d7   :  { %5565 = vst [vmem:[#allocation5 + $0x9c] sm:$0xff] %v5564_v41   ;;  %5569 = vst [vmem:[#allocation5 + $0xa4] sm:$0xf] %v5568_v42  ;;  %v5570_v43 = vld [vmem:[%s13682_s13 + $0xa4] sm:$0xf]  ;;  %v5580_v47 = vld [vmem:[%s13682_s13 + $0xbc] sm:$0xff]  }
 0x1d8   :  { %v5576_v45 = vld [vmem:[%s13682_s13 + $0xb8] sm:$0xf]  ;;  %5571 = vst [vmem:[#allocation5 + $0xa8] sm:$0xf] %v5570_v43  ;;  %5573 = vst [vmem:[#allocation5 + $0xac] sm:$0xff] %v5572_v44   ;;  %v5588_v50 = vld [vmem:[%s13682_s13 + $0xcc] sm:$0xff]  }
 0x1d9   :  { %5577 = vst [vmem:[#allocation5 + $0xb4] sm:$0xf] %v5576_v45  ;;  %v5578_v46 = vld [vmem:[%s13682_s13 + $0xb4] sm:$0xf]  ;;  %v5584_v48 = vld [vmem:[%s13682_s13 + $0xc8] sm:$0xf] }
 0x1da   :  { %5579 = vst [vmem:[#allocation5 + $0xb8] sm:$0xf] %v5578_v46  ;;  %5581 = vst [vmem:[#allocation5 + $0xbc] sm:$0xff] %v5580_v47   ;;  %v5586_v49 = vld [vmem:[%s13682_s13 + $0xc4] sm:$0xf]  ;;  %v5596_v53 = vld [vmem:[%s13682_s13 + $0xdc] sm:$0xff]  }
 0x1db   :  { %5585 = vst [vmem:[#allocation5 + $0xc4] sm:$0xf] %v5584_v48  ;;  %v5592_v51 = vld [vmem:[%s13682_s13 + $0xd8] sm:$0xf]  ;;  %5587 = vst [vmem:[#allocation5 + $0xc8] sm:$0xf] %v5586_v49 }
 0x1dc   :  { %5589 = vst [vmem:[#allocation5 + $0xcc] sm:$0xff] %v5588_v50   ;;  %5593 = vst [vmem:[#allocation5 + $0xd4] sm:$0xf] %v5592_v51  ;;  %v5594_v52 = vld [vmem:[%s13682_s13 + $0xd4] sm:$0xf]  ;;  %v5604_v56 = vld [vmem:[%s13682_s13 + $0xec] sm:$0xff]  }
 0x1dd   :  { %v5600_v54 = vld [vmem:[%s13682_s13 + $0xe8] sm:$0xf]  ;;  %5595 = vst [vmem:[#allocation5 + $0xd8] sm:$0xf] %v5594_v52  ;;  %5597 = vst [vmem:[#allocation5 + $0xdc] sm:$0xff] %v5596_v53   ;;  %v5612_v59 = vld [vmem:[%s13682_s13 + $0xfc] sm:$0xff]  }
 0x1de   :  { %5601 = vst [vmem:[#allocation5 + $0xe4] sm:$0xf] %v5600_v54  ;;  %v5602_v55 = vld [vmem:[%s13682_s13 + $0xe4] sm:$0xf]  ;;  %v5608_v57 = vld [vmem:[%s13682_s13 + $0xf8] sm:$0xf] }
 0x1df   :  { %5603 = vst [vmem:[#allocation5 + $0xe8] sm:$0xf] %v5602_v55  ;;  %5605 = vst [vmem:[#allocation5 + $0xec] sm:$0xff] %v5604_v56   ;;  %v5610_v58 = vld [vmem:[%s13682_s13 + $0xf4] sm:$0xf]  ;;  %v5620_v62 = vld [vmem:[%s13682_s13 + $0x10c] sm:$0xff]  }
 0x1e0   :  { %5609 = vst [vmem:[#allocation5 + $0xf4] sm:$0xf] %v5608_v57  ;;  %v5616_v60 = vld [vmem:[%s13682_s13 + $0x108] sm:$0xf]  ;;  %5611 = vst [vmem:[#allocation5 + $0xf8] sm:$0xf] %v5610_v58 }
 0x1e1   :  { %5613 = vst [vmem:[#allocation5 + $0xfc] sm:$0xff] %v5612_v59   ;;  %5617 = vst [vmem:[#allocation5 + $0x104] sm:$0xf] %v5616_v60  ;;  %v5618_v61 = vld [vmem:[%s13682_s13 + $0x104] sm:$0xf]  ;;  %v5628_v1 = vld [vmem:[%s13682_s13 + $0x11c] sm:$0xff]  }
 0x1e2   :  { %v5624_v63 = vld [vmem:[%s13682_s13 + $0x118] sm:$0xf]  ;;  %5619 = vst [vmem:[#allocation5 + $0x108] sm:$0xf] %v5618_v61  ;;  %5621 = vst [vmem:[#allocation5 + $0x10c] sm:$0xff] %v5620_v62   ;;  %v5636_v4 = vld [vmem:[%s13682_s13 + $0x12c] sm:$0xff]  }
 0x1e3   :  { %5625 = vst [vmem:[#allocation5 + $0x114] sm:$0xf] %v5624_v63  ;;  %v5626_v0 = vld [vmem:[%s13682_s13 + $0x114] sm:$0xf]  ;;  %v5632_v2 = vld [vmem:[%s13682_s13 + $0x128] sm:$0xf] }
 0x1e4   :  { %5627 = vst [vmem:[#allocation5 + $0x118] sm:$0xf] %v5626_v0  ;;  %5629 = vst [vmem:[#allocation5 + $0x11c] sm:$0xff] %v5628_v1   ;;  %v5634_v3 = vld [vmem:[%s13682_s13 + $0x124] sm:$0xf]  ;;  %v5644_v7 = vld [vmem:[%s13682_s13 + $0x13c] sm:$0xff]  }
 0x1e5   :  { %5633 = vst [vmem:[#allocation5 + $0x124] sm:$0xf] %v5632_v2  ;;  %v5640_v5 = vld [vmem:[%s13682_s13 + $0x138] sm:$0xf]  ;;  %5635 = vst [vmem:[#allocation5 + $0x128] sm:$0xf] %v5634_v3 }
 0x1e6   :  { %5637 = vst [vmem:[#allocation5 + $0x12c] sm:$0xff] %v5636_v4   ;;  %5641 = vst [vmem:[#allocation5 + $0x134] sm:$0xf] %v5640_v5  ;;  %v5642_v6 = vld [vmem:[%s13682_s13 + $0x134] sm:$0xf]  ;;  %v5652_v10 = vld [vmem:[%s13682_s13 + $0x14c] sm:$0xff]  }
 0x1e7   :  { %v5648_v8 = vld [vmem:[%s13682_s13 + $0x148] sm:$0xf]  ;;  %5643 = vst [vmem:[#allocation5 + $0x138] sm:$0xf] %v5642_v6  ;;  %5645 = vst [vmem:[#allocation5 + $0x13c] sm:$0xff] %v5644_v7   ;;  %v5660_v13 = vld [vmem:[%s13682_s13 + $0x15c] sm:$0xff]  }
 0x1e8   :  { %5649 = vst [vmem:[#allocation5 + $0x144] sm:$0xf] %v5648_v8  ;;  %v5650_v9 = vld [vmem:[%s13682_s13 + $0x144] sm:$0xf]  ;;  %v5656_v11 = vld [vmem:[%s13682_s13 + $0x158] sm:$0xf] }
 0x1e9   :  { %5651 = vst [vmem:[#allocation5 + $0x148] sm:$0xf] %v5650_v9  ;;  %5653 = vst [vmem:[#allocation5 + $0x14c] sm:$0xff] %v5652_v10   ;;  %v5658_v12 = vld [vmem:[%s13682_s13 + $0x154] sm:$0xf]  ;;  %v5668_v16 = vld [vmem:[%s13682_s13 + $0x16c] sm:$0xff]  }
 0x1ea   :  { %5657 = vst [vmem:[#allocation5 + $0x154] sm:$0xf] %v5656_v11  ;;  %v5664_v14 = vld [vmem:[%s13682_s13 + $0x168] sm:$0xf]  ;;  %5659 = vst [vmem:[#allocation5 + $0x158] sm:$0xf] %v5658_v12 }
 0x1eb   :  { %5661 = vst [vmem:[#allocation5 + $0x15c] sm:$0xff] %v5660_v13   ;;  %5665 = vst [vmem:[#allocation5 + $0x164] sm:$0xf] %v5664_v14  ;;  %v5666_v15 = vld [vmem:[%s13682_s13 + $0x164] sm:$0xf]  ;;  %v5676_v19 = vld [vmem:[%s13682_s13 + $0x17c] sm:$0xff]  }
 0x1ec   :  { %v5672_v17 = vld [vmem:[%s13682_s13 + $0x178] sm:$0xf]  ;;  %5667 = vst [vmem:[#allocation5 + $0x168] sm:$0xf] %v5666_v15  ;;  %5669 = vst [vmem:[#allocation5 + $0x16c] sm:$0xff] %v5668_v16   ;;  %v5684_v22 = vld [vmem:[%s13682_s13 + $0x18c] sm:$0xff]  }
 0x1ed   :  { %5673 = vst [vmem:[#allocation5 + $0x174] sm:$0xf] %v5672_v17  ;;  %v5674_v18 = vld [vmem:[%s13682_s13 + $0x174] sm:$0xf]  ;;  %v5680_v20 = vld [vmem:[%s13682_s13 + $0x188] sm:$0xf] }
 0x1ee   :  { %5675 = vst [vmem:[#allocation5 + $0x178] sm:$0xf] %v5674_v18  ;;  %5677 = vst [vmem:[#allocation5 + $0x17c] sm:$0xff] %v5676_v19   ;;  %v5682_v21 = vld [vmem:[%s13682_s13 + $0x184] sm:$0xf]  ;;  %v5692_v25 = vld [vmem:[%s13682_s13 + $0x19c] sm:$0xff]  }
 0x1ef   :  { %5681 = vst [vmem:[#allocation5 + $0x184] sm:$0xf] %v5680_v20  ;;  %v5688_v23 = vld [vmem:[%s13682_s13 + $0x198] sm:$0xf]  ;;  %5683 = vst [vmem:[#allocation5 + $0x188] sm:$0xf] %v5682_v21 }
 0x1f0   :  { %5685 = vst [vmem:[#allocation5 + $0x18c] sm:$0xff] %v5684_v22   ;;  %5689 = vst [vmem:[#allocation5 + $0x194] sm:$0xf] %v5688_v23  ;;  %v5690_v24 = vld [vmem:[%s13682_s13 + $0x194] sm:$0xf]  ;;  %v5700_v28 = vld [vmem:[%s13682_s13 + $0x1ac] sm:$0xff]  }
 0x1f1   :  { %v5696_v26 = vld [vmem:[%s13682_s13 + $0x1a8] sm:$0xf]  ;;  %5691 = vst [vmem:[#allocation5 + $0x198] sm:$0xf] %v5690_v24  ;;  %5693 = vst [vmem:[#allocation5 + $0x19c] sm:$0xff] %v5692_v25   ;;  %v5708_v31 = vld [vmem:[%s13682_s13 + $0x1bc] sm:$0xff]  }
 0x1f2   :  { %5697 = vst [vmem:[#allocation5 + $0x1a4] sm:$0xf] %v5696_v26  ;;  %v5698_v27 = vld [vmem:[%s13682_s13 + $0x1a4] sm:$0xf]  ;;  %v5704_v29 = vld [vmem:[%s13682_s13 + $0x1b8] sm:$0xf] }
 0x1f3   :  { %5699 = vst [vmem:[#allocation5 + $0x1a8] sm:$0xf] %v5698_v27  ;;  %5701 = vst [vmem:[#allocation5 + $0x1ac] sm:$0xff] %v5700_v28   ;;  %v5706_v30 = vld [vmem:[%s13682_s13 + $0x1b4] sm:$0xf]  ;;  %v5716_v34 = vld [vmem:[%s13682_s13 + $0x1cc] sm:$0xff]  }
 0x1f4   :  { %5705 = vst [vmem:[#allocation5 + $0x1b4] sm:$0xf] %v5704_v29  ;;  %v5712_v32 = vld [vmem:[%s13682_s13 + $0x1c8] sm:$0xf]  ;;  %5707 = vst [vmem:[#allocation5 + $0x1b8] sm:$0xf] %v5706_v30 }
 0x1f5   :  { %5709 = vst [vmem:[#allocation5 + $0x1bc] sm:$0xff] %v5708_v31   ;;  %5713 = vst [vmem:[#allocation5 + $0x1c4] sm:$0xf] %v5712_v32  ;;  %v5714_v33 = vld [vmem:[%s13682_s13 + $0x1c4] sm:$0xf]  ;;  %v5724_v37 = vld [vmem:[%s13682_s13 + $0x1dc] sm:$0xff]  }
 0x1f6   :  { %v5720_v35 = vld [vmem:[%s13682_s13 + $0x1d8] sm:$0xf]  ;;  %5715 = vst [vmem:[#allocation5 + $0x1c8] sm:$0xf] %v5714_v33  ;;  %5717 = vst [vmem:[#allocation5 + $0x1cc] sm:$0xff] %v5716_v34   ;;  %v5732_v40 = vld [vmem:[%s13682_s13 + $0x1ec] sm:$0xff]  }
 0x1f7   :  { %5721 = vst [vmem:[#allocation5 + $0x1d4] sm:$0xf] %v5720_v35  ;;  %v5722_v36 = vld [vmem:[%s13682_s13 + $0x1d4] sm:$0xf]  ;;  %v5728_v38 = vld [vmem:[%s13682_s13 + $0x1e8] sm:$0xf] }
 0x1f8   :  { %5723 = vst [vmem:[#allocation5 + $0x1d8] sm:$0xf] %v5722_v36  ;;  %5725 = vst [vmem:[#allocation5 + $0x1dc] sm:$0xff] %v5724_v37   ;;  %v5730_v39 = vld [vmem:[%s13682_s13 + $0x1e4] sm:$0xf] }
 0x1f9   :  { %5729 = vst [vmem:[#allocation5 + $0x1e4] sm:$0xf] %v5728_v38  ;;  %v5736_v41 = vld [vmem:[%s13682_s13 + $0x1f8] sm:$0xf]  ;;  %5731 = vst [vmem:[#allocation5 + $0x1e8] sm:$0xf] %v5730_v39 }
 0x1fa   :  { %5733 = vst [vmem:[#allocation5 + $0x1ec] sm:$0xff] %v5732_v40   ;;  %5737 = vst [vmem:[#allocation5 + $0x1f4] sm:$0xf] %v5736_v41  ;;  %v5738_v42 = vld [vmem:[%s13682_s13 + $0x1f4] sm:$0xf] }
 0x1fb   :  { %v5740_v43 = vld [vmem:[%s13682_s13 + $0x1fc] sm:$0xf]  ;;  %5739 = vst [vmem:[#allocation5 + $0x1f8] sm:$0xf] %v5738_v42 }
 0x1fc   :  { %5741 = vst [vmem:[#allocation5 + $0x1fc] sm:$0xf] %v5740_v43 }
 0x1fd   :  { %6028 = vsyncadd [#allocation6 + $0x3], 8192  ;;  %v12728_v44 = vld [vmem:[%s13672_s3] sm:$0xf]  ;;  %v12733_v45 = vld [vmem:[%s13672_s3 + $0x4] sm:$0xf] }
 0x1fe   :  { %v12738_v46 = vld [vmem:[%s13672_s3 + $0x8] sm:$0xf]  ;;  %v12743_v47 = vld [vmem:[%s13672_s3 + $0xc] sm:$0xf]  ;;  %v12748_v48 = vld [vmem:[%s13672_s3 + $0x10] sm:$0xf] }
 0x1ff   :  { %v12753_v49 = vld [vmem:[%s13672_s3 + $0x14] sm:$0xf]  ;;  %v12758_v50 = vld [vmem:[%s13672_s3 + $0x18] sm:$0xf]  ;;  %v12763_v51 = vld [vmem:[%s13672_s3 + $0x1c] sm:$0xf] }
 0x200   :  { %v10006_v52 = vld [vmem:[%s13670_s1] sm:$0xff]   ;;  %v10207_v53 = vmov 0.0   ;;  %vm6059_vm0 = vcmask 1041408   ;;  %v10008_v55 = vld [vmem:[%s13670_s1 + $0x8] ss:$0 sps:$4 sm:$0x33]  }
 0x201   :  { %9763 = vmatprep.subr.bf16.mxu0 %v10207_v53  ;;  %9771 = vmatprep.subr.bf16.mxu1 %v10207_v53  ;;  %v10007_v54 = vld [vmem:[%s13671_s2] sm:$0xff]   ;;  %v10009_v56 = vld [vmem:[%s13671_s2 + $0x8] ss:$0 sps:$4 sm:$0x33]   ;;  %v6061_v58 = vsel %vm6059_vm0, %v10008_v55, 0  ;;  %vm10208_vm1 = vmmov 0  }
 0x202   :  { %9764 = vmatpush3.bf16.msra.mxu0 %v10006_v52  ;;  %9772 = vmatpush3.bf16.msra.mxu1 %v10007_v54  ;;  %v6029_v57 = vld [vmem:[%s13669_s0] sm:$0xff]  ;;  %v6030_v59 = vld [vmem:[%s13669_s0 + $0x8] sm:$0xff]  ;;  %v6114_v60 = vsel %vm6059_vm0, %v10009_v56, 0  ;;  %vm6055_vm2 = vcmask 162816   ;;  %vm6157_vm3 = vcmask 523264   ;;  %s12825_s0 = smov 0  }
 0x203   :  { %9765 = vmatprep.subr.bf16.mxu0 %v10207_v53  ;;  %9773 = vmatprep.subr.bf16.mxu1 %v10207_v53  ;;  %v6045_v61 = vpack.c.bf16 %v6030_v59, %v6029_v57 }
 0x204   :  { %9767 = vmatprep.mubr.msk.bf16.mxu0 %vm10208_vm1, %v10207_v53  ;;  %9775 = vmatprep.mubr.msk.bf16.mxu1 %vm10208_vm1, %v10207_v53 }
 0x206   :  { %9766 = vmatpush3.bf16.msra.mxu0 %v6061_v58  ;;  %9774 = vmatpush3.bf16.msra.mxu1 %v6114_v60 }
 0x209   :  { %9768 = vmatmul.mubr.msk.bf16.vlgmr.msra.gmra.mrb[0].mxu0 %vm6055_vm2, %v6045_v61  ;;  %9776 = vmatmul.mubr.msk.bf16.vlgmr.msra.gmra.mrb[0].mxu1 %vm6055_vm2, %v6045_v61 }
 0x2dc   :  { %v12791_v62 = vpop.f32.mrb[0].mxu0  ;;  %v12795_v0 = vpop.f32.mrb[0].mxu1 }
 0x2dd   :  { %v6169_v63 = vmul.f32 %v12791_v62, %v12791_v62  ;;  %v9769_v1 = vpop.f32.mrb[1].mxu0  ;;  %v6194_v2 = vmul.f32 %v12795_v0, %v12795_v0  ;;  %v9777_v3 = vpop.f32.mrb[1].mxu1  ;;  %v6158_v5 = vsel %vm6157_vm3, %v12791_v62, 0.0  ;;  %v6184_v10 = vsel %vm6157_vm3, %v12795_v0, 0.0 }
 0x2de   :  { %v6100_v4 = vpop.f32.mrb[2].mxu0  ;;  %v6153_v8 = vpop.f32.mrb[2].mxu1 }
 0x2df   :  { %v6159_v6 = vsel %vm6157_vm3, %v6100_v4, 0.0  ;;  %v6170_v7 = vmul.f32 %v6100_v4, %v6100_v4  ;;  %v9770_v9 = vpop.f32.mrb[3].mxu0  ;;  %v6185_v12 = vsel %vm6157_vm3, %v6153_v8, 0.0  ;;  %v6195_v13 = vmul.f32 %v6153_v8, %v6153_v8  ;;  %v9778_v14 = vpop.f32.mrb[3].mxu1 }
 0x2e0   :  { %v6160_v11 = vadd.f32 %v6159_v6, %v6158_v5  ;;  %v6171_v15 = vsel %vm6157_vm3, %v6169_v63, 0.0  ;;  %v6186_v17 = vadd.f32 %v6185_v12, %v6184_v10  ;;  %v6196_v18 = vsel %vm6157_vm3, %v6194_v2, 0.0 }
 0x2e1   :  { %v6172_v16 = vsel %vm6157_vm3, %v6170_v7, 0.0  ;;  %v6197_v21 = vsel %vm6157_vm3, %v6195_v13, 0.0 }
 0x2e2   :  { %v6161_v19 = vrot.slane %v6160_v11, 4  ;;  %v6173_v20 = vadd.f32 %v6172_v16, %v6171_v15  ;;  %v6187_v22 = vrot.slane %v6186_v17, 4  ;;  %v6198_v23 = vadd.f32 %v6197_v21, %v6196_v18 }
 0x2e4   :  { %v6162_v24 = vadd.f32 %v6161_v19, %v6160_v11  ;;  %v6174_v25 = vrot.slane %v6173_v20, 4  ;;  %v6188_v26 = vadd.f32 %v6187_v22, %v6186_v17  ;;  %v6199_v27 = vrot.slane %v6198_v23, 4 }
 0x2e6   :  { %v6163_v28 = vrot.slane %v6162_v24, 2  ;;  %v6175_v29 = vadd.f32 %v6174_v25, %v6173_v20  ;;  %v6189_v30 = vrot.slane %v6188_v26, 2  ;;  %v6200_v31 = vadd.f32 %v6199_v27, %v6198_v23 }
 0x2e8   :  { %v6164_v32 = vadd.f32 %v6163_v28, %v6162_v24  ;;  %v6176_v33 = vrot.slane %v6175_v29, 2  ;;  %v6190_v34 = vadd.f32 %v6189_v30, %v6188_v26  ;;  %v6201_v35 = vrot.slane %v6200_v31, 2 }
 0x2ea   :  { %v6165_v36 = vrot.slane %v6164_v32, 1  ;;  %v6177_v37 = vadd.f32 %v6176_v33, %v6175_v29  ;;  %v6191_v38 = vrot.slane %v6190_v34, 1  ;;  %v6202_v39 = vadd.f32 %v6201_v35, %v6200_v31 }
 0x2ec   :  { %v6166_v40 = vadd.f32 %v6165_v36, %v6164_v32  ;;  %v6178_v41 = vrot.slane %v6177_v37, 1  ;;  %v6192_v42 = vadd.f32 %v6191_v38, %v6190_v34  ;;  %v6203_v43 = vrot.slane %v6202_v39, 1 }
 0x2ee   :  { %v6168_v52 = vmul.f32 0.0625, %v6166_v40  ;;  %v6179_v54 = vadd.f32 %v6178_v41, %v6177_v37  ;;  %v6193_v55 = vmul.f32 0.0625, %v6192_v42  ;;  %v6204_v56 = vadd.f32 %v6203_v43, %v6202_v39 }
 0x2f0   :  { %v6180_v57 = vmul.f32 0.0625, %v6179_v54  ;;  %v6181_v58 = vmul.f32 %v6168_v52, %v6168_v52  ;;  %v6212_v59 = vsub.f32 %v12791_v62, %v6168_v52  ;;  %v6213_v60 = vsub.f32 %v6100_v4, %v6168_v52 }
 0x2f1   :  { %v6205_v61 = vmul.f32 0.0625, %v6204_v56  ;;  %v6206_v63 = vmul.f32 %v6193_v55, %v6193_v55  ;;  %v6216_v1 = vsub.f32 %v12795_v0, %v6193_v55  ;;  %v6217_v2 = vsub.f32 %v6153_v8, %v6193_v55 }
 0x2f2   :  { %v6182_v3 = vsub.f32 %v6180_v57, %v6181_v58  ;;  %v12817_v62 = vmov -inf   ;;  %v12819_v0 = vmov -inf   ;;  %v12821_v4 = vmov 0.0  }
 0x2f3   :  { %v6207_v5 = vsub.f32 %v6205_v61, %v6206_v63  ;;  %v12823_v8 = vmov 0.0  }
 0x2f4   :  { %v6183_v6 = vmax.f32 %v6182_v3, 0.0 }
 0x2f5   :  { %v6208_v7 = vmax.f32 %v6207_v5, 0.0 }
 0x2f7   :  { %v6209_v9 = vadd.f32 %v6208_v7, %v6183_v6 }
 0x2f9   :  { %v6210_v10 = vadd.f32 1e-05, %v6209_v9 }
 0x2fb   :  { %10010 = vrsqrt.f32 %v6210_v10 }
 0x305   :  { %v10011_v11 = vpop.eup %10010 }
 0x306   :  { %v6214_v12 = vmul.f32 %v10011_v11, %v6212_v59  ;;  %v6215_v13 = vmul.f32 %v10011_v11, %v6213_v60  ;;  %v12811_v14 = vmul.f32 %v10011_v11, %v6216_v1  ;;  %v12813_v15 = vmul.f32 %v10011_v11, %v6217_v2 }
 0x308   :  { %6220 = vst.msk [vmem:[#allocation7] sm:$0xff] %vm6157_vm3, %v6214_v12  ;;  %6221 = vst.msk [vmem:[#allocation7 + $0x8] sm:$0xff] %vm6157_vm3, %v6215_v13 }
 0x309 LB: > { %v9620_v16 = vcombine.low %v12728_v44, %v12733_v45  ;;  %v9621_v17 = vcombine.low %v12738_v46, %v12743_v47  ;;  %v6240_v18 = vlaneseq  ;;  %s9619_s2 = sshll.u32 %s10185_s0, 3  ;;  %v10209_v19 = vmov 1966171168   ;;  %s6227_s0 = sadd.s32 1, %s10185_s0   ;;  %s10185_s0 = sphi %s12825_s0, %s6227_s0   ;;  %v10181_v8 = vphi %v12823_v8, %v13689_v8   ;;  %v10177_v4 = vphi %v12821_v4, %v13688_v4   ;;  %v10173_v0 = vphi %v12819_v0, %v13687_v0   ;;  %v10169_v62 = vphi %v12817_v62, %v13686_v62  }
 0x30a   : > { %v6238_v20 = vunpack.c.l.s4 %v10209_v19  ;;  %v9622_v22 = vcombine.low %v12748_v48, %v12753_v49  ;;  %s6233_s19 = scalar_lea.vmem [#allocation7], %s9619_s2  ;;  %v9623_v27 = vcombine.low %v12758_v50, %v12763_v51  ;;  %p6224_p0 = scmp.ge.s32.totalorder %s6227_s0, 2  }
 0x30b   : > { %9779 = vmatprep.subr.bf16.mxu0 %v9620_v16  ;;  %9875 = vmatprep.subr.bf16.mxu1 %v9620_v16  ;;  %v6241_v21 = vshrl.u32 %v6240_v18, 7  ;;  %v13012_v44 = vld [vmem:[%s13675_s6 + $0xc] sm:$0xf] (%p6224_p0)  ;;  %v13017_v45 = vld [vmem:[%s13675_s6 + $0x10] sm:$0xf] (%p6224_p0)  ;;  %v10013_v49 = vld [vmem:[%s13673_s4] sm:$0xff] (%p6224_p0)  }
 0x30c   : > { %9780 = vmatpush3.bf16.msra.mxu0 %v9620_v16  ;;  %9879 = vmatpush3.bf16.msra.mxu1 %v9620_v16  ;;  %v6239_v24 = vunpack.c.0.s8 %v6238_v20  ;;  %v13022_v46 = vld [vmem:[%s13675_s6 + $0x14] sm:$0xf] (%p6224_p0)  ;;  %v13031_v47 = vld [vmem:[%s13675_s6 + $0x18] sm:$0xf] (%p6224_p0)  ;;  %v13036_v48 = vld [vmem:[%s13675_s6 + $0x1c] sm:$0xf] (%p6224_p0) }
 0x30d   : > { %9781 = vmatprep.subr.bf16.mxu0 %v9621_v17  ;;  %9876 = vmatprep.subr.bf16.mxu1 %v9621_v17  ;;  %v12854_v29 = vsub.s32 0, %v6241_v21  ;;  %v10014_v51 = vld [vmem:[%s13674_s5] sm:$0xff] (%p6224_p0)  }
 0x30e   : > { %v12849_v26 = vsub.s32 %v6239_v24, %v6241_v21 }
 0x30f   : > { %v6234_v23 = vld [vmem:[%s6233_s19] sm:$0xff] }
 0x310   : > { %v6236_v25 = vcombine.high %v6234_v23, %v6234_v23  ;;  %9782 = vmatpush3.bf16.msra.mxu0 %v9621_v17  ;;  %9880 = vmatpush3.bf16.msra.mxu1 %v9621_v17  ;;  %v6243_v28 = vrot.slane %v6234_v23, %v12849_v26 }
 0x311   : > { %9783 = vmatprep.subr.bf16.mxu0 %v9622_v22  ;;  %9877 = vmatprep.subr.bf16.mxu1 %v9622_v22 }
 0x312   : > { %v6250_v30 = vrot.slane %v6236_v25, %v12849_v26  ;;  %v6251_v31 = vcombine.high %v6243_v28, %v6243_v28  ;;  %v6259_v32 = vrot.slane %v6243_v28, %v12849_v26 }
 0x314   : > { %v6252_v33 = vcombine.high %v6250_v30, %v6250_v30  ;;  %v6266_v34 = vrot.slane %v6250_v30, %v12849_v26  ;;  %9784 = vmatpush3.bf16.msra.mxu0 %v9622_v22  ;;  %9881 = vmatpush3.bf16.msra.mxu1 %v9622_v22  ;;  %v6281_v35 = vcombine.high %v6259_v32, %v6259_v32 }
 0x315   : > { %9785 = vmatprep.subr.bf16.mxu0 %v9623_v27  ;;  %v6288_v36 = vrot.slane %v6259_v32, %v12854_v29  ;;  %9878 = vmatprep.subr.bf16.mxu1 %v9623_v27  ;;  %v6273_v37 = vrot.slane %v6251_v31, %v12849_v26 }
 0x316   : > { %v6282_v38 = vcombine.high %v6266_v34, %v6266_v34  ;;  %v6304_v39 = vrot.slane %v6266_v34, %v12854_v29  ;;  %v6280_v40 = vrot.slane %v6252_v33, %v12849_v26  ;;  %v6296_v52 = vrot.slane %v6281_v35, %v12854_v29 }
 0x317   : > { %v6325_v41 = vadd.f32 %v6288_v36, %v12811_v14  ;;  %v6326_v42 = vadd.f32 %v6288_v36, %v12813_v15  ;;  %v6292_v43 = vrot.slane %v6273_v37, %v12854_v29  ;;  %v6283_v25 = vcombine.high %v6273_v37, %v6273_v37 }
 0x318   : > { %9786 = vmatpush3.bf16.msra.mxu0 %v9623_v27  ;;  %9882 = vmatpush3.bf16.msra.mxu1 %v9623_v27  ;;  %v6333_v54 = vadd.f32 %v6304_v39, %v12811_v14  ;;  %v6334_v55 = vadd.f32 %v6304_v39, %v12813_v15  ;;  %v6308_v56 = vrot.slane %v6280_v40, %v12854_v29 }
 0x319   : > { %v6341_v57 = vmul.f32 0.2, %v6325_v41  ;;  %v6342_v58 = vmul.f32 0.2, %v6326_v42  ;;  %v6327_v59 = vadd.f32 %v6292_v43, %v12811_v14  ;;  %v6328_v60 = vadd.f32 %v6292_v43, %v12813_v15  ;;  %9803 = vmatprep.subr.bf16.mxu0 (%p6224_p0), %v10207_v53  ;;  %9815 = vmatprep.subr.bf16.mxu1 (%p6224_p0), %v10207_v53 }
 0x31a   : > { %v6349_v61 = vmul.f32 0.2, %v6333_v54  ;;  %v6350_v63 = vmul.f32 0.2, %v6334_v55  ;;  %v6335_v1 = vadd.f32 %v6308_v56, %v12811_v14  ;;  %v6336_v2 = vadd.f32 %v6308_v56, %v12813_v15 }
 0x31b   : > { %v6357_v3 = vmax.f32 %v6325_v41, %v6341_v57  ;;  %v6358_v5 = vmax.f32 %v6326_v42, %v6342_v58  ;;  %v6343_v6 = vmul.f32 0.2, %v6327_v59  ;;  %v6344_v7 = vmul.f32 0.2, %v6328_v60 }
 0x31c   : > { %v6365_v9 = vmax.f32 %v6333_v54, %v6349_v61  ;;  %v6366_v10 = vmax.f32 %v6334_v55, %v6350_v63  ;;  %v6351_v11 = vmul.f32 0.2, %v6335_v1  ;;  %v6352_v12 = vmul.f32 0.2, %v6336_v2 }
 0x31d   : > { %v6373_v13 = vpack.c.bf16 %v6358_v5, %v6357_v3  ;;  %v6359_v16 = vmax.f32 %v6327_v59, %v6343_v6  ;;  %v6360_v17 = vmax.f32 %v6328_v60, %v6344_v7  ;;  %v6329_v18 = vadd.f32 %v6296_v52, %v12811_v14 }
 0x31e   : > { %v6377_v19 = vpack.c.bf16 %v6366_v10, %v6365_v9  ;;  %v6367_v20 = vmax.f32 %v6335_v1, %v6351_v11  ;;  %v6368_v21 = vmax.f32 %v6336_v2, %v6352_v12  ;;  %v6330_v22 = vadd.f32 %v6296_v52, %v12813_v15 }
 0x31f   : > { %9787 = vmatprep.mubr.msk.bf16.mxu0 %vm6157_vm3, %v6373_v13  ;;  %v6374_v23 = vpack.c.bf16 %v6360_v17, %v6359_v16  ;;  %v6345_v24 = vmul.f32 0.2, %v6329_v18  ;;  %v6312_v27 = vrot.slane %v6282_v38, %v12854_v29  ;;  %v6284_v31 = vcombine.high %v6280_v40, %v6280_v40 }
 0x320   : > { %9795 = vmatprep.mubr.msk.bf16.mxu1 %vm6157_vm3, %v6377_v19  ;;  %v6378_v28 = vpack.c.bf16 %v6368_v21, %v6367_v20  ;;  %v6346_v30 = vmul.f32 0.2, %v6330_v22  ;;  %v6300_v33 = vrot.slane %v6283_v25, %v12854_v29 }
 0x321   : > { %9788 = vmatmul.mubr.msk.bf16.vlgmr.msra.gmra.mrb[0].mxu0 %vm6157_vm3, %v6374_v23  ;;  %v6361_v32 = vmax.f32 %v6329_v18, %v6345_v24  ;;  %v6337_v34 = vadd.f32 %v6312_v27, %v12811_v14  ;;  %v6338_v35 = vadd.f32 %v6312_v27, %v12813_v15  ;;  %v6316_v37 = vrot.slane %v6284_v31, %v12854_v29 }
 0x322   : > { %9796 = vmatmul.mubr.msk.bf16.vlgmr.msra.gmra.mrb[0].mxu1 %vm6157_vm3, %v6378_v28  ;;  %v6362_v36 = vmax.f32 %v6330_v22, %v6346_v30  ;;  %v6331_v38 = vadd.f32 %v6300_v33, %v12811_v14  ;;  %v6332_v39 = vadd.f32 %v6300_v33, %v12813_v15  ;;  %9804 = vmatpush3.bf16.msra.mxu0 (%p6224_p0), %v10013_v49 }
 0x323   : > { %v6353_v41 = vmul.f32 0.2, %v6337_v34  ;;  %v6354_v40 = vmul.f32 0.2, %v6338_v35  ;;  %v6339_v43 = vadd.f32 %v6316_v37, %v12811_v14  ;;  %v6340_v52 = vadd.f32 %v6316_v37, %v12813_v15  ;;  %v10015_v15 = vld [vmem:[%s13673_s4 + $0x8] sm:$0xff] (%p6224_p0)   ;;  %9816 = vmatpush3.bf16.msra.mxu1 (%p6224_p0), %v10014_v51  ;;  %9805 = vmatprep.subr.bf16.mxu0 (%p6224_p0), %v10207_v53 }
 0x324   : > { %v6375_v42 = vpack.c.bf16 %v6362_v36, %v6361_v32  ;;  %v6347_v54 = vmul.f32 0.2, %v6331_v38  ;;  %v6348_v55 = vmul.f32 0.2, %v6332_v39  ;;  %9817 = vmatprep.subr.bf16.mxu1 (%p6224_p0), %v10207_v53 }
 0x325   : > { %v6369_v56 = vmax.f32 %v6337_v34, %v6353_v41  ;;  %v6370_v57 = vmax.f32 %v6338_v35, %v6354_v40  ;;  %v6355_v58 = vmul.f32 0.2, %v6339_v43  ;;  %v6356_v59 = vmul.f32 0.2, %v6340_v52 }
 0x326   : > { %9791 = vmatprep.mubr.msk.bf16.mxu0 %vm6157_vm3, %v6375_v42  ;;  %v6363_v60 = vmax.f32 %v6331_v38, %v6347_v54  ;;  %v6364_v61 = vmax.f32 %v6332_v39, %v6348_v55  ;;  %9806 = vmatpush3.bf16.msra.mxu0 (%p6224_p0), %v10015_v15 }
 0x327   : > { %v6379_v63 = vpack.c.bf16 %v6370_v57, %v6369_v56  ;;  %v6371_v1 = vmax.f32 %v6339_v43, %v6355_v58  ;;  %v6372_v2 = vmax.f32 %v6340_v52, %v6356_v59  ;;  %9807 = vmatprep.subr.bf16.mxu0 (%p6224_p0), %v10207_v53 }
 0x328   : > { %v6376_v3 = vpack.c.bf16 %v6364_v61, %v6363_v60 }
 0x329   : > { %9799 = vmatprep.mubr.msk.bf16.mxu1 %vm6157_vm3, %v6379_v63  ;;  %v6380_v5 = vpack.c.bf16 %v6372_v2, %v6371_v1 }
 0x32a   : > { %9792 = vmatmul.mubr.msk.bf16.gmra.mrb[4].mxu0 %vm6157_vm3, %v6376_v3 }
 0x32b   : > { %9800 = vmatmul.mubr.msk.bf16.gmra.mrb[4].mxu1 %vm6157_vm3, %v6380_v5  ;;  %9811 = vmatprep.mubr.msk.bf16.mxu0 (%p6224_p0), %vm10208_vm1, %v10207_v53 }
 0x32c   :  { %9823 = vmatprep.mubr.msk.bf16.mxu1 (%p6224_p0), %vm10208_vm1, %v10207_v53 }
 0x3f4   : > { %v9789_v6 = vpop.f32.mrb[0].mxu0 }
 0x3f5   : > { %v6463_v7 = vpop.f32.mrb[1].mxu0  ;;  %v12893_v9 = vpop.f32.mrb[0].mxu1  ;;  %v6566_v17 = vmul.f32 %v9789_v6, %v9789_v6  ;;  %v6529_v23 = vsel %vm6157_vm3, %v9789_v6, 0.0  ;;  %v6619_v33 = vsel %vm6157_vm3, %v9789_v6, -inf }
 0x3f6   : > { %v6564_v10 = vmul.f32 %v6463_v7, %v6463_v7  ;;  %v9790_v11 = vpop.f32.mrb[2].mxu0  ;;  %v6495_v12 = vpop.f32.mrb[1].mxu1  ;;  %v6526_v18 = vsel %vm6157_vm3, %v6463_v7, 0.0  ;;  %v6618_v36 = vsel %vm6157_vm3, %v6463_v7, -inf  ;;  %v6626_v42 = vsel %vm6157_vm3, %v12893_v9, -inf }
 0x3f7   : > { %v6466_v13 = vpop.f32.mrb[3].mxu0  ;;  %v12895_v16 = vpop.f32.mrb[2].mxu1  ;;  %v6567_v25 = vmul.f32 %v9790_v11, %v9790_v11  ;;  %v6583_v31 = vsel %vm6157_vm3, %v6566_v17, 0.0  ;;  %v6531_v32 = vsel %vm6157_vm3, %v9790_v11, 0.0  ;;  %v6634_v38 = vsel %vm6157_vm3, %v9790_v11, -inf }
 0x3f8   : > { %v6527_v19 = vsel %vm6157_vm3, %v6466_v13, 0.0  ;;  %v6565_v20 = vmul.f32 %v6466_v13, %v6466_v13  ;;  %v12899_v21 = vpop.f32.mrb[3].mxu1  ;;  %v6580_v24 = vsel %vm6157_vm3, %v6564_v10, 0.0  ;;  %v6633_v39 = vsel %vm6157_vm3, %v6466_v13, -inf }
 0x3f9   : > { %v6528_v22 = vadd.f32 %v6527_v19, %v6526_v18  ;;  %v6585_v37 = vsel %vm6157_vm3, %v6567_v25, 0.0  ;;  %v6624_v54 = vsel %vm6157_vm3, %v6495_v12, -inf  ;;  %v6541_v2 = vsel %vm6157_vm3, %v6495_v12, 0.0 }
 0x3fa   : > { %v6581_v27 = vsel %vm6157_vm3, %v6565_v20, 0.0  ;;  %v6641_v3 = vsel %vm6157_vm3, %v12895_v16, -inf  ;;  %v6639_v13 = vsel %vm6157_vm3, %v12899_v21, -inf }
 0x3fb   : > { %v6530_v28 = vadd.f32 %v6529_v23, %v6528_v22  ;;  %v6582_v30 = vadd.f32 %v6581_v27, %v6580_v24 }
 0x3fd   : > { %v6584_v34 = vadd.f32 %v6583_v31, %v6582_v30  ;;  %v6532_v35 = vadd.f32 %v6531_v32, %v6530_v28  ;;  %v9793_v41 = vpop.f32.mrb[4].mxu0  ;;  %v6572_v30 = vmul.f32 %v6495_v12, %v6495_v12 }
 0x3fe   : > { %v6622_v40 = vsel %vm6157_vm3, %v9793_v41, -inf  ;;  %v6479_v43 = vpop.f32.mrb[5].mxu0  ;;  %v12915_v55 = vpop.f32.mrb[4].mxu1  ;;  %v6570_v23 = vmul.f32 %v9793_v41, %v9793_v41  ;;  %v6537_v28 = vsel %vm6157_vm3, %v9793_v41, 0.0 }
 0x3ff   : > { %v6586_v52 = vadd.f32 %v6585_v37, %v6584_v34  ;;  %v6623_v56 = vmax.f32 %v6619_v33, %v6622_v40  ;;  %v6533_v57 = vsel %vm6157_vm3, %v6479_v43, 0.0  ;;  %v6568_v58 = vmul.f32 %v6479_v43, %v6479_v43  ;;  %v9794_v60 = vpop.f32.mrb[6].mxu0  ;;  %v6511_v61 = vpop.f32.mrb[5].mxu1 }
 0x400   : > { %v6620_v59 = vsel %vm6157_vm3, %v6479_v43, -inf  ;;  %v6534_v63 = vadd.f32 %v6533_v57, %v6532_v35  ;;  %v6482_v5 = vpop.f32.mrb[7].mxu0  ;;  %v12922_v6 = vpop.f32.mrb[6].mxu1  ;;  %v6637_v11 = vsel %vm6157_vm3, %v9794_v60, -inf  ;;  %v6571_v33 = vmul.f32 %v9794_v60, %v9794_v60 }
 0x401   : > { %v6621_v1 = vmax.f32 %v6618_v36, %v6620_v59  ;;  %v6627_v7 = vmax.f32 %v6623_v56, %v6626_v42  ;;  %v6587_v10 = vsel %vm6157_vm3, %v6568_v58, 0.0  ;;  %v6514_v17 = vpop.f32.mrb[7].mxu1  ;;  %v6638_v20 = vmax.f32 %v6634_v38, %v6637_v11 }
 0x402   : > { %v6588_v18 = vadd.f32 %v6587_v10, %v6586_v52  ;;  %v6535_v22 = vsel %vm6157_vm3, %v6482_v5, 0.0  ;;  %v6569_v25 = vmul.f32 %v6482_v5, %v6482_v5  ;;  %v6635_v27 = vsel %vm6157_vm3, %v6482_v5, -inf }
 0x403   : > { %v6625_v19 = vmax.f32 %v6621_v1, %v6624_v54  ;;  %v6536_v24 = vadd.f32 %v6535_v22, %v6534_v63  ;;  %v6642_v31 = vmax.f32 %v6638_v20, %v6641_v3  ;;  %v6636_v32 = vmax.f32 %v6633_v39, %v6635_v27 }
 0x404   : > { %v6589_v35 = vsel %vm6157_vm3, %v6569_v25, 0.0  ;;  %v6630_v36 = vsel %vm6157_vm3, %v12915_v55, -inf  ;;  %v6539_v37 = vsel %vm6157_vm3, %v9794_v60, 0.0  ;;  %v6591_v43 = vsel %vm6157_vm3, %v6570_v23, 0.0 }
 0x405   : > { %v6538_v34 = vadd.f32 %v6537_v28, %v6536_v24  ;;  %v6590_v38 = vadd.f32 %v6589_v35, %v6588_v18  ;;  %v6640_v40 = vmax.f32 %v6636_v32, %v6639_v13  ;;  %v6631_v42 = vmax.f32 %v6627_v7, %v6630_v36 }
 0x406   : > { %v6628_v41 = vsel %vm6157_vm3, %v6511_v61, -inf  ;;  %v6595_v12 = vsel %vm6157_vm3, %v6572_v30, 0.0  ;;  %v6593_v56 = vsel %vm6157_vm3, %v6571_v33, 0.0  ;;  %v6573_v58 = vmul.f32 %v12899_v21, %v12899_v21 }
 0x407   : > { %v6540_v52 = vadd.f32 %v6539_v37, %v6538_v34  ;;  %v6592_v39 = vadd.f32 %v6591_v43, %v6590_v38  ;;  %v6629_v54 = vmax.f32 %v6625_v19, %v6628_v41  ;;  %v6645_v59 = vsel %vm6157_vm3, %v12922_v6, -inf }
 0x408   : > { %v6543_v63 = vsel %vm6157_vm3, %v12899_v21, 0.0  ;;  %v6646_v3 = vmax.f32 %v6642_v31, %v6645_v59  ;;  %v6574_v5 = vmul.f32 %v12893_v9, %v12893_v9  ;;  %v6643_v10 = vsel %vm6157_vm3, %v6514_v17, -inf }
 0x409   : > { %v6542_v57 = vadd.f32 %v6541_v2, %v6540_v52  ;;  %v6594_v60 = vadd.f32 %v6593_v56, %v6592_v39  ;;  %v6632_v1 = vmax.f32 %v6629_v54, %v6631_v42  ;;  %v6545_v2 = vsel %vm6157_vm3, %v12893_v9, 0.0 }
 0x40a   : > { %v6644_v18 = vmax.f32 %v6640_v40, %v6643_v10  ;;  %v6575_v19 = vmul.f32 %v12895_v16, %v12895_v16  ;;  %v6597_v20 = vsel %vm6157_vm3, %v6573_v58, 0.0  ;;  %v6576_v22 = vmul.f32 %v6511_v61, %v6511_v61 }
 0x40b   : > { %v6544_v7 = vadd.f32 %v6543_v63, %v6542_v57  ;;  %v6596_v11 = vadd.f32 %v6595_v12, %v6594_v60  ;;  %v12951_v0 = vmax.f32 %v10173_v0, %v6632_v1   ;;  %v6547_v23 = vsel %vm6157_vm3, %v12895_v16, 0.0 }
 0x40c   : > { %v6549_v25 = vsel %vm6157_vm3, %v6511_v61, 0.0  ;;  %v6647_v27 = vmax.f32 %v6644_v18, %v6646_v3  ;;  %v6599_v9 = vsel %vm6157_vm3, %v6574_v5, 0.0  ;;  %v6603_v33 = vsel %vm6157_vm3, %v6576_v22, 0.0  ;;  %v13005_v18 = vld [vmem:[%s13675_s6 + $0x8] sm:$0xf] (%p6224_p0) }
 0x40d   : > { %v13684_v13 = vmov %v12951_v0  ;;  %v6546_v21 = vadd.f32 %v6545_v2, %v6544_v7  ;;  %v6598_v24 = vadd.f32 %v6597_v20, %v6596_v11  ;;  %v6601_v0 = vsel %vm6157_vm3, %v6575_v19, 0.0  ;;  %v13000_v11 = vld [vmem:[%s13675_s6 + $0x4] sm:$0xf] (%p6224_p0)  ;;  %v10016_v19 = vld [vmem:[%s13674_s5 + $0x8] sm:$0xff] (%p6224_p0)   ;;  %v10017_v20 = vld [vmem:[%s13673_s4 + $0x10] sm:$0xff] (%p6224_p0)  }
 0x40e   : > { %v12961_v62 = vmax.f32 %v10169_v62, %v6647_v27   ;;  %v6577_v34 = vmul.f32 %v6514_v17, %v6514_v17  ;;  %v6551_v16 = vsel %vm6157_vm3, %v6514_v17, 0.0  ;;  %v6578_v61 = vmul.f32 %v12915_v55, %v12915_v55  ;;  %9818 = vmatpush3.bf16.msra.mxu1 (%p6224_p0), %v10016_v19  ;;  %9808 = vmatpush3.bf16.msra.mxu0 (%p6224_p0), %v10017_v20  ;;  %v10020_v27 = vld [vmem:[%s13674_s5 + $0x18] sm:$0xff] (%p6224_p0)  }
 0x40f   : > { %v6548_v28 = vadd.f32 %v6547_v23, %v6546_v21  ;;  %v6600_v30 = vadd.f32 %v6599_v9, %v6598_v24  ;;  %v6553_v37 = vsel %vm6157_vm3, %v12915_v55, 0.0  ;;  %v6555_v43 = vsel %vm6157_vm3, %v12922_v6, 0.0  ;;  %v10018_v23 = vld [vmem:[%s13674_s5 + $0x10] sm:$0xff] (%p6224_p0)   ;;  %9819 = vmatprep.subr.bf16.mxu1 (%p6224_p0), %v10207_v53  ;;  %9809 = vmatprep.subr.bf16.mxu0 (%p6224_p0), %v10207_v53 }
 0x410   : > { %v13685_v31 = vmov %v12961_v62  ;;  %v6579_v62 = vmul.f32 %v12922_v6, %v12922_v6  ;;  %v6605_v42 = vsel %vm6157_vm3, %v6577_v34, 0.0  ;;  %v6607_v17 = vsel %vm6157_vm3, %v6578_v61, 0.0 }
 0x411   : > { %v6550_v32 = vadd.f32 %v6549_v25, %v6548_v28  ;;  %v6602_v35 = vadd.f32 %v6601_v0, %v6600_v30  ;;  %v13687_v0 = vmov %v13684_v13  ;;  %v10019_v25 = vld [vmem:[%s13673_s4 + $0x18] sm:$0xff] (%p6224_p0)   ;;  %s13118_s4 = smov (%p6224_p0), 0  }
 0x412   : > { %v6609_v39 = vsel %vm6157_vm3, %v6579_v62, 0.0  ;;  %v13686_v62 = vmov %v13685_v31  ;;  %9820 = vmatpush3.bf16.msra.mxu1 (%p6224_p0), %v10018_v23  ;;  %9810 = vmatpush3.bf16.msra.mxu0 (%p6224_p0), %v10019_v25 }
 0x413   : > { %v6552_v36 = vadd.f32 %v6551_v16, %v6550_v32  ;;  %v6604_v38 = vadd.f32 %v6603_v33, %v6602_v35  ;;  %9821 = vmatprep.subr.bf16.mxu1 (%p6224_p0), %v10207_v53 }
 0x415   : > { %v6554_v40 = vadd.f32 %v6553_v37, %v6552_v36  ;;  %v6606_v52 = vadd.f32 %v6605_v42, %v6604_v38 }
 0x416   :  { %9822 = vmatpush3.bf16.msra.mxu1 (%p6224_p0), %v10020_v27 }
 0x417   : > { %v6556_v41 = vadd.f32 %v6555_v43, %v6554_v40  ;;  %v6608_v12 = vadd.f32 %v6607_v17, %v6606_v52 }
 0x419   : > { %v6557_v54 = vrot.slane %v6556_v41, 4  ;;  %v6610_v56 = vadd.f32 %v6609_v39, %v6608_v12 }
 0x41b   : > { %v6558_v55 = vadd.f32 %v6557_v54, %v6556_v41  ;;  %v6611_v57 = vrot.slane %v6610_v56, 4 }
 0x41d   : > { %v6559_v58 = vrot.slane %v6558_v55, 2  ;;  %v6612_v59 = vadd.f32 %v6611_v57, %v6610_v56 }
 0x41f   : > { %v6560_v60 = vadd.f32 %v6559_v58, %v6558_v55  ;;  %v6613_v63 = vrot.slane %v6612_v59, 2 }
 0x421   : > { %v6561_v1 = vrot.slane %v6560_v60, 1  ;;  %v6614_v3 = vadd.f32 %v6613_v63, %v6612_v59 }
 0x423   : > { %v6562_v5 = vadd.f32 %v6561_v1, %v6560_v60  ;;  %v6615_v7 = vrot.slane %v6614_v3, 1  ;;  %6226 = sbr.rel (!%p6224_p0) target bundleno = 777 (0x309), region = 319 }
 0x425   : > { %v6563_v6 = vadd.f32 %v10181_v8, %v6562_v5   ;;  %v6616_v10 = vadd.f32 %v6615_v7, %v6614_v3 }
 0x427   : > { %v6617_v2 = vadd.f32 %v10177_v4, %v6616_v10   ;;  %v13689_v8 = vmov %v6563_v6  ;;  %v6650_v50 = vmul.f32 (%p6224_p0), 0.00390625, %v6563_v6 }
 0x428   :  { %v12995_v8 = vld [vmem:[%s13675_s6] sm:$0xf] (%p6224_p0) }
 0x429   : > { %v13688_v4 = vmov %v6617_v2  ;;  %v6651_v14 = vmul.f32 (%p6224_p0), 0.00390625, %v6617_v2  ;;  %v6655_v9 = vsub.f32 (%p6224_p0), %v13684_v13, %v6650_v50  ;;  %v6656_v28 = vsub.f32 (%p6224_p0), %v13685_v31, %v6650_v50 }
 0x42a   :  { %v6652_v4 = vmul.f32 %v6650_v50, %v6650_v50 }
 0x42c   :  { %v6653_v21 = vsub.f32 %v6651_v14, %v6652_v4 }
 0x42e   :  { %v6654_v22 = vmax.f32 %v6653_v21, 0.0 }
 0x430   :  { %v6657_v24 = vadd.f32 1e-05, %v6654_v22 }
 0x432   :  { %10021 = vrsqrt.f32 %v6657_v24 }
 0x43c   :  { %v10022_v30 = vpop.eup %10021 }
 0x43d   :  { %v6659_v0 = vmul.f32 %v10022_v30, %v6655_v9  ;;  %v6660_v32 = vmul.f32 %v10022_v30, %v6656_v28 }
 0x43f   :  { %v6661_v33 = vmul.f32 0.2, %v6659_v0  ;;  %v6662_v34 = vmul.f32 0.2, %v6660_v32 }
 0x441   :  { %v13070_v35 = vmax.f32 %v6659_v0, %v6661_v33  ;;  %v13072_v16 = vmax.f32 %v6660_v32, %v6662_v34 }
 0x443   :  { %v6689_v61 = vpack.c.bf16 %v13072_v16, %v13070_v35 }
 0x445   :  { %9812 = vmatmul.mubr.msk.bf16.vlgmr.msra.gmra.mrb[0].mxu0 %vm6157_vm3, %v6689_v61  ;;  %9824 = vmatmul.mubr.msk.bf16.vlgmr.msra.gmra.mrb[0].mxu1 %vm6157_vm3, %v6689_v61 }
 0x518   :  { %v13078_v36 = vpop.f32.mrb[0].mxu0  ;;  %v13080_v13 = vpop.f32.mrb[0].mxu1 }
 0x519   :  { %v6833_v31 = vmul.f32 %v13078_v36, %v13078_v36  ;;  %v9813_v37 = vpop.f32.mrb[1].mxu0  ;;  %v9825_v38 = vpop.f32.mrb[1].mxu1  ;;  %v6858_v62 = vmul.f32 %v13080_v13, %v13080_v13  ;;  %v6823_v43 = vsel %vm6157_vm3, %v13078_v36, 0.0  ;;  %v6848_v39 = vsel %vm6157_vm3, %v13080_v13, 0.0 }
 0x51a   :  { %v6754_v40 = vpop.f32.mrb[2].mxu0  ;;  %v13086_v42 = vpop.f32.mrb[2].mxu1 }
 0x51b   :  { %v6824_v52 = vsel %vm6157_vm3, %v6754_v40, 0.0  ;;  %v6834_v17 = vmul.f32 %v6754_v40, %v6754_v40  ;;  %v9814_v41 = vpop.f32.mrb[3].mxu0  ;;  %v9826_v12 = vpop.f32.mrb[3].mxu1  ;;  %v6849_v56 = vsel %vm6157_vm3, %v13086_v42, 0.0  ;;  %v6859_v55 = vmul.f32 %v13086_v42, %v13086_v42 }
 0x51c   :  { %v6825_v54 = vadd.f32 %v6824_v52, %v6823_v43  ;;  %v6835_v57 = vsel %vm6157_vm3, %v6833_v31, 0.0  ;;  %v6850_v59 = vadd.f32 %v6849_v56, %v6848_v39  ;;  %v6860_v60 = vsel %vm6157_vm3, %v6858_v62, 0.0 }
 0x51d   :  { %v6836_v58 = vsel %vm6157_vm3, %v6834_v17, 0.0  ;;  %v6861_v3 = vsel %vm6157_vm3, %v6859_v55, 0.0 }
 0x51e   :  { %v6826_v63 = vrot.slane %v6825_v54, 4  ;;  %v6837_v1 = vadd.f32 %v6836_v58, %v6835_v57  ;;  %v6851_v5 = vrot.slane %v6850_v59, 4  ;;  %v6862_v7 = vadd.f32 %v6861_v3, %v6860_v60 }
 0x520   :  { %v6827_v6 = vadd.f32 %v6826_v63, %v6825_v54  ;;  %v6838_v10 = vrot.slane %v6837_v1, 4  ;;  %v6852_v2 = vadd.f32 %v6851_v5, %v6850_v59  ;;  %v6863_v49 = vrot.slane %v6862_v7, 4 }
 0x521   :  { %v13116_v63 = vmov 0.0  }
 0x522   :  { %v6828_v50 = vrot.slane %v6827_v6, 2  ;;  %v6839_v51 = vadd.f32 %v6838_v10, %v6837_v1  ;;  %v6853_v14 = vrot.slane %v6852_v2, 2  ;;  %v6864_v15 = vadd.f32 %v6863_v49, %v6862_v7 }
 0x524   :  { %v6829_v4 = vadd.f32 %v6828_v50, %v6827_v6  ;;  %v6840_v19 = vrot.slane %v6839_v51, 2  ;;  %v6854_v21 = vadd.f32 %v6853_v14, %v6852_v2  ;;  %v6865_v20 = vrot.slane %v6864_v15, 2 }
 0x526   :  { %v6830_v22 = vrot.slane %v6829_v4, 1  ;;  %v6841_v23 = vadd.f32 %v6840_v19, %v6839_v51  ;;  %v6855_v24 = vrot.slane %v6854_v21, 1  ;;  %v6866_v25 = vadd.f32 %v6865_v20, %v6864_v15 }
 0x528   :  { %v6831_v27 = vadd.f32 %v6830_v22, %v6829_v4  ;;  %v6842_v9 = vrot.slane %v6841_v23, 1  ;;  %v6856_v28 = vadd.f32 %v6855_v24, %v6854_v21  ;;  %v6867_v30 = vrot.slane %v6866_v25, 1 }
 0x52a   :  { %v6832_v0 = vmul.f32 0.0625, %v6831_v27  ;;  %v6843_v32 = vadd.f32 %v6842_v9, %v6841_v23  ;;  %v6857_v33 = vmul.f32 0.0625, %v6856_v28  ;;  %v6868_v34 = vadd.f32 %v6867_v30, %v6866_v25 }
 0x52c   :  { %v6844_v61 = vmul.f32 0.0625, %v6843_v32  ;;  %v6845_v31 = vmul.f32 %v6832_v0, %v6832_v0  ;;  %v6876_v37 = vsub.f32 %v13078_v36, %v6832_v0  ;;  %v6877_v38 = vsub.f32 %v6754_v40, %v6832_v0 }
 0x52d   :  { %v6869_v62 = vmul.f32 0.0625, %v6868_v34  ;;  %v6870_v43 = vmul.f32 %v6857_v33, %v6857_v33  ;;  %v6880_v52 = vsub.f32 %v13080_v13, %v6857_v33  ;;  %v6881_v17 = vsub.f32 %v13086_v42, %v6857_v33 }
 0x52e   :  { %v6846_v41 = vsub.f32 %v6844_v61, %v6845_v31  ;;  %v13110_v13 = vmov -inf   ;;  %v13112_v40 = vmov -inf   ;;  %v13114_v42 = vmov 0.0  }
 0x52f   :  { %v6871_v12 = vsub.f32 %v6869_v62, %v6870_v43 }
 0x530   :  { %v6847_v39 = vmax.f32 %v6846_v41, 0.0 }
 0x531   :  { %v6872_v54 = vmax.f32 %v6871_v12, 0.0 }
 0x533   :  { %v6873_v56 = vadd.f32 %v6872_v54, %v6847_v39 }
 0x535   :  { %v6874_v55 = vadd.f32 1e-05, %v6873_v56 }
 0x537   :  { %10023 = vrsqrt.f32 %v6874_v55 }
 0x541   :  { %v10024_v57 = vpop.eup %10023 }
 0x542   :  { %v6878_v58 = vmul.f32 %v10024_v57, %v6876_v37  ;;  %v6879_v59 = vmul.f32 %v10024_v57, %v6877_v38  ;;  %v13104_v60 = vmul.f32 %v10024_v57, %v6880_v52  ;;  %v13106_v36 = vmul.f32 %v10024_v57, %v6881_v17 }
 0x544   :  { %6884 = vst.msk [vmem:[#allocation7] sm:$0xff] %vm6157_vm3, %v6878_v58  ;;  %6885 = vst.msk [vmem:[#allocation7 + $0x8] sm:$0xff] %vm6157_vm3, %v6879_v59 }
 0x545 LB: > { %v9643_v1 = vcombine.low %v12995_v8, %v13000_v11  ;;  %v9644_v3 = vcombine.low %v13005_v18, %v13012_v44  ;;  %s9642_s5 = sshll.u32 %s10205_s4, 3  ;;  %v9645_v5 = vcombine.low %v13017_v45, %v13022_v46  ;;  %v9646_v51 = vcombine.low %v13031_v47, %v13036_v48  ;;  %s6891_s4 = sadd.s32 1, %s10205_s4   ;;  %s10205_s4 = sphi %s13118_s4, %s6891_s4   ;;  %v10201_v63 = vphi %v13116_v63, %v13695_v63   ;;  %v10197_v42 = vphi %v13114_v42, %v13694_v42   ;;  %v10193_v40 = vphi %v13112_v40, %v13693_v40   ;;  %v10189_v13 = vphi %v13110_v13, %v13692_v13  }
 0x546   : > { %s6897_s26 = scalar_lea.vmem [#allocation7], %s9642_s5  ;;  %p6888_p1 = scmp.ge.s32.totalorder %s6891_s4, 2  }
 0x547   : > { %9827 = vmatprep.subr.bf16.mxu0 %v9643_v1  ;;  %9883 = vmatprep.subr.bf16.mxu1 %v9643_v1  ;;  %v10034_v11 = vld [vmem:[%s13677_s8 + $0x8] sm:$0xff] (%p6888_p1)   ;;  %v10035_v44 = vld [vmem:[%s13676_s7 + $0x10] sm:$0xff] (%p6888_p1)   ;;  %v10037_v48 = vld [vmem:[%s13676_s7 + $0x18] sm:$0xff] (%p6888_p1)  }
 0x548   : > { %9828 = vmatpush3.bf16.msra.mxu0 %v9643_v1  ;;  %9887 = vmatpush3.bf16.msra.mxu1 %v9643_v1  ;;  %v10036_v46 = vld [vmem:[%s13677_s8 + $0x10] sm:$0xff] (%p6888_p1)  }
 0x549   : > { %9829 = vmatprep.subr.bf16.mxu0 %v9644_v3  ;;  %9884 = vmatprep.subr.bf16.mxu1 %v9644_v3 }
 0x54b   : > { %v6898_v7 = vld [vmem:[%s6897_s26] sm:$0xff] }
 0x54c   : > { %v6907_v6 = vrot.slane %v6898_v7, %v12849_v26  ;;  %v6900_v10 = vcombine.high %v6898_v7, %v6898_v7  ;;  %9830 = vmatpush3.bf16.msra.mxu0 %v9644_v3  ;;  %9888 = vmatpush3.bf16.msra.mxu1 %v9644_v3 }
 0x54d   : > { %9831 = vmatprep.subr.bf16.mxu0 %v9645_v5  ;;  %9885 = vmatprep.subr.bf16.mxu1 %v9645_v5 }
 0x54e   : > { %v6915_v2 = vcombine.high %v6907_v6, %v6907_v6  ;;  %v6923_v49 = vrot.slane %v6907_v6, %v12849_v26  ;;  %v6914_v50 = vrot.slane %v6900_v10, %v12849_v26 }
 0x550   : > { %v6952_v14 = vrot.slane %v6923_v49, %v12854_v29  ;;  %v6937_v15 = vrot.slane %v6915_v2, %v12849_v26  ;;  %v6916_v4 = vcombine.high %v6914_v50, %v6914_v50  ;;  %v6945_v19 = vcombine.high %v6923_v49, %v6923_v49  ;;  %9832 = vmatpush3.bf16.msra.mxu0 %v9645_v5 }
 0x551   : > { %v6930_v21 = vrot.slane %v6914_v50, %v12849_v26  ;;  %9889 = vmatpush3.bf16.msra.mxu1 %v9645_v5  ;;  %9833 = vmatprep.subr.bf16.mxu0 %v9646_v51 }
 0x552   : > { %v6989_v20 = vadd.f32 %v6952_v14, %v13104_v60  ;;  %v6990_v22 = vadd.f32 %v6952_v14, %v13106_v36  ;;  %v6956_v23 = vrot.slane %v6937_v15, %v12854_v29  ;;  %9886 = vmatprep.subr.bf16.mxu1 %v9646_v51  ;;  %v6944_v27 = vrot.slane %v6916_v4, %v12849_v26  ;;  %v10033_v26 = vld [vmem:[%s13676_s7 + $0x8] sm:$0xff] (%p6888_p1)  }
 0x553   : > { %v6946_v24 = vcombine.high %v6930_v21, %v6930_v21  ;;  %v6968_v25 = vrot.slane %v6930_v21, %v12854_v29  ;;  %v6960_v61 = vrot.slane %v6945_v19, %v12854_v29  ;;  %v6947_v7 = vcombine.high %v6937_v15, %v6937_v15 }
 0x554   : > { %v7005_v9 = vmul.f32 0.2, %v6989_v20  ;;  %v7006_v28 = vmul.f32 0.2, %v6990_v22  ;;  %v6991_v30 = vadd.f32 %v6956_v23, %v13104_v60  ;;  %v6992_v0 = vadd.f32 %v6956_v23, %v13106_v36  ;;  %9834 = vmatpush3.bf16.msra.mxu0 %v9646_v51 }
 0x555   : > { %v6997_v32 = vadd.f32 %v6968_v25, %v13104_v60  ;;  %v6998_v33 = vadd.f32 %v6968_v25, %v13106_v36  ;;  %v6972_v34 = vrot.slane %v6944_v27, %v12854_v29  ;;  %9890 = vmatpush3.bf16.msra.mxu1 %v9646_v51  ;;  %v6993_v56 = vadd.f32 %v6960_v61, %v13104_v60 }
 0x556   : > { %v7021_v31 = vmax.f32 %v6989_v20, %v7005_v9  ;;  %v7022_v37 = vmax.f32 %v6990_v22, %v7006_v28  ;;  %v7007_v38 = vmul.f32 0.2, %v6991_v30  ;;  %v7008_v62 = vmul.f32 0.2, %v6992_v0  ;;  %9851 = vmatprep.subr.bf16.mxu0 (%p6888_p1), %v10207_v53  ;;  %9863 = vmatprep.subr.bf16.mxu1 (%p6888_p1), %v10207_v53 }
 0x557   : > { %v7013_v43 = vmul.f32 0.2, %v6997_v32  ;;  %v7014_v52 = vmul.f32 0.2, %v6998_v33  ;;  %v6999_v17 = vadd.f32 %v6972_v34, %v13104_v60  ;;  %v7000_v41 = vadd.f32 %v6972_v34, %v13106_v36 }
 0x558   : > { %v7037_v12 = vpack.c.bf16 %v7022_v37, %v7021_v31  ;;  %v7023_v39 = vmax.f32 %v6991_v30, %v7007_v38  ;;  %v7024_v54 = vmax.f32 %v6992_v0, %v7008_v62  ;;  %v6994_v3 = vadd.f32 %v6960_v61, %v13106_v36 }
 0x559   : > { %v7029_v55 = vmax.f32 %v6997_v32, %v7013_v43  ;;  %v7030_v57 = vmax.f32 %v6998_v33, %v7014_v52  ;;  %v7015_v58 = vmul.f32 0.2, %v6999_v17  ;;  %v7016_v59 = vmul.f32 0.2, %v7000_v41 }
 0x55a   : > { %9835 = vmatprep.mubr.msk.bf16.mxu0 %vm6157_vm3, %v7037_v12  ;;  %v7038_v1 = vpack.c.bf16 %v7024_v54, %v7023_v39  ;;  %v7009_v5 = vmul.f32 0.2, %v6993_v56  ;;  %v6976_v49 = vrot.slane %v6946_v24, %v12854_v29  ;;  %v7010_v50 = vmul.f32 0.2, %v6994_v3 }
 0x55b   : > { %v7041_v6 = vpack.c.bf16 %v7030_v57, %v7029_v55  ;;  %v7031_v10 = vmax.f32 %v6999_v17, %v7015_v58  ;;  %v7032_v2 = vmax.f32 %v7000_v41, %v7016_v59  ;;  %v6964_v14 = vrot.slane %v6947_v7, %v12854_v29 }
 0x55c   : > { %9836 = vmatmul.mubr.msk.bf16.vlgmr.msra.gmra.mrb[0].mxu0 %vm6157_vm3, %v7038_v1  ;;  %v7025_v51 = vmax.f32 %v6993_v56, %v7009_v5  ;;  %v6948_v4 = vcombine.high %v6944_v27, %v6944_v27  ;;  %v7001_v21 = vadd.f32 %v6976_v49, %v13104_v60  ;;  %v7002_v20 = vadd.f32 %v6976_v49, %v13106_v36 }
 0x55d   : > { %9843 = vmatprep.mubr.msk.bf16.mxu1 %vm6157_vm3, %v7041_v6  ;;  %v7042_v19 = vpack.c.bf16 %v7032_v2, %v7031_v10  ;;  %v7026_v15 = vmax.f32 %v6994_v3, %v7010_v50  ;;  %v6995_v22 = vadd.f32 %v6964_v14, %v13104_v60  ;;  %v6996_v23 = vadd.f32 %v6964_v14, %v13106_v36 }
 0x55e   : > { %v6980_v24 = vrot.slane %v6948_v4, %v12854_v29  ;;  %v7017_v25 = vmul.f32 0.2, %v7001_v21  ;;  %v7018_v9 = vmul.f32 0.2, %v7002_v20 }
 0x55f   : > { %9844 = vmatmul.mubr.msk.bf16.vlgmr.msra.gmra.mrb[0].mxu1 %vm6157_vm3, %v7042_v19  ;;  %v7039_v28 = vpack.c.bf16 %v7026_v15, %v7025_v51  ;;  %v7011_v27 = vmul.f32 0.2, %v6995_v22  ;;  %v7012_v30 = vmul.f32 0.2, %v6996_v23 }
 0x560   : > { %v7003_v0 = vadd.f32 %v6980_v24, %v13104_v60  ;;  %v7033_v32 = vmax.f32 %v7001_v21, %v7017_v25  ;;  %v7034_v33 = vmax.f32 %v7002_v20, %v7018_v9  ;;  %v7004_v34 = vadd.f32 %v6980_v24, %v13106_v36  ;;  %v10038_v60 = vld [vmem:[%s13677_s8 + $0x18] sm:$0xff] (%p6888_p1)  }
 0x561   : > { %9839 = vmatprep.mubr.msk.bf16.mxu0 %vm6157_vm3, %v7039_v28  ;;  %v7027_v61 = vmax.f32 %v6995_v22, %v7011_v27  ;;  %v7028_v31 = vmax.f32 %v6996_v23, %v7012_v30 }
 0x562   : > { %v7019_v37 = vmul.f32 0.2, %v7003_v0  ;;  %v7043_v38 = vpack.c.bf16 %v7034_v33, %v7033_v32  ;;  %v7020_v62 = vmul.f32 0.2, %v7004_v34 }
 0x563   : > { %v7040_v43 = vpack.c.bf16 %v7028_v31, %v7027_v61 }
 0x564   : > { %v7035_v52 = vmax.f32 %v7003_v0, %v7019_v37  ;;  %9847 = vmatprep.mubr.msk.bf16.mxu1 %vm6157_vm3, %v7043_v38  ;;  %v7036_v17 = vmax.f32 %v7004_v34, %v7020_v62 }
 0x565   : > { %9840 = vmatmul.mubr.msk.bf16.gmra.mrb[4].mxu0 %vm6157_vm3, %v7040_v43 }
 0x566   : > { %v7044_v41 = vpack.c.bf16 %v7036_v17, %v7035_v52  ;;  %9859 = vmatprep.mubr.msk.bf16.mxu0 (%p6888_p1), %vm10208_vm1, %v10207_v53 }
 0x568   : > { %9848 = vmatmul.mubr.msk.bf16.gmra.mrb[4].mxu1 %vm6157_vm3, %v7044_v41 }
 0x569   :  { %9871 = vmatprep.mubr.msk.bf16.mxu1 (%p6888_p1), %vm10208_vm1, %v10207_v53 }
 0x62f   : > { %v9837_v12 = vpop.f32.mrb[0].mxu0 }
 0x630   : > { %v7127_v39 = vpop.f32.mrb[1].mxu0  ;;  %v7230_v58 = vmul.f32 %v9837_v12, %v9837_v12  ;;  %v7193_v10 = vsel %vm6157_vm3, %v9837_v12, 0.0  ;;  %v7283_v20 = vsel %vm6157_vm3, %v9837_v12, -inf }
 0x631   : > { %v7228_v54 = vmul.f32 %v7127_v39, %v7127_v39  ;;  %v9838_v56 = vpop.f32.mrb[2].mxu0  ;;  %v7190_v59 = vsel %vm6157_vm3, %v7127_v39, 0.0  ;;  %v7282_v23 = vsel %vm6157_vm3, %v7127_v39, -inf }
 0x632   : > { %v7130_v55 = vpop.f32.mrb[3].mxu0  ;;  %v13182_v57 = vpop.f32.mrb[0].mxu1  ;;  %v7231_v49 = vmul.f32 %v9838_v56, %v9838_v56  ;;  %v7247_v19 = vsel %vm6157_vm3, %v7230_v58, 0.0  ;;  %v7195_v21 = vsel %vm6157_vm3, %v9838_v56, 0.0  ;;  %v7298_v25 = vsel %vm6157_vm3, %v9838_v56, -inf }
 0x633   : > { %v7191_v1 = vsel %vm6157_vm3, %v7130_v55, 0.0  ;;  %v7229_v3 = vmul.f32 %v7130_v55, %v7130_v55  ;;  %v7159_v5 = vpop.f32.mrb[1].mxu1  ;;  %v7244_v2 = vsel %vm6157_vm3, %v7228_v54, 0.0  ;;  %v7297_v9 = vsel %vm6157_vm3, %v7130_v55, -inf }
 0x634   : > { %v7192_v7 = vadd.f32 %v7191_v1, %v7190_v59  ;;  %v13186_v6 = vpop.f32.mrb[2].mxu1  ;;  %v7249_v24 = vsel %vm6157_vm3, %v7231_v49, 0.0  ;;  %v7290_v30 = vsel %vm6157_vm3, %v13182_v57, -inf  ;;  %v7288_v33 = vsel %vm6157_vm3, %v7159_v5, -inf }
 0x635   : > { %v7245_v50 = vsel %vm6157_vm3, %v7229_v3, 0.0  ;;  %v13191_v51 = vpop.f32.mrb[3].mxu1  ;;  %v7205_v52 = vsel %vm6157_vm3, %v7159_v5, 0.0  ;;  %v7305_v17 = vsel %vm6157_vm3, %v13186_v6, -inf }
 0x636   : > { %v7194_v14 = vadd.f32 %v7193_v10, %v7192_v7  ;;  %v7246_v4 = vadd.f32 %v7245_v50, %v7244_v2  ;;  %v7303_v55 = vsel %vm6157_vm3, %v13191_v51, -inf }
 0x638   : > { %v7248_v15 = vadd.f32 %v7247_v19, %v7246_v4  ;;  %v7196_v22 = vadd.f32 %v7195_v21, %v7194_v14  ;;  %v9841_v28 = vpop.f32.mrb[4].mxu0  ;;  %v7236_v21 = vmul.f32 %v7159_v5, %v7159_v5 }
 0x639   : > { %v7286_v27 = vsel %vm6157_vm3, %v9841_v28, -inf  ;;  %v7143_v0 = vpop.f32.mrb[5].mxu0  ;;  %v7234_v2 = vmul.f32 %v9841_v28, %v9841_v28  ;;  %v7201_v19 = vsel %vm6157_vm3, %v9841_v28, 0.0 }
 0x63a   : > { %v7250_v32 = vadd.f32 %v7249_v24, %v7248_v15  ;;  %v7287_v34 = vmax.f32 %v7283_v20, %v7286_v27  ;;  %v7197_v61 = vsel %vm6157_vm3, %v7143_v0, 0.0  ;;  %v7232_v31 = vmul.f32 %v7143_v0, %v7143_v0  ;;  %v9842_v38 = vpop.f32.mrb[6].mxu0 }
 0x63b   : > { %v7284_v37 = vsel %vm6157_vm3, %v7143_v0, -inf  ;;  %v7198_v62 = vadd.f32 %v7197_v61, %v7196_v22  ;;  %v7146_v41 = vpop.f32.mrb[7].mxu0  ;;  %v13209_v12 = vpop.f32.mrb[4].mxu1  ;;  %v7301_v56 = vsel %vm6157_vm3, %v9842_v38, -inf  ;;  %v7235_v22 = vmul.f32 %v9842_v38, %v9842_v38 }
 0x63c   : > { %v7285_v43 = vmax.f32 %v7282_v23, %v7284_v37  ;;  %v7291_v39 = vmax.f32 %v7287_v34, %v7290_v30  ;;  %v7251_v54 = vsel %vm6157_vm3, %v7232_v31, 0.0  ;;  %v7175_v58 = vpop.f32.mrb[5].mxu1  ;;  %v7302_v3 = vmax.f32 %v7298_v25, %v7301_v56 }
 0x63d   : > { %v7252_v59 = vadd.f32 %v7251_v54, %v7250_v32  ;;  %v7199_v7 = vsel %vm6157_vm3, %v7146_v41, 0.0  ;;  %v13216_v10 = vpop.f32.mrb[6].mxu1  ;;  %v7233_v50 = vmul.f32 %v7146_v41, %v7146_v41  ;;  %v7299_v14 = vsel %vm6157_vm3, %v7146_v41, -inf }
 0x63e   : > { %v7289_v1 = vmax.f32 %v7285_v43, %v7288_v33  ;;  %v7200_v49 = vadd.f32 %v7199_v7, %v7198_v62  ;;  %v7178_v4 = vpop.f32.mrb[7].mxu1  ;;  %v7306_v20 = vmax.f32 %v7302_v3, %v7305_v17  ;;  %v7300_v15 = vmax.f32 %v7297_v9, %v7299_v14 }
 0x63f   : > { %v7253_v24 = vsel %vm6157_vm3, %v7233_v50, 0.0  ;;  %v7294_v25 = vsel %vm6157_vm3, %v13209_v12, -inf  ;;  %v7203_v27 = vsel %vm6157_vm3, %v9842_v38, 0.0  ;;  %v7255_v33 = vsel %vm6157_vm3, %v7234_v2, 0.0 }
 0x640   : > { %v7202_v23 = vadd.f32 %v7201_v19, %v7200_v49  ;;  %v7254_v30 = vadd.f32 %v7253_v24, %v7252_v59  ;;  %v7304_v0 = vmax.f32 %v7300_v15, %v7303_v55  ;;  %v7295_v32 = vmax.f32 %v7291_v39, %v7294_v25 }
 0x641   : > { %v7292_v28 = vsel %vm6157_vm3, %v7175_v58, -inf  ;;  %v7259_v5 = vsel %vm6157_vm3, %v7236_v21, 0.0  ;;  %v7257_v31 = vsel %vm6157_vm3, %v7235_v22, 0.0  ;;  %v7237_v62 = vmul.f32 %v13191_v51, %v13191_v51 }
 0x642   : > { %v7204_v34 = vadd.f32 %v7203_v27, %v7202_v23  ;;  %v7256_v9 = vadd.f32 %v7255_v33, %v7254_v30  ;;  %v7293_v61 = vmax.f32 %v7289_v1, %v7292_v28  ;;  %v7309_v38 = vsel %vm6157_vm3, %v13216_v10, -inf }
 0x643   : > { %v7207_v17 = vsel %vm6157_vm3, %v13191_v51, 0.0  ;;  %v7310_v39 = vmax.f32 %v7306_v20, %v7309_v38  ;;  %v7238_v54 = vmul.f32 %v13182_v57, %v13182_v57  ;;  %v7307_v55 = vsel %vm6157_vm3, %v7178_v4, -inf }
 0x644   : > { %v7206_v37 = vadd.f32 %v7205_v52, %v7204_v34  ;;  %v7258_v43 = vadd.f32 %v7257_v31, %v7256_v9  ;;  %v7296_v41 = vmax.f32 %v7293_v61, %v7295_v32  ;;  %v7209_v52 = vsel %vm6157_vm3, %v13182_v57, 0.0 }
 0x645   : > { %v7308_v3 = vmax.f32 %v7304_v0, %v7307_v55  ;;  %v7239_v7 = vmul.f32 %v13186_v6, %v13186_v6  ;;  %v7261_v2 = vsel %vm6157_vm3, %v7237_v62, 0.0  ;;  %v7240_v49 = vmul.f32 %v7175_v58, %v7175_v58 }
 0x646   : > { %v7208_v56 = vadd.f32 %v7207_v17, %v7206_v37  ;;  %v7260_v59 = vadd.f32 %v7259_v5, %v7258_v43  ;;  %v13240_v40 = vmax.f32 %v10193_v40, %v7296_v41   ;;  %v7211_v50 = vsel %vm6157_vm3, %v13186_v6, 0.0 }
 0x647   : > { %v7213_v19 = vsel %vm6157_vm3, %v7175_v58, 0.0  ;;  %v7311_v21 = vmax.f32 %v7308_v3, %v7310_v39  ;;  %v7263_v57 = vsel %vm6157_vm3, %v7238_v54, 0.0  ;;  %v7267_v24 = vsel %vm6157_vm3, %v7240_v49, 0.0 }
 0x648   : > { %v13690_v1 = vmov %v13240_v40  ;;  %v7210_v51 = vadd.f32 %v7209_v52, %v7208_v56  ;;  %v7262_v14 = vadd.f32 %v7261_v2, %v7260_v59  ;;  %v7265_v40 = vsel %vm6157_vm3, %v7239_v7, 0.0 }
 0x649   : > { %v13250_v13 = vmax.f32 %v10189_v13, %v7311_v21   ;;  %v7241_v25 = vmul.f32 %v7178_v4, %v7178_v4  ;;  %v7215_v6 = vsel %vm6157_vm3, %v7178_v4, 0.0  ;;  %v7242_v58 = vmul.f32 %v13209_v12, %v13209_v12 }
 0x64a   : > { %v7212_v20 = vadd.f32 %v7211_v50, %v7210_v51  ;;  %v7264_v15 = vadd.f32 %v7263_v57, %v7262_v14  ;;  %v7217_v0 = vsel %vm6157_vm3, %v13209_v12, 0.0  ;;  %v7219_v28 = vsel %vm6157_vm3, %v13216_v10, 0.0  ;;  %v10032_v51 = vld [vmem:[%s13677_s8] sm:$0xff] (%p6888_p1)  }
 0x64b   : > { %v13691_v22 = vmov %v13250_v13  ;;  %v7243_v13 = vmul.f32 %v13216_v10, %v13216_v10  ;;  %v7269_v34 = vsel %vm6157_vm3, %v7241_v25, 0.0  ;;  %v7271_v4 = vsel %vm6157_vm3, %v7242_v58, 0.0  ;;  %9864 = vmatpush3.bf16.msra.mxu1 (%p6888_p1), %v10032_v51 }
 0x64c   : > { %v7214_v23 = vadd.f32 %v7213_v19, %v7212_v20  ;;  %v7266_v27 = vadd.f32 %v7265_v40, %v7264_v15  ;;  %v13693_v40 = vmov %v13690_v1  ;;  %9865 = vmatprep.subr.bf16.mxu1 (%p6888_p1), %v10207_v53 }
 0x64d   : > { %v7273_v31 = vsel %vm6157_vm3, %v7243_v13, 0.0  ;;  %v13692_v13 = vmov %v13691_v22 }
 0x64e   : > { %v7216_v30 = vadd.f32 %v7215_v6, %v7214_v23  ;;  %v7268_v32 = vadd.f32 %v7267_v24, %v7266_v27 }
 0x64f   :  { %9866 = vmatpush3.bf16.msra.mxu1 (%p6888_p1), %v10034_v11 }
 0x650   : > { %v7218_v33 = vadd.f32 %v7217_v0, %v7216_v30  ;;  %v7270_v5 = vadd.f32 %v7269_v34, %v7268_v32  ;;  %9867 = vmatprep.subr.bf16.mxu1 (%p6888_p1), %v10207_v53 }
 0x652   : > { %v7220_v9 = vadd.f32 %v7219_v28, %v7218_v33  ;;  %v7272_v61 = vadd.f32 %v7271_v4, %v7270_v5 }
 0x653   :  { %9868 = vmatpush3.bf16.msra.mxu1 (%p6888_p1), %v10036_v46 }
 0x654   : > { %v7221_v37 = vrot.slane %v7220_v9, 4  ;;  %v7274_v62 = vadd.f32 %v7273_v31, %v7272_v61  ;;  %9869 = vmatprep.subr.bf16.mxu1 (%p6888_p1), %v10207_v53 }
 0x656   : > { %v7222_v12 = vadd.f32 %v7221_v37, %v7220_v9  ;;  %v7275_v38 = vrot.slane %v7274_v62, 4 }
 0x657   :  { %9870 = vmatpush3.bf16.msra.mxu1 (%p6888_p1), %v10038_v60 }
 0x658   : > { %v7223_v43 = vrot.slane %v7222_v12, 2  ;;  %v7276_v17 = vadd.f32 %v7275_v38, %v7274_v62 }
 0x65a   : > { %v7224_v41 = vadd.f32 %v7223_v43, %v7222_v12  ;;  %v7277_v39 = vrot.slane %v7276_v17, 2 }
 0x65c   : > { %v7225_v54 = vrot.slane %v7224_v41, 1  ;;  %v7278_v56 = vadd.f32 %v7277_v39, %v7276_v17 }
 0x65e   : > { %v7226_v55 = vadd.f32 %v7225_v54, %v7224_v41  ;;  %v7279_v52 = vrot.slane %v7278_v56, 1  ;;  %6890 = sbr.rel (!%p6888_p1) target bundleno = 1349 (0x545), region = 330 }
 0x660   : > { %v7227_v10 = vadd.f32 %v10201_v63, %v7226_v55   ;;  %v7280_v59 = vadd.f32 %v7279_v52, %v7278_v56 }
 0x662   : > { %v7281_v3 = vadd.f32 %v10197_v42, %v7280_v59   ;;  %v13695_v63 = vmov %v7227_v10  ;;  %v7314_v7 = vmul.f32 (%p6888_p1), 0.00390625, %v7227_v10 }
 0x663   :  { %v10031_v63 = vld [vmem:[%s13676_s7] sm:$0xff] (%p6888_p1)   ;;  %s10210_s7 = smov (%p6888_p1), 64  }
 0x664   : > { %v13694_v42 = vmov %v7281_v3  ;;  %v7315_v2 = vmul.f32 (%p6888_p1), 0.00390625, %v7281_v3  ;;  %9852 = vmatpush3.bf16.msra.mxu0 (%p6888_p1), %v10031_v63  ;;  %v7316_v8 = vmul.f32 (%p6888_p1), %v7314_v7, %v7314_v7  ;;  %v7319_v36 = vsub.f32 (%p6888_p1), %v13690_v1, %v7314_v7 }
 0x665   :  { %9853 = vmatprep.subr.bf16.mxu0 %v10207_v53  ;;  %v7320_v42 = vsub.f32 %v13691_v22, %v7314_v7 }
 0x666   :  { %v7317_v18 = vsub.f32 %v7315_v2, %v7316_v8 }
 0x668   :  { %9854 = vmatpush3.bf16.msra.mxu0 %v10033_v26  ;;  %v7318_v45 = vmax.f32 %v7317_v18, 0.0 }
 0x669   :  { %9855 = vmatprep.subr.bf16.mxu0 %v10207_v53 }
 0x66a   :  { %v7321_v47 = vadd.f32 1e-05, %v7318_v45 }
 0x66c   :  { %9856 = vmatpush3.bf16.msra.mxu0 %v10035_v44  ;;  %10039 = vrsqrt.f32 %v7321_v47 }
 0x66d   :  { %9857 = vmatprep.subr.bf16.mxu0 %v10207_v53 }
 0x670   :  { %9858 = vmatpush3.bf16.msra.mxu0 %v10037_v48 }
 0x676   :  { %v10040_v49 = vpop.eup %10039 }
 0x677   :  { %v7323_v50 = vmul.f32 %v10040_v49, %v7319_v36  ;;  %v7324_v14 = vmul.f32 %v10040_v49, %v7320_v42 }
 0x679   :  { %v7325_v19 = vmul.f32 0.2, %v7323_v50  ;;  %v7326_v21 = vmul.f32 0.2, %v7324_v14 }
 0x67b   :  { %v7327_v57 = vmax.f32 %v7323_v50, %v7325_v19  ;;  %v7328_v20 = vmax.f32 %v7324_v14, %v7326_v21 }
 0x67d   :  { %v7345_v15 = vpack.c.bf16 %v7328_v20, %v7327_v57  ;;  %v10026_v40 = vpack.i.bf16 %v7328_v20, %v7327_v57 }
 0x67f   :  { %9860 = vmatmul.mubr.msk.bf16.vlgmr.msra.gmra.mrb[0].mxu0 %vm6157_vm3, %v7345_v15  ;;  %9872 = vmatmul.mubr.msk.bf16.vlgmr.msra.gmra.mrb[0].mxu1 %vm6157_vm3, %v7345_v15 }
 0x680   :  { %10027 = vrot.lane.b32.xlu0 %v10026_v40, %s10210_s7 }
 0x6f2   :  { %v10028_v53 = vpop.permute.xlu0 %10027 }
 0x6f3   :  { %v10030_v23 = vunpack.i.h.bf16 %v10028_v53  ;;  %v10029_v1 = vunpack.i.l.bf16 %v10028_v53 }
 0x6f5   :  { %v7561_v22 = vsel %vm6157_vm3, %v13072_v16, %v10030_v23  ;;  %v7560_v24 = vsel %vm6157_vm3, %v13070_v35, %v10029_v1 }
 0x6f6   :  { %v13325_v25 = vpack.c.bf16 %v7561_v22, %v7560_v24 }
 0x752   :  { %v7407_v27 = vpop.f32.mrb[0].mxu0  ;;  %v13327_v6 = vpop.f32.mrb[0].mxu1 }
 0x753   :  { %v7489_v58 = vmul.f32 %v7407_v27, %v7407_v27  ;;  %v9861_v30 = vpop.f32.mrb[1].mxu0  ;;  %v9873_v0 = vpop.f32.mrb[1].mxu1  ;;  %v7479_v32 = vsel %vm6157_vm3, %v7407_v27, 0.0  ;;  %v7532_v13 = vsel %vm6157_vm3, %v7407_v27, -inf  ;;  %v7514_v16 = vmul.f32 %v13327_v6, %v13327_v6 }
 0x754   :  { %v7410_v33 = vpop.f32.mrb[2].mxu0  ;;  %v7475_v34 = vpop.f32.mrb[2].mxu1  ;;  %v7504_v61 = vsel %vm6157_vm3, %v13327_v6, 0.0 }
 0x755   :  { %v7480_v28 = vsel %vm6157_vm3, %v7410_v33, 0.0  ;;  %v7490_v35 = vmul.f32 %v7410_v33, %v7410_v33  ;;  %v7533_v5 = vsel %vm6157_vm3, %v7410_v33, -inf  ;;  %v9862_v4 = vpop.f32.mrb[3].mxu0  ;;  %v9874_v9 = vpop.f32.mrb[3].mxu1  ;;  %v7505_v62 = vsel %vm6157_vm3, %v7475_v34, 0.0 }
 0x756   :  { %v7481_v31 = vadd.f32 %v7480_v28, %v7479_v32  ;;  %v7534_v37 = vmax.f32 %v7532_v13, %v7533_v5  ;;  %v7491_v12 = vsel %vm6157_vm3, %v7489_v58, 0.0  ;;  %v7506_v43 = vadd.f32 %v7505_v62, %v7504_v61 }
 0x757   :  { %v7492_v38 = vsel %vm6157_vm3, %v7490_v35, 0.0  ;;  %v7515_v17 = vmul.f32 %v7475_v34, %v7475_v34  ;;  %v7516_v56 = vsel %vm6157_vm3, %v7514_v16, 0.0 }
 0x758   :  { %v7482_v41 = vrot.slane %v7481_v31, 4  ;;  %v7493_v39 = vadd.f32 %v7492_v38, %v7491_v12  ;;  %v7535_v54 = vrot.slane %v7534_v37, 4  ;;  %v7507_v55 = vrot.slane %v7506_v43, 4 }
 0x759   :  { %v7517_v52 = vsel %vm6157_vm3, %v7515_v17, 0.0 }
 0x75a   :  { %v7483_v10 = vadd.f32 %v7482_v41, %v7481_v31  ;;  %v7494_v59 = vrot.slane %v7493_v39, 4  ;;  %v7536_v3 = vmax.f32 %v7534_v37, %v7535_v54  ;;  %v7518_v63 = vadd.f32 %v7517_v52, %v7516_v56 }
 0x75b   :  { %v7508_v7 = vadd.f32 %v7507_v55, %v7506_v43 }
 0x75c   :  { %v7484_v51 = vrot.slane %v7483_v10, 2  ;;  %v7495_v2 = vadd.f32 %v7494_v59, %v7493_v39  ;;  %v7537_v26 = vrot.slane %v7536_v3, 2  ;;  %v7519_v8 = vrot.slane %v7518_v63, 4 }
 0x75d   :  { %v7509_v11 = vrot.slane %v7508_v7, 2 }
 0x75e   :  { %v7485_v18 = vadd.f32 %v7484_v51, %v7483_v10  ;;  %v7496_v44 = vrot.slane %v7495_v2, 2  ;;  %v7538_v45 = vmax.f32 %v7536_v3, %v7537_v26  ;;  %v7520_v46 = vadd.f32 %v7519_v8, %v7518_v63 }
 0x75f   :  { %v7510_v47 = vadd.f32 %v7509_v11, %v7508_v7 }
 0x760   :  { %v7486_v48 = vrot.slane %v7485_v18, 1  ;;  %v7497_v60 = vadd.f32 %v7496_v44, %v7495_v2  ;;  %v7539_v36 = vrot.slane %v7538_v45, 1  ;;  %v7521_v42 = vrot.slane %v7520_v46, 2 }
 0x761   :  { %v7511_v49 = vrot.slane %v7510_v47, 1 }
 0x762   :  { %v7498_v50 = vrot.slane %v7497_v60, 1  ;;  %v7487_v14 = vadd.f32 %v7486_v48, %v7485_v18  ;;  %v7522_v19 = vadd.f32 %v7521_v42, %v7520_v46  ;;  %v7540_v40 = vmax.f32 %v7538_v45, %v7539_v36 }
 0x763   :  { %v7512_v21 = vadd.f32 %v7511_v49, %v7510_v47 }
 0x764   :  { %v7499_v57 = vadd.f32 %v7498_v50, %v7497_v60  ;;  %v7488_v20 = vmul.f32 0.0625, %v7487_v14  ;;  %v7523_v15 = vrot.slane %v7522_v19, 1 }
 0x765   :  { %v7513_v53 = vmul.f32 0.0625, %v7512_v21 }
 0x766   :  { %v7500_v23 = vmul.f32 0.0625, %v7499_v57  ;;  %v7501_v1 = vmul.f32 %v7488_v20, %v7488_v20  ;;  %v7524_v22 = vadd.f32 %v7523_v15, %v7522_v19  ;;  %v7541_v24 = vsub.f32 %v7540_v40, %v7488_v20 }
 0x767   :  { %v7526_v27 = vmul.f32 %v7513_v53, %v7513_v53  ;;  %v7542_v58 = vsub.f32 %v13327_v6, %v7513_v53  ;;  %v7543_v30 = vsub.f32 %v7475_v34, %v7513_v53 }
 0x768   :  { %v7502_v0 = vsub.f32 %v7500_v23, %v7501_v1  ;;  %v7525_v32 = vmul.f32 0.0625, %v7524_v22 }
 0x769   :  { %v7544_v13 = vadd.f32 %v7542_v58, %v7541_v24  ;;  %v7545_v33 = vadd.f32 %v7543_v30, %v7541_v24 }
 0x76a   :  { %v7503_v16 = vmax.f32 %v7502_v0, 0.0  ;;  %v7527_v28 = vsub.f32 %v7525_v32, %v7526_v27 }
 0x76c   :  { %v7528_v35 = vmax.f32 %v7527_v28, 0.0 }
 0x76e   :  { %v7529_v5 = vadd.f32 %v7528_v35, %v7503_v16 }
 0x770   :  { %v7530_v4 = vadd.f32 1e-05, %v7529_v5 }
 0x772   :  { %10041 = vrsqrt.f32 %v7530_v4 }
 0x77c   :  { %v10042_v9 = vpop.eup %10041 }
 0x77d   :  { %v7546_v61 = vmul.f32 %v10042_v9, %v7544_v13  ;;  %v7547_v31 = vmul.f32 %v10042_v9, %v7545_v33 }
 0x77f   :  { %v7548_v37 = vmul.f32 0.2, %v7546_v61  ;;  %v7549_v62 = vmul.f32 0.2, %v7547_v31 }
 0x781   :  { %v7550_v12 = vmax.f32 %v7546_v61, %v7548_v37  ;;  %v7551_v38 = vmax.f32 %v7547_v31, %v7549_v62 }
 0x783   :  { %v13343_v43 = vpack.c.bf16 %v7551_v38, %v7550_v12 }
 0x784   :  { %10157 = dma.done.wait [#allocation6], 12288 }
 0x785   :  { %10158 = vsyncadd [#allocation6], 4294955008  ;;  %9665 = vmatprep.mubr.msk.bf16.mxu1 %vm6157_vm3, %v13343_v43  ;;  %9667 = vmatprep.mubr.msk.bf16.mxu0 %vm6157_vm3, %v13343_v43  ;;  %v7569_v6 = vld [vmem:[#allocation2 + $0x8] sm:$0xff]  ;;  %v7568_v34 = vld [vmem:[#allocation2] sm:$0xff] }
 0x786   :  { %v7577_v17 = vld [vmem:[#allocation2 + $0x48] sm:$0xff]  ;;  %7667 = vmatprep.subr.bf16.mxu1 %v7569_v6  ;;  %v7576_v41 = vld [vmem:[#allocation2 + $0x40] sm:$0xff]  ;;  %v7571_v58 = vld [vmem:[#allocation2 + $0x18] sm:$0xff] }
 0x787   :  { %7668 = vmatpush1.bf16.msra.mxu1 %v7568_v34  ;;  %v7585_v39 = vld [vmem:[#allocation2 + $0x88] sm:$0xff]  ;;  %v7584_v54 = vld [vmem:[#allocation2 + $0x80] sm:$0xff]  ;;  %v7570_v32 = vld [vmem:[#allocation2 + $0x10] sm:$0xff] }
 0x788   :  { %7669 = vmatprep.subr.bf16.mxu1 %v7577_v17  ;;  %v7593_v56 = vld [vmem:[#allocation2 + $0xc8] sm:$0xff]  ;;  %v7572_v52 = vld [vmem:[#allocation2 + $0x20] sm:$0xff]  ;;  %v7579_v13 = vld [vmem:[#allocation2 + $0x58] sm:$0xff] }
 0x789   :  { %v7573_v55 = vld [vmem:[#allocation2 + $0x28] sm:$0xff]  ;;  %v7592_v59 = vld [vmem:[#allocation2 + $0xc0] sm:$0xff]  ;;  %v7578_v28 = vld [vmem:[#allocation2 + $0x50] sm:$0xff] }
 0x78a   :  { %7753 = vmatprep.subr.bf16.mxu0 %v7573_v55  ;;  %v7581_v10 = vld [vmem:[#allocation2 + $0x68] sm:$0xff]  ;;  %v7580_v63 = vld [vmem:[#allocation2 + $0x60] sm:$0xff]  ;;  %v7587_v35 = vld [vmem:[#allocation2 + $0x98] sm:$0xff] }
 0x78b   :  { %7670 = vmatpush1.bf16.msra.mxu1 %v7576_v41  ;;  %7754 = vmatpush1.bf16.msra.mxu0 %v7572_v52  ;;  %v7601_v3 = vld [vmem:[#allocation2 + $0x108] sm:$0xff]  ;;  %v7600_v51 = vld [vmem:[#allocation2 + $0x100] sm:$0xff]  ;;  %v7586_v4 = vld [vmem:[#allocation2 + $0x90] sm:$0xff] }
 0x78c   :  { %7671 = vmatprep.subr.bf16.mxu1 %v7585_v39  ;;  %7755 = vmatprep.subr.bf16.mxu0 %v7581_v10  ;;  %v7589_v7 = vld [vmem:[#allocation2 + $0xa8] sm:$0xff]  ;;  %v7588_v26 = vld [vmem:[#allocation2 + $0xa0] sm:$0xff]  ;;  %v7595_v9 = vld [vmem:[#allocation2 + $0xd8] sm:$0xff] }
 0x78d   :  { %v7609_v2 = vld [vmem:[#allocation2 + $0x148] sm:$0xff]  ;;  %v7608_v11 = vld [vmem:[#allocation2 + $0x140] sm:$0xff]  ;;  %v7594_v61 = vld [vmem:[#allocation2 + $0xd0] sm:$0xff] }
 0x78e   :  { %v7597_v8 = vld [vmem:[#allocation2 + $0xe8] sm:$0xff]  ;;  %v7596_v44 = vld [vmem:[#allocation2 + $0xe0] sm:$0xff]  ;;  %v7603_v31 = vld [vmem:[#allocation2 + $0x118] sm:$0xff] }
 0x78f   :  { %7672 = vmatpush1.bf16.msra.mxu1 %v7584_v54  ;;  %7756 = vmatpush1.bf16.msra.mxu0 %v7580_v63  ;;  %v7617_v18 = vld [vmem:[#allocation2 + $0x188] sm:$0xff]  ;;  %v7616_v46 = vld [vmem:[#allocation2 + $0x180] sm:$0xff]  ;;  %v7602_v37 = vld [vmem:[#allocation2 + $0x110] sm:$0xff] }
 0x790   :  { %7673 = vmatprep.subr.bf16.mxu1 %v7593_v56  ;;  %7757 = vmatprep.subr.bf16.mxu0 %v7589_v7  ;;  %v7605_v45 = vld [vmem:[#allocation2 + $0x128] sm:$0xff]  ;;  %v7604_v48 = vld [vmem:[#allocation2 + $0x120] sm:$0xff]  ;;  %v7611_v62 = vld [vmem:[#allocation2 + $0x158] sm:$0xff] }
 0x791   :  { %v7625_v47 = vld [vmem:[#allocation2 + $0x1c8] sm:$0xff]  ;;  %v7624_v36 = vld [vmem:[#allocation2 + $0x1c0] sm:$0xff]  ;;  %v7610_v12 = vld [vmem:[#allocation2 + $0x150] sm:$0xff] }
 0x792   :  { %v7613_v60 = vld [vmem:[#allocation2 + $0x168] sm:$0xff]  ;;  %v7612_v49 = vld [vmem:[#allocation2 + $0x160] sm:$0xff]  ;;  %v7619_v38 = vld [vmem:[#allocation2 + $0x198] sm:$0xff] }
 0x793   :  { %7674 = vmatpush1.bf16.msra.mxu1 %v7592_v59  ;;  %7758 = vmatpush1.bf16.msra.mxu0 %v7588_v26  ;;  %v7633_v42 = vld [vmem:[#allocation2 + $0x208] sm:$0xff]  ;;  %v7632_v14 = vld [vmem:[#allocation2 + $0x200] sm:$0xff]  ;;  %v7618_v6 = vld [vmem:[#allocation2 + $0x190] sm:$0xff] }
 0x794   :  { %7675 = vmatprep.subr.bf16.mxu1 %v7601_v3  ;;  %7759 = vmatprep.subr.bf16.mxu0 %v7597_v8  ;;  %v7621_v50 = vld [vmem:[#allocation2 + $0x1a8] sm:$0xff]  ;;  %v7620_v21 = vld [vmem:[#allocation2 + $0x1a0] sm:$0xff]  ;;  %v7627_v34 = vld [vmem:[#allocation2 + $0x1d8] sm:$0xff] }
 0x795   :  { %v7641_v19 = vld [vmem:[#allocation2 + $0x248] sm:$0xff]  ;;  %v7640_v20 = vld [vmem:[#allocation2 + $0x240] sm:$0xff]  ;;  %v7626_v17 = vld [vmem:[#allocation2 + $0x1d0] sm:$0xff] }
 0x796   :  { %v7629_v57 = vld [vmem:[#allocation2 + $0x1e8] sm:$0xff]  ;;  %v7628_v40 = vld [vmem:[#allocation2 + $0x1e0] sm:$0xff]  ;;  %v7635_v41 = vld [vmem:[#allocation2 + $0x218] sm:$0xff] }
 0x797   :  { %7676 = vmatpush1.bf16.msra.mxu1 %v7600_v51  ;;  %7760 = vmatpush1.bf16.msra.mxu0 %v7596_v44  ;;  %v7649_v15 = vld [vmem:[#allocation2 + $0x288] sm:$0xff]  ;;  %v7648_v23 = vld [vmem:[#allocation2 + $0x280] sm:$0xff]  ;;  %v7634_v39 = vld [vmem:[#allocation2 + $0x210] sm:$0xff] }
 0x798   :  { %7677 = vmatprep.subr.bf16.mxu1 %v7609_v2  ;;  %7761 = vmatprep.subr.bf16.mxu0 %v7605_v45  ;;  %v7637_v53 = vld [vmem:[#allocation2 + $0x228] sm:$0xff]  ;;  %v7636_v22 = vld [vmem:[#allocation2 + $0x220] sm:$0xff]  ;;  %v7643_v54 = vld [vmem:[#allocation2 + $0x258] sm:$0xff] }
 0x799   :  { %v7657_v1 = vld [vmem:[#allocation2 + $0x2c8] sm:$0xff]  ;;  %v7656_v27 = vld [vmem:[#allocation2 + $0x2c0] sm:$0xff]  ;;  %v7642_v56 = vld [vmem:[#allocation2 + $0x250] sm:$0xff] }
 0x79a   :  { %v7645_v24 = vld [vmem:[#allocation2 + $0x268] sm:$0xff]  ;;  %v7644_v30 = vld [vmem:[#allocation2 + $0x260] sm:$0xff]  ;;  %v7651_v55 = vld [vmem:[#allocation2 + $0x298] sm:$0xff] }
 0x79b   :  { %7678 = vmatpush1.bf16.msra.mxu1 %v7608_v11  ;;  %7762 = vmatpush1.bf16.msra.mxu0 %v7604_v48  ;;  %v7653_v0 = vld [vmem:[#allocation2 + $0x2a8] sm:$0xff]  ;;  %v7652_v33 = vld [vmem:[#allocation2 + $0x2a0] sm:$0xff]  ;;  %v7650_v52 = vld [vmem:[#allocation2 + $0x290] sm:$0xff] }
 0x79c   :  { %7679 = vmatprep.subr.bf16.mxu1 %v7617_v18  ;;  %7763 = vmatprep.subr.bf16.mxu0 %v7613_v60  ;;  %v7661_v16 = vld [vmem:[#allocation2 + $0x2e8] sm:$0xff]  ;;  %v7660_v5 = vld [vmem:[#allocation2 + $0x2e0] sm:$0xff]  ;;  %v7659_v10 = vld [vmem:[#allocation2 + $0x2d8] sm:$0xff] }
 0x79d   :  { %v7658_v59 = vld [vmem:[#allocation2 + $0x2d0] sm:$0xff]  ;;  %v7575_v3 = vld [vmem:[#allocation2 + $0x38] sm:$0xff] }
 0x79e   :  { %v7574_v63 = vld [vmem:[#allocation2 + $0x30] sm:$0xff]  ;;  %v7583_v7 = vld [vmem:[#allocation2 + $0x78] sm:$0xff] }
 0x79f   :  { %7680 = vmatpush1.bf16.msra.mxu1 %v7616_v46  ;;  %7764 = vmatpush1.bf16.msra.mxu0 %v7612_v49  ;;  %v7582_v51 = vld [vmem:[#allocation2 + $0x70] sm:$0xff]  ;;  %v7591_v2 = vld [vmem:[#allocation2 + $0xb8] sm:$0xff] }
 0x7a0   :  { %7681 = vmatprep.subr.bf16.mxu1 %v7625_v47  ;;  %7765 = vmatprep.subr.bf16.mxu0 %v7621_v50  ;;  %v7590_v26 = vld [vmem:[#allocation2 + $0xb0] sm:$0xff]  ;;  %v7599_v8 = vld [vmem:[#allocation2 + $0xf8] sm:$0xff] }
 0x7a1   :  { %v7598_v11 = vld [vmem:[#allocation2 + $0xf0] sm:$0xff]  ;;  %v7607_v18 = vld [vmem:[#allocation2 + $0x138] sm:$0xff] }
 0x7a2   :  { %v7606_v44 = vld [vmem:[#allocation2 + $0x130] sm:$0xff]  ;;  %v7615_v45 = vld [vmem:[#allocation2 + $0x178] sm:$0xff] }
 0x7a3   :  { %7682 = vmatpush1.bf16.msra.mxu1 %v7624_v36  ;;  %7766 = vmatpush1.bf16.msra.mxu0 %v7620_v21  ;;  %v7614_v46 = vld [vmem:[#allocation2 + $0x170] sm:$0xff]  ;;  %v7623_v47 = vld [vmem:[#allocation2 + $0x1b8] sm:$0xff] }
 0x7a4   :  { %7683 = vmatprep.subr.bf16.mxu1 %v7633_v42  ;;  %7767 = vmatprep.subr.bf16.mxu0 %v7629_v57  ;;  %v7622_v48 = vld [vmem:[#allocation2 + $0x1b0] sm:$0xff]  ;;  %v7631_v60 = vld [vmem:[#allocation2 + $0x1f8] sm:$0xff] }
 0x7a5   :  { %v7630_v36 = vld [vmem:[#allocation2 + $0x1f0] sm:$0xff]  ;;  %v7639_v42 = vld [vmem:[#allocation2 + $0x238] sm:$0xff] }
 0x7a6   :  { %v7638_v49 = vld [vmem:[#allocation2 + $0x230] sm:$0xff]  ;;  %v7647_v50 = vld [vmem:[#allocation2 + $0x278] sm:$0xff] }
 0x7a7   :  { %7684 = vmatpush1.bf16.msra.mxu1 %v7632_v14  ;;  %7768 = vmatpush1.bf16.msra.mxu0 %v7628_v40  ;;  %v7646_v14 = vld [vmem:[#allocation2 + $0x270] sm:$0xff]  ;;  %v7663_v57 = vld [vmem:[#allocation2 + $0x2f8] sm:$0xff] }
 0x7a8   :  { %7685 = vmatprep.subr.bf16.mxu1 %v7641_v19  ;;  %7769 = vmatprep.subr.bf16.mxu0 %v7637_v53  ;;  %v7655_v19 = vld [vmem:[#allocation2 + $0x2b8] sm:$0xff]  ;;  %v7654_v21 = vld [vmem:[#allocation2 + $0x2b0] sm:$0xff] }
 0x7ab   :  { %7686 = vmatpush1.bf16.msra.mxu1 %v7640_v20  ;;  %7770 = vmatpush1.bf16.msra.mxu0 %v7636_v22  ;;  %v7662_v20 = vld [vmem:[#allocation2 + $0x2f0] sm:$0xff] }
 0x7ac   :  { %7687 = vmatprep.subr.bf16.mxu1 %v7649_v15  ;;  %7771 = vmatprep.subr.bf16.mxu0 %v7645_v24 }
 0x7af   :  { %7688 = vmatpush1.bf16.msra.mxu1 %v7648_v23  ;;  %7772 = vmatpush1.bf16.msra.mxu0 %v7644_v30 }
 0x7b0   :  { %7689 = vmatprep.subr.bf16.mxu1 %v7657_v1  ;;  %7773 = vmatprep.subr.bf16.mxu0 %v7653_v0 }
 0x7b3   :  { %7690 = vmatpush1.bf16.msra.mxu1 %v7656_v27  ;;  %7774 = vmatpush1.bf16.msra.mxu0 %v7652_v33 }
 0x7b4   :  { %7710 = vmatprep.subr.bf16.mxu1 %v7571_v58  ;;  %7775 = vmatprep.subr.bf16.mxu0 %v7661_v16 }
 0x7b6   :  { %7700 = vmatmul.mubr.bf16.vlgmr.msra.gmra.mrb[4].mxu1 %v13325_v25 }
 0x7b7   :  { %7711 = vmatpush1.bf16.msra.mxu1 %v7570_v32  ;;  %9666 = vmatprep.mubr.msk.bf16.mxu1 %vm6157_vm3, %v13343_v43 }
 0x7b8   :  { %7712 = vmatprep.subr.bf16.mxu1 %v7579_v13  ;;  %7776 = vmatpush1.bf16.msra.mxu0 %v7660_v5 }
 0x7bb   :  { %7713 = vmatpush1.bf16.msra.mxu1 %v7578_v28  ;;  %7786 = vmatmul.mubr.bf16.vlgmr.msra.gmra.mrb[4].mxu0 %v13325_v25 }
 0x7bc   :  { %7714 = vmatprep.subr.bf16.mxu1 %v7587_v35 }
 0x7bf   :  { %7715 = vmatpush1.bf16.msra.mxu1 %v7586_v4 }
 0x7c0   :  { %7716 = vmatprep.subr.bf16.mxu1 %v7595_v9 }
 0x7c3   :  { %7717 = vmatpush1.bf16.msra.mxu1 %v7594_v61 }
 0x7c4   :  { %7718 = vmatprep.subr.bf16.mxu1 %v7603_v31 }
 0x7c7   :  { %7719 = vmatpush1.bf16.msra.mxu1 %v7602_v37 }
 0x7c8   :  { %7720 = vmatprep.subr.bf16.mxu1 %v7611_v62 }
 0x7cb   :  { %7721 = vmatpush1.bf16.msra.mxu1 %v7610_v12 }
 0x7cc   :  { %7722 = vmatprep.subr.bf16.mxu1 %v7619_v38 }
 0x7cf   :  { %7723 = vmatpush1.bf16.msra.mxu1 %v7618_v6 }
 0x7d0   :  { %7724 = vmatprep.subr.bf16.mxu1 %v7627_v34 }
 0x7d3   :  { %7725 = vmatpush1.bf16.msra.mxu1 %v7626_v17 }
 0x7d4   :  { %7726 = vmatprep.subr.bf16.mxu1 %v7635_v41 }
 0x7d7   :  { %7727 = vmatpush1.bf16.msra.mxu1 %v7634_v39 }
 0x7d8   :  { %7728 = vmatprep.subr.bf16.mxu1 %v7643_v54 }
 0x7db   :  { %7729 = vmatpush1.bf16.msra.mxu1 %v7642_v56 }
 0x7dc   :  { %7730 = vmatprep.subr.bf16.mxu1 %v7651_v55 }
 0x7df   :  { %7731 = vmatpush1.bf16.msra.mxu1 %v7650_v52 }
 0x7e0   :  { %7732 = vmatprep.subr.bf16.mxu1 %v7659_v10 }
 0x7e3   :  { %7733 = vmatpush1.bf16.msra.mxu1 %v7658_v59 }
 0x7e4   :  { %7796 = vmatprep.subr.bf16.mxu1 %v7575_v3 }
 0x7e6   :  { %7743 = vmatmul.mubr.bf16.vlgmr.msra.gmra.mrb[8].mxu1 %v13325_v25 }
 0x7e7   :  { %7797 = vmatpush1.bf16.msra.mxu1 %v7574_v63  ;;  %9668 = vmatprep.mubr.msk.bf16.mxu1 %vm6157_vm3, %v13343_v43 }
 0x7e8   :  { %7798 = vmatprep.subr.bf16.mxu1 %v7583_v7 }
 0x7eb   :  { %7799 = vmatpush1.bf16.msra.mxu1 %v7582_v51 }
 0x7ec   :  { %7800 = vmatprep.subr.bf16.mxu1 %v7591_v2 }
 0x7ef   :  { %7801 = vmatpush1.bf16.msra.mxu1 %v7590_v26 }
 0x7f0   :  { %7802 = vmatprep.subr.bf16.mxu1 %v7599_v8 }
 0x7f3   :  { %7803 = vmatpush1.bf16.msra.mxu1 %v7598_v11 }
 0x7f4   :  { %7804 = vmatprep.subr.bf16.mxu1 %v7607_v18 }
 0x7f7   :  { %7805 = vmatpush1.bf16.msra.mxu1 %v7606_v44 }
 0x7f8   :  { %7806 = vmatprep.subr.bf16.mxu1 %v7615_v45 }
 0x7fb   :  { %7807 = vmatpush1.bf16.msra.mxu1 %v7614_v46 }
 0x7fc   :  { %7808 = vmatprep.subr.bf16.mxu1 %v7623_v47 }
 0x7ff   :  { %7809 = vmatpush1.bf16.msra.mxu1 %v7622_v48 }
 0x800   :  { %7810 = vmatprep.subr.bf16.mxu1 %v7631_v60 }
 0x803   :  { %7811 = vmatpush1.bf16.msra.mxu1 %v7630_v36 }
 0x804   :  { %7812 = vmatprep.subr.bf16.mxu1 %v7639_v42 }
 0x807   :  { %7813 = vmatpush1.bf16.msra.mxu1 %v7638_v49 }
 0x808   :  { %7814 = vmatprep.subr.bf16.mxu1 %v7647_v50 }
 0x80b   :  { %7815 = vmatpush1.bf16.msra.mxu1 %v7646_v14 }
 0x80c   :  { %7816 = vmatprep.subr.bf16.mxu1 %v7655_v19 }
 0x80f   :  { %7817 = vmatpush1.bf16.msra.mxu1 %v7654_v21 }
 0x810   :  { %7818 = vmatprep.subr.bf16.mxu1 %v7663_v57 }
 0x813   :  { %7819 = vmatpush1.bf16.msra.mxu1 %v7662_v20 }
 0x816   :  { %7829 = vmatmul.mubr.bf16.vlgmr.msra.gmra.mrb[12].mxu1 %v13325_v25 }
 0x889   :  { %v13357_v15 = vpop.f32.mrb[4].mxu1 }
 0x88a   :  { %v7903_v40 = vmul.f32 %v13357_v15, %v13357_v15  ;;  %v13361_v53 = vpop.f32.mrb[5].mxu1 }
 0x88b   :  { %v13363_v23 = vpop.f32.mrb[6].mxu1  ;;  %v7904_v27 = vmul.f32 %v13361_v53, %v13361_v53 }
 0x88c   :  { %v7839_v1 = vadd.f32 %v13363_v23, %v13357_v15  ;;  %v7911_v22 = vmul.f32 %v13363_v23, %v13363_v23  ;;  %v13369_v24 = vpop.f32.mrb[7].mxu1 }
 0x88d   :  { %v7846_v58 = vadd.f32 %v13369_v24, %v13361_v53  ;;  %v7912_v30 = vmul.f32 %v13369_v24, %v13369_v24 }
 0x88e   :  { %v7840_v0 = vrot.slane %v7839_v1, 4  ;;  %v7919_v32 = vadd.f32 %v7911_v22, %v7903_v40  ;;  %v13377_v61 = vpop.f32.mrb[4].mxu0 }
 0x88f   :  { %v7847_v13 = vrot.slane %v7846_v58, 4  ;;  %v7926_v33 = vadd.f32 %v7912_v30, %v7904_v27  ;;  %v7907_v62 = vmul.f32 %v13377_v61, %v13377_v61  ;;  %v13381_v12 = vpop.f32.mrb[5].mxu0 }
 0x890   :  { %v7841_v16 = vadd.f32 %v7840_v0, %v7839_v1  ;;  %v7920_v28 = vrot.slane %v7919_v32, 4  ;;  %v7908_v34 = vmul.f32 %v13381_v12, %v13381_v12  ;;  %v13385_v17 = vpop.f32.mrb[6].mxu0 }
 0x891   :  { %v7848_v35 = vadd.f32 %v7847_v13, %v7846_v58  ;;  %v7927_v5 = vrot.slane %v7926_v33, 4  ;;  %v7867_v54 = vadd.f32 %v13385_v17, %v13377_v61  ;;  %v7915_v56 = vmul.f32 %v13385_v17, %v13385_v17  ;;  %v13391_v55 = vpop.f32.mrb[7].mxu0 }
 0x892   :  { %v7842_v4 = vrot.slane %v7841_v16, 2  ;;  %v7921_v9 = vadd.f32 %v7920_v28, %v7919_v32  ;;  %v7874_v59 = vadd.f32 %v13391_v55, %v13381_v12  ;;  %v7916_v3 = vmul.f32 %v13391_v55, %v13391_v55 }
 0x893   :  { %v7849_v31 = vrot.slane %v7848_v35, 2  ;;  %v7928_v37 = vadd.f32 %v7927_v5, %v7926_v33  ;;  %v7868_v51 = vrot.slane %v7867_v54, 4  ;;  %v7947_v2 = vadd.f32 %v7915_v56, %v7907_v62 }
 0x894   :  { %v7843_v38 = vadd.f32 %v7842_v4, %v7841_v16  ;;  %v7922_v6 = vrot.slane %v7921_v9, 2  ;;  %v7875_v11 = vrot.slane %v7874_v59, 4  ;;  %v7954_v18 = vadd.f32 %v7916_v3, %v7908_v34 }
 0x895   :  { %v7850_v41 = vadd.f32 %v7849_v31, %v7848_v35  ;;  %v7929_v39 = vrot.slane %v7928_v37, 2  ;;  %v7869_v46 = vadd.f32 %v7868_v51, %v7867_v54  ;;  %v7948_v47 = vrot.slane %v7947_v2, 4 }
 0x896   :  { %v7844_v52 = vrot.slane %v7843_v38, 1  ;;  %v7923_v10 = vadd.f32 %v7922_v6, %v7921_v9  ;;  %v7876_v36 = vadd.f32 %v7875_v11, %v7874_v59  ;;  %v7955_v42 = vrot.slane %v7954_v18, 4 }
 0x897   :  { %v7851_v63 = vrot.slane %v7850_v41, 1  ;;  %v7930_v7 = vadd.f32 %v7929_v39, %v7928_v37  ;;  %v7870_v14 = vrot.slane %v7869_v46, 2  ;;  %v7949_v19 = vadd.f32 %v7948_v47, %v7947_v2 }
 0x898   :  { %v7845_v26 = vadd.f32 %v7844_v52, %v7843_v38  ;;  %v7924_v8 = vrot.slane %v7923_v10, 1  ;;  %v7877_v13 = vrot.slane %v7876_v36, 2  ;;  %v7956_v16 = vadd.f32 %v7955_v42, %v7954_v18 }
 0x899   :  { %v7852_v44 = vadd.f32 %v7851_v63, %v7850_v41  ;;  %v7931_v45 = vrot.slane %v7930_v7, 1  ;;  %v7871_v0 = vadd.f32 %v7870_v14, %v7869_v46  ;;  %v7950_v32 = vrot.slane %v7949_v19, 2 }
 0x89a   :  { %v7895_v48 = vmul.f32 0.0625, %v7845_v26  ;;  %v7925_v60 = vadd.f32 %v7924_v8, %v7923_v10  ;;  %v7878_v4 = vadd.f32 %v7877_v13, %v7876_v36 }
 0x89b   :  { %v7896_v49 = vmul.f32 0.0625, %v7852_v44  ;;  %v7932_v50 = vadd.f32 %v7931_v45, %v7930_v7  ;;  %v7872_v35 = vrot.slane %v7871_v0, 1  ;;  %v7951_v5 = vadd.f32 %v7950_v32, %v7949_v19 }
 0x89c   :  { %v7975_v21 = vmul.f32 0.0625, %v7925_v60  ;;  %v7983_v57 = vmul.f32 %v7895_v48, %v7895_v48  ;;  %v8007_v20 = vsub.f32 %v13357_v15, %v7895_v48  ;;  %v8015_v40 = vsub.f32 %v13363_v23, %v7895_v48 }
 0x89d   :  { %v7976_v1 = vmul.f32 0.0625, %v7932_v50  ;;  %v7984_v22 = vmul.f32 %v7896_v49, %v7896_v49  ;;  %v8008_v27 = vsub.f32 %v13361_v53, %v7896_v49  ;;  %v8016_v58 = vsub.f32 %v13369_v24, %v7896_v49 }
 0x89e   :  { %v7991_v30 = vsub.f32 %v7975_v21, %v7983_v57  ;;  %v7957_v15 = vrot.slane %v7956_v16, 2  ;;  %v7873_v23 = vadd.f32 %v7872_v35, %v7871_v0  ;;  %v7952_v37 = vrot.slane %v7951_v5, 1 }
 0x89f   :  { %v7992_v33 = vsub.f32 %v7976_v1, %v7984_v22  ;;  %v7879_v62 = vrot.slane %v7878_v4, 1 }
 0x8a0   :  { %v7999_v28 = vmax.f32 %v7991_v30, 0.0  ;;  %v7958_v53 = vadd.f32 %v7957_v15, %v7956_v16  ;;  %v7899_v24 = vmul.f32 0.0625, %v7873_v23  ;;  %v7953_v6 = vadd.f32 %v7952_v37, %v7951_v5 }
 0x8a1   :  { %v8000_v9 = vmax.f32 %v7992_v33, 0.0  ;;  %v7880_v34 = vadd.f32 %v7879_v62, %v7878_v4 }
 0x8a2   :  { %v8023_v31 = vadd.f32 1e-05, %v7999_v28  ;;  %v7959_v41 = vrot.slane %v7958_v53, 1  ;;  %v7979_v39 = vmul.f32 0.0625, %v7953_v6  ;;  %v7987_v54 = vmul.f32 %v7899_v24, %v7899_v24 }
 0x8a3   :  { %v8024_v38 = vadd.f32 1e-05, %v8000_v9  ;;  %v8011_v56 = vsub.f32 %v13377_v61, %v7899_v24  ;;  %v8019_v52 = vsub.f32 %v13385_v17, %v7899_v24  ;;  %v13403_v10 = vmul.f32 0.0625, %v7880_v34 }
 0x8a4   :  { %10043 = vrsqrt.f32 %v8023_v31  ;;  %v7960_v59 = vadd.f32 %v7959_v41, %v7958_v53  ;;  %v7995_v3 = vsub.f32 %v7979_v39, %v7987_v54 }
 0x8a5   :  { %10045 = vrsqrt.f32 %v8024_v38  ;;  %v7988_v7 = vmul.f32 %v13403_v10, %v13403_v10  ;;  %v8012_v51 = vsub.f32 %v13381_v12, %v13403_v10  ;;  %v8020_v2 = vsub.f32 %v13391_v55, %v13403_v10 }
 0x8a6   :  { %v7980_v63 = vmul.f32 0.0625, %v7960_v59  ;;  %v8003_v26 = vmax.f32 %v7995_v3, 0.0 }
 0x8a8   :  { %v7996_v8 = vsub.f32 %v7980_v63, %v7988_v7  ;;  %v8027_v11 = vadd.f32 1e-05, %v8003_v26 }
 0x8aa   :  { %v8004_v61 = vmax.f32 %v7996_v8, 0.0  ;;  %10047 = vrsqrt.f32 %v8027_v11 }
 0x8ac   :  { %v8028_v46 = vadd.f32 1e-05, %v8004_v61 }
 0x8ae   :  { %v10044_v18 = vpop.eup %10043  ;;  %10049 = vrsqrt.f32 %v8028_v46 }
 0x8af   :  { %v10046_v17 = vpop.eup %10045  ;;  %v8039_v44 = vmul.f32 %v10044_v18, %v8007_v20  ;;  %v8047_v45 = vmul.f32 %v10044_v18, %v8015_v40 }
 0x8b0   :  { %v8040_v47 = vmul.f32 %v10046_v17, %v8008_v27  ;;  %v8048_v48 = vmul.f32 %v10046_v17, %v8016_v58 }
 0x8b1   :  { %v8055_v60 = vmul.f32 0.2, %v8039_v44  ;;  %v8063_v36 = vmul.f32 0.2, %v8047_v45 }
 0x8b2   :  { %v8056_v42 = vmul.f32 0.2, %v8040_v47  ;;  %v8064_v12 = vmul.f32 0.2, %v8048_v48 }
 0x8b3   :  { %v8071_v49 = vmax.f32 %v8039_v44, %v8055_v60  ;;  %v8079_v50 = vmax.f32 %v8047_v45, %v8063_v36 }
 0x8b4   :  { %v8072_v55 = vmax.f32 %v8040_v47, %v8056_v42  ;;  %v8080_v14 = vmax.f32 %v8048_v48, %v8064_v12  ;;  %v10048_v1 = vpop.eup %10047 }
 0x8b5   :  { %v8087_v19 = vmax.f32 %v8071_v49, %v8079_v50  ;;  %v8043_v40 = vmul.f32 %v10048_v1, %v8011_v56  ;;  %v8051_v27 = vmul.f32 %v10048_v1, %v8019_v52 }
 0x8b6   :  { %v8094_v21 = vmax.f32 %v8072_v55, %v8080_v14 }
 0x8b7   :  { %v8088_v57 = vrot.slane %v8087_v19, 4  ;;  %v8059_v35 = vmul.f32 0.2, %v8043_v40  ;;  %v8067_v5 = vmul.f32 0.2, %v8051_v27 }
 0x8b8   :  { %v8095_v22 = vrot.slane %v8094_v21, 4  ;;  %v10050_v13 = vpop.eup %10049 }
 0x8b9   :  { %v8089_v30 = vmax.f32 %v8087_v19, %v8088_v57  ;;  %v13411_v20 = vpop.f32.mrb[8].mxu1  ;;  %v8044_v23 = vmul.f32 %v10050_v13, %v8012_v51  ;;  %v8075_v53 = vmax.f32 %v8043_v40, %v8059_v35  ;;  %v8083_v41 = vmax.f32 %v8051_v27, %v8067_v5 }
 0x8ba   :  { %v8096_v58 = vmax.f32 %v8094_v21, %v8095_v22  ;;  %v7905_v0 = vmul.f32 %v13411_v20, %v13411_v20  ;;  %v13415_v32 = vpop.f32.mrb[9].mxu1  ;;  %v8052_v52 = vmul.f32 %v10050_v13, %v8020_v2 }
 0x8bb   :  { %v8090_v33 = vrot.slane %v8089_v30, 2  ;;  %v7906_v16 = vmul.f32 %v13415_v32, %v13415_v32  ;;  %v13419_v28 = vpop.f32.mrb[10].mxu1  ;;  %v8115_v63 = vmax.f32 %v8075_v53, %v8083_v41  ;;  %v8060_v8 = vmul.f32 0.2, %v8044_v23 }
 0x8bc   :  { %v8097_v4 = vrot.slane %v8096_v58, 2  ;;  %v7853_v9 = vadd.f32 %v13419_v28, %v13411_v20  ;;  %v7913_v15 = vmul.f32 %v13419_v28, %v13419_v28  ;;  %v13425_v31 = vpop.f32.mrb[11].mxu1  ;;  %v8068_v47 = vmul.f32 0.2, %v8052_v52 }
 0x8bd   :  { %v8091_v37 = vmax.f32 %v8089_v30, %v8090_v33  ;;  %v7860_v62 = vadd.f32 %v13425_v31, %v13415_v32  ;;  %v7914_v38 = vmul.f32 %v13425_v31, %v13425_v31  ;;  %v8116_v17 = vrot.slane %v8115_v63, 4 }
 0x8be   :  { %v8098_v24 = vmax.f32 %v8096_v58, %v8097_v4  ;;  %v7854_v6 = vrot.slane %v7853_v9, 4  ;;  %v7933_v34 = vadd.f32 %v7913_v15, %v7905_v0  ;;  %v8076_v49 = vmax.f32 %v8044_v23, %v8060_v8 }
 0x8bf   :  { %v8092_v39 = vrot.slane %v8091_v37, 1  ;;  %v7861_v54 = vrot.slane %v7860_v62, 4  ;;  %v7940_v56 = vadd.f32 %v7914_v38, %v7906_v16  ;;  %v8117_v36 = vmax.f32 %v8115_v63, %v8116_v17 }
 0x8c0   :  { %v8099_v10 = vrot.slane %v8098_v24, 1  ;;  %v7855_v59 = vadd.f32 %v7854_v6, %v7853_v9  ;;  %v7934_v3 = vrot.slane %v7933_v34, 4  ;;  %v8084_v50 = vmax.f32 %v8052_v52, %v8068_v47 }
 0x8c1   :  { %v8093_v7 = vmax.f32 %v8091_v37, %v8092_v39  ;;  %v7862_v51 = vadd.f32 %v7861_v54, %v7860_v62  ;;  %v7941_v26 = vrot.slane %v7940_v56, 4  ;;  %v8118_v19 = vrot.slane %v8117_v36, 2 }
 0x8c2   :  { %v8100_v11 = vmax.f32 %v8098_v24, %v8099_v10  ;;  %v7856_v61 = vrot.slane %v7855_v59, 2  ;;  %v7935_v18 = vadd.f32 %v7934_v3, %v7933_v34  ;;  %v8122_v1 = vmax.f32 %v8076_v49, %v8084_v50 }
 0x8c3   :  { %v13431_v44 = vpack.c.bf16 %v8093_v7, %v8093_v7  ;;  %v7863_v45 = vrot.slane %v7862_v51, 2  ;;  %v7942_v46 = vadd.f32 %v7941_v26, %v7940_v56  ;;  %v8119_v40 = vmax.f32 %v8117_v36, %v8118_v19 }
 0x8c4   :  { %v13433_v48 = vpack.c.bf16 %v8100_v11, %v8100_v11  ;;  %v7857_v2 = vadd.f32 %v7856_v61, %v7855_v59  ;;  %v7936_v60 = vrot.slane %v7935_v18, 2  ;;  %v8123_v0 = vrot.slane %v8122_v1, 4 }
 0x8c5   :  { %v7864_v42 = vadd.f32 %v7863_v45, %v7862_v51  ;;  %v7943_v12 = vrot.slane %v7942_v46, 2  ;;  %v8120_v16 = vrot.slane %v8119_v40, 1 }
 0x8c6   :  { %v7858_v55 = vrot.slane %v7857_v2, 1  ;;  %v7937_v14 = vadd.f32 %v7936_v60, %v7935_v18  ;;  %v8124_v4 = vmax.f32 %v8122_v1, %v8123_v0 }
 0x8c7   :  { %v7865_v21 = vrot.slane %v7864_v42, 1  ;;  %v7944_v57 = vadd.f32 %v7943_v12, %v7942_v46  ;;  %v8121_v34 = vmax.f32 %v8119_v40, %v8120_v16 }
 0x8c8   :  { %v7859_v22 = vadd.f32 %v7858_v55, %v7857_v2  ;;  %v7938_v30 = vrot.slane %v7937_v14, 1  ;;  %v8125_v41 = vrot.slane %v8124_v4, 2 }
 0x8c9   :  { %v7866_v27 = vadd.f32 %v7865_v21, %v7864_v42  ;;  %v7945_v58 = vrot.slane %v7944_v57, 1  ;;  %v13439_v56 = vpack.c.bf16 %v8121_v34, %v8121_v34 }
 0x8ca   :  { %v7897_v13 = vmul.f32 0.0625, %v7859_v22  ;;  %v7939_v33 = vadd.f32 %v7938_v30, %v7937_v14  ;;  %v8126_v52 = vmax.f32 %v8124_v4, %v8125_v41 }
 0x8cb   :  { %v7898_v35 = vmul.f32 0.0625, %v7866_v27  ;;  %v7946_v5 = vadd.f32 %v7945_v58, %v7944_v57 }
 0x8cc   :  { %v7977_v9 = vmul.f32 0.0625, %v7939_v33  ;;  %v7985_v15 = vmul.f32 %v7897_v13, %v7897_v13  ;;  %v8009_v23 = vsub.f32 %v13411_v20, %v7897_v13  ;;  %v8017_v37 = vsub.f32 %v13419_v28, %v7897_v13 }
 0x8cd   :  { %v7978_v62 = vmul.f32 0.0625, %v7946_v5  ;;  %v7986_v38 = vmul.f32 %v7898_v35, %v7898_v35  ;;  %v8010_v53 = vsub.f32 %v13415_v32, %v7898_v35  ;;  %v8018_v24 = vsub.f32 %v13425_v31, %v7898_v35 }
 0x8ce   :  { %v7993_v6 = vsub.f32 %v7977_v9, %v7985_v15  ;;  %v8127_v3 = vrot.slane %v8126_v52, 1 }
 0x8cf   :  { %v7994_v39 = vsub.f32 %v7978_v62, %v7986_v38 }
 0x8d0   :  { %v8001_v54 = vmax.f32 %v7993_v6, 0.0  ;;  %v8128_v28 = vmax.f32 %v8126_v52, %v8127_v3 }
 0x8d1   :  { %v8002_v10 = vmax.f32 %v7994_v39, 0.0 }
 0x8d2   :  { %v8025_v59 = vadd.f32 1e-05, %v8001_v54  ;;  %v13441_v63 = vpack.c.bf16 %v8128_v28, %v8128_v28 }
 0x8d3   :  { %v8026_v20 = vadd.f32 1e-05, %v8002_v10 }
 0x8d4   :  { %10051 = vrsqrt.f32 %v8025_v59 }
 0x8d5   :  { %10053 = vrsqrt.f32 %v8026_v20 }
 0x8de   :  { %v10052_v32 = vpop.eup %10051 }
 0x8df   :  { %v10054_v7 = vpop.eup %10053  ;;  %v8041_v31 = vmul.f32 %v10052_v32, %v8009_v23  ;;  %v8049_v51 = vmul.f32 %v10052_v32, %v8017_v37 }
 0x8e0   :  { %v8042_v26 = vmul.f32 %v10054_v7, %v8010_v53  ;;  %v8050_v8 = vmul.f32 %v10054_v7, %v8018_v24 }
 0x8e1   :  { %v8057_v11 = vmul.f32 0.2, %v8041_v31  ;;  %v8065_v61 = vmul.f32 0.2, %v8049_v51 }
 0x8e2   :  { %v8058_v18 = vmul.f32 0.2, %v8042_v26  ;;  %v8066_v17 = vmul.f32 0.2, %v8050_v8 }
 0x8e3   :  { %v8073_v45 = vmax.f32 %v8041_v31, %v8057_v11  ;;  %v8081_v46 = vmax.f32 %v8049_v51, %v8065_v61 }
 0x8e4   :  { %v8074_v47 = vmax.f32 %v8042_v26, %v8058_v18  ;;  %v8082_v2 = vmax.f32 %v8050_v8, %v8066_v17 }
 0x8e5   :  { %v8101_v60 = vmax.f32 %v8073_v45, %v8081_v46 }
 0x8e6   :  { %v8108_v36 = vmax.f32 %v8074_v47, %v8082_v2 }
 0x8e7   :  { %v8102_v42 = vrot.slane %v8101_v60, 4 }
 0x8e8   :  { %v8109_v12 = vrot.slane %v8108_v36, 4 }
 0x8e9   :  { %v8103_v49 = vmax.f32 %v8101_v60, %v8102_v42  ;;  %v13443_v50 = vpop.f32.mrb[12].mxu1 }
 0x8ea   :  { %v8110_v55 = vmax.f32 %v8108_v36, %v8109_v12  ;;  %v13445_v14 = vpop.f32.mrb[13].mxu1  ;;  %v7909_v1 = vmul.f32 %v13443_v50, %v13443_v50 }
 0x8eb   :  { %v8104_v19 = vrot.slane %v8103_v49, 2  ;;  %v13447_v21 = vpop.f32.mrb[14].mxu1  ;;  %v7910_v58 = vmul.f32 %v13445_v14, %v13445_v14 }
 0x8ec   :  { %v8111_v57 = vrot.slane %v8110_v55, 2  ;;  %v7881_v22 = vadd.f32 %v13447_v21, %v13443_v50  ;;  %v7917_v30 = vmul.f32 %v13447_v21, %v13447_v21  ;;  %v7836_v40 = vpop.f32.mrb[15].mxu1 }
 0x8ed   :  { %v8105_v27 = vmax.f32 %v8103_v49, %v8104_v19  ;;  %v7888_v0 = vadd.f32 %v7836_v40, %v13445_v14  ;;  %v7918_v13 = vmul.f32 %v7836_v40, %v7836_v40 }
 0x8ee   :  { %v8112_v33 = vmax.f32 %v8110_v55, %v8111_v57  ;;  %v7882_v16 = vrot.slane %v7881_v22, 4  ;;  %v7961_v35 = vadd.f32 %v7917_v30, %v7909_v1 }
 0x8ef   :  { %v8106_v5 = vrot.slane %v8105_v27, 1  ;;  %v7889_v4 = vrot.slane %v7888_v0, 4  ;;  %v7968_v9 = vadd.f32 %v7918_v13, %v7910_v58 }
 0x8f0   :  { %v8113_v15 = vrot.slane %v8112_v33, 1  ;;  %v7883_v23 = vadd.f32 %v7882_v16, %v7881_v22  ;;  %v7962_v37 = vrot.slane %v7961_v35, 4 }
 0x8f1   :  { %v8107_v62 = vmax.f32 %v8105_v27, %v8106_v5  ;;  %v7890_v38 = vadd.f32 %v7889_v4, %v7888_v0  ;;  %v7969_v53 = vrot.slane %v7968_v9, 4 }
 0x8f2   :  { %v8114_v24 = vmax.f32 %v8112_v33, %v8113_v15  ;;  %v7884_v6 = vrot.slane %v7883_v23, 2  ;;  %v7963_v34 = vadd.f32 %v7962_v37, %v7961_v35 }
 0x8f3   :  { %v13458_v41 = vpack.c.bf16 %v8107_v62, %v8107_v62  ;;  %v7891_v39 = vrot.slane %v7890_v38, 2  ;;  %v7970_v54 = vadd.f32 %v7969_v53, %v7968_v9 }
 0x8f4   :  { %v13460_v52 = vpack.c.bf16 %v8114_v24, %v8114_v24  ;;  %v7885_v10 = vadd.f32 %v7884_v6, %v7883_v23  ;;  %v7964_v59 = vrot.slane %v7963_v34, 2 }
 0x8f5   :  { %v7892_v3 = vadd.f32 %v7891_v39, %v7890_v38  ;;  %v7971_v20 = vrot.slane %v7970_v54, 2 }
 0x8f6   :  { %v7886_v28 = vrot.slane %v7885_v10, 1  ;;  %v7965_v32 = vadd.f32 %v7964_v59, %v7963_v34 }
 0x8f7   :  { %v7893_v7 = vrot.slane %v7892_v3, 1  ;;  %v7972_v31 = vadd.f32 %v7971_v20, %v7970_v54 }
 0x8f8   :  { %v7887_v51 = vadd.f32 %v7886_v28, %v7885_v10  ;;  %v7966_v26 = vrot.slane %v7965_v32, 1 }
 0x8f9   :  { %v7894_v8 = vadd.f32 %v7893_v7, %v7892_v3  ;;  %v7973_v11 = vrot.slane %v7972_v31, 1 }
 0x8fa   :  { %v7901_v61 = vmul.f32 0.0625, %v7887_v51  ;;  %v7967_v18 = vadd.f32 %v7966_v26, %v7965_v32 }
 0x8fb   :  { %v7902_v17 = vmul.f32 0.0625, %v7894_v8  ;;  %v7974_v45 = vadd.f32 %v7973_v11, %v7972_v31 }
 0x8fc   :  { %v7981_v46 = vmul.f32 0.0625, %v7967_v18  ;;  %v7989_v47 = vmul.f32 %v7901_v61, %v7901_v61  ;;  %v8013_v2 = vsub.f32 %v13443_v50, %v7901_v61  ;;  %v8021_v60 = vsub.f32 %v13447_v21, %v7901_v61 }
 0x8fd   :  { %v7982_v36 = vmul.f32 0.0625, %v7974_v45  ;;  %v7990_v42 = vmul.f32 %v7902_v17, %v7902_v17  ;;  %v8014_v12 = vsub.f32 %v13445_v14, %v7902_v17  ;;  %v8022_v49 = vsub.f32 %v7836_v40, %v7902_v17 }
 0x8fe   :  { %v7997_v55 = vsub.f32 %v7981_v46, %v7989_v47 }
 0x8ff   :  { %v7998_v19 = vsub.f32 %v7982_v36, %v7990_v42 }
 0x900   :  { %v8005_v57 = vmax.f32 %v7997_v55, 0.0 }
 0x901   :  { %v8006_v1 = vmax.f32 %v7998_v19, 0.0 }
 0x902   :  { %v8029_v22 = vadd.f32 1e-05, %v8005_v57 }
 0x903   :  { %v8030_v30 = vadd.f32 1e-05, %v8006_v1 }
 0x904   :  { %10055 = vrsqrt.f32 %v8029_v22 }
 0x905   :  { %10057 = vrsqrt.f32 %v8030_v30 }
 0x90e   :  { %v10056_v27 = vpop.eup %10055 }
 0x90f   :  { %v10058_v58 = vpop.eup %10057  ;;  %v8045_v0 = vmul.f32 %v10056_v27, %v8013_v2  ;;  %v8053_v13 = vmul.f32 %v10056_v27, %v8021_v60 }
 0x910   :  { %v8046_v50 = vmul.f32 %v10058_v58, %v8014_v12  ;;  %v8054_v33 = vmul.f32 %v10058_v58, %v8022_v49 }
 0x911   :  { %v8061_v21 = vmul.f32 0.2, %v8045_v0  ;;  %v8069_v16 = vmul.f32 0.2, %v8053_v13 }
 0x912   :  { %v8062_v35 = vmul.f32 0.2, %v8046_v50  ;;  %v8070_v5 = vmul.f32 0.2, %v8054_v33 }
 0x913   :  { %v8077_v14 = vmax.f32 %v8045_v0, %v8061_v21  ;;  %v8085_v40 = vmax.f32 %v8053_v13, %v8069_v16 }
 0x914   :  { %v8078_v4 = vmax.f32 %v8046_v50, %v8062_v35  ;;  %v8086_v9 = vmax.f32 %v8054_v33, %v8070_v5 }
 0x915   :  { %v8129_v15 = vmax.f32 %v8077_v14, %v8085_v40 }
 0x916   :  { %v8136_v23 = vmax.f32 %v8078_v4, %v8086_v9 }
 0x917   :  { %v8130_v37 = vrot.slane %v8129_v15, 4 }
 0x918   :  { %v8137_v62 = vrot.slane %v8136_v23, 4 }
 0x919   :  { %v8131_v38 = vmax.f32 %v8129_v15, %v8130_v37 }
 0x91a   :  { %v8138_v53 = vmax.f32 %v8136_v23, %v8137_v62 }
 0x91b   :  { %v8132_v24 = vrot.slane %v8131_v38, 2 }
 0x91c   :  { %v8139_v6 = vrot.slane %v8138_v53, 2 }
 0x91d   :  { %v8133_v34 = vmax.f32 %v8131_v38, %v8132_v24 }
 0x91e   :  { %v8140_v39 = vmax.f32 %v8138_v53, %v8139_v6 }
 0x91f   :  { %v8134_v54 = vrot.slane %v8133_v34, 1 }
 0x920   :  { %v8141_v10 = vrot.slane %v8140_v39, 1 }
 0x921   :  { %v8135_v59 = vmax.f32 %v8133_v34, %v8134_v54 }
 0x922   :  { %v8142_v3 = vmax.f32 %v8140_v39, %v8141_v10 }
 0x923   :  { %v13465_v20 = vpack.c.bf16 %v8135_v59, %v8135_v59 }
 0x924   :  { %v13467_v28 = vpack.c.bf16 %v8142_v3, %v8142_v3 }
 0x925   :  { %10159 = dma.done.wait [#allocation6 + $0x1], 32768 }
 0x926   :  { %10160 = vsyncadd [#allocation6 + $0x1], 4294934528 }
 0x927   :  { %10161 = dma.done.wait [#allocation6 + $0x2], 6144 }
 0x928   :  { %10162 = vsyncadd [#allocation6 + $0x2], 4294961152  ;;  %8446 = vmatprep.mubr.bf16.mxu0 %v13433_v48  ;;  %8610 = vmatprep.mubr.bf16.mxu1 %v13433_v48  ;;  %v8159_v32 = vld [vmem:[#allocation3 + $0x8] sm:$0xff]  ;;  %v8161_v7 = vld [vmem:[#allocation3 + $0x18] sm:$0xff] }
 0x929   :  { %v8158_v31 = vld [vmem:[#allocation3] sm:$0xff]  ;;  %8414 = vmatprep.subr.bf16.mxu0 %v8159_v32  ;;  %8578 = vmatprep.subr.bf16.mxu1 %v8161_v7  ;;  %v8160_v51 = vld [vmem:[#allocation3 + $0x10] sm:$0xff]  ;;  %v8163_v26 = vld [vmem:[#allocation3 + $0x28] sm:$0xff] }
 0x92a   :  { %v8165_v8 = vld [vmem:[#allocation3 + $0x38] sm:$0xff]  ;;  %8415 = vmatpush1.bf16.msra.mxu0 %v8158_v31  ;;  %8579 = vmatpush1.bf16.msra.mxu1 %v8160_v51  ;;  %v8162_v11 = vld [vmem:[#allocation3 + $0x20] sm:$0xff]  ;;  %v8164_v61 = vld [vmem:[#allocation3 + $0x30] sm:$0xff] }
 0x92b   :  { %8416 = vmatprep.subr.bf16.mxu0 %v8163_v26  ;;  %8580 = vmatprep.subr.bf16.mxu1 %v8165_v8  ;;  %v8167_v18 = vld [vmem:[#allocation3 + $0x48] sm:$0xff]  ;;  %v8169_v17 = vld [vmem:[#allocation3 + $0x58] sm:$0xff]  ;;  %v8166_v48 = vld [vmem:[#allocation3 + $0x40] sm:$0xff] }
 0x92c   :  { %v8168_v45 = vld [vmem:[#allocation3 + $0x50] sm:$0xff]  ;;  %v8171_v46 = vld [vmem:[#allocation3 + $0x68] sm:$0xff]  ;;  %v8173_v47 = vld [vmem:[#allocation3 + $0x78] sm:$0xff] }
 0x92d   :  { %v8170_v2 = vld [vmem:[#allocation3 + $0x60] sm:$0xff]  ;;  %v8172_v60 = vld [vmem:[#allocation3 + $0x70] sm:$0xff]  ;;  %v8175_v36 = vld [vmem:[#allocation3 + $0x88] sm:$0xff] }
 0x92e   :  { %8417 = vmatpush1.bf16.msra.mxu0 %v8162_v11  ;;  %8581 = vmatpush1.bf16.msra.mxu1 %v8164_v61  ;;  %v8177_v42 = vld [vmem:[#allocation3 + $0x98] sm:$0xff]  ;;  %v8174_v12 = vld [vmem:[#allocation3 + $0x80] sm:$0xff]  ;;  %v8176_v49 = vld [vmem:[#allocation3 + $0x90] sm:$0xff] }
 0x92f   :  { %8418 = vmatprep.subr.bf16.mxu0 %v8167_v18  ;;  %8582 = vmatprep.subr.bf16.mxu1 %v8169_v17  ;;  %v8179_v55 = vld [vmem:[#allocation3 + $0xa8] sm:$0xff]  ;;  %v8181_v19 = vld [vmem:[#allocation3 + $0xb8] sm:$0xff]  ;;  %v8178_v57 = vld [vmem:[#allocation3 + $0xa0] sm:$0xff] }
 0x930   :  { %v8180_v1 = vld [vmem:[#allocation3 + $0xb0] sm:$0xff]  ;;  %v8183_v22 = vld [vmem:[#allocation3 + $0xc8] sm:$0xff]  ;;  %v8185_v30 = vld [vmem:[#allocation3 + $0xd8] sm:$0xff] }
 0x931   :  { %v8182_v27 = vld [vmem:[#allocation3 + $0xc0] sm:$0xff]  ;;  %v8184_v58 = vld [vmem:[#allocation3 + $0xd0] sm:$0xff]  ;;  %v8187_v0 = vld [vmem:[#allocation3 + $0xe8] sm:$0xff] }
 0x932   :  { %8419 = vmatpush1.bf16.msra.mxu0 %v8166_v48  ;;  %8583 = vmatpush1.bf16.msra.mxu1 %v8168_v45  ;;  %v8189_v13 = vld [vmem:[#allocation3 + $0xf8] sm:$0xff]  ;;  %v8186_v50 = vld [vmem:[#allocation3 + $0xe0] sm:$0xff]  ;;  %v8188_v33 = vld [vmem:[#allocation3 + $0xf0] sm:$0xff] }
 0x933   :  { %8420 = vmatprep.subr.bf16.mxu0 %v8171_v46  ;;  %8584 = vmatprep.subr.bf16.mxu1 %v8173_v47  ;;  %v8191_v21 = vld [vmem:[#allocation3 + $0x108] sm:$0xff]  ;;  %v8193_v16 = vld [vmem:[#allocation3 + $0x118] sm:$0xff]  ;;  %v8190_v35 = vld [vmem:[#allocation3 + $0x100] sm:$0xff] }
 0x934   :  { %v8192_v5 = vld [vmem:[#allocation3 + $0x110] sm:$0xff]  ;;  %v8195_v14 = vld [vmem:[#allocation3 + $0x128] sm:$0xff]  ;;  %v8197_v40 = vld [vmem:[#allocation3 + $0x138] sm:$0xff] }
 0x935   :  { %v8194_v4 = vld [vmem:[#allocation3 + $0x120] sm:$0xff]  ;;  %v8196_v9 = vld [vmem:[#allocation3 + $0x130] sm:$0xff]  ;;  %v8199_v15 = vld [vmem:[#allocation3 + $0x148] sm:$0xff] }
 0x936   :  { %8421 = vmatpush1.bf16.msra.mxu0 %v8170_v2  ;;  %8585 = vmatpush1.bf16.msra.mxu1 %v8172_v60  ;;  %v8201_v23 = vld [vmem:[#allocation3 + $0x158] sm:$0xff]  ;;  %v8198_v37 = vld [vmem:[#allocation3 + $0x140] sm:$0xff]  ;;  %v8200_v62 = vld [vmem:[#allocation3 + $0x150] sm:$0xff] }
 0x937   :  { %8422 = vmatprep.subr.bf16.mxu0 %v8175_v36  ;;  %8586 = vmatprep.subr.bf16.mxu1 %v8177_v42  ;;  %v8203_v38 = vld [vmem:[#allocation3 + $0x168] sm:$0xff]  ;;  %v8205_v53 = vld [vmem:[#allocation3 + $0x178] sm:$0xff]  ;;  %v8202_v24 = vld [vmem:[#allocation3 + $0x160] sm:$0xff] }
 0x938   :  { %v8204_v6 = vld [vmem:[#allocation3 + $0x170] sm:$0xff]  ;;  %v8207_v34 = vld [vmem:[#allocation3 + $0x188] sm:$0xff]  ;;  %v8209_v39 = vld [vmem:[#allocation3 + $0x198] sm:$0xff] }
 0x939   :  { %v8206_v54 = vld [vmem:[#allocation3 + $0x180] sm:$0xff]  ;;  %v8208_v10 = vld [vmem:[#allocation3 + $0x190] sm:$0xff]  ;;  %v8211_v59 = vld [vmem:[#allocation3 + $0x1a8] sm:$0xff] }
 0x93a   :  { %8423 = vmatpush1.bf16.msra.mxu0 %v8174_v12  ;;  %8587 = vmatpush1.bf16.msra.mxu1 %v8176_v49  ;;  %v8213_v3 = vld [vmem:[#allocation3 + $0x1b8] sm:$0xff]  ;;  %v8210_v32 = vld [vmem:[#allocation3 + $0x1a0] sm:$0xff]  ;;  %v8212_v7 = vld [vmem:[#allocation3 + $0x1b0] sm:$0xff] }
 0x93b   :  { %8424 = vmatprep.subr.bf16.mxu0 %v8179_v55  ;;  %8588 = vmatprep.subr.bf16.mxu1 %v8181_v19  ;;  %v8215_v31 = vld [vmem:[#allocation3 + $0x1c8] sm:$0xff]  ;;  %v8217_v51 = vld [vmem:[#allocation3 + $0x1d8] sm:$0xff]  ;;  %v8214_v26 = vld [vmem:[#allocation3 + $0x1c0] sm:$0xff] }
 0x93c   :  { %v8216_v8 = vld [vmem:[#allocation3 + $0x1d0] sm:$0xff]  ;;  %v8219_v11 = vld [vmem:[#allocation3 + $0x1e8] sm:$0xff]  ;;  %v8221_v61 = vld [vmem:[#allocation3 + $0x1f8] sm:$0xff] }
 0x93d   :  { %v8218_v18 = vld [vmem:[#allocation3 + $0x1e0] sm:$0xff]  ;;  %v8220_v17 = vld [vmem:[#allocation3 + $0x1f0] sm:$0xff]  ;;  %v8223_v48 = vld [vmem:[#allocation3 + $0x208] sm:$0xff] }
 0x93e   :  { %8425 = vmatpush1.bf16.msra.mxu0 %v8178_v57  ;;  %8589 = vmatpush1.bf16.msra.mxu1 %v8180_v1  ;;  %v8225_v45 = vld [vmem:[#allocation3 + $0x218] sm:$0xff]  ;;  %v8222_v46 = vld [vmem:[#allocation3 + $0x200] sm:$0xff]  ;;  %v8224_v47 = vld [vmem:[#allocation3 + $0x210] sm:$0xff] }
 0x93f   :  { %8426 = vmatprep.subr.bf16.mxu0 %v8183_v22  ;;  %8590 = vmatprep.subr.bf16.mxu1 %v8185_v30  ;;  %v8227_v2 = vld [vmem:[#allocation3 + $0x228] sm:$0xff]  ;;  %v8229_v60 = vld [vmem:[#allocation3 + $0x238] sm:$0xff]  ;;  %v8226_v36 = vld [vmem:[#allocation3 + $0x220] sm:$0xff] }
 0x940   :  { %v8228_v42 = vld [vmem:[#allocation3 + $0x230] sm:$0xff]  ;;  %v8231_v12 = vld [vmem:[#allocation3 + $0x248] sm:$0xff]  ;;  %v8233_v49 = vld [vmem:[#allocation3 + $0x258] sm:$0xff] }
 0x941   :  { %v8230_v55 = vld [vmem:[#allocation3 + $0x240] sm:$0xff]  ;;  %v8232_v19 = vld [vmem:[#allocation3 + $0x250] sm:$0xff]  ;;  %v8235_v57 = vld [vmem:[#allocation3 + $0x268] sm:$0xff] }
 0x942   :  { %8427 = vmatpush1.bf16.msra.mxu0 %v8182_v27  ;;  %8591 = vmatpush1.bf16.msra.mxu1 %v8184_v58  ;;  %v8234_v1 = vld [vmem:[#allocation3 + $0x260] sm:$0xff]  ;;  %v8236_v22 = vld [vmem:[#allocation3 + $0x270] sm:$0xff]  ;;  %v8239_v30 = vld [vmem:[#allocation3 + $0x288] sm:$0xff] }
 0x943   :  { %8428 = vmatprep.subr.bf16.mxu0 %v8187_v0  ;;  %8592 = vmatprep.subr.bf16.mxu1 %v8189_v13  ;;  %v8241_v27 = vld [vmem:[#allocation3 + $0x298] sm:$0xff]  ;;  %v8240_v58 = vld [vmem:[#allocation3 + $0x290] sm:$0xff]  ;;  %v8243_v0 = vld [vmem:[#allocation3 + $0x2a8] sm:$0xff] }
 0x944   :  { %v8245_v13 = vld [vmem:[#allocation3 + $0x2b8] sm:$0xff] }
 0x946   :  { %8429 = vmatpush1.bf16.msra.mxu0 %v8186_v50  ;;  %8593 = vmatpush1.bf16.msra.mxu1 %v8188_v33  ;;  %v8242_v50 = vld [vmem:[#allocation3 + $0x2a0] sm:$0xff]  ;;  %v8244_v33 = vld [vmem:[#allocation3 + $0x2b0] sm:$0xff] }
 0x947   :  { %8430 = vmatprep.subr.bf16.mxu0 %v8191_v21  ;;  %8594 = vmatprep.subr.bf16.mxu1 %v8193_v16  ;;  %v8247_v21 = vld [vmem:[#allocation3 + $0x2c8] sm:$0xff]  ;;  %v8249_v16 = vld [vmem:[#allocation3 + $0x2d8] sm:$0xff] }
 0x94a   :  { %8431 = vmatpush1.bf16.msra.mxu0 %v8190_v35  ;;  %8595 = vmatpush1.bf16.msra.mxu1 %v8192_v5  ;;  %v8246_v35 = vld [vmem:[#allocation3 + $0x2c0] sm:$0xff]  ;;  %v8248_v5 = vld [vmem:[#allocation3 + $0x2d0] sm:$0xff] }
 0x94b   :  { %8432 = vmatprep.subr.bf16.mxu0 %v8195_v14  ;;  %8596 = vmatprep.subr.bf16.mxu1 %v8197_v40  ;;  %v8251_v14 = vld [vmem:[#allocation3 + $0x2e8] sm:$0xff]  ;;  %v8253_v40 = vld [vmem:[#allocation3 + $0x2f8] sm:$0xff] }
 0x94e   :  { %8433 = vmatpush1.bf16.msra.mxu0 %v8194_v4  ;;  %8597 = vmatpush1.bf16.msra.mxu1 %v8196_v9  ;;  %v8250_v4 = vld [vmem:[#allocation3 + $0x2e0] sm:$0xff]  ;;  %v8252_v9 = vld [vmem:[#allocation3 + $0x2f0] sm:$0xff] }
 0x94f   :  { %8434 = vmatprep.subr.bf16.mxu0 %v8199_v15  ;;  %8598 = vmatprep.subr.bf16.mxu1 %v8201_v23  ;;  %v8255_v15 = vld [vmem:[#allocation3 + $0x308] sm:$0xff]  ;;  %v8257_v23 = vld [vmem:[#allocation3 + $0x318] sm:$0xff] }
 0x952   :  { %8435 = vmatpush1.bf16.msra.mxu0 %v8198_v37  ;;  %8599 = vmatpush1.bf16.msra.mxu1 %v8200_v62  ;;  %v8254_v37 = vld [vmem:[#allocation3 + $0x300] sm:$0xff]  ;;  %v8256_v62 = vld [vmem:[#allocation3 + $0x310] sm:$0xff] }
 0x953   :  { %8436 = vmatprep.subr.bf16.mxu0 %v8203_v38  ;;  %8600 = vmatprep.subr.bf16.mxu1 %v8205_v53  ;;  %v8259_v38 = vld [vmem:[#allocation3 + $0x328] sm:$0xff]  ;;  %v8261_v53 = vld [vmem:[#allocation3 + $0x338] sm:$0xff] }
 0x956   :  { %8437 = vmatpush1.bf16.msra.mxu0 %v8202_v24  ;;  %8601 = vmatpush1.bf16.msra.mxu1 %v8204_v6  ;;  %v8258_v24 = vld [vmem:[#allocation3 + $0x320] sm:$0xff]  ;;  %v8260_v6 = vld [vmem:[#allocation3 + $0x330] sm:$0xff] }
 0x957   :  { %8438 = vmatprep.subr.bf16.mxu0 %v8207_v34  ;;  %8602 = vmatprep.subr.bf16.mxu1 %v8209_v39  ;;  %v8263_v34 = vld [vmem:[#allocation3 + $0x348] sm:$0xff]  ;;  %v8265_v39 = vld [vmem:[#allocation3 + $0x358] sm:$0xff] }
 0x95a   :  { %8439 = vmatpush1.bf16.msra.mxu0 %v8206_v54  ;;  %8603 = vmatpush1.bf16.msra.mxu1 %v8208_v10  ;;  %v8262_v54 = vld [vmem:[#allocation3 + $0x340] sm:$0xff]  ;;  %v8264_v10 = vld [vmem:[#allocation3 + $0x350] sm:$0xff] }
 0x95b   :  { %8440 = vmatprep.subr.bf16.mxu0 %v8211_v59  ;;  %8604 = vmatprep.subr.bf16.mxu1 %v8213_v3  ;;  %v8267_v59 = vld [vmem:[#allocation3 + $0x368] sm:$0xff]  ;;  %v8269_v3 = vld [vmem:[#allocation3 + $0x378] sm:$0xff] }
 0x95e   :  { %8441 = vmatpush1.bf16.msra.mxu0 %v8210_v32  ;;  %8605 = vmatpush1.bf16.msra.mxu1 %v8212_v7  ;;  %v8266_v32 = vld [vmem:[#allocation3 + $0x360] sm:$0xff]  ;;  %v8268_v7 = vld [vmem:[#allocation3 + $0x370] sm:$0xff] }
 0x95f   :  { %8442 = vmatprep.subr.bf16.mxu0 %v8215_v31  ;;  %8606 = vmatprep.subr.bf16.mxu1 %v8217_v51  ;;  %v8271_v31 = vld [vmem:[#allocation3 + $0x388] sm:$0xff]  ;;  %v8273_v51 = vld [vmem:[#allocation3 + $0x398] sm:$0xff] }
 0x962   :  { %8443 = vmatpush1.bf16.msra.mxu0 %v8214_v26  ;;  %8607 = vmatpush1.bf16.msra.mxu1 %v8216_v8  ;;  %v8270_v26 = vld [vmem:[#allocation3 + $0x380] sm:$0xff]  ;;  %v8272_v8 = vld [vmem:[#allocation3 + $0x390] sm:$0xff] }
 0x963   :  { %8444 = vmatprep.subr.bf16.mxu0 %v8219_v11  ;;  %8608 = vmatprep.subr.bf16.mxu1 %v8221_v61  ;;  %v8275_v11 = vld [vmem:[#allocation3 + $0x3a8] sm:$0xff]  ;;  %v8277_v61 = vld [vmem:[#allocation3 + $0x3b8] sm:$0xff] }
 0x966   :  { %8445 = vmatpush1.bf16.msra.mxu0 %v8218_v18  ;;  %8609 = vmatpush1.bf16.msra.mxu1 %v8220_v17  ;;  %v8274_v18 = vld [vmem:[#allocation3 + $0x3a0] sm:$0xff]  ;;  %v8276_v17 = vld [vmem:[#allocation3 + $0x3b0] sm:$0xff] }
 0x967   :  { %8455 = vmatprep.subr.bf16.mxu0 %v8223_v48  ;;  %8619 = vmatprep.subr.bf16.mxu1 %v8225_v45  ;;  %v8279_v48 = vld [vmem:[#allocation3 + $0x3c8] sm:$0xff]  ;;  %v8281_v45 = vld [vmem:[#allocation3 + $0x3d8] sm:$0xff] }
 0x969   :  { %8447 = vmatmul.mubr.bf16.vlgmr.msra.gmra.mrb[8].mxu0 %v13431_v44  ;;  %8611 = vmatmul.mubr.bf16.vlgmr.msra.gmra.mrb[16].mxu1 %v13431_v44  ;;  %v8237_v44 = vld [vmem:[#allocation3 + $0x278] sm:$0xff] }
 0x96a   :  { %8456 = vmatpush1.bf16.msra.mxu0 %v8222_v46  ;;  %8620 = vmatpush1.bf16.msra.mxu1 %v8224_v47  ;;  %v8278_v46 = vld [vmem:[#allocation3 + $0x3c0] sm:$0xff]  ;;  %v8280_v47 = vld [vmem:[#allocation3 + $0x3d0] sm:$0xff] }
 0x96b   :  { %8457 = vmatprep.subr.bf16.mxu0 %v8227_v2  ;;  %8621 = vmatprep.subr.bf16.mxu1 %v8229_v60  ;;  %v8283_v2 = vld [vmem:[#allocation3 + $0x3e8] sm:$0xff]  ;;  %v8285_v60 = vld [vmem:[#allocation3 + $0x3f8] sm:$0xff] }
 0x96c   :  { %8487 = vmatprep.mubr.bf16.mxu0 %v13460_v52  ;;  %8651 = vmatprep.mubr.bf16.mxu1 %v13460_v52  ;;  %v8238_v52 = vld [vmem:[#allocation3 + $0x280] sm:$0xff] }
 0x96e   :  { %8458 = vmatpush1.bf16.msra.mxu0 %v8226_v36  ;;  %8622 = vmatpush1.bf16.msra.mxu1 %v8228_v42  ;;  %v8282_v36 = vld [vmem:[#allocation3 + $0x3e0] sm:$0xff]  ;;  %v8284_v42 = vld [vmem:[#allocation3 + $0x3f0] sm:$0xff] }
 0x96f   :  { %8459 = vmatprep.subr.bf16.mxu0 %v8231_v12  ;;  %8623 = vmatprep.subr.bf16.mxu1 %v8233_v49  ;;  %v8287_v12 = vld [vmem:[#allocation3 + $0x408] sm:$0xff]  ;;  %v8289_v49 = vld [vmem:[#allocation3 + $0x418] sm:$0xff] }
 0x972   :  { %8460 = vmatpush1.bf16.msra.mxu0 %v8230_v55  ;;  %8624 = vmatpush1.bf16.msra.mxu1 %v8232_v19  ;;  %v8286_v55 = vld [vmem:[#allocation3 + $0x400] sm:$0xff]  ;;  %v8288_v19 = vld [vmem:[#allocation3 + $0x410] sm:$0xff] }
 0x973   :  { %8461 = vmatprep.subr.bf16.mxu0 %v8235_v57  ;;  %8625 = vmatprep.subr.bf16.mxu1 %v8237_v44  ;;  %v8291_v57 = vld [vmem:[#allocation3 + $0x428] sm:$0xff]  ;;  %v8293_v44 = vld [vmem:[#allocation3 + $0x438] sm:$0xff] }
 0x976   :  { %8462 = vmatpush1.bf16.msra.mxu0 %v8234_v1  ;;  %8626 = vmatpush1.bf16.msra.mxu1 %v8236_v22  ;;  %v8290_v1 = vld [vmem:[#allocation3 + $0x420] sm:$0xff]  ;;  %v8292_v22 = vld [vmem:[#allocation3 + $0x430] sm:$0xff] }
 0x977   :  { %8463 = vmatprep.subr.bf16.mxu0 %v8239_v30  ;;  %8627 = vmatprep.subr.bf16.mxu1 %v8241_v27  ;;  %v8295_v30 = vld [vmem:[#allocation3 + $0x448] sm:$0xff]  ;;  %v8297_v27 = vld [vmem:[#allocation3 + $0x458] sm:$0xff] }
 0x97a   :  { %8464 = vmatpush1.bf16.msra.mxu0 %v8238_v52  ;;  %8628 = vmatpush1.bf16.msra.mxu1 %v8240_v58  ;;  %v8294_v52 = vld [vmem:[#allocation3 + $0x440] sm:$0xff]  ;;  %v8296_v58 = vld [vmem:[#allocation3 + $0x450] sm:$0xff] }
 0x97b   :  { %8465 = vmatprep.subr.bf16.mxu0 %v8243_v0  ;;  %8629 = vmatprep.subr.bf16.mxu1 %v8245_v13  ;;  %v8299_v0 = vld [vmem:[#allocation3 + $0x468] sm:$0xff]  ;;  %v8298_v13 = vld [vmem:[#allocation3 + $0x460] sm:$0xff] }
 0x97e   :  { %8466 = vmatpush1.bf16.msra.mxu0 %v8242_v50  ;;  %8630 = vmatpush1.bf16.msra.mxu1 %v8244_v33  ;;  %v8300_v50 = vld [vmem:[#allocation3 + $0x470] sm:$0xff]  ;;  %v8303_v33 = vld [vmem:[#allocation3 + $0x488] sm:$0xff] }
 0x97f   :  { %8467 = vmatprep.subr.bf16.mxu0 %v8247_v21  ;;  %8631 = vmatprep.subr.bf16.mxu1 %v8249_v16  ;;  %v8305_v21 = vld [vmem:[#allocation3 + $0x498] sm:$0xff]  ;;  %v8304_v16 = vld [vmem:[#allocation3 + $0x490] sm:$0xff] }
 0x982   :  { %8468 = vmatpush1.bf16.msra.mxu0 %v8246_v35  ;;  %8632 = vmatpush1.bf16.msra.mxu1 %v8248_v5  ;;  %v8307_v35 = vld [vmem:[#allocation3 + $0x4a8] sm:$0xff]  ;;  %v8309_v5 = vld [vmem:[#allocation3 + $0x4b8] sm:$0xff] }
 0x983   :  { %8469 = vmatprep.subr.bf16.mxu0 %v8251_v14  ;;  %8633 = vmatprep.subr.bf16.mxu1 %v8253_v40  ;;  %v8306_v14 = vld [vmem:[#allocation3 + $0x4a0] sm:$0xff]  ;;  %v8308_v40 = vld [vmem:[#allocation3 + $0x4b0] sm:$0xff] }
 0x986   :  { %8470 = vmatpush1.bf16.msra.mxu0 %v8250_v4  ;;  %8634 = vmatpush1.bf16.msra.mxu1 %v8252_v9  ;;  %v8311_v4 = vld [vmem:[#allocation3 + $0x4c8] sm:$0xff]  ;;  %v8313_v9 = vld [vmem:[#allocation3 + $0x4d8] sm:$0xff] }
 0x987   :  { %8471 = vmatprep.subr.bf16.mxu0 %v8255_v15  ;;  %8635 = vmatprep.subr.bf16.mxu1 %v8257_v23  ;;  %v8310_v15 = vld [vmem:[#allocation3 + $0x4c0] sm:$0xff]  ;;  %v8312_v23 = vld [vmem:[#allocation3 + $0x4d0] sm:$0xff] }
 0x98a   :  { %8472 = vmatpush1.bf16.msra.mxu0 %v8254_v37  ;;  %8636 = vmatpush1.bf16.msra.mxu1 %v8256_v62  ;;  %v8315_v37 = vld [vmem:[#allocation3 + $0x4e8] sm:$0xff]  ;;  %v8317_v62 = vld [vmem:[#allocation3 + $0x4f8] sm:$0xff] }
 0x98b   :  { %8473 = vmatprep.subr.bf16.mxu0 %v8259_v38  ;;  %8637 = vmatprep.subr.bf16.mxu1 %v8261_v53  ;;  %v8314_v38 = vld [vmem:[#allocation3 + $0x4e0] sm:$0xff]  ;;  %v8316_v53 = vld [vmem:[#allocation3 + $0x4f0] sm:$0xff] }
 0x98e   :  { %8474 = vmatpush1.bf16.msra.mxu0 %v8258_v24  ;;  %8638 = vmatpush1.bf16.msra.mxu1 %v8260_v6  ;;  %v8319_v24 = vld [vmem:[#allocation3 + $0x508] sm:$0xff]  ;;  %v8321_v6 = vld [vmem:[#allocation3 + $0x518] sm:$0xff] }
 0x98f   :  { %8475 = vmatprep.subr.bf16.mxu0 %v8263_v34  ;;  %8639 = vmatprep.subr.bf16.mxu1 %v8265_v39  ;;  %v8318_v34 = vld [vmem:[#allocation3 + $0x500] sm:$0xff]  ;;  %v8320_v39 = vld [vmem:[#allocation3 + $0x510] sm:$0xff] }
 0x992   :  { %8476 = vmatpush1.bf16.msra.mxu0 %v8262_v54  ;;  %8640 = vmatpush1.bf16.msra.mxu1 %v8264_v10  ;;  %v8323_v54 = vld [vmem:[#allocation3 + $0x528] sm:$0xff]  ;;  %v8325_v10 = vld [vmem:[#allocation3 + $0x538] sm:$0xff] }
 0x993   :  { %8477 = vmatprep.subr.bf16.mxu0 %v8267_v59  ;;  %8641 = vmatprep.subr.bf16.mxu1 %v8269_v3  ;;  %v8322_v59 = vld [vmem:[#allocation3 + $0x520] sm:$0xff]  ;;  %v8324_v3 = vld [vmem:[#allocation3 + $0x530] sm:$0xff] }
 0x996   :  { %8478 = vmatpush1.bf16.msra.mxu0 %v8266_v32  ;;  %8642 = vmatpush1.bf16.msra.mxu1 %v8268_v7  ;;  %v8327_v32 = vld [vmem:[#allocation3 + $0x548] sm:$0xff]  ;;  %v8329_v7 = vld [vmem:[#allocation3 + $0x558] sm:$0xff] }
 0x997   :  { %8479 = vmatprep.subr.bf16.mxu0 %v8271_v31  ;;  %8643 = vmatprep.subr.bf16.mxu1 %v8273_v51  ;;  %v8326_v31 = vld [vmem:[#allocation3 + $0x540] sm:$0xff]  ;;  %v8328_v51 = vld [vmem:[#allocation3 + $0x550] sm:$0xff] }
 0x99a   :  { %8480 = vmatpush1.bf16.msra.mxu0 %v8270_v26  ;;  %8644 = vmatpush1.bf16.msra.mxu1 %v8272_v8  ;;  %v8331_v26 = vld [vmem:[#allocation3 + $0x568] sm:$0xff]  ;;  %v8333_v8 = vld [vmem:[#allocation3 + $0x578] sm:$0xff] }
 0x99b   :  { %8481 = vmatprep.subr.bf16.mxu0 %v8275_v11  ;;  %8645 = vmatprep.subr.bf16.mxu1 %v8277_v61  ;;  %v8330_v11 = vld [vmem:[#allocation3 + $0x560] sm:$0xff]  ;;  %v8332_v61 = vld [vmem:[#allocation3 + $0x570] sm:$0xff] }
 0x99e   :  { %8482 = vmatpush1.bf16.msra.mxu0 %v8274_v18  ;;  %8646 = vmatpush1.bf16.msra.mxu1 %v8276_v17  ;;  %v8335_v18 = vld [vmem:[#allocation3 + $0x588] sm:$0xff]  ;;  %v8337_v17 = vld [vmem:[#allocation3 + $0x598] sm:$0xff] }
 0x99f   :  { %8483 = vmatprep.subr.bf16.mxu0 %v8279_v48  ;;  %8647 = vmatprep.subr.bf16.mxu1 %v8281_v45  ;;  %v8334_v48 = vld [vmem:[#allocation3 + $0x580] sm:$0xff]  ;;  %v8336_v45 = vld [vmem:[#allocation3 + $0x590] sm:$0xff] }
 0x9a2   :  { %8484 = vmatpush1.bf16.msra.mxu0 %v8278_v46  ;;  %8648 = vmatpush1.bf16.msra.mxu1 %v8280_v47  ;;  %v8339_v46 = vld [vmem:[#allocation3 + $0x5a8] sm:$0xff]  ;;  %v8341_v47 = vld [vmem:[#allocation3 + $0x5b8] sm:$0xff] }
 0x9a3   :  { %8485 = vmatprep.subr.bf16.mxu0 %v8283_v2  ;;  %8649 = vmatprep.subr.bf16.mxu1 %v8285_v60  ;;  %v8338_v2 = vld [vmem:[#allocation3 + $0x5a0] sm:$0xff]  ;;  %v8340_v60 = vld [vmem:[#allocation3 + $0x5b0] sm:$0xff] }
 0x9a6   :  { %8486 = vmatpush1.bf16.msra.mxu0 %v8282_v36  ;;  %8650 = vmatpush1.bf16.msra.mxu1 %v8284_v42  ;;  %v8343_v36 = vld [vmem:[#allocation3 + $0x5c8] sm:$0xff]  ;;  %v8345_v42 = vld [vmem:[#allocation3 + $0x5d8] sm:$0xff] }
 0x9a7   :  { %8496 = vmatprep.subr.bf16.mxu0 %v8287_v12  ;;  %8660 = vmatprep.subr.bf16.mxu1 %v8289_v49  ;;  %v8342_v12 = vld [vmem:[#allocation3 + $0x5c0] sm:$0xff]  ;;  %v8344_v49 = vld [vmem:[#allocation3 + $0x5d0] sm:$0xff] }
 0x9a9   :  { %8488 = vmatmul.mubr.bf16.vlgmr.msra.gmra.mrb[8].mxu0 %v13458_v41  ;;  %8652 = vmatmul.mubr.bf16.vlgmr.msra.gmra.mrb[16].mxu1 %v13458_v41  ;;  %v8301_v41 = vld [vmem:[#allocation3 + $0x478] sm:$0xff] }
 0x9aa   :  { %8497 = vmatpush1.bf16.msra.mxu0 %v8286_v55  ;;  %8661 = vmatpush1.bf16.msra.mxu1 %v8288_v19  ;;  %v8347_v55 = vld [vmem:[#allocation3 + $0x5e8] sm:$0xff]  ;;  %v8349_v19 = vld [vmem:[#allocation3 + $0x5f8] sm:$0xff] }
 0x9ab   :  { %8498 = vmatprep.subr.bf16.mxu0 %v8291_v57  ;;  %8662 = vmatprep.subr.bf16.mxu1 %v8293_v44  ;;  %v8346_v57 = vld [vmem:[#allocation3 + $0x5e0] sm:$0xff]  ;;  %v8348_v44 = vld [vmem:[#allocation3 + $0x5f0] sm:$0xff] }
 0x9ac   :  { %8528 = vmatprep.mubr.bf16.mxu0 %v13441_v63  ;;  %8692 = vmatprep.mubr.bf16.mxu1 %v13441_v63  ;;  %v8302_v63 = vld [vmem:[#allocation3 + $0x480] sm:$0xff] }
 0x9ae   :  { %8499 = vmatpush1.bf16.msra.mxu0 %v8290_v1  ;;  %8663 = vmatpush1.bf16.msra.mxu1 %v8292_v22  ;;  %v8351_v1 = vld [vmem:[#allocation3 + $0x608] sm:$0xff]  ;;  %v8353_v22 = vld [vmem:[#allocation3 + $0x618] sm:$0xff] }
 0x9af   :  { %8500 = vmatprep.subr.bf16.mxu0 %v8295_v30  ;;  %8664 = vmatprep.subr.bf16.mxu1 %v8297_v27  ;;  %v8350_v30 = vld [vmem:[#allocation3 + $0x600] sm:$0xff]  ;;  %v8352_v27 = vld [vmem:[#allocation3 + $0x610] sm:$0xff] }
 0x9b2   :  { %8501 = vmatpush1.bf16.msra.mxu0 %v8294_v52  ;;  %8665 = vmatpush1.bf16.msra.mxu1 %v8296_v58  ;;  %v8355_v52 = vld [vmem:[#allocation3 + $0x628] sm:$0xff]  ;;  %v8357_v58 = vld [vmem:[#allocation3 + $0x638] sm:$0xff] }
 0x9b3   :  { %8502 = vmatprep.subr.bf16.mxu0 %v8299_v0  ;;  %8666 = vmatprep.subr.bf16.mxu1 %v8301_v41  ;;  %v8354_v0 = vld [vmem:[#allocation3 + $0x620] sm:$0xff]  ;;  %v8356_v41 = vld [vmem:[#allocation3 + $0x630] sm:$0xff] }
 0x9b6   :  { %8503 = vmatpush1.bf16.msra.mxu0 %v8298_v13  ;;  %8667 = vmatpush1.bf16.msra.mxu1 %v8300_v50  ;;  %v8359_v13 = vld [vmem:[#allocation3 + $0x648] sm:$0xff]  ;;  %v8361_v50 = vld [vmem:[#allocation3 + $0x658] sm:$0xff] }
 0x9b7   :  { %8504 = vmatprep.subr.bf16.mxu0 %v8303_v33  ;;  %8668 = vmatprep.subr.bf16.mxu1 %v8305_v21  ;;  %v8358_v33 = vld [vmem:[#allocation3 + $0x640] sm:$0xff]  ;;  %v8360_v21 = vld [vmem:[#allocation3 + $0x650] sm:$0xff] }
 0x9ba   :  { %8505 = vmatpush1.bf16.msra.mxu0 %v8302_v63  ;;  %8669 = vmatpush1.bf16.msra.mxu1 %v8304_v16  ;;  %v8363_v63 = vld [vmem:[#allocation3 + $0x668] sm:$0xff]  ;;  %v8362_v16 = vld [vmem:[#allocation3 + $0x660] sm:$0xff] }
 0x9bb   :  { %8506 = vmatprep.subr.bf16.mxu0 %v8307_v35  ;;  %8670 = vmatprep.subr.bf16.mxu1 %v8309_v5  ;;  %v8364_v35 = vld [vmem:[#allocation3 + $0x670] sm:$0xff]  ;;  %v8367_v5 = vld [vmem:[#allocation3 + $0x688] sm:$0xff] }
 0x9be   :  { %8507 = vmatpush1.bf16.msra.mxu0 %v8306_v14  ;;  %8671 = vmatpush1.bf16.msra.mxu1 %v8308_v40  ;;  %v8369_v14 = vld [vmem:[#allocation3 + $0x698] sm:$0xff]  ;;  %v8368_v40 = vld [vmem:[#allocation3 + $0x690] sm:$0xff] }
 0x9bf   :  { %8508 = vmatprep.subr.bf16.mxu0 %v8311_v4  ;;  %8672 = vmatprep.subr.bf16.mxu1 %v8313_v9  ;;  %v8371_v4 = vld [vmem:[#allocation3 + $0x6a8] sm:$0xff]  ;;  %v8373_v9 = vld [vmem:[#allocation3 + $0x6b8] sm:$0xff] }
 0x9c2   :  { %8509 = vmatpush1.bf16.msra.mxu0 %v8310_v15  ;;  %8673 = vmatpush1.bf16.msra.mxu1 %v8312_v23  ;;  %v8370_v15 = vld [vmem:[#allocation3 + $0x6a0] sm:$0xff]  ;;  %v8372_v23 = vld [vmem:[#allocation3 + $0x6b0] sm:$0xff] }
 0x9c3   :  { %8510 = vmatprep.subr.bf16.mxu0 %v8315_v37  ;;  %8674 = vmatprep.subr.bf16.mxu1 %v8317_v62  ;;  %v8375_v37 = vld [vmem:[#allocation3 + $0x6c8] sm:$0xff]  ;;  %v8377_v62 = vld [vmem:[#allocation3 + $0x6d8] sm:$0xff] }
 0x9c6   :  { %8511 = vmatpush1.bf16.msra.mxu0 %v8314_v38  ;;  %8675 = vmatpush1.bf16.msra.mxu1 %v8316_v53  ;;  %v8374_v38 = vld [vmem:[#allocation3 + $0x6c0] sm:$0xff]  ;;  %v8376_v53 = vld [vmem:[#allocation3 + $0x6d0] sm:$0xff] }
 0x9c7   :  { %8512 = vmatprep.subr.bf16.mxu0 %v8319_v24  ;;  %8676 = vmatprep.subr.bf16.mxu1 %v8321_v6  ;;  %v8379_v24 = vld [vmem:[#allocation3 + $0x6e8] sm:$0xff]  ;;  %v8381_v6 = vld [vmem:[#allocation3 + $0x6f8] sm:$0xff] }
 0x9ca   :  { %8513 = vmatpush1.bf16.msra.mxu0 %v8318_v34  ;;  %8677 = vmatpush1.bf16.msra.mxu1 %v8320_v39  ;;  %v8378_v34 = vld [vmem:[#allocation3 + $0x6e0] sm:$0xff]  ;;  %v8380_v39 = vld [vmem:[#allocation3 + $0x6f0] sm:$0xff] }
 0x9cb   :  { %8514 = vmatprep.subr.bf16.mxu0 %v8323_v54  ;;  %8678 = vmatprep.subr.bf16.mxu1 %v8325_v10  ;;  %v8383_v54 = vld [vmem:[#allocation3 + $0x708] sm:$0xff]  ;;  %v8385_v10 = vld [vmem:[#allocation3 + $0x718] sm:$0xff] }
 0x9ce   :  { %8515 = vmatpush1.bf16.msra.mxu0 %v8322_v59  ;;  %8679 = vmatpush1.bf16.msra.mxu1 %v8324_v3  ;;  %v8382_v59 = vld [vmem:[#allocation3 + $0x700] sm:$0xff]  ;;  %v8384_v3 = vld [vmem:[#allocation3 + $0x710] sm:$0xff] }
 0x9cf   :  { %8516 = vmatprep.subr.bf16.mxu0 %v8327_v32  ;;  %8680 = vmatprep.subr.bf16.mxu1 %v8329_v7  ;;  %v8387_v32 = vld [vmem:[#allocation3 + $0x728] sm:$0xff]  ;;  %v8389_v7 = vld [vmem:[#allocation3 + $0x738] sm:$0xff] }
 0x9d2   :  { %8517 = vmatpush1.bf16.msra.mxu0 %v8326_v31  ;;  %8681 = vmatpush1.bf16.msra.mxu1 %v8328_v51  ;;  %v8386_v31 = vld [vmem:[#allocation3 + $0x720] sm:$0xff]  ;;  %v8388_v51 = vld [vmem:[#allocation3 + $0x730] sm:$0xff] }
 0x9d3   :  { %8518 = vmatprep.subr.bf16.mxu0 %v8331_v26  ;;  %8682 = vmatprep.subr.bf16.mxu1 %v8333_v8  ;;  %v8391_v26 = vld [vmem:[#allocation3 + $0x748] sm:$0xff]  ;;  %v8393_v8 = vld [vmem:[#allocation3 + $0x758] sm:$0xff] }
 0x9d6   :  { %8519 = vmatpush1.bf16.msra.mxu0 %v8330_v11  ;;  %8683 = vmatpush1.bf16.msra.mxu1 %v8332_v61  ;;  %v8390_v11 = vld [vmem:[#allocation3 + $0x740] sm:$0xff]  ;;  %v8392_v61 = vld [vmem:[#allocation3 + $0x750] sm:$0xff] }
 0x9d7   :  { %8520 = vmatprep.subr.bf16.mxu0 %v8335_v18  ;;  %8684 = vmatprep.subr.bf16.mxu1 %v8337_v17  ;;  %v8395_v18 = vld [vmem:[#allocation3 + $0x768] sm:$0xff]  ;;  %v8397_v17 = vld [vmem:[#allocation3 + $0x778] sm:$0xff] }
 0x9da   :  { %8521 = vmatpush1.bf16.msra.mxu0 %v8334_v48  ;;  %8685 = vmatpush1.bf16.msra.mxu1 %v8336_v45  ;;  %v8394_v48 = vld [vmem:[#allocation3 + $0x760] sm:$0xff]  ;;  %v8396_v45 = vld [vmem:[#allocation3 + $0x770] sm:$0xff] }
 0x9db   :  { %8522 = vmatprep.subr.bf16.mxu0 %v8339_v46  ;;  %8686 = vmatprep.subr.bf16.mxu1 %v8341_v47  ;;  %v8399_v46 = vld [vmem:[#allocation3 + $0x788] sm:$0xff]  ;;  %v8401_v47 = vld [vmem:[#allocation3 + $0x798] sm:$0xff] }
 0x9de   :  { %8523 = vmatpush1.bf16.msra.mxu0 %v8338_v2  ;;  %8687 = vmatpush1.bf16.msra.mxu1 %v8340_v60  ;;  %v8398_v2 = vld [vmem:[#allocation3 + $0x780] sm:$0xff]  ;;  %v8400_v60 = vld [vmem:[#allocation3 + $0x790] sm:$0xff] }
 0x9df   :  { %8524 = vmatprep.subr.bf16.mxu0 %v8343_v36  ;;  %8688 = vmatprep.subr.bf16.mxu1 %v8345_v42  ;;  %v8403_v36 = vld [vmem:[#allocation3 + $0x7a8] sm:$0xff]  ;;  %v8405_v42 = vld [vmem:[#allocation3 + $0x7b8] sm:$0xff] }
 0x9e2   :  { %8525 = vmatpush1.bf16.msra.mxu0 %v8342_v12  ;;  %8689 = vmatpush1.bf16.msra.mxu1 %v8344_v49  ;;  %v8402_v12 = vld [vmem:[#allocation3 + $0x7a0] sm:$0xff]  ;;  %v8404_v49 = vld [vmem:[#allocation3 + $0x7b0] sm:$0xff] }
 0x9e3   :  { %8526 = vmatprep.subr.bf16.mxu0 %v8347_v55  ;;  %8690 = vmatprep.subr.bf16.mxu1 %v8349_v19  ;;  %v8407_v55 = vld [vmem:[#allocation3 + $0x7c8] sm:$0xff]  ;;  %v8409_v19 = vld [vmem:[#allocation3 + $0x7d8] sm:$0xff] }
 0x9e6   :  { %8527 = vmatpush1.bf16.msra.mxu0 %v8346_v57  ;;  %8691 = vmatpush1.bf16.msra.mxu1 %v8348_v44  ;;  %v8406_v57 = vld [vmem:[#allocation3 + $0x7c0] sm:$0xff]  ;;  %v8408_v44 = vld [vmem:[#allocation3 + $0x7d0] sm:$0xff] }
 0x9e7   :  { %8537 = vmatprep.subr.bf16.mxu0 %v8351_v1  ;;  %8701 = vmatprep.subr.bf16.mxu1 %v8353_v22  ;;  %v8411_v1 = vld [vmem:[#allocation3 + $0x7e8] sm:$0xff]  ;;  %v8413_v22 = vld [vmem:[#allocation3 + $0x7f8] sm:$0xff] }
 0x9e9   :  { %8529 = vmatmul.mubr.bf16.vlgmr.msra.gmra.mrb[8].mxu0 %v13439_v56  ;;  %8693 = vmatmul.mubr.bf16.vlgmr.msra.gmra.mrb[16].mxu1 %v13439_v56  ;;  %v8365_v56 = vld [vmem:[#allocation3 + $0x678] sm:$0xff] }
 0x9ea   :  { %8538 = vmatpush1.bf16.msra.mxu0 %v8350_v30  ;;  %8702 = vmatpush1.bf16.msra.mxu1 %v8352_v27  ;;  %v8410_v30 = vld [vmem:[#allocation3 + $0x7e0] sm:$0xff]  ;;  %v8412_v27 = vld [vmem:[#allocation3 + $0x7f0] sm:$0xff] }
 0x9eb   :  { %8539 = vmatprep.subr.bf16.mxu0 %v8355_v52  ;;  %8703 = vmatprep.subr.bf16.mxu1 %v8357_v58  ;;  %v8743_v52 = vld [vmem:[#allocation4 + $0x8] sm:$0xff]  ;;  %v8745_v58 = vld [vmem:[#allocation4 + $0x18] sm:$0xff] }
 0x9ec   :  { %8569 = vmatprep.mubr.bf16.mxu0 %v13467_v28  ;;  %8733 = vmatprep.mubr.bf16.mxu1 %v13467_v28  ;;  %v8366_v28 = vld [vmem:[#allocation3 + $0x680] sm:$0xff] }
 0x9ee   :  { %8540 = vmatpush1.bf16.msra.mxu0 %v8354_v0  ;;  %8704 = vmatpush1.bf16.msra.mxu1 %v8356_v41  ;;  %v8742_v0 = vld [vmem:[#allocation4] sm:$0xff]  ;;  %v8744_v41 = vld [vmem:[#allocation4 + $0x10] sm:$0xff] }
 0x9ef   :  { %8541 = vmatprep.subr.bf16.mxu0 %v8359_v13  ;;  %8705 = vmatprep.subr.bf16.mxu1 %v8361_v50  ;;  %v8747_v13 = vld [vmem:[#allocation4 + $0x28] sm:$0xff]  ;;  %v8749_v50 = vld [vmem:[#allocation4 + $0x38] sm:$0xff] }
 0x9f2   :  { %8542 = vmatpush1.bf16.msra.mxu0 %v8358_v33  ;;  %8706 = vmatpush1.bf16.msra.mxu1 %v8360_v21  ;;  %v8746_v33 = vld [vmem:[#allocation4 + $0x20] sm:$0xff]  ;;  %v8748_v21 = vld [vmem:[#allocation4 + $0x30] sm:$0xff] }
 0x9f3   :  { %8543 = vmatprep.subr.bf16.mxu0 %v8363_v63  ;;  %8707 = vmatprep.subr.bf16.mxu1 %v8365_v56  ;;  %v8751_v63 = vld [vmem:[#allocation4 + $0x48] sm:$0xff]  ;;  %v8753_v56 = vld [vmem:[#allocation4 + $0x58] sm:$0xff] }
 0x9f6   :  { %8544 = vmatpush1.bf16.msra.mxu0 %v8362_v16  ;;  %8708 = vmatpush1.bf16.msra.mxu1 %v8364_v35  ;;  %v8750_v16 = vld [vmem:[#allocation4 + $0x40] sm:$0xff]  ;;  %v8755_v35 = vld [vmem:[#allocation4 + $0x68] sm:$0xff] }
 0x9f7   :  { %8545 = vmatprep.subr.bf16.mxu0 %v8367_v5  ;;  %8709 = vmatprep.subr.bf16.mxu1 %v8369_v14  ;;  %v8757_v5 = vld [vmem:[#allocation4 + $0x78] sm:$0xff]  ;;  %v8754_v14 = vld [vmem:[#allocation4 + $0x60] sm:$0xff] }
 0x9fa   :  { %8546 = vmatpush1.bf16.msra.mxu0 %v8366_v28  ;;  %8710 = vmatpush1.bf16.msra.mxu1 %v8368_v40  ;;  %v8756_v28 = vld [vmem:[#allocation4 + $0x70] sm:$0xff]  ;;  %v8759_v40 = vld [vmem:[#allocation4 + $0x88] sm:$0xff] }
 0x9fb   :  { %8547 = vmatprep.subr.bf16.mxu0 %v8371_v4  ;;  %8711 = vmatprep.subr.bf16.mxu1 %v8373_v9  ;;  %v8761_v4 = vld [vmem:[#allocation4 + $0x98] sm:$0xff]  ;;  %v8760_v9 = vld [vmem:[#allocation4 + $0x90] sm:$0xff] }
 0x9fe   :  { %8548 = vmatpush1.bf16.msra.mxu0 %v8370_v15  ;;  %8712 = vmatpush1.bf16.msra.mxu1 %v8372_v23  ;;  %v8763_v15 = vld [vmem:[#allocation4 + $0xa8] sm:$0xff]  ;;  %v8765_v23 = vld [vmem:[#allocation4 + $0xb8] sm:$0xff] }
 0x9ff   :  { %8549 = vmatprep.subr.bf16.mxu0 %v8375_v37  ;;  %8713 = vmatprep.subr.bf16.mxu1 %v8377_v62  ;;  %v8762_v37 = vld [vmem:[#allocation4 + $0xa0] sm:$0xff]  ;;  %v8764_v62 = vld [vmem:[#allocation4 + $0xb0] sm:$0xff] }
 0xa02   :  { %8550 = vmatpush1.bf16.msra.mxu0 %v8374_v38  ;;  %8714 = vmatpush1.bf16.msra.mxu1 %v8376_v53  ;;  %v8767_v38 = vld [vmem:[#allocation4 + $0xc8] sm:$0xff]  ;;  %v8769_v53 = vld [vmem:[#allocation4 + $0xd8] sm:$0xff] }
 0xa03   :  { %8551 = vmatprep.subr.bf16.mxu0 %v8379_v24  ;;  %8715 = vmatprep.subr.bf16.mxu1 %v8381_v6  ;;  %v8766_v24 = vld [vmem:[#allocation4 + $0xc0] sm:$0xff]  ;;  %v8768_v6 = vld [vmem:[#allocation4 + $0xd0] sm:$0xff] }
 0xa06   :  { %8552 = vmatpush1.bf16.msra.mxu0 %v8378_v34  ;;  %8716 = vmatpush1.bf16.msra.mxu1 %v8380_v39  ;;  %v8771_v34 = vld [vmem:[#allocation4 + $0xe8] sm:$0xff]  ;;  %v8773_v39 = vld [vmem:[#allocation4 + $0xf8] sm:$0xff] }
 0xa07   :  { %8553 = vmatprep.subr.bf16.mxu0 %v8383_v54  ;;  %8717 = vmatprep.subr.bf16.mxu1 %v8385_v10  ;;  %v8770_v54 = vld [vmem:[#allocation4 + $0xe0] sm:$0xff]  ;;  %v8772_v10 = vld [vmem:[#allocation4 + $0xf0] sm:$0xff] }
 0xa0a   :  { %8554 = vmatpush1.bf16.msra.mxu0 %v8382_v59  ;;  %8718 = vmatpush1.bf16.msra.mxu1 %v8384_v3  ;;  %v8775_v59 = vld [vmem:[#allocation4 + $0x108] sm:$0xff]  ;;  %v8777_v3 = vld [vmem:[#allocation4 + $0x118] sm:$0xff] }
 0xa0b   :  { %8555 = vmatprep.subr.bf16.mxu0 %v8387_v32  ;;  %8719 = vmatprep.subr.bf16.mxu1 %v8389_v7  ;;  %v8774_v32 = vld [vmem:[#allocation4 + $0x100] sm:$0xff]  ;;  %v8776_v7 = vld [vmem:[#allocation4 + $0x110] sm:$0xff] }
 0xa0e   :  { %8556 = vmatpush1.bf16.msra.mxu0 %v8386_v31  ;;  %8720 = vmatpush1.bf16.msra.mxu1 %v8388_v51  ;;  %v8779_v31 = vld [vmem:[#allocation4 + $0x128] sm:$0xff]  ;;  %v8781_v51 = vld [vmem:[#allocation4 + $0x138] sm:$0xff] }
 0xa0f   :  { %8557 = vmatprep.subr.bf16.mxu0 %v8391_v26  ;;  %8721 = vmatprep.subr.bf16.mxu1 %v8393_v8  ;;  %v8778_v26 = vld [vmem:[#allocation4 + $0x120] sm:$0xff]  ;;  %v8780_v8 = vld [vmem:[#allocation4 + $0x130] sm:$0xff] }
 0xa12   :  { %8558 = vmatpush1.bf16.msra.mxu0 %v8390_v11  ;;  %8722 = vmatpush1.bf16.msra.mxu1 %v8392_v61  ;;  %v8783_v11 = vld [vmem:[#allocation4 + $0x148] sm:$0xff]  ;;  %v8785_v61 = vld [vmem:[#allocation4 + $0x158] sm:$0xff] }
 0xa13   :  { %8559 = vmatprep.subr.bf16.mxu0 %v8395_v18  ;;  %8723 = vmatprep.subr.bf16.mxu1 %v8397_v17  ;;  %v8782_v18 = vld [vmem:[#allocation4 + $0x140] sm:$0xff]  ;;  %v8784_v17 = vld [vmem:[#allocation4 + $0x150] sm:$0xff] }
 0xa16   :  { %8560 = vmatpush1.bf16.msra.mxu0 %v8394_v48  ;;  %8724 = vmatpush1.bf16.msra.mxu1 %v8396_v45  ;;  %v8787_v48 = vld [vmem:[#allocation4 + $0x168] sm:$0xff]  ;;  %v8789_v45 = vld [vmem:[#allocation4 + $0x178] sm:$0xff] }
 0xa17   :  { %8561 = vmatprep.subr.bf16.mxu0 %v8399_v46  ;;  %8725 = vmatprep.subr.bf16.mxu1 %v8401_v47  ;;  %v8786_v46 = vld [vmem:[#allocation4 + $0x160] sm:$0xff]  ;;  %v8788_v47 = vld [vmem:[#allocation4 + $0x170] sm:$0xff] }
 0xa1a   :  { %8562 = vmatpush1.bf16.msra.mxu0 %v8398_v2  ;;  %8726 = vmatpush1.bf16.msra.mxu1 %v8400_v60 }
 0xa1b   :  { %8563 = vmatprep.subr.bf16.mxu0 %v8403_v36  ;;  %8727 = vmatprep.subr.bf16.mxu1 %v8405_v42 }
 0xa1e   :  { %8564 = vmatpush1.bf16.msra.mxu0 %v8402_v12  ;;  %8728 = vmatpush1.bf16.msra.mxu1 %v8404_v49 }
 0xa1f   :  { %8565 = vmatprep.subr.bf16.mxu0 %v8407_v55  ;;  %8729 = vmatprep.subr.bf16.mxu1 %v8409_v19 }
 0xa22   :  { %8566 = vmatpush1.bf16.msra.mxu0 %v8406_v57  ;;  %8730 = vmatpush1.bf16.msra.mxu1 %v8408_v44 }
 0xa23   :  { %8567 = vmatprep.subr.bf16.mxu0 %v8411_v1  ;;  %8731 = vmatprep.subr.bf16.mxu1 %v8413_v22 }
 0xa26   :  { %8568 = vmatpush1.bf16.msra.mxu0 %v8410_v30  ;;  %8732 = vmatpush1.bf16.msra.mxu1 %v8412_v27 }
 0xa27   :  { %8790 = vmatprep.subr.bf16.mxu0 %v8743_v52  ;;  %8833 = vmatprep.subr.bf16.mxu1 %v8745_v58 }
 0xa29   :  { %8570 = vmatmul.mubr.bf16.vlgmr.msra.gmra.mrb[8].mxu0 %v13465_v20  ;;  %8734 = vmatmul.mubr.bf16.vlgmr.msra.gmra.mrb[16].mxu1 %v13465_v20  ;;  %v8752_v20 = vld [vmem:[#allocation4 + $0x50] sm:$0xff] }
 0xa2a   :  { %8791 = vmatpush1.bf16.msra.mxu0 %v8742_v0  ;;  %8834 = vmatpush1.bf16.msra.mxu1 %v8744_v41 }
 0xa2b   :  { %8792 = vmatprep.subr.bf16.mxu0 %v8747_v13  ;;  %8835 = vmatprep.subr.bf16.mxu1 %v8749_v50 }
 0xa2c   :  { %9669 = vmatprep.mubr.msk.bf16.mxu0 %vm6157_vm3, %v13343_v43  ;;  %9670 = vmatprep.mubr.msk.bf16.mxu1 %vm6157_vm3, %v13343_v43  ;;  %v8758_v43 = vld [vmem:[#allocation4 + $0x80] sm:$0xff] }
 0xa2e   :  { %8793 = vmatpush1.bf16.msra.mxu0 %v8746_v33  ;;  %8836 = vmatpush1.bf16.msra.mxu1 %v8748_v21 }
 0xa2f   :  { %8794 = vmatprep.subr.bf16.mxu0 %v8751_v63  ;;  %8837 = vmatprep.subr.bf16.mxu1 %v8753_v56 }
 0xa32   :  { %8795 = vmatpush1.bf16.msra.mxu0 %v8750_v16  ;;  %8838 = vmatpush1.bf16.msra.mxu1 %v8752_v20 }
 0xa33   :  { %8796 = vmatprep.subr.bf16.mxu0 %v8755_v35  ;;  %8839 = vmatprep.subr.bf16.mxu1 %v8757_v5 }
 0xa36   :  { %8797 = vmatpush1.bf16.msra.mxu0 %v8754_v14  ;;  %8840 = vmatpush1.bf16.msra.mxu1 %v8756_v28 }
 0xa37   :  { %8798 = vmatprep.subr.bf16.mxu0 %v8759_v40  ;;  %8841 = vmatprep.subr.bf16.mxu1 %v8761_v4 }
 0xa3a   :  { %8799 = vmatpush1.bf16.msra.mxu0 %v8758_v43  ;;  %8842 = vmatpush1.bf16.msra.mxu1 %v8760_v9 }
 0xa3b   :  { %8800 = vmatprep.subr.bf16.mxu0 %v8763_v15  ;;  %8843 = vmatprep.subr.bf16.mxu1 %v8765_v23 }
 0xa3e   :  { %8801 = vmatpush1.bf16.msra.mxu0 %v8762_v37  ;;  %8844 = vmatpush1.bf16.msra.mxu1 %v8764_v62 }
 0xa3f   :  { %8802 = vmatprep.subr.bf16.mxu0 %v8767_v38  ;;  %8845 = vmatprep.subr.bf16.mxu1 %v8769_v53 }
 0xa42   :  { %8803 = vmatpush1.bf16.msra.mxu0 %v8766_v24  ;;  %8846 = vmatpush1.bf16.msra.mxu1 %v8768_v6 }
 0xa43   :  { %8804 = vmatprep.subr.bf16.mxu0 %v8771_v34  ;;  %8847 = vmatprep.subr.bf16.mxu1 %v8773_v39 }
 0xa46   :  { %8805 = vmatpush1.bf16.msra.mxu0 %v8770_v54  ;;  %8848 = vmatpush1.bf16.msra.mxu1 %v8772_v10 }
 0xa47   :  { %8806 = vmatprep.subr.bf16.mxu0 %v8775_v59  ;;  %8849 = vmatprep.subr.bf16.mxu1 %v8777_v3 }
 0xa4a   :  { %8807 = vmatpush1.bf16.msra.mxu0 %v8774_v32  ;;  %8850 = vmatpush1.bf16.msra.mxu1 %v8776_v7 }
 0xa4b   :  { %8808 = vmatprep.subr.bf16.mxu0 %v8779_v31  ;;  %8851 = vmatprep.subr.bf16.mxu1 %v8781_v51 }
 0xa4e   :  { %8809 = vmatpush1.bf16.msra.mxu0 %v8778_v26  ;;  %8852 = vmatpush1.bf16.msra.mxu1 %v8780_v8 }
 0xa4f   :  { %8810 = vmatprep.subr.bf16.mxu0 %v8783_v11  ;;  %8853 = vmatprep.subr.bf16.mxu1 %v8785_v61 }
 0xa52   :  { %8811 = vmatpush1.bf16.msra.mxu0 %v8782_v18  ;;  %8854 = vmatpush1.bf16.msra.mxu1 %v8784_v17 }
 0xa53   :  { %8812 = vmatprep.subr.bf16.mxu0 %v8787_v48  ;;  %8855 = vmatprep.subr.bf16.mxu1 %v8789_v45 }
 0xa56   :  { %8813 = vmatpush1.bf16.msra.mxu0 %v8786_v46  ;;  %8856 = vmatpush1.bf16.msra.mxu1 %v8788_v47 }
 0xa59   :  { %8823 = vmatmul.mubr.bf16.vlgmr.msra.gmra.mrb[12].mxu0 %v13325_v25  ;;  %8866 = vmatmul.mubr.bf16.vlgmr.msra.gmra.mrb[20].mxu1 %v13325_v25 }
 0xafc   :  { %v8571_v2 = vpop.f32.mrb[8].mxu0  ;;  %v8735_v60 = vpop.f32.mrb[16].mxu1 }
 0xafd   :  { %v8573_v36 = vpop.f32.mrb[9].mxu0  ;;  %v8737_v42 = vpop.f32.mrb[17].mxu1  ;;  %v8879_v57 = vrot.slane %v8571_v2, %v12854_v29  ;;  %v8887_v44 = vrot.slane %v8735_v60, %v12854_v29 }
 0xafe   :  { %v8575_v12 = vpop.f32.mrb[10].mxu0  ;;  %v8739_v49 = vpop.f32.mrb[18].mxu1  ;;  %v8883_v1 = vrot.slane %v8573_v36, %v12854_v29  ;;  %v8891_v22 = vrot.slane %v8737_v42, %v12854_v29 }
 0xaff   :  { %v8576_v55 = vpop.f32.mrb[11].mxu0  ;;  %v8740_v19 = vpop.f32.mrb[19].mxu1 }
 0xb2c   :  { %v8824_v30 = vpop.f32.mrb[12].mxu0  ;;  %v8867_v27 = vpop.f32.mrb[20].mxu1 }
 0xb2d   :  { %v13495_v52 = vadd.f32 %v8879_v57, %v8824_v30  ;;  %v13497_v25 = vadd.f32 %v8887_v44, %v8867_v27  ;;  %v8826_v58 = vpop.f32.mrb[13].mxu0  ;;  %v8869_v0 = vpop.f32.mrb[21].mxu1 }
 0xb2e   :  { %v13499_v41 = vadd.f32 %v8883_v1, %v8826_v58  ;;  %v13501_v13 = vadd.f32 %v8891_v22, %v8869_v0  ;;  %v8828_v50 = vpop.f32.mrb[14].mxu0  ;;  %v8871_v33 = vpop.f32.mrb[22].mxu1 }
 0xb2f   :  { %v8932_v21 = vmul.f32 %v13495_v52, %v13495_v52  ;;  %v8934_v29 = vmul.f32 %v13497_v25, %v13497_v25  ;;  %v13507_v63 = vadd.f32 %v8879_v57, %v8828_v50  ;;  %v13509_v56 = vadd.f32 %v8887_v44, %v8871_v33  ;;  %v8830_v16 = vpop.f32.mrb[15].mxu0  ;;  %v8873_v20 = vpop.f32.mrb[23].mxu1 }
 0xb30   :  { %v8933_v35 = vmul.f32 %v13499_v41, %v13499_v41  ;;  %v8935_v5 = vmul.f32 %v13501_v13, %v13501_v13  ;;  %v13515_v14 = vadd.f32 %v8883_v1, %v8830_v16  ;;  %v13517_v28 = vadd.f32 %v8891_v22, %v8873_v20 }
 0xb31   :  { %v8900_v40 = vadd.f32 %v13507_v63, %v13495_v52  ;;  %v8936_v4 = vmul.f32 %v13507_v63, %v13507_v63  ;;  %v8914_v43 = vadd.f32 %v13509_v56, %v13497_v25  ;;  %v8938_v9 = vmul.f32 %v13509_v56, %v13509_v56 }
 0xb32   :  { %v8907_v15 = vadd.f32 %v13515_v14, %v13499_v41  ;;  %v8937_v23 = vmul.f32 %v13515_v14, %v13515_v14  ;;  %v8921_v37 = vadd.f32 %v13517_v28, %v13501_v13  ;;  %v8939_v62 = vmul.f32 %v13517_v28, %v13517_v28 }
 0xb33   :  { %v8901_v38 = vrot.slane %v8900_v40, 4  ;;  %v8940_v53 = vadd.f32 %v8936_v4, %v8932_v21  ;;  %v8915_v24 = vrot.slane %v8914_v43, 4  ;;  %v8954_v6 = vadd.f32 %v8938_v9, %v8934_v29 }
 0xb34   :  { %v8908_v34 = vrot.slane %v8907_v15, 4  ;;  %v8947_v39 = vadd.f32 %v8937_v23, %v8933_v35  ;;  %v8922_v54 = vrot.slane %v8921_v37, 4  ;;  %v8961_v10 = vadd.f32 %v8939_v62, %v8935_v5 }
 0xb35   :  { %v8902_v59 = vadd.f32 %v8901_v38, %v8900_v40  ;;  %v8941_v3 = vrot.slane %v8940_v53, 4  ;;  %v8916_v32 = vadd.f32 %v8915_v24, %v8914_v43  ;;  %v8955_v7 = vrot.slane %v8954_v6, 4 }
 0xb36   :  { %v8909_v31 = vadd.f32 %v8908_v34, %v8907_v15  ;;  %v8948_v51 = vrot.slane %v8947_v39, 4  ;;  %v8923_v26 = vadd.f32 %v8922_v54, %v8921_v37  ;;  %v8962_v8 = vrot.slane %v8961_v10, 4 }
 0xb37   :  { %v8903_v11 = vrot.slane %v8902_v59, 2  ;;  %v8942_v61 = vadd.f32 %v8941_v3, %v8940_v53  ;;  %v8917_v18 = vrot.slane %v8916_v32, 2  ;;  %v8956_v17 = vadd.f32 %v8955_v7, %v8954_v6 }
 0xb38   :  { %v8910_v48 = vrot.slane %v8909_v31, 2  ;;  %v8949_v45 = vadd.f32 %v8948_v51, %v8947_v39  ;;  %v8924_v46 = vrot.slane %v8923_v26, 2  ;;  %v8963_v47 = vadd.f32 %v8962_v8, %v8961_v10 }
 0xb39   :  { %v8904_v2 = vadd.f32 %v8903_v11, %v8902_v59  ;;  %v8943_v60 = vrot.slane %v8942_v61, 2  ;;  %v8918_v36 = vadd.f32 %v8917_v18, %v8916_v32  ;;  %v8957_v42 = vrot.slane %v8956_v17, 2 }
 0xb3a   :  { %v8911_v12 = vadd.f32 %v8910_v48, %v8909_v31  ;;  %v8950_v49 = vrot.slane %v8949_v45, 2  ;;  %v8925_v55 = vadd.f32 %v8924_v46, %v8923_v26  ;;  %v8964_v19 = vrot.slane %v8963_v47, 2 }
 0xb3b   :  { %v8905_v57 = vrot.slane %v8904_v2, 1  ;;  %v8944_v44 = vadd.f32 %v8943_v60, %v8942_v61  ;;  %v8919_v1 = vrot.slane %v8918_v36, 1  ;;  %v8958_v22 = vadd.f32 %v8957_v42, %v8956_v17 }
 0xb3c   :  { %v8912_v30 = vrot.slane %v8911_v12, 1  ;;  %v8951_v27 = vadd.f32 %v8950_v49, %v8949_v45  ;;  %v8926_v58 = vrot.slane %v8925_v55, 1  ;;  %v8965_v0 = vadd.f32 %v8964_v19, %v8963_v47 }
 0xb3d   :  { %v8906_v50 = vadd.f32 %v8905_v57, %v8904_v2  ;;  %v8945_v33 = vrot.slane %v8944_v44, 1  ;;  %v8920_v21 = vadd.f32 %v8919_v1, %v8918_v36  ;;  %v8959_v29 = vrot.slane %v8958_v22, 1 }
 0xb3e   :  { %v8913_v16 = vadd.f32 %v8912_v30, %v8911_v12  ;;  %v8952_v20 = vrot.slane %v8951_v27, 1  ;;  %v8927_v35 = vadd.f32 %v8926_v58, %v8925_v55  ;;  %v8966_v5 = vrot.slane %v8965_v0, 1 }
 0xb3f   :  { %v8928_v40 = vmul.f32 0.0625, %v8906_v50  ;;  %v8946_v4 = vadd.f32 %v8945_v33, %v8944_v44  ;;  %v8930_v43 = vmul.f32 0.0625, %v8920_v21  ;;  %v8960_v9 = vadd.f32 %v8959_v29, %v8958_v22 }
 0xb40   :  { %v8929_v15 = vmul.f32 0.0625, %v8913_v16  ;;  %v8953_v23 = vadd.f32 %v8952_v20, %v8951_v27  ;;  %v8931_v37 = vmul.f32 0.0625, %v8927_v35  ;;  %v8967_v62 = vadd.f32 %v8966_v5, %v8965_v0 }
 0xb41   :  { %v8968_v38 = vmul.f32 0.0625, %v8946_v4  ;;  %v8972_v53 = vmul.f32 %v8928_v40, %v8928_v40  ;;  %v8984_v24 = vsub.f32 %v13495_v52, %v8928_v40  ;;  %v8988_v6 = vsub.f32 %v13507_v63, %v8928_v40 }
 0xb42   :  { %v8970_v34 = vmul.f32 0.0625, %v8960_v9  ;;  %v8974_v39 = vmul.f32 %v8930_v43, %v8930_v43  ;;  %v8986_v54 = vsub.f32 %v13497_v25, %v8930_v43  ;;  %v8990_v10 = vsub.f32 %v13509_v56, %v8930_v43 }
 0xb43   :  { %v8976_v59 = vsub.f32 %v8968_v38, %v8972_v53  ;;  %v8969_v3 = vmul.f32 0.0625, %v8953_v23  ;;  %v8973_v32 = vmul.f32 %v8929_v15, %v8929_v15  ;;  %v8985_v7 = vsub.f32 %v13499_v41, %v8929_v15 }
 0xb44   :  { %v8978_v31 = vsub.f32 %v8970_v34, %v8974_v39  ;;  %v8989_v51 = vsub.f32 %v13515_v14, %v8929_v15  ;;  %v8971_v26 = vmul.f32 0.0625, %v8967_v62  ;;  %v8975_v8 = vmul.f32 %v8931_v37, %v8931_v37 }
 0xb45   :  { %v8980_v11 = vmax.f32 %v8976_v59, 0.0  ;;  %v8977_v52 = vsub.f32 %v8969_v3, %v8973_v32  ;;  %v8987_v63 = vsub.f32 %v13501_v13, %v8931_v37  ;;  %v8991_v61 = vsub.f32 %v13517_v28, %v8931_v37 }
 0xb46   :  { %v8982_v18 = vmax.f32 %v8978_v31, 0.0  ;;  %v8979_v25 = vsub.f32 %v8971_v26, %v8975_v8 }
 0xb47   :  { %v8992_v17 = vadd.f32 1e-05, %v8980_v11  ;;  %v8981_v56 = vmax.f32 %v8977_v52, 0.0 }
 0xb48   :  { %v8994_v48 = vadd.f32 1e-05, %v8982_v18  ;;  %v8983_v45 = vmax.f32 %v8979_v25, 0.0 }
 0xb49   :  { %10059 = vrsqrt.f32 %v8992_v17  ;;  %v8993_v46 = vadd.f32 1e-05, %v8981_v56 }
 0xb4a   :  { %10061 = vrsqrt.f32 %v8994_v48  ;;  %v8995_v41 = vadd.f32 1e-05, %v8983_v45 }
 0xb4b   :  { %10063 = vrsqrt.f32 %v8993_v46 }
 0xb4c   :  { %10065 = vrsqrt.f32 %v8995_v41 }
 0xb53   :  { %v10060_v14 = vpop.eup %10059 }
 0xb54   :  { %v10062_v47 = vpop.eup %10061  ;;  %v13543_v2 = vmul.f32 %v10060_v14, %v8984_v24  ;;  %v13545_v60 = vmul.f32 %v10060_v14, %v8988_v6 }
 0xb55   :  { %v10064_v13 = vpop.eup %10063  ;;  %v13547_v28 = vmul.f32 %v10062_v47, %v8986_v54  ;;  %v13549_v36 = vmul.f32 %v10062_v47, %v8990_v10 }
 0xb56   :  { %v10066_v42 = vpop.eup %10065  ;;  %v13552_v12 = vmul.f32 0.2, %v13543_v2  ;;  %v13555_v49 = vmul.f32 0.2, %v13545_v60  ;;  %v9001_v55 = vmul.f32 %v10064_v13, %v8985_v7  ;;  %v9005_v19 = vmul.f32 %v10064_v13, %v8989_v51 }
 0xb57   :  { %v13558_v57 = vmul.f32 0.2, %v13547_v28  ;;  %v13561_v44 = vmul.f32 0.2, %v13549_v36  ;;  %v13563_v1 = vmul.f32 %v10066_v42, %v8987_v63  ;;  %v13565_v22 = vmul.f32 %v10066_v42, %v8991_v61 }
 0xb58   :  { %v9016_v30 = vmax.f32 %v13543_v2, %v13552_v12  ;;  %v9020_v27 = vmax.f32 %v13545_v60, %v13555_v49  ;;  %v9009_v58 = vmul.f32 0.2, %v9001_v55  ;;  %v9013_v0 = vmul.f32 0.2, %v9005_v19 }
 0xb59   :  { %v9018_v50 = vmax.f32 %v13547_v28, %v13558_v57  ;;  %v9022_v33 = vmax.f32 %v13549_v36, %v13561_v44  ;;  %v13576_v21 = vmul.f32 0.2, %v13563_v1  ;;  %v13579_v29 = vmul.f32 0.2, %v13565_v22 }
 0xb5a   :  { %v9017_v16 = vmax.f32 %v9001_v55, %v9009_v58  ;;  %v9021_v20 = vmax.f32 %v9005_v19, %v9013_v0 }
 0xb5b   :  { %v9019_v35 = vmax.f32 %v13563_v1, %v13576_v21  ;;  %v9023_v5 = vmax.f32 %v13565_v22, %v13579_v29 }
 0xb5c   :  { %10163 = dma.done.wait [#allocation6 + $0x3], 8192 }
 0xb5d   :  { %10164 = vsyncadd [#allocation6 + $0x3], 4294959104  ;;  %v9029_v40 = vpack.c.bf16 %v9021_v20, %v9017_v16  ;;  %v9033_v4 = vld [vmem:[#allocation5 + $0x8] sm:$0xff]  ;;  %v9032_v43 = vld [vmem:[#allocation5] sm:$0xff]  ;;  %v9028_v46 = vpack.c.bf16 %v9020_v27, %v9016_v30  ;;  %v9031_v41 = vpack.c.bf16 %v9023_v5, %v9019_v35  ;;  %vm9415_vm4 = vcmask 269312  }
 0xb5e   :  { %v9035_v9 = vld [vmem:[#allocation5 + $0x18] sm:$0xff]  ;;  %9096 = vmatprep.subr.bf16.mxu0 %v9033_v4  ;;  %v9034_v15 = vld [vmem:[#allocation5 + $0x10] sm:$0xff]  ;;  %v9037_v23 = vld [vmem:[#allocation5 + $0x28] sm:$0xff] }
 0xb5f   :  { %9128 = vmatprep.mubr.bf16.mxu0 %v9029_v40  ;;  %9097 = vmatpush1.bf16.msra.mxu0 %v9032_v43  ;;  %v9036_v37 = vld [vmem:[#allocation5 + $0x20] sm:$0xff]  ;;  %v9039_v62 = vld [vmem:[#allocation5 + $0x38] sm:$0xff]  ;;  %v9038_v38 = vld [vmem:[#allocation5 + $0x30] sm:$0xff] }
 0xb60   :  { %9098 = vmatprep.subr.bf16.mxu0 %v9035_v9  ;;  %v9041_v53 = vld [vmem:[#allocation5 + $0x48] sm:$0xff]  ;;  %v9040_v24 = vld [vmem:[#allocation5 + $0x40] sm:$0xff]  ;;  %v9043_v6 = vld [vmem:[#allocation5 + $0x58] sm:$0xff] }
 0xb61   :  { %v9042_v34 = vld [vmem:[#allocation5 + $0x50] sm:$0xff]  ;;  %v9045_v39 = vld [vmem:[#allocation5 + $0x68] sm:$0xff]  ;;  %v9044_v54 = vld [vmem:[#allocation5 + $0x60] sm:$0xff] }
 0xb62   :  { %v9047_v10 = vld [vmem:[#allocation5 + $0x78] sm:$0xff]  ;;  %v9046_v59 = vld [vmem:[#allocation5 + $0x70] sm:$0xff]  ;;  %v9049_v3 = vld [vmem:[#allocation5 + $0x88] sm:$0xff] }
 0xb63   :  { %9099 = vmatpush1.bf16.msra.mxu0 %v9034_v15  ;;  %v9048_v32 = vld [vmem:[#allocation5 + $0x80] sm:$0xff]  ;;  %v9051_v7 = vld [vmem:[#allocation5 + $0x98] sm:$0xff]  ;;  %v9050_v31 = vld [vmem:[#allocation5 + $0x90] sm:$0xff] }
 0xb64   :  { %9100 = vmatprep.subr.bf16.mxu0 %v9037_v23  ;;  %v9053_v51 = vld [vmem:[#allocation5 + $0xa8] sm:$0xff]  ;;  %v9052_v26 = vld [vmem:[#allocation5 + $0xa0] sm:$0xff]  ;;  %v9055_v8 = vld [vmem:[#allocation5 + $0xb8] sm:$0xff] }
 0xb65   :  { %v9054_v11 = vld [vmem:[#allocation5 + $0xb0] sm:$0xff]  ;;  %v9057_v52 = vld [vmem:[#allocation5 + $0xc8] sm:$0xff]  ;;  %v9056_v63 = vld [vmem:[#allocation5 + $0xc0] sm:$0xff] }
 0xb66   :  { %v9059_v61 = vld [vmem:[#allocation5 + $0xd8] sm:$0xff]  ;;  %v9058_v18 = vld [vmem:[#allocation5 + $0xd0] sm:$0xff]  ;;  %v9061_v25 = vld [vmem:[#allocation5 + $0xe8] sm:$0xff] }
 0xb67   :  { %9101 = vmatpush1.bf16.msra.mxu0 %v9036_v37  ;;  %v9060_v17 = vld [vmem:[#allocation5 + $0xe0] sm:$0xff]  ;;  %v9063_v56 = vld [vmem:[#allocation5 + $0xf8] sm:$0xff]  ;;  %v9062_v48 = vld [vmem:[#allocation5 + $0xf0] sm:$0xff] }
 0xb68   :  { %9102 = vmatprep.subr.bf16.mxu0 %v9039_v62  ;;  %v9065_v45 = vld [vmem:[#allocation5 + $0x108] sm:$0xff]  ;;  %v9064_v14 = vld [vmem:[#allocation5 + $0x100] sm:$0xff]  ;;  %v9067_v47 = vld [vmem:[#allocation5 + $0x118] sm:$0xff] }
 0xb69   :  { %v9066_v2 = vld [vmem:[#allocation5 + $0x110] sm:$0xff]  ;;  %v9069_v13 = vld [vmem:[#allocation5 + $0x128] sm:$0xff]  ;;  %v9068_v60 = vld [vmem:[#allocation5 + $0x120] sm:$0xff] }
 0xb6a   :  { %v9071_v42 = vld [vmem:[#allocation5 + $0x138] sm:$0xff]  ;;  %v9070_v12 = vld [vmem:[#allocation5 + $0x130] sm:$0xff]  ;;  %v9073_v49 = vld [vmem:[#allocation5 + $0x148] sm:$0xff] }
 0xb6b   :  { %9103 = vmatpush1.bf16.msra.mxu0 %v9038_v38  ;;  %v9072_v55 = vld [vmem:[#allocation5 + $0x140] sm:$0xff]  ;;  %v9075_v19 = vld [vmem:[#allocation5 + $0x158] sm:$0xff]  ;;  %v9074_v1 = vld [vmem:[#allocation5 + $0x150] sm:$0xff] }
 0xb6c   :  { %9104 = vmatprep.subr.bf16.mxu0 %v9041_v53  ;;  %v9077_v22 = vld [vmem:[#allocation5 + $0x168] sm:$0xff]  ;;  %v9076_v30 = vld [vmem:[#allocation5 + $0x160] sm:$0xff]  ;;  %v9079_v27 = vld [vmem:[#allocation5 + $0x178] sm:$0xff]  ;;  %v9030_v53 = vpack.c.bf16 %v9022_v33, %v9018_v50 }
 0xb6d   :  { %v9078_v58 = vld [vmem:[#allocation5 + $0x170] sm:$0xff]  ;;  %v9081_v0 = vld [vmem:[#allocation5 + $0x188] sm:$0xff]  ;;  %v9080_v21 = vld [vmem:[#allocation5 + $0x180] sm:$0xff] }
 0xb6e   :  { %v9083_v29 = vld [vmem:[#allocation5 + $0x198] sm:$0xff]  ;;  %v9082_v16 = vld [vmem:[#allocation5 + $0x190] sm:$0xff]  ;;  %v9085_v20 = vld [vmem:[#allocation5 + $0x1a8] sm:$0xff] }
 0xb6f   :  { %9105 = vmatpush1.bf16.msra.mxu0 %v9040_v24  ;;  %v9084_v35 = vld [vmem:[#allocation5 + $0x1a0] sm:$0xff]  ;;  %v9087_v5 = vld [vmem:[#allocation5 + $0x1b8] sm:$0xff]  ;;  %v9086_v40 = vld [vmem:[#allocation5 + $0x1b0] sm:$0xff] }
 0xb70   :  { %9106 = vmatprep.subr.bf16.mxu0 %v9043_v6  ;;  %v9089_v4 = vld [vmem:[#allocation5 + $0x1c8] sm:$0xff]  ;;  %v9088_v43 = vld [vmem:[#allocation5 + $0x1c0] sm:$0xff]  ;;  %v9091_v9 = vld [vmem:[#allocation5 + $0x1d8] sm:$0xff] }
 0xb71   :  { %v9090_v15 = vld [vmem:[#allocation5 + $0x1d0] sm:$0xff]  ;;  %v9093_v23 = vld [vmem:[#allocation5 + $0x1e8] sm:$0xff]  ;;  %v9092_v37 = vld [vmem:[#allocation5 + $0x1e0] sm:$0xff] }
 0xb72   :  { %v9095_v62 = vld [vmem:[#allocation5 + $0x1f8] sm:$0xff]  ;;  %v9094_v38 = vld [vmem:[#allocation5 + $0x1f0] sm:$0xff]  ;;  %v10067_v24 = vld [vmem:[%s13678_s9 + $0x40] sm:$0xff]  }
 0xb73   :  { %9107 = vmatpush1.bf16.msra.mxu0 %v9042_v34  ;;  %v10068_v6 = vld [vmem:[%s13678_s9] sm:$0xff]   ;;  %9741 = vmatprep.subr.bf16.mxu1 %v10067_v24  ;;  %v10069_v28 = vld [vmem:[%s13678_s9 + $0x48] sm:$0xff]   ;;  %v10071_v57 = vld [vmem:[%s13678_s9 + $0x50] sm:$0xff]  }
 0xb74   :  { %9108 = vmatprep.subr.bf16.mxu0 %v9045_v39  ;;  %9742 = vmatpush3.bf16.msra.mxu1 %v10068_v6  ;;  %v10070_v36 = vld [vmem:[%s13678_s9 + $0x8] sm:$0xff]   ;;  %v10072_v44 = vld [vmem:[%s13678_s9 + $0x10] sm:$0xff]   ;;  %v10073_v50 = vld [vmem:[%s13678_s9 + $0x58] sm:$0xff]  }
 0xb75   :  { %9743 = vmatprep.subr.bf16.mxu1 %v10069_v28  ;;  %v10074_v33 = vld [vmem:[%s13678_s9 + $0x18] sm:$0xff]   ;;  %v10075_v34 = vld [vmem:[%s13678_s9 + $0x60] sm:$0xff]  }
 0xb76   :  { %v10076_v39 = vld [vmem:[%s13678_s9 + $0x20] sm:$0xff]  }
 0xb77   :  { %9109 = vmatpush1.bf16.msra.mxu0 %v9044_v54  ;;  %v10077_v54 = vld [vmem:[%s13678_s9 + $0x68] sm:$0xff]  }
 0xb78   :  { %9110 = vmatprep.subr.bf16.mxu0 %v9047_v10  ;;  %9744 = vmatpush3.bf16.msra.mxu1 %v10070_v36  ;;  %v10078_v10 = vld [vmem:[%s13678_s9 + $0x28] sm:$0xff]  }
 0xb79   :  { %9745 = vmatprep.subr.bf16.mxu1 %v10071_v57 }
 0xb7b   :  { %9111 = vmatpush1.bf16.msra.mxu0 %v9046_v59  ;;  %v10079_v59 = vld [vmem:[%s13678_s9 + $0x70] sm:$0xff]  }
 0xb7c   :  { %9112 = vmatprep.subr.bf16.mxu0 %v9049_v3  ;;  %9746 = vmatpush3.bf16.msra.mxu1 %v10072_v44  ;;  %v10080_v3 = vld [vmem:[%s13678_s9 + $0x30] sm:$0xff]  }
 0xb7d   :  { %9747 = vmatprep.subr.bf16.mxu1 %v10073_v50 }
 0xb7f   :  { %9113 = vmatpush1.bf16.msra.mxu0 %v9048_v32  ;;  %v10081_v32 = vld [vmem:[%s13678_s9 + $0x78] sm:$0xff]  }
 0xb80   :  { %9114 = vmatprep.subr.bf16.mxu0 %v9051_v7  ;;  %9748 = vmatpush3.bf16.msra.mxu1 %v10074_v33  ;;  %v10082_v7 = vld [vmem:[%s13678_s9 + $0x38] sm:$0xff]   ;;  %s10211_s9 = smov [#allocation8]  }
 0xb81   :  { %9749 = vmatprep.subr.bf16.mxu1 %v10075_v34  ;;  %s9445_s20 = sshll.u32 %s10211_s9, 4  ;;  %s9446_s20 = int_to_ptr.vmem [resolvable:$true] %s9445_s20 }
 0xb82   :  { %s10095_s21 = scalar_lea.vmem %s9446_s20, 256  ;;  %p10100_p3 = scmp.lt.s32.totalorder %s9446_s20, %s9446_s20 }
 0xb83   :  { %9115 = vmatpush1.bf16.msra.mxu0 %v9050_v31  ;;  %p10096_p2 = scmp.ne.s32.totalorder %s9446_s20, %s10095_s21  ;;  %p10101_p4 = scmp.lt.s32.totalorder %s10095_s21, %s10095_s21 }
 0xb84   :  { %9116 = vmatprep.subr.bf16.mxu0 %v9053_v51  ;;  %9750 = vmatpush3.bf16.msra.mxu1 %v10076_v39 }
 0xb85   :  { %9751 = vmatprep.subr.bf16.mxu1 %v10077_v54  ;;  %p10102_p5 = por %p10101_p4, %p10100_p3 }
 0xb87   :  { %9117 = vmatpush1.bf16.msra.mxu0 %v9052_v26  ;;  %p10103_p6 = pnand %p10102_p5, %p10096_p2 }
 0xb88   :  { %9118 = vmatprep.subr.bf16.mxu0 %v9055_v8  ;;  %9752 = vmatpush3.bf16.msra.mxu1 %v10078_v10 }
 0xb89   :  { %9753 = vmatprep.subr.bf16.mxu1 %v10079_v59 }
 0xb8b   :  { %9119 = vmatpush1.bf16.msra.mxu0 %v9054_v11 }
 0xb8c   :  { %9120 = vmatprep.subr.bf16.mxu0 %v9057_v52  ;;  %9754 = vmatpush3.bf16.msra.mxu1 %v10080_v3 }
 0xb8d   :  { %9755 = vmatprep.subr.bf16.mxu1 %v10081_v32 }
 0xb8f   :  { %9121 = vmatpush1.bf16.msra.mxu0 %v9056_v63 }
 0xb90   :  { %9122 = vmatprep.subr.bf16.mxu0 %v9059_v61  ;;  %9756 = vmatpush3.bf16.msra.mxu1 %v10082_v7 }
 0xb93   :  { %9123 = vmatpush1.bf16.msra.mxu0 %v9058_v18 }
 0xb94   :  { %9124 = vmatprep.subr.bf16.mxu0 %v9061_v25 }
 0xb97   :  { %9125 = vmatpush1.bf16.msra.mxu0 %v9060_v17 }
 0xb98   :  { %9126 = vmatprep.subr.bf16.mxu0 %v9063_v56 }
 0xb9b   :  { %9127 = vmatpush1.bf16.msra.mxu0 %v9062_v48 }
 0xb9c   :  { %9139 = vmatprep.subr.bf16.mxu0 %v9065_v45 }
 0xb9e   :  { %9129 = vmatmul.mubr.bf16.vlgmr.msra.gmra.mrb[16].mxu0 %v9028_v46 }
 0xb9f   :  { %9140 = vmatpush1.bf16.msra.mxu0 %v9064_v14  ;;  %9171 = vmatprep.mubr.bf16.mxu0 %v9031_v41 }
 0xba0   :  { %9141 = vmatprep.subr.bf16.mxu0 %v9067_v47 }
 0xba3   :  { %9142 = vmatpush1.bf16.msra.mxu0 %v9066_v2 }
 0xba4   :  { %9143 = vmatprep.subr.bf16.mxu0 %v9069_v13 }
 0xba7   :  { %9144 = vmatpush1.bf16.msra.mxu0 %v9068_v60 }
 0xba8   :  { %9145 = vmatprep.subr.bf16.mxu0 %v9071_v42 }
 0xbab   :  { %9146 = vmatpush1.bf16.msra.mxu0 %v9070_v12 }
 0xbac   :  { %9147 = vmatprep.subr.bf16.mxu0 %v9073_v49 }
 0xbaf   :  { %9148 = vmatpush1.bf16.msra.mxu0 %v9072_v55 }
 0xbb0   :  { %9149 = vmatprep.subr.bf16.mxu0 %v9075_v19 }
 0xbb3   :  { %9150 = vmatpush1.bf16.msra.mxu0 %v9074_v1 }
 0xbb4   :  { %9151 = vmatprep.subr.bf16.mxu0 %v9077_v22 }
 0xbb7   :  { %9152 = vmatpush1.bf16.msra.mxu0 %v9076_v30 }
 0xbb8   :  { %9153 = vmatprep.subr.bf16.mxu0 %v9079_v27 }
 0xbbb   :  { %9154 = vmatpush1.bf16.msra.mxu0 %v9078_v58 }
 0xbbc   :  { %9155 = vmatprep.subr.bf16.mxu0 %v9081_v0 }
 0xbbf   :  { %9156 = vmatpush1.bf16.msra.mxu0 %v9080_v21 }
 0xbc0   :  { %9157 = vmatprep.subr.bf16.mxu0 %v9083_v29 }
 0xbc3   :  { %9158 = vmatpush1.bf16.msra.mxu0 %v9082_v16 }
 0xbc4   :  { %9159 = vmatprep.subr.bf16.mxu0 %v9085_v20 }
 0xbc7   :  { %9160 = vmatpush1.bf16.msra.mxu0 %v9084_v35 }
 0xbc8   :  { %9161 = vmatprep.subr.bf16.mxu0 %v9087_v5 }
 0xbcb   :  { %9162 = vmatpush1.bf16.msra.mxu0 %v9086_v40 }
 0xbcc   :  { %9163 = vmatprep.subr.bf16.mxu0 %v9089_v4 }
 0xbcf   :  { %9164 = vmatpush1.bf16.msra.mxu0 %v9088_v43 }
 0xbd0   :  { %9165 = vmatprep.subr.bf16.mxu0 %v9091_v9 }
 0xbd3   :  { %9166 = vmatpush1.bf16.msra.mxu0 %v9090_v15 }
 0xbd4   :  { %9167 = vmatprep.subr.bf16.mxu0 %v9093_v23 }
 0xbd7   :  { %9168 = vmatpush1.bf16.msra.mxu0 %v9092_v37 }
 0xbd8   :  { %9169 = vmatprep.subr.bf16.mxu0 %v9095_v62 }
 0xbdb   :  { %9170 = vmatpush1.bf16.msra.mxu0 %v9094_v38 }
 0xbde   :  { %9172 = vmatmul.mubr.bf16.vlgmr.msra.gmra.mrb[16].mxu0 %v9030_v53 }
 0xcb1   :  { %v9173_v31 = vpop.f32.mrb[16].mxu0 }
 0xcb2   :  { %v9175_v51 = vpop.f32.mrb[17].mxu0  ;;  %v9198_v8 = vmul.f32 %v9173_v31, %v9173_v31 }
 0xcb3   :  { %v9177_v26 = vpop.f32.mrb[18].mxu0  ;;  %v9199_v61 = vmul.f32 %v9175_v51, %v9175_v51 }
 0xcb4   :  { %v9182_v11 = vadd.f32 %v9177_v26, %v9173_v31  ;;  %v9200_v52 = vmul.f32 %v9177_v26, %v9177_v26  ;;  %v9179_v63 = vpop.f32.mrb[19].mxu0 }
 0xcb5   :  { %v9189_v18 = vadd.f32 %v9179_v63, %v9175_v51  ;;  %v9201_v25 = vmul.f32 %v9179_v63, %v9179_v63 }
 0xcb6   :  { %v9183_v17 = vrot.slane %v9182_v11, 4  ;;  %v9202_v56 = vadd.f32 %v9200_v52, %v9198_v8 }
 0xcb7   :  { %v9190_v48 = vrot.slane %v9189_v18, 4  ;;  %v9209_v45 = vadd.f32 %v9201_v25, %v9199_v61 }
 0xcb8   :  { %v9184_v46 = vadd.f32 %v9183_v17, %v9182_v11  ;;  %v9203_v41 = vrot.slane %v9202_v56, 4 }
 0xcb9   :  { %v9191_v14 = vadd.f32 %v9190_v48, %v9189_v18  ;;  %v9210_v47 = vrot.slane %v9209_v45, 4 }
 0xcba   :  { %v9185_v2 = vrot.slane %v9184_v46, 2  ;;  %v9204_v13 = vadd.f32 %v9203_v41, %v9202_v56 }
 0xcbb   :  { %v9192_v60 = vrot.slane %v9191_v14, 2  ;;  %v9211_v42 = vadd.f32 %v9210_v47, %v9209_v45 }
 0xcbc   :  { %v9186_v12 = vadd.f32 %v9185_v2, %v9184_v46  ;;  %v9205_v49 = vrot.slane %v9204_v13, 2 }
 0xcbd   :  { %v9193_v55 = vadd.f32 %v9192_v60, %v9191_v14  ;;  %v9212_v19 = vrot.slane %v9211_v42, 2 }
 0xcbe   :  { %v9187_v1 = vrot.slane %v9186_v12, 1  ;;  %v9206_v22 = vadd.f32 %v9205_v49, %v9204_v13 }
 0xcbf   :  { %v9194_v30 = vrot.slane %v9193_v55, 1  ;;  %v9213_v27 = vadd.f32 %v9212_v19, %v9211_v42 }
 0xcc0   :  { %v9188_v58 = vadd.f32 %v9187_v1, %v9186_v12  ;;  %v9207_v0 = vrot.slane %v9206_v22, 1 }
 0xcc1   :  { %v9195_v21 = vadd.f32 %v9194_v30, %v9193_v55  ;;  %v9214_v29 = vrot.slane %v9213_v27, 1 }
 0xcc2   :  { %v9196_v16 = vmul.f32 0.0625, %v9188_v58  ;;  %v9208_v20 = vadd.f32 %v9207_v0, %v9206_v22 }
 0xcc3   :  { %v9197_v35 = vmul.f32 0.0625, %v9195_v21  ;;  %v9215_v5 = vadd.f32 %v9214_v29, %v9213_v27 }
 0xcc4   :  { %v9216_v40 = vmul.f32 0.0625, %v9208_v20  ;;  %v9218_v4 = vmul.f32 %v9196_v16, %v9196_v16  ;;  %v9226_v43 = vsub.f32 %v9177_v26, %v9196_v16  ;;  %v9224_v9 = vsub.f32 %v9173_v31, %v9196_v16 }
 0xcc5   :  { %v9217_v15 = vmul.f32 0.0625, %v9215_v5  ;;  %v9219_v23 = vmul.f32 %v9197_v35, %v9197_v35  ;;  %v9227_v37 = vsub.f32 %v9179_v63, %v9197_v35  ;;  %v9225_v62 = vsub.f32 %v9175_v51, %v9197_v35 }
 0xcc6   :  { %v9220_v38 = vsub.f32 %v9216_v40, %v9218_v4 }
 0xcc7   :  { %v9221_v53 = vsub.f32 %v9217_v15, %v9219_v23 }
 0xcc8   :  { %v9222_v24 = vmax.f32 %v9220_v38, 0.0 }
 0xcc9   :  { %v9223_v6 = vmax.f32 %v9221_v53, 0.0 }
 0xcca   :  { %v9228_v28 = vadd.f32 1e-05, %v9222_v24 }
 0xccb   :  { %v9229_v36 = vadd.f32 1e-05, %v9223_v6 }
 0xccc   :  { %10083 = vrsqrt.f32 %v9228_v28 }
 0xccd   :  { %10085 = vrsqrt.f32 %v9229_v36 }
 0xcd6   :  { %v10084_v57 = vpop.eup %10083 }
 0xcd7   :  { %v10086_v44 = vpop.eup %10085  ;;  %v9234_v50 = vmul.f32 %v10084_v57, %v9226_v43  ;;  %v9232_v33 = vmul.f32 %v10084_v57, %v9224_v9 }
 0xcd8   :  { %v9235_v34 = vmul.f32 %v10086_v44, %v9227_v37  ;;  %v9233_v39 = vmul.f32 %v10086_v44, %v9225_v62 }
 0xcd9   :  { %v9238_v54 = vmul.f32 0.2, %v9234_v50  ;;  %v9236_v10 = vmul.f32 0.2, %v9232_v33 }
 0xcda   :  { %v9237_v59 = vmul.f32 0.2, %v9233_v39  ;;  %v9239_v3 = vmul.f32 0.2, %v9235_v34 }
 0xcdb   :  { %v9240_v32 = vmax.f32 %v9232_v33, %v9236_v10  ;;  %v9242_v7 = vmax.f32 %v9234_v50, %v9238_v54 }
 0xcdc   :  { %v9241_v31 = vmax.f32 %v9233_v39, %v9237_v59  ;;  %v9243_v51 = vmax.f32 %v9235_v34, %v9239_v3 }
 0xcdd   :  { %v9244_v26 = vpack.c.bf16 %v9242_v7, %v9240_v32 }
 0xcde   :  { %v9245_v8 = vpack.c.bf16 %v9243_v51, %v9241_v31 }
 0xce0   :  { %9406 = vmatprep.mubr.bf16.mxu1 %v9245_v8 }
 0xce1   :  { %9407 = vmatmul.mubr.bf16.vlgmr.msra.gmra.mrb[24].mxu1 %v9244_v26 }
 0xdb4   :  { %v9757_v11 = vpop.f32.mrb[24].mxu1 }
 0xdb5   :  { %v9758_v52 = vpop.f32.mrb[25].mxu1 }
 0xdb6   :  { %v9759_v63 = vadd.f32 %v9758_v52, %v9757_v11  ;;  %v9760_v61 = vpop.f32.mrb[26].mxu1 }
 0xdb7   :  { %v9761_v18 = vpop.f32.mrb[27].mxu1 }
 0xdb8   :  { %v9762_v25 = vadd.f32 %v9761_v18, %v9760_v61  ;;  %v9416_v17 = vsel %vm9415_vm4, %v9759_v63, -inf }
 0xdb9   :  { %9417 = vmax.xlane.f32.xlu0 %v9416_v17 }
 0xdba   :  { %v9419_v56 = vsel %vm9415_vm4, %v9762_v25, -inf }
 0xdbd   :  { %9420 = vmax.xlane.f32.xlu0 %v9419_v56 }
 0xe46   :  { %v9418_v48 = vpop.xlane.xlu0 %9417 }
 0xe47   :  { %v9422_v45 = vsub.f32 %v9759_v63, %v9418_v48 }
 0xe49   :  { %v9424_v46 = vmul.f32 1.442695, %v9422_v45 }
 0xe4a   :  { %v9421_v41 = vpop.xlane.xlu0 %9420 }
 0xe4b   :  { %10087 = vpow2.f32 %v9424_v46  ;;  %v9423_v14 = vsub.f32 %v9762_v25, %v9421_v41 }
 0xe4d   :  { %v9426_v47 = vmul.f32 1.442695, %v9423_v14 }
 0xe4f   :  { %10089 = vpow2.f32 %v9426_v47 }
 0xe55   :  { %v10088_v2 = vpop.eup %10087 }
 0xe56   :  { %v9428_v13 = vsel %vm9415_vm4, %v10088_v2, 0.0 }
 0xe57   :  { %9429 = vadd.xlane.f32.xlu1 %v9428_v13 }
 0xe59   :  { %v10090_v60 = vpop.eup %10089 }
 0xe5a   :  { %v9431_v42 = vsel %vm9415_vm4, %v10090_v60, 0.0 }
 0xe5b   :  { %9432 = vadd.xlane.f32.xlu1 %v9431_v42 }
 0xee4   :  { %v9430_v12 = vpop.xlane.xlu1 %9429 }
 0xee5   :  { %10091 = vrcp.f32 %v9430_v12 }
 0xee8   :  { %v9433_v49 = vpop.xlane.xlu1 %9432 }
 0xee9   :  { %10093 = vrcp.f32 %v9433_v49 }
 0xeef   :  { %v10092_v55 = vpop.eup %10091 }
 0xef0   :  { %v9435_v19 = vmul.f32 %v10092_v55, %v10088_v2 }
 0xef2   :  { %9438 = vst.msk [vmem:[#allocation8] sm:$0xff] %vm9415_vm4, %v9435_v19 }
 0xef3   :  { %v10094_v1 = vpop.eup %10093 }
 0xef4   :  { %v9437_v22 = vmul.f32 %v10094_v1, %v10090_v60 }
 0xef6   :  { %9439 = vst.msk [vmem:[#allocation8 + $0x8] sm:$0xff] %vm9415_vm4, %v9437_v22 }
 0xef7   :  { %10106 = shalt.err (!%p10103_p6)
}
 0xef8   :  { %s10107_s24 = scalar_lea.hbm %s13683_s14, 256 }
 0xef9   :  { %p10108_p7 = scmp.ne.s32.totalorder %s13683_s14, %s10107_s24  ;;  %p10111_p8 = scmp.lt.u32.totalorder %s10107_s24, %s13683_s14 }
 0xefb   :  { %p10113_p9 = pnand %p10111_p8, %p10108_p7 }
 0xefd   :  { %10116 = shalt.err (!%p10113_p9)
}
 0xefe   :  { %s10212_s11 = smov 128   ;;  %s10213_s27 = smov 8  }
 0xeff   :  { %9451 = dma.vmem_to_hbm [thread:$0]  %s9446_s20, 256, %s13683_s14, [#allocation9], %s10212_s11, %s10212_s11, %s10213_s27  }
 0xf00   :  { %10165 = dma.done.wait [#allocation9], 256  }
 0xf01   :  { %10166 = vsyncadd [#allocation9], 4294967040 }
 0xf02   :  { %9455 = vsyncpa [#allocation9], 1 }
 0xf03   :  { %9456 = vsyncmov [#allocation6] }
 0xf06   :  { %s9457_s30 = vpop.sfrf %9456 }
 0xf07   :  { %p9687_p10 = scmp.ne.s32.totalorder %s9457_s30, 0 }
 0xf09   :  { %9461 = shalt.err (%p9687_p10)  }
 0xf0a   :  { %9463 = vsyncmov [#allocation6 + $0x1] }
 0xf0d   :  { %s9464_s10 = vpop.sfrf %9463 }
 0xf0e   :  { %p9688_p11 = scmp.ne.s32.totalorder %s9464_s10, 0 }
 0xf10   :  { %9468 = shalt.err (%p9688_p11)  }
 0xf11   :  { %9470 = vsyncmov [#allocation6 + $0x2] }
 0xf14   :  { %s9471_s15 = vpop.sfrf %9470 }
 0xf15   :  { %p9689_p12 = scmp.ne.s32.totalorder %s9471_s15, 0 }
 0xf17   :  { %9475 = shalt.err (%p9689_p12)  }
 0xf18   :  { %9477 = vsyncmov [#allocation6 + $0x3] }
 0xf1b   :  { %s9478_s3 = vpop.sfrf %9477 }
 0xf1c   :  { %p9690_p13 = scmp.ne.s32.totalorder %s9478_s3, 0 }
 0xf1e   :  { %9482 = shalt.err (%p9690_p13)  }

</bundles_post_ra>
